<compile_context>
chip_gen: v6e
topology: v6e:2x2x1
jax: 0.10.0
libtpu: 0.0.40
codegen_flags: <defaults>
</compile_context>

<pallas_src>
import jax
import jax.numpy as jnp
from jax.experimental import pallas as pl
from jax.experimental.pallas import tpu as pltpu

# Layer dims of the PyTorch module.
D_IN, D_H1, D_H2, D_H3, D_OUT = 30368, 2048, 256, 32, 1

# fc1 tiling: contraction dim padded once at init to KP = 17*1792 = 30464
# (only 96 padded rows, ~0.3% extra weight bytes) so every tile is 128-lane
# aligned.
TK = 1792                       # contraction tile (14 * 128)
TN = 1024                       # output-feature tile (keeps NN = 2)
NK = pl.cdiv(D_IN, TK)          # 17
KP = NK * TK                    # 30464
NN = D_H1 // TN                 # 2


# ----------------------------------------------------------------------------
# Kernel 1: fc1  (y = relu(x @ W1 + b1)), K-reduction with VMEM accumulator.
# ----------------------------------------------------------------------------
def _fc1_kernel(x_ref, w_ref, b_ref, o_ref, acc_ref):
    k = pl.program_id(1)

    @pl.when(k == 0)
    def _():
        acc_ref[...] = jnp.zeros_like(acc_ref)

    start = pl.multiple_of(k * TK, 128)
    x_blk = x_ref[:, pl.ds(start, TK)]                # x is fully VMEM-resident
    acc_ref[...] += jnp.dot(
        x_blk,
        w_ref[...].astype(jnp.float32),               # bf16 stream, f32 math
        preferred_element_type=jnp.float32,
    )

    @pl.when(k == pl.num_programs(1) - 1)
    def _():
        y = acc_ref[...] + b_ref[...]
        o_ref[...] = jnp.maximum(y, 0.0).astype(o_ref.dtype)   # fused bias+ReLU


def _fc1(x_padded, w1, b1):
    M = x_padded.shape[0]
    return pl.pallas_call(
        _fc1_kernel,
        out_shape=jax.ShapeDtypeStruct((M, D_H1), jnp.float32),
        grid_spec=pltpu.PrefetchScalarGridSpec(
            num_scalar_prefetch=0,
            grid=(NN, NK),
            in_specs=[
                # activation: one block covering the whole (M, KP) array,
                # DMA'd once (constant index map), sliced in-kernel.
                pl.BlockSpec((M, KP), lambda j, k: (0, 0)),
                # bf16 weight blocks streamed along the contraction axis.
                pl.BlockSpec((TK, TN), lambda j, k: (k, j)),
                pl.BlockSpec((1, TN), lambda j, k: (0, j)),
            ],
            out_specs=pl.BlockSpec((M, TN), lambda j, k: (0, j)),
            scratch_shapes=[pltpu.VMEM((M, TN), jnp.float32)],
        ),
        compiler_params=pltpu.CompilerParams(
            dimension_semantics=("parallel", "arbitrary"),
            vmem_limit_bytes=32 * 1024 * 1024,
        ),
    )(x_padded, w1, b1.reshape(1, D_H1))


# ----------------------------------------------------------------------------
# Kernel 2: fused fc2 + fc3 + fc4 (everything resident in VMEM, no grid).
# ----------------------------------------------------------------------------
def _tail_kernel(h_ref, w2_ref, b2_ref, w3_ref, b3_ref, w4_ref, b4_ref, o_ref):
    h = jnp.maximum(
        jnp.dot(h_ref[...], w2_ref[...], preferred_element_type=jnp.float32)
        + b2_ref[...],
        0.0,
    )
    h = jnp.maximum(
        jnp.dot(h, w3_ref[...], preferred_element_type=jnp.float32)
        + b3_ref[...],
        0.0,
    )
    # fc4 has a single output feature -> lane reduction instead of an N=1 matmul.
    o_ref[...] = jnp.sum(h * w4_ref[...], axis=-1, keepdims=True) + b4_ref[...]


def _tail(h1, w2, b2, w3, b3, w4, b4):
    M = h1.shape[0]
    return pl.pallas_call(
        _tail_kernel,
        out_shape=jax.ShapeDtypeStruct((M, D_OUT), jnp.float32),
    )(
        h1,
        w2, b2.reshape(1, D_H2),
        w3, b3.reshape(1, D_H3),
        w4.reshape(1, D_H3),       # (32, 1) -> (1, 32) row vector
        b4.reshape(1, D_OUT),
    )


# ----------------------------------------------------------------------------
# Parameters (deterministic, PyTorch-style uniform init).  The fc1 weight is
# cast to bf16 and zero-padded to KP ONCE here, outside the per-call path.
# ----------------------------------------------------------------------------
def init_params(key):
    dims = [(D_IN, D_H1), (D_H1, D_H2), (D_H2, D_H3), (D_H3, D_OUT)]
    raw = []
    for fan_in, fan_out in dims:
        key, kw, kb = jax.random.split(key, 3)
        bound = 1.0 / (fan_in ** 0.5)
        w = jax.random.uniform(kw, (fan_in, fan_out), jnp.float32, -bound, bound)
        b = jax.random.uniform(kb, (fan_out,), jnp.float32, -bound, bound)
        raw.append((w, b))
    (w1, b1), (w2, b2), (w3, b3), (w4, b4) = raw
    w1 = jnp.pad(w1.astype(jnp.bfloat16), ((0, KP - D_IN), (0, 0)))
    return (w1, b1, w2, b2, w3, b3, w4, b4)


@jax.jit
def solo_classifier_forward(x, params):
    w1, b1, w2, b2, w3, b3, w4, b4 = params
    # Pad only the (tiny) activation; the big weight is already padded at init.
    x_p = jnp.pad(x, ((0, 0), (0, KP - D_IN)))
    h1 = _fc1(x_p, w1, b1)                   # fc1 + bias + ReLU (dropout = id)
    return _tail(h1, w2, b2, w3, b3, w4, b4) # fc2/fc3/fc4 fused (dropout = id)


def reference_forward(x, params):
    w1, b1, w2, b2, w3, b3, w4, b4 = params
    hp = jax.lax.Precision.HIGHEST
    h = jnp.maximum(
        jnp.dot(x, w1[:D_IN].astype(jnp.float32), precision=hp) + b1, 0.0)
    h = jnp.maximum(jnp.dot(h, w2, precision=hp) + b2, 0.0)
    h = jnp.maximum(jnp.dot(h, w3, precision=hp) + b3, 0.0)
    return jnp.dot(h, w4, precision=hp) + b4


if __name__ == "__main__":
    key = jax.random.PRNGKey(0)
    kparam, kx = jax.random.split(key)
    params = init_params(kparam)

    batch = 8
    x = jax.random.normal(kx, (batch, D_IN), jnp.float32)

    out = jax.block_until_ready(solo_classifier_forward(x, params))
    assert out.shape == (batch, D_OUT), out.shape

    ref = reference_forward(x, params)
    assert jnp.allclose(out, ref, rtol=1e-3, atol=1e-3), (
        float(jnp.max(jnp.abs(out - ref))))

    print("KERNEL_OK")
</pallas_src>

<mosaic_0001>
module attributes {stable_mosaic.version = 11 : i64} {
  func.func @_fc1_kernel(%arg0: i32, %arg1: i32, %arg2: memref<8x30464xf32, #tpu.memory_space<vmem>>, %arg3: memref<1792x1024xbf16, #tpu.memory_space<vmem>>, %arg4: memref<1x1024xf32, #tpu.memory_space<vmem>>, %arg5: memref<8x1024xf32, #tpu.memory_space<vmem>>, %arg6: memref<8x1024xf32, #tpu.memory_space<vmem>>) attributes {dimension_semantics = [#tpu.dimension_semantics<parallel>, #tpu.dimension_semantics<arbitrary>], iteration_bounds = array<i64: 2, 17>, scalar_prefetch = 0 : i64, scratch_operands = 1 : i64, tpu.core_type = #tpu.core_type<tc>, window_params = [{pipeline_mode = #tpu.pipeline_mode<synchronous>, transform_indices = @transform_0, window_bounds = array<i64: 8, 30464>}, {transform_indices = @transform_1, window_bounds = array<i64: 1792, 1024>}, {transform_indices = @transform_2, window_bounds = array<i64: 1, 1024>}, {transform_indices = @transform_3, window_bounds = array<i64: 8, 1024>}]} {
    %c0_i32 = arith.constant 0 : i32
    %0 = arith.cmpi eq, %arg1, %c0_i32 : i32
    %1 = arith.extui %0 : i1 to i32
    %c0_i32_0 = arith.constant 0 : i32
    %2 = arith.cmpi ne, %1, %c0_i32_0 : i32
    scf.if %2 {
      %cst_8 = arith.constant 0.000000e+00 : f32
      %16 = vector.broadcast %cst_8 : f32 to vector<8x1024xf32>
      %c0_9 = arith.constant 0 : index
      %c0_10 = arith.constant 0 : index
      %17 = vector.load %arg6[%c0_9, %c0_10] : memref<8x1024xf32, #tpu.memory_space<vmem>>, vector<8x1024xf32>
      tpu.vector_store %arg6[%c0_9, %c0_10], %16 {strides = array<i32>} : memref<8x1024xf32, #tpu.memory_space<vmem>>, vector<8x1024xf32>,
    } else {
    }
    %c1792_i32 = arith.constant 1792 : i32
    %3 = arith.muli %arg1, %c1792_i32 : i32
    %4 = tpu.assume_multiple %3, 128 : i32
    %c0 = arith.constant 0 : index
    %5 = arith.index_cast %4 : i32 to index
    %6 = vector.load %arg2[%c0, %5] : memref<8x30464xf32, #tpu.memory_space<vmem>>, vector<8x1792xf32>
    %c0_1 = arith.constant 0 : index
    %c0_2 = arith.constant 0 : index
    %7 = vector.load %arg6[%c0_1, %c0_2] : memref<8x1024xf32, #tpu.memory_space<vmem>>, vector<8x1024xf32>
    %c0_3 = arith.constant 0 : index
    %c0_4 = arith.constant 0 : index
    %8 = vector.load %arg3[%c0_3, %c0_4] : memref<1792x1024xbf16, #tpu.memory_space<vmem>>, vector<1792x1024xbf16>
    %9 = arith.extf %8 : vector<1792x1024xbf16> to vector<1792x1024xf32>
    %cst = arith.constant dense<0.000000e+00> : vector<8x1024xf32>
    %10 = tpu.matmul %6, %9, %cst {dimension_numbers = #tpu.dot_dimension_numbers<[1], [0], [0], [1], [0, 0, 1, 1], [], []>} : vector<8x1792xf32>, vector<1792x1024xf32>, vector<8x1024xf32> -> vector<8x1024xf32>
    %11 = arith.addf %7, %10 : vector<8x1024xf32>
    %c0_5 = arith.constant 0 : index
    %c0_6 = arith.constant 0 : index
    %12 = vector.load %arg6[%c0_5, %c0_6] : memref<8x1024xf32, #tpu.memory_space<vmem>>, vector<8x1024xf32>
    tpu.vector_store %arg6[%c0_5, %c0_6], %11 {strides = array<i32>} : memref<8x1024xf32, #tpu.memory_space<vmem>>, vector<8x1024xf32>,
    %c16_i32 = arith.constant 16 : i32
    %13 = arith.cmpi eq, %arg1, %c16_i32 : i32
    %14 = arith.extui %13 : i1 to i32
    %c0_i32_7 = arith.constant 0 : i32
    %15 = arith.cmpi ne, %14, %c0_i32_7 : i32
    scf.if %15 {
      %c0_8 = arith.constant 0 : index
      %c0_9 = arith.constant 0 : index
      %16 = vector.load %arg6[%c0_8, %c0_9] : memref<8x1024xf32, #tpu.memory_space<vmem>>, vector<8x1024xf32>
      %c0_10 = arith.constant 0 : index
      %c0_11 = arith.constant 0 : index
      %17 = vector.load %arg4[%c0_10, %c0_11] : memref<1x1024xf32, #tpu.memory_space<vmem>>, vector<1x1024xf32>
      %18 = vector.broadcast %17 : vector<1x1024xf32> to vector<8x1024xf32>
      %19 = arith.addf %16, %18 : vector<8x1024xf32>
      %cst_12 = arith.constant 0.000000e+00 : f32
      %20 = vector.broadcast %cst_12 : f32 to vector<8x1024xf32>
      %21 = arith.maximumf %19, %20 : vector<8x1024xf32>
      %c0_13 = arith.constant 0 : index
      %c0_14 = arith.constant 0 : index
      %22 = vector.load %arg5[%c0_13, %c0_14] : memref<8x1024xf32, #tpu.memory_space<vmem>>, vector<8x1024xf32>
      tpu.vector_store %arg5[%c0_13, %c0_14], %21 {strides = array<i32>} : memref<8x1024xf32, #tpu.memory_space<vmem>>, vector<8x1024xf32>,
    } else {
    }
    return
  }
  func.func @transform_0(%arg0: i32, %arg1: i32) -> (i32, i32) {
    %c0_i32 = arith.constant 0 : i32
    %c0_i32_0 = arith.constant 0 : i32
    %c0_i32_1 = arith.constant 0 : i32
    return %c0_i32, %c0_i32_0 : i32, i32
  }
  func.func @transform_1(%arg0: i32, %arg1: i32) -> (i32, i32) {
    %c0_i32 = arith.constant 0 : i32
    return %arg1, %arg0 : i32, i32
  }
  func.func @transform_2(%arg0: i32, %arg1: i32) -> (i32, i32) {
    %c0_i32 = arith.constant 0 : i32
    %c0_i32_0 = arith.constant 0 : i32
    return %c0_i32, %arg0 : i32, i32
  }
  func.func @transform_3(%arg0: i32, %arg1: i32) -> (i32, i32) {
    %c0_i32 = arith.constant 0 : i32
    %c0_i32_0 = arith.constant 0 : i32
    return %c0_i32, %arg0 : i32, i32
  }
}

module attributes {stable_mosaic.version = 11 : i64} {
  func.func @_tail_kernel(%arg0: memref<8x2048xf32, #tpu.memory_space<vmem>>, %arg1: memref<2048x256xf32, #tpu.memory_space<vmem>>, %arg2: memref<1x256xf32, #tpu.memory_space<vmem>>, %arg3: memref<256x32xf32, #tpu.memory_space<vmem>>, %arg4: memref<1x32xf32, #tpu.memory_space<vmem>>, %arg5: memref<1x32xf32, #tpu.memory_space<vmem>>, %arg6: memref<1x1xf32, #tpu.memory_space<vmem>>, %arg7: memref<8x1xf32, #tpu.memory_space<vmem>>) attributes {dimension_semantics = [], scalar_prefetch = 0 : i64, scratch_operands = 0 : i64, tpu.core_type = #tpu.core_type<tc>} {
    %c0 = arith.constant 0 : index
    %c0_0 = arith.constant 0 : index
    %0 = vector.load %arg0[%c0, %c0_0] : memref<8x2048xf32, #tpu.memory_space<vmem>>, vector<8x2048xf32>
    %c0_1 = arith.constant 0 : index
    %c0_2 = arith.constant 0 : index
    %1 = vector.load %arg1[%c0_1, %c0_2] : memref<2048x256xf32, #tpu.memory_space<vmem>>, vector<2048x256xf32>
    %cst = arith.constant dense<0.000000e+00> : vector<8x256xf32>
    %2 = tpu.matmul %0, %1, %cst {dimension_numbers = #tpu.dot_dimension_numbers<[1], [0], [0], [1], [0, 0, 1, 1], [], []>} : vector<8x2048xf32>, vector<2048x256xf32>, vector<8x256xf32> -> vector<8x256xf32>
    %c0_3 = arith.constant 0 : index
    %c0_4 = arith.constant 0 : index
    %3 = vector.load %arg2[%c0_3, %c0_4] : memref<1x256xf32, #tpu.memory_space<vmem>>, vector<1x256xf32>
    %4 = vector.broadcast %3 : vector<1x256xf32> to vector<8x256xf32>
    %5 = arith.addf %2, %4 : vector<8x256xf32>
    %cst_5 = arith.constant 0.000000e+00 : f32
    %6 = vector.broadcast %cst_5 : f32 to vector<8x256xf32>
    %7 = arith.maximumf %5, %6 : vector<8x256xf32>
    %c0_6 = arith.constant 0 : index
    %c0_7 = arith.constant 0 : index
    %8 = vector.load %arg3[%c0_6, %c0_7] : memref<256x32xf32, #tpu.memory_space<vmem>>, vector<256x32xf32>
    %cst_8 = arith.constant dense<0.000000e+00> : vector<8x32xf32>
    %9 = tpu.matmul %7, %8, %cst_8 {dimension_numbers = #tpu.dot_dimension_numbers<[1], [0], [0], [1], [0, 0, 1, 1], [], []>} : vector<8x256xf32>, vector<256x32xf32>, vector<8x32xf32> -> vector<8x32xf32>
    %c0_9 = arith.constant 0 : index
    %c0_10 = arith.constant 0 : index
    %10 = vector.load %arg4[%c0_9, %c0_10] : memref<1x32xf32, #tpu.memory_space<vmem>>, vector<1x32xf32>
    %11 = vector.broadcast %10 : vector<1x32xf32> to vector<8x32xf32>
    %12 = arith.addf %9, %11 : vector<8x32xf32>
    %cst_11 = arith.constant 0.000000e+00 : f32
    %13 = vector.broadcast %cst_11 : f32 to vector<8x32xf32>
    %14 = arith.maximumf %12, %13 : vector<8x32xf32>
    %c0_12 = arith.constant 0 : index
    %c0_13 = arith.constant 0 : index
    %15 = vector.load %arg5[%c0_12, %c0_13] : memref<1x32xf32, #tpu.memory_space<vmem>>, vector<1x32xf32>
    %16 = vector.broadcast %15 : vector<1x32xf32> to vector<8x32xf32>
    %17 = arith.mulf %14, %16 : vector<8x32xf32>
    %cst_14 = arith.constant dense<0.000000e+00> : vector<8xf32>
    %18 = vector.multi_reduction <add>, %17, %cst_14 [1] : vector<8x32xf32> to vector<8xf32>
    %19 = vector.shape_cast %18 : vector<8xf32> to vector<8x1xf32>
    %c0_15 = arith.constant 0 : index
    %c0_16 = arith.constant 0 : index
    %20 = vector.load %arg6[%c0_15, %c0_16] : memref<1x1xf32, #tpu.memory_space<vmem>>, vector<1x1xf32>
    %21 = vector.broadcast %20 : vector<1x1xf32> to vector<8x1xf32>
    %22 = arith.addf %19, %21 : vector<8x1xf32>
    %c0_17 = arith.constant 0 : index
    %c0_18 = arith.constant 0 : index
    %23 = vector.load %arg7[%c0_17, %c0_18] : memref<8x1xf32, #tpu.memory_space<vmem>>, vector<8x1xf32>
    tpu.vector_store %arg7[%c0_17, %c0_18], %22 {strides = array<i32>} : memref<8x1xf32, #tpu.memory_space<vmem>>, vector<8x1xf32>,
    return
  }
}

</mosaic_0001>

<bundles_post_ra>
// kernel: solo_classifier_forward.3
= control target key start
LH: loop header
LB: loop body
LE: loop exit
PB: predicated region body
PF: predicated region fallthrough
CT: control target
= control target key end

     0   :  { %vm1256_vm0 = vcmask 261120   ;;  %vm1268_vm1 = vcmask 7168   ;;  %s3047_s1 = inlined_call_operand.vmem [shape: f32[2048,256], index: 1, kind: input, shape index: {}]   ;;  %s3048_s0 = inlined_call_operand.vmem [shape: f32[8,2048], index: 0, kind: input, shape index: {}]   ;;  %s3049_s3 = inlined_call_operand.vmem [shape: f32[256,32], index: 3, kind: input, shape index: {}]   ;;  %s3050_s2 = inlined_call_operand.vmem [shape: f32[1,256], index: 2, kind: input, shape index: {}]   ;;  %s3051_s6 = inlined_call_operand.<no memory space> [shape: f32[1,1], index: 6, kind: input, shape index: {}]   ;;  %s3052_s4 = inlined_call_operand.vmem [shape: f32[1,32], index: 4, kind: input, shape index: {}]   ;;  %s3053_s5 = inlined_call_operand.vmem [shape: f32[1,32], index: 5, kind: input, shape index: {}]   ;;  %s3054_s7 = inlined_call_operand.vmem [shape: f32[8,1], index: 7, kind: output, shape index: {}]  }
   0x1   :  { %v75_v0 = vld [vmem:[%s3047_s1 + $0xf8] sm:$0xff]  ;;  %v74_v2 = vld [vmem:[%s3047_s1 + $0xf0] sm:$0xff]  ;;  %v73_v4 = vld [vmem:[%s3047_s1 + $0xe8] sm:$0xff] }
   0x2   :  { %v139_v1 = vld [vmem:[%s3047_s1 + $0x2f8] sm:$0xff]  ;;  %568 = vmatprep.subr.mxu0 %v75_v0  ;;  %v138_v3 = vld [vmem:[%s3047_s1 + $0x2f0] sm:$0xff]  ;;  %v137_v5 = vld [vmem:[%s3047_s1 + $0x2e8] sm:$0xff] }
   0x3   :  { %639 = vmatprep.subr.mxu1 %v139_v1  ;;  %569 = vmatpush1.msra.mxu0 %v74_v2  ;;  %v72_v6 = vld [vmem:[%s3047_s1 + $0xe0] sm:$0xff]  ;;  %v71_v8 = vld [vmem:[%s3047_s1 + $0xd8] sm:$0xff]  ;;  %v70_v10 = vld [vmem:[%s3047_s1 + $0xd0] sm:$0xff] }
   0x4   :  { %640 = vmatpush1.msra.mxu1 %v138_v3  ;;  %v136_v7 = vld [vmem:[%s3047_s1 + $0x2e0] sm:$0xff]  ;;  %570 = vmatprep.subr.mxu0 %v73_v4  ;;  %v135_v9 = vld [vmem:[%s3047_s1 + $0x2d8] sm:$0xff]  ;;  %v134_v11 = vld [vmem:[%s3047_s1 + $0x2d0] sm:$0xff] }
   0x5   :  { %641 = vmatprep.subr.mxu1 %v137_v5  ;;  %571 = vmatpush1.msra.mxu0 %v72_v6  ;;  %v69_v12 = vld [vmem:[%s3047_s1 + $0xc8] sm:$0xff]  ;;  %v68_v14 = vld [vmem:[%s3047_s1 + $0xc0] sm:$0xff]  ;;  %v67_v16 = vld [vmem:[%s3047_s1 + $0xb8] sm:$0xff] }
   0x6   :  { %642 = vmatpush1.msra.mxu1 %v136_v7  ;;  %v133_v13 = vld [vmem:[%s3047_s1 + $0x2c8] sm:$0xff]  ;;  %572 = vmatprep.subr.mxu0 %v71_v8  ;;  %v132_v15 = vld [vmem:[%s3047_s1 + $0x2c0] sm:$0xff]  ;;  %v131_v17 = vld [vmem:[%s3047_s1 + $0x2b8] sm:$0xff] }
   0x7   :  { %643 = vmatprep.subr.mxu1 %v135_v9  ;;  %573 = vmatpush1.msra.mxu0 %v70_v10  ;;  %v66_v18 = vld [vmem:[%s3047_s1 + $0xb0] sm:$0xff]  ;;  %v65_v20 = vld [vmem:[%s3047_s1 + $0xa8] sm:$0xff]  ;;  %v64_v22 = vld [vmem:[%s3047_s1 + $0xa0] sm:$0xff] }
   0x8   :  { %644 = vmatpush1.msra.mxu1 %v134_v11  ;;  %574 = vmatprep.subr.mxu0 %v69_v12  ;;  %v130_v19 = vld [vmem:[%s3047_s1 + $0x2b0] sm:$0xff]  ;;  %v129_v21 = vld [vmem:[%s3047_s1 + $0x2a8] sm:$0xff]  ;;  %v128_v23 = vld [vmem:[%s3047_s1 + $0x2a0] sm:$0xff] }
   0x9   :  { %645 = vmatprep.subr.mxu1 %v133_v13  ;;  %575 = vmatpush1.msra.mxu0 %v68_v14  ;;  %v63_v24 = vld [vmem:[%s3047_s1 + $0x98] sm:$0xff]  ;;  %v62_v26 = vld [vmem:[%s3047_s1 + $0x90] sm:$0xff]  ;;  %v61_v28 = vld [vmem:[%s3047_s1 + $0x88] sm:$0xff] }
   0xa   :  { %646 = vmatpush1.msra.mxu1 %v132_v15  ;;  %576 = vmatprep.subr.mxu0 %v67_v16  ;;  %v127_v25 = vld [vmem:[%s3047_s1 + $0x298] sm:$0xff]  ;;  %v126_v27 = vld [vmem:[%s3047_s1 + $0x290] sm:$0xff]  ;;  %v125_v29 = vld [vmem:[%s3047_s1 + $0x288] sm:$0xff] }
   0xb   :  { %647 = vmatprep.subr.mxu1 %v131_v17  ;;  %577 = vmatpush1.msra.mxu0 %v66_v18  ;;  %v60_v30 = vld [vmem:[%s3047_s1 + $0x80] sm:$0xff]  ;;  %v59_v32 = vld [vmem:[%s3047_s1 + $0x78] sm:$0xff]  ;;  %v58_v34 = vld [vmem:[%s3047_s1 + $0x70] sm:$0xff] }
   0xc   :  { %648 = vmatpush1.msra.mxu1 %v130_v19  ;;  %578 = vmatprep.subr.mxu0 %v65_v20  ;;  %v124_v31 = vld [vmem:[%s3047_s1 + $0x280] sm:$0xff]  ;;  %v123_v33 = vld [vmem:[%s3047_s1 + $0x278] sm:$0xff]  ;;  %v122_v35 = vld [vmem:[%s3047_s1 + $0x270] sm:$0xff] }
   0xd   :  { %649 = vmatprep.subr.mxu1 %v129_v21  ;;  %579 = vmatpush1.msra.mxu0 %v64_v22  ;;  %v57_v36 = vld [vmem:[%s3047_s1 + $0x68] sm:$0xff]  ;;  %v56_v38 = vld [vmem:[%s3047_s1 + $0x60] sm:$0xff]  ;;  %v55_v40 = vld [vmem:[%s3047_s1 + $0x58] sm:$0xff] }
   0xe   :  { %650 = vmatpush1.msra.mxu1 %v128_v23  ;;  %580 = vmatprep.subr.mxu0 %v63_v24  ;;  %v121_v37 = vld [vmem:[%s3047_s1 + $0x268] sm:$0xff]  ;;  %v120_v39 = vld [vmem:[%s3047_s1 + $0x260] sm:$0xff]  ;;  %v119_v41 = vld [vmem:[%s3047_s1 + $0x258] sm:$0xff] }
   0xf   :  { %651 = vmatprep.subr.mxu1 %v127_v25  ;;  %581 = vmatpush1.msra.mxu0 %v62_v26  ;;  %v54_v42 = vld [vmem:[%s3047_s1 + $0x50] sm:$0xff]  ;;  %v53_v44 = vld [vmem:[%s3047_s1 + $0x48] sm:$0xff]  ;;  %v52_v46 = vld [vmem:[%s3047_s1 + $0x40] sm:$0xff] }
  0x10   :  { %652 = vmatpush1.msra.mxu1 %v126_v27  ;;  %582 = vmatprep.subr.mxu0 %v61_v28  ;;  %v118_v43 = vld [vmem:[%s3047_s1 + $0x250] sm:$0xff]  ;;  %v117_v45 = vld [vmem:[%s3047_s1 + $0x248] sm:$0xff]  ;;  %v116_v47 = vld [vmem:[%s3047_s1 + $0x240] sm:$0xff] }
  0x11   :  { %653 = vmatprep.subr.mxu1 %v125_v29  ;;  %583 = vmatpush1.msra.mxu0 %v60_v30  ;;  %v51_v48 = vld [vmem:[%s3047_s1 + $0x38] sm:$0xff]  ;;  %v50_v50 = vld [vmem:[%s3047_s1 + $0x30] sm:$0xff]  ;;  %v49_v52 = vld [vmem:[%s3047_s1 + $0x28] sm:$0xff] }
  0x12   :  { %654 = vmatpush1.msra.mxu1 %v124_v31  ;;  %584 = vmatprep.subr.mxu0 %v59_v32  ;;  %v115_v49 = vld [vmem:[%s3047_s1 + $0x238] sm:$0xff]  ;;  %v114_v51 = vld [vmem:[%s3047_s1 + $0x230] sm:$0xff]  ;;  %v113_v53 = vld [vmem:[%s3047_s1 + $0x228] sm:$0xff] }
  0x13   :  { %655 = vmatprep.subr.mxu1 %v123_v33  ;;  %585 = vmatpush1.msra.mxu0 %v58_v34  ;;  %v48_v54 = vld [vmem:[%s3047_s1 + $0x20] sm:$0xff]  ;;  %v47_v56 = vld [vmem:[%s3047_s1 + $0x18] sm:$0xff]  ;;  %v46_v58 = vld [vmem:[%s3047_s1 + $0x10] sm:$0xff] }
  0x14   :  { %656 = vmatpush1.msra.mxu1 %v122_v35  ;;  %586 = vmatprep.subr.mxu0 %v57_v36  ;;  %v112_v55 = vld [vmem:[%s3047_s1 + $0x220] sm:$0xff]  ;;  %v111_v57 = vld [vmem:[%s3047_s1 + $0x218] sm:$0xff]  ;;  %v110_v59 = vld [vmem:[%s3047_s1 + $0x210] sm:$0xff] }
  0x15   :  { %657 = vmatprep.subr.mxu1 %v121_v37  ;;  %587 = vmatpush1.msra.mxu0 %v56_v38  ;;  %v45_v60 = vld [vmem:[%s3047_s1 + $0x8] sm:$0xff]  ;;  %v44_v62 = vld [vmem:[%s3047_s1] sm:$0xff]  ;;  %v107_v0 = vld [vmem:[%s3047_s1 + $0x1f8] sm:$0xff] }
  0x16   :  { %658 = vmatpush1.msra.mxu1 %v120_v39  ;;  %588 = vmatprep.subr.mxu0 %v55_v40  ;;  %v109_v61 = vld [vmem:[%s3047_s1 + $0x208] sm:$0xff]  ;;  %v108_v63 = vld [vmem:[%s3047_s1 + $0x200] sm:$0xff]  ;;  %v171_v1 = vld [vmem:[%s3047_s1 + $0x3f8] sm:$0xff] }
  0x17   :  { %659 = vmatprep.subr.mxu1 %v119_v41  ;;  %589 = vmatpush1.msra.mxu0 %v54_v42  ;;  %v106_v2 = vld [vmem:[%s3047_s1 + $0x1f0] sm:$0xff]  ;;  %v105_v4 = vld [vmem:[%s3047_s1 + $0x1e8] sm:$0xff]  ;;  %v104_v6 = vld [vmem:[%s3047_s1 + $0x1e0] sm:$0xff] }
  0x18   :  { %660 = vmatpush1.msra.mxu1 %v118_v43  ;;  %590 = vmatprep.subr.mxu0 %v53_v44  ;;  %v170_v3 = vld [vmem:[%s3047_s1 + $0x3f0] sm:$0xff]  ;;  %v169_v5 = vld [vmem:[%s3047_s1 + $0x3e8] sm:$0xff]  ;;  %v168_v7 = vld [vmem:[%s3047_s1 + $0x3e0] sm:$0xff] }
  0x19   :  { %661 = vmatprep.subr.mxu1 %v117_v45  ;;  %591 = vmatpush1.msra.mxu0 %v52_v46  ;;  %v103_v8 = vld [vmem:[%s3047_s1 + $0x1d8] sm:$0xff]  ;;  %v102_v10 = vld [vmem:[%s3047_s1 + $0x1d0] sm:$0xff]  ;;  %v101_v12 = vld [vmem:[%s3047_s1 + $0x1c8] sm:$0xff] }
  0x1a   :  { %662 = vmatpush1.msra.mxu1 %v116_v47  ;;  %592 = vmatprep.subr.mxu0 %v51_v48  ;;  %v167_v9 = vld [vmem:[%s3047_s1 + $0x3d8] sm:$0xff]  ;;  %v166_v11 = vld [vmem:[%s3047_s1 + $0x3d0] sm:$0xff]  ;;  %v165_v13 = vld [vmem:[%s3047_s1 + $0x3c8] sm:$0xff] }
  0x1b   :  { %663 = vmatprep.subr.mxu1 %v115_v49  ;;  %593 = vmatpush1.msra.mxu0 %v50_v50  ;;  %v100_v14 = vld [vmem:[%s3047_s1 + $0x1c0] sm:$0xff]  ;;  %v99_v16 = vld [vmem:[%s3047_s1 + $0x1b8] sm:$0xff]  ;;  %v98_v18 = vld [vmem:[%s3047_s1 + $0x1b0] sm:$0xff] }
  0x1c   :  { %664 = vmatpush1.msra.mxu1 %v114_v51  ;;  %594 = vmatprep.subr.mxu0 %v49_v52  ;;  %v164_v15 = vld [vmem:[%s3047_s1 + $0x3c0] sm:$0xff]  ;;  %v163_v17 = vld [vmem:[%s3047_s1 + $0x3b8] sm:$0xff]  ;;  %v162_v19 = vld [vmem:[%s3047_s1 + $0x3b0] sm:$0xff] }
  0x1d   :  { %665 = vmatprep.subr.mxu1 %v113_v53  ;;  %595 = vmatpush1.msra.mxu0 %v48_v54  ;;  %v97_v20 = vld [vmem:[%s3047_s1 + $0x1a8] sm:$0xff]  ;;  %v96_v22 = vld [vmem:[%s3047_s1 + $0x1a0] sm:$0xff]  ;;  %v95_v24 = vld [vmem:[%s3047_s1 + $0x198] sm:$0xff] }
  0x1e   :  { %666 = vmatpush1.msra.mxu1 %v112_v55  ;;  %596 = vmatprep.subr.mxu0 %v47_v56  ;;  %v161_v21 = vld [vmem:[%s3047_s1 + $0x3a8] sm:$0xff]  ;;  %v160_v23 = vld [vmem:[%s3047_s1 + $0x3a0] sm:$0xff]  ;;  %v159_v25 = vld [vmem:[%s3047_s1 + $0x398] sm:$0xff] }
  0x1f   :  { %667 = vmatprep.subr.mxu1 %v111_v57  ;;  %597 = vmatpush1.msra.mxu0 %v46_v58  ;;  %v94_v26 = vld [vmem:[%s3047_s1 + $0x190] sm:$0xff]  ;;  %v93_v28 = vld [vmem:[%s3047_s1 + $0x188] sm:$0xff]  ;;  %v92_v30 = vld [vmem:[%s3047_s1 + $0x180] sm:$0xff] }
  0x20   :  { %668 = vmatpush1.msra.mxu1 %v110_v59  ;;  %598 = vmatprep.subr.mxu0 %v45_v60  ;;  %v158_v27 = vld [vmem:[%s3047_s1 + $0x390] sm:$0xff]  ;;  %v157_v29 = vld [vmem:[%s3047_s1 + $0x388] sm:$0xff]  ;;  %v156_v31 = vld [vmem:[%s3047_s1 + $0x380] sm:$0xff] }
  0x21   :  { %669 = vmatprep.subr.mxu1 %v109_v61  ;;  %599 = vmatpush1.msra.mxu0 %v44_v62  ;;  %v91_v32 = vld [vmem:[%s3047_s1 + $0x178] sm:$0xff]  ;;  %v90_v34 = vld [vmem:[%s3047_s1 + $0x170] sm:$0xff]  ;;  %v89_v36 = vld [vmem:[%s3047_s1 + $0x168] sm:$0xff] }
  0x22   :  { %670 = vmatpush1.msra.mxu1 %v108_v63  ;;  %600 = vmatprep.subr.mxu0 %v107_v0  ;;  %v155_v33 = vld [vmem:[%s3047_s1 + $0x378] sm:$0xff]  ;;  %v154_v35 = vld [vmem:[%s3047_s1 + $0x370] sm:$0xff]  ;;  %v153_v37 = vld [vmem:[%s3047_s1 + $0x368] sm:$0xff] }
  0x23   :  { %671 = vmatprep.subr.mxu1 %v171_v1  ;;  %601 = vmatpush2.msra.mxu0 %v106_v2  ;;  %v88_v38 = vld [vmem:[%s3047_s1 + $0x160] sm:$0xff]  ;;  %v87_v40 = vld [vmem:[%s3047_s1 + $0x158] sm:$0xff]  ;;  %v86_v42 = vld [vmem:[%s3047_s1 + $0x150] sm:$0xff] }
  0x24   :  { %672 = vmatpush2.msra.mxu1 %v170_v3  ;;  %602 = vmatprep.subr.mxu0 %v105_v4  ;;  %v152_v39 = vld [vmem:[%s3047_s1 + $0x360] sm:$0xff]  ;;  %v151_v41 = vld [vmem:[%s3047_s1 + $0x358] sm:$0xff]  ;;  %v150_v43 = vld [vmem:[%s3047_s1 + $0x350] sm:$0xff] }
  0x25   :  { %673 = vmatprep.subr.mxu1 %v169_v5  ;;  %603 = vmatpush2.msra.mxu0 %v104_v6  ;;  %v85_v44 = vld [vmem:[%s3047_s1 + $0x148] sm:$0xff]  ;;  %v84_v46 = vld [vmem:[%s3047_s1 + $0x140] sm:$0xff]  ;;  %v83_v48 = vld [vmem:[%s3047_s1 + $0x138] sm:$0xff] }
  0x26   :  { %674 = vmatpush2.msra.mxu1 %v168_v7  ;;  %604 = vmatprep.subr.mxu0 %v103_v8  ;;  %v149_v45 = vld [vmem:[%s3047_s1 + $0x348] sm:$0xff]  ;;  %v148_v47 = vld [vmem:[%s3047_s1 + $0x340] sm:$0xff]  ;;  %v147_v49 = vld [vmem:[%s3047_s1 + $0x338] sm:$0xff] }
  0x27   :  { %675 = vmatprep.subr.mxu1 %v167_v9  ;;  %605 = vmatpush2.msra.mxu0 %v102_v10  ;;  %v82_v50 = vld [vmem:[%s3047_s1 + $0x130] sm:$0xff]  ;;  %v81_v52 = vld [vmem:[%s3047_s1 + $0x128] sm:$0xff]  ;;  %v80_v54 = vld [vmem:[%s3047_s1 + $0x120] sm:$0xff] }
  0x28   :  { %676 = vmatpush2.msra.mxu1 %v166_v11  ;;  %606 = vmatprep.subr.mxu0 %v101_v12  ;;  %v146_v51 = vld [vmem:[%s3047_s1 + $0x330] sm:$0xff]  ;;  %v145_v53 = vld [vmem:[%s3047_s1 + $0x328] sm:$0xff]  ;;  %v144_v55 = vld [vmem:[%s3047_s1 + $0x320] sm:$0xff] }
  0x29   :  { %677 = vmatprep.subr.mxu1 %v165_v13  ;;  %607 = vmatpush2.msra.mxu0 %v100_v14  ;;  %v79_v56 = vld [vmem:[%s3047_s1 + $0x118] sm:$0xff]  ;;  %v78_v58 = vld [vmem:[%s3047_s1 + $0x110] sm:$0xff]  ;;  %v77_v60 = vld [vmem:[%s3047_s1 + $0x108] sm:$0xff] }
  0x2a   :  { %678 = vmatpush2.msra.mxu1 %v164_v15  ;;  %608 = vmatprep.subr.mxu0 %v99_v16  ;;  %v143_v57 = vld [vmem:[%s3047_s1 + $0x318] sm:$0xff]  ;;  %v142_v59 = vld [vmem:[%s3047_s1 + $0x310] sm:$0xff]  ;;  %v141_v61 = vld [vmem:[%s3047_s1 + $0x308] sm:$0xff] }
  0x2b   :  { %679 = vmatprep.subr.mxu1 %v163_v17  ;;  %609 = vmatpush2.msra.mxu0 %v98_v18  ;;  %v76_v62 = vld [vmem:[%s3047_s1 + $0x100] sm:$0xff]  ;;  %v29_v63 = vld [vmem:[%s3048_s0 + $0x8] sm:$0xff]  ;;  %v31_v2 = vld [vmem:[%s3048_s0 + $0x18] sm:$0xff] }
  0x2c   :  { %680 = vmatpush2.msra.mxu1 %v162_v19  ;;  %610 = vmatprep.subr.mxu0 %v97_v20  ;;  %v140_v0 = vld [vmem:[%s3047_s1 + $0x300] sm:$0xff]  ;;  %v203_v3 = vld [vmem:[%s3047_s1 + $0x4f8] sm:$0xff]  ;;  %v30_v5 = vld [vmem:[%s3048_s0 + $0x10] sm:$0xff] }
  0x2d   :  { %681 = vmatprep.subr.mxu1 %v161_v21  ;;  %611 = vmatpush2.msra.mxu0 %v96_v22  ;;  %v28_v1 = vld [vmem:[%s3048_s0] sm:$0xff]  ;;  %v267_v4 = vld [vmem:[%s3047_s1 + $0x6f8] sm:$0xff]  ;;  %v202_v6 = vld [vmem:[%s3047_s1 + $0x4f0] sm:$0xff] }
  0x2e   :  { %682 = vmatpush2.msra.mxu1 %v160_v23  ;;  %612 = vmatprep.subr.mxu0 %v95_v24  ;;  %v266_v7 = vld [vmem:[%s3047_s1 + $0x6f0] sm:$0xff]  ;;  %v201_v8 = vld [vmem:[%s3047_s1 + $0x4e8] sm:$0xff]  ;;  %v200_v10 = vld [vmem:[%s3047_s1 + $0x4e0] sm:$0xff] }
  0x2f   :  { %683 = vmatprep.subr.mxu1 %v159_v25  ;;  %613 = vmatpush2.msra.mxu0 %v94_v26  ;;  %v265_v9 = vld [vmem:[%s3047_s1 + $0x6e8] sm:$0xff]  ;;  %v264_v11 = vld [vmem:[%s3047_s1 + $0x6e0] sm:$0xff]  ;;  %v199_v12 = vld [vmem:[%s3047_s1 + $0x4d8] sm:$0xff] }
  0x30   :  { %684 = vmatpush2.msra.mxu1 %v158_v27  ;;  %614 = vmatprep.subr.mxu0 %v93_v28  ;;  %v263_v13 = vld [vmem:[%s3047_s1 + $0x6d8] sm:$0xff]  ;;  %v198_v14 = vld [vmem:[%s3047_s1 + $0x4d0] sm:$0xff]  ;;  %v197_v16 = vld [vmem:[%s3047_s1 + $0x4c8] sm:$0xff] }
  0x31   :  { %685 = vmatprep.subr.mxu1 %v157_v29  ;;  %615 = vmatpush2.msra.mxu0 %v92_v30  ;;  %v262_v15 = vld [vmem:[%s3047_s1 + $0x6d0] sm:$0xff]  ;;  %v261_v17 = vld [vmem:[%s3047_s1 + $0x6c8] sm:$0xff]  ;;  %v196_v18 = vld [vmem:[%s3047_s1 + $0x4c0] sm:$0xff] }
  0x32   :  { %686 = vmatpush2.msra.mxu1 %v156_v31  ;;  %616 = vmatprep.subr.mxu0 %v91_v32  ;;  %v260_v19 = vld [vmem:[%s3047_s1 + $0x6c0] sm:$0xff]  ;;  %v195_v20 = vld [vmem:[%s3047_s1 + $0x4b8] sm:$0xff]  ;;  %v194_v22 = vld [vmem:[%s3047_s1 + $0x4b0] sm:$0xff] }
  0x33   :  { %687 = vmatprep.subr.mxu1 %v155_v33  ;;  %617 = vmatpush2.msra.mxu0 %v90_v34  ;;  %v259_v21 = vld [vmem:[%s3047_s1 + $0x6b8] sm:$0xff]  ;;  %v258_v23 = vld [vmem:[%s3047_s1 + $0x6b0] sm:$0xff]  ;;  %v193_v24 = vld [vmem:[%s3047_s1 + $0x4a8] sm:$0xff] }
  0x34   :  { %688 = vmatpush2.msra.mxu1 %v154_v35  ;;  %618 = vmatprep.subr.mxu0 %v89_v36  ;;  %v257_v25 = vld [vmem:[%s3047_s1 + $0x6a8] sm:$0xff]  ;;  %v192_v26 = vld [vmem:[%s3047_s1 + $0x4a0] sm:$0xff]  ;;  %v191_v28 = vld [vmem:[%s3047_s1 + $0x498] sm:$0xff] }
  0x35   :  { %689 = vmatprep.subr.mxu1 %v153_v37  ;;  %619 = vmatpush2.msra.mxu0 %v88_v38  ;;  %v256_v27 = vld [vmem:[%s3047_s1 + $0x6a0] sm:$0xff]  ;;  %v255_v29 = vld [vmem:[%s3047_s1 + $0x698] sm:$0xff]  ;;  %v190_v30 = vld [vmem:[%s3047_s1 + $0x490] sm:$0xff] }
  0x36   :  { %690 = vmatpush2.msra.mxu1 %v152_v39  ;;  %620 = vmatprep.subr.mxu0 %v87_v40  ;;  %v254_v31 = vld [vmem:[%s3047_s1 + $0x690] sm:$0xff]  ;;  %v189_v32 = vld [vmem:[%s3047_s1 + $0x488] sm:$0xff]  ;;  %v188_v34 = vld [vmem:[%s3047_s1 + $0x480] sm:$0xff] }
  0x37   :  { %691 = vmatprep.subr.mxu1 %v151_v41  ;;  %621 = vmatpush2.msra.mxu0 %v86_v42  ;;  %v253_v33 = vld [vmem:[%s3047_s1 + $0x688] sm:$0xff]  ;;  %v252_v35 = vld [vmem:[%s3047_s1 + $0x680] sm:$0xff]  ;;  %v187_v36 = vld [vmem:[%s3047_s1 + $0x478] sm:$0xff] }
  0x38   :  { %692 = vmatpush2.msra.mxu1 %v150_v43  ;;  %622 = vmatprep.subr.mxu0 %v85_v44  ;;  %v251_v37 = vld [vmem:[%s3047_s1 + $0x678] sm:$0xff]  ;;  %v186_v38 = vld [vmem:[%s3047_s1 + $0x470] sm:$0xff]  ;;  %v185_v40 = vld [vmem:[%s3047_s1 + $0x468] sm:$0xff] }
  0x39   :  { %693 = vmatprep.subr.mxu1 %v149_v45  ;;  %623 = vmatpush2.msra.mxu0 %v84_v46  ;;  %v250_v39 = vld [vmem:[%s3047_s1 + $0x670] sm:$0xff]  ;;  %v249_v41 = vld [vmem:[%s3047_s1 + $0x668] sm:$0xff]  ;;  %v184_v42 = vld [vmem:[%s3047_s1 + $0x460] sm:$0xff] }
  0x3a   :  { %694 = vmatpush2.msra.mxu1 %v148_v47  ;;  %624 = vmatprep.subr.mxu0 %v83_v48  ;;  %v248_v43 = vld [vmem:[%s3047_s1 + $0x660] sm:$0xff]  ;;  %v183_v44 = vld [vmem:[%s3047_s1 + $0x458] sm:$0xff]  ;;  %v182_v46 = vld [vmem:[%s3047_s1 + $0x450] sm:$0xff] }
  0x3b   :  { %695 = vmatprep.subr.mxu1 %v147_v49  ;;  %625 = vmatpush2.msra.mxu0 %v82_v50  ;;  %v247_v45 = vld [vmem:[%s3047_s1 + $0x658] sm:$0xff]  ;;  %v246_v47 = vld [vmem:[%s3047_s1 + $0x650] sm:$0xff]  ;;  %v181_v48 = vld [vmem:[%s3047_s1 + $0x448] sm:$0xff] }
  0x3c   :  { %696 = vmatpush2.msra.mxu1 %v146_v51  ;;  %626 = vmatprep.subr.mxu0 %v81_v52  ;;  %v245_v49 = vld [vmem:[%s3047_s1 + $0x648] sm:$0xff]  ;;  %v180_v50 = vld [vmem:[%s3047_s1 + $0x440] sm:$0xff]  ;;  %v179_v52 = vld [vmem:[%s3047_s1 + $0x438] sm:$0xff] }
  0x3d   :  { %697 = vmatprep.subr.mxu1 %v145_v53  ;;  %627 = vmatpush2.msra.mxu0 %v80_v54  ;;  %v244_v51 = vld [vmem:[%s3047_s1 + $0x640] sm:$0xff]  ;;  %v243_v53 = vld [vmem:[%s3047_s1 + $0x638] sm:$0xff]  ;;  %v178_v54 = vld [vmem:[%s3047_s1 + $0x430] sm:$0xff] }
  0x3e   :  { %698 = vmatpush2.msra.mxu1 %v144_v55  ;;  %628 = vmatprep.subr.mxu0 %v79_v56  ;;  %v242_v55 = vld [vmem:[%s3047_s1 + $0x630] sm:$0xff]  ;;  %v177_v56 = vld [vmem:[%s3047_s1 + $0x428] sm:$0xff] }
  0x3f   :  { %699 = vmatprep.subr.mxu1 %v143_v57  ;;  %629 = vmatpush2.msra.mxu0 %v78_v58  ;;  %v241_v57 = vld [vmem:[%s3047_s1 + $0x628] sm:$0xff]  ;;  %v176_v58 = vld [vmem:[%s3047_s1 + $0x420] sm:$0xff] }
  0x40   :  { %700 = vmatpush2.msra.mxu1 %v142_v59  ;;  %630 = vmatprep.subr.mxu0 %v77_v60  ;;  %v240_v59 = vld [vmem:[%s3047_s1 + $0x620] sm:$0xff]  ;;  %v175_v60 = vld [vmem:[%s3047_s1 + $0x418] sm:$0xff] }
  0x41   :  { %701 = vmatprep.subr.mxu1 %v141_v61  ;;  %631 = vmatpush2.msra.mxu0 %v76_v62  ;;  %v239_v61 = vld [vmem:[%s3047_s1 + $0x618] sm:$0xff]  ;;  %v174_v62 = vld [vmem:[%s3047_s1 + $0x410] sm:$0xff] }
  0x42   :  { %632 = vmatprep.mubr.f32.mxu0 %v29_v63  ;;  %702 = vmatpush2.msra.mxu1 %v140_v0  ;;  %v238_v63 = vld [vmem:[%s3047_s1 + $0x610] sm:$0xff]  ;;  %v173_v0 = vld [vmem:[%s3047_s1 + $0x408] sm:$0xff] }
  0x43   :  { %633 = vmatmul.mubr.f32.vlgmr.msra.gmra.mxu0 %v28_v1  ;;  %703 = vmatprep.mubr.f32.mxu1 %v31_v2  ;;  %v237_v1 = vld [vmem:[%s3047_s1 + $0x608] sm:$0xff]  ;;  %v172_v2 = vld [vmem:[%s3047_s1 + $0x400] sm:$0xff] }
  0x44   :  { %710 = vmatprep.subr.mxu0 %v203_v3  ;;  %781 = vmatprep.subr.mxu1 %v267_v4  ;;  %v236_v3 = vld [vmem:[%s3047_s1 + $0x600] sm:$0xff]  ;;  %v235_v4 = vld [vmem:[%s3047_s1 + $0x5f8] sm:$0xff] }
  0x45   :  { %704 = vmatmul.mubr.f32.vlgmr.msra.gmra.mxu1 %v30_v5  ;;  %711 = vmatpush1.msra.mxu0 %v202_v6  ;;  %v299_v5 = vld [vmem:[%s3047_s1 + $0x7f8] sm:$0xff]  ;;  %v234_v6 = vld [vmem:[%s3047_s1 + $0x5f0] sm:$0xff] }
  0x46   :  { %782 = vmatpush1.msra.mxu1 %v266_v7  ;;  %712 = vmatprep.subr.mxu0 %v201_v8  ;;  %v298_v7 = vld [vmem:[%s3047_s1 + $0x7f0] sm:$0xff]  ;;  %v233_v8 = vld [vmem:[%s3047_s1 + $0x5e8] sm:$0xff] }
  0x47   :  { %783 = vmatprep.subr.mxu1 %v265_v9  ;;  %713 = vmatpush1.msra.mxu0 %v200_v10  ;;  %v297_v9 = vld [vmem:[%s3047_s1 + $0x7e8] sm:$0xff]  ;;  %v232_v10 = vld [vmem:[%s3047_s1 + $0x5e0] sm:$0xff] }
  0x48   :  { %784 = vmatpush1.msra.mxu1 %v264_v11  ;;  %714 = vmatprep.subr.mxu0 %v199_v12  ;;  %v296_v11 = vld [vmem:[%s3047_s1 + $0x7e0] sm:$0xff]  ;;  %v231_v12 = vld [vmem:[%s3047_s1 + $0x5d8] sm:$0xff] }
  0x49   :  { %785 = vmatprep.subr.mxu1 %v263_v13  ;;  %715 = vmatpush1.msra.mxu0 %v198_v14  ;;  %v295_v13 = vld [vmem:[%s3047_s1 + $0x7d8] sm:$0xff]  ;;  %v230_v14 = vld [vmem:[%s3047_s1 + $0x5d0] sm:$0xff] }
  0x4a   :  { %786 = vmatpush1.msra.mxu1 %v262_v15  ;;  %716 = vmatprep.subr.mxu0 %v197_v16  ;;  %v294_v15 = vld [vmem:[%s3047_s1 + $0x7d0] sm:$0xff]  ;;  %v229_v16 = vld [vmem:[%s3047_s1 + $0x5c8] sm:$0xff] }
  0x4b   :  { %787 = vmatprep.subr.mxu1 %v261_v17  ;;  %717 = vmatpush1.msra.mxu0 %v196_v18  ;;  %v293_v17 = vld [vmem:[%s3047_s1 + $0x7c8] sm:$0xff]  ;;  %v228_v18 = vld [vmem:[%s3047_s1 + $0x5c0] sm:$0xff] }
  0x4c   :  { %788 = vmatpush1.msra.mxu1 %v260_v19  ;;  %718 = vmatprep.subr.mxu0 %v195_v20  ;;  %v292_v19 = vld [vmem:[%s3047_s1 + $0x7c0] sm:$0xff]  ;;  %v227_v20 = vld [vmem:[%s3047_s1 + $0x5b8] sm:$0xff] }
  0x4d   :  { %789 = vmatprep.subr.mxu1 %v259_v21  ;;  %719 = vmatpush1.msra.mxu0 %v194_v22  ;;  %v291_v21 = vld [vmem:[%s3047_s1 + $0x7b8] sm:$0xff]  ;;  %v226_v22 = vld [vmem:[%s3047_s1 + $0x5b0] sm:$0xff] }
  0x4e   :  { %790 = vmatpush1.msra.mxu1 %v258_v23  ;;  %720 = vmatprep.subr.mxu0 %v193_v24  ;;  %v290_v23 = vld [vmem:[%s3047_s1 + $0x7b0] sm:$0xff]  ;;  %v225_v24 = vld [vmem:[%s3047_s1 + $0x5a8] sm:$0xff] }
  0x4f   :  { %791 = vmatprep.subr.mxu1 %v257_v25  ;;  %721 = vmatpush1.msra.mxu0 %v192_v26  ;;  %v289_v25 = vld [vmem:[%s3047_s1 + $0x7a8] sm:$0xff]  ;;  %v224_v26 = vld [vmem:[%s3047_s1 + $0x5a0] sm:$0xff] }
  0x50   :  { %792 = vmatpush1.msra.mxu1 %v256_v27  ;;  %722 = vmatprep.subr.mxu0 %v191_v28  ;;  %v288_v27 = vld [vmem:[%s3047_s1 + $0x7a0] sm:$0xff]  ;;  %v223_v28 = vld [vmem:[%s3047_s1 + $0x598] sm:$0xff] }
  0x51   :  { %793 = vmatprep.subr.mxu1 %v255_v29  ;;  %723 = vmatpush1.msra.mxu0 %v190_v30  ;;  %v287_v29 = vld [vmem:[%s3047_s1 + $0x798] sm:$0xff]  ;;  %v222_v30 = vld [vmem:[%s3047_s1 + $0x590] sm:$0xff] }
  0x52   :  { %794 = vmatpush1.msra.mxu1 %v254_v31  ;;  %724 = vmatprep.subr.mxu0 %v189_v32  ;;  %v286_v31 = vld [vmem:[%s3047_s1 + $0x790] sm:$0xff]  ;;  %v221_v32 = vld [vmem:[%s3047_s1 + $0x588] sm:$0xff] }
  0x53   :  { %795 = vmatprep.subr.mxu1 %v253_v33  ;;  %725 = vmatpush1.msra.mxu0 %v188_v34  ;;  %v285_v33 = vld [vmem:[%s3047_s1 + $0x788] sm:$0xff]  ;;  %v220_v34 = vld [vmem:[%s3047_s1 + $0x580] sm:$0xff] }
  0x54   :  { %796 = vmatpush1.msra.mxu1 %v252_v35  ;;  %726 = vmatprep.subr.mxu0 %v187_v36  ;;  %v284_v35 = vld [vmem:[%s3047_s1 + $0x780] sm:$0xff]  ;;  %v219_v36 = vld [vmem:[%s3047_s1 + $0x578] sm:$0xff] }
  0x55   :  { %797 = vmatprep.subr.mxu1 %v251_v37  ;;  %727 = vmatpush1.msra.mxu0 %v186_v38  ;;  %v283_v37 = vld [vmem:[%s3047_s1 + $0x778] sm:$0xff]  ;;  %v218_v38 = vld [vmem:[%s3047_s1 + $0x570] sm:$0xff] }
  0x56   :  { %798 = vmatpush1.msra.mxu1 %v250_v39  ;;  %728 = vmatprep.subr.mxu0 %v185_v40  ;;  %v282_v39 = vld [vmem:[%s3047_s1 + $0x770] sm:$0xff]  ;;  %v217_v40 = vld [vmem:[%s3047_s1 + $0x568] sm:$0xff] }
  0x57   :  { %799 = vmatprep.subr.mxu1 %v249_v41  ;;  %729 = vmatpush1.msra.mxu0 %v184_v42  ;;  %v281_v41 = vld [vmem:[%s3047_s1 + $0x768] sm:$0xff]  ;;  %v216_v42 = vld [vmem:[%s3047_s1 + $0x560] sm:$0xff] }
  0x58   :  { %800 = vmatpush1.msra.mxu1 %v248_v43  ;;  %730 = vmatprep.subr.mxu0 %v183_v44  ;;  %v280_v43 = vld [vmem:[%s3047_s1 + $0x760] sm:$0xff]  ;;  %v215_v44 = vld [vmem:[%s3047_s1 + $0x558] sm:$0xff] }
  0x59   :  { %801 = vmatprep.subr.mxu1 %v247_v45  ;;  %731 = vmatpush1.msra.mxu0 %v182_v46  ;;  %v279_v45 = vld [vmem:[%s3047_s1 + $0x758] sm:$0xff]  ;;  %v214_v46 = vld [vmem:[%s3047_s1 + $0x550] sm:$0xff] }
  0x5a   :  { %802 = vmatpush1.msra.mxu1 %v246_v47  ;;  %732 = vmatprep.subr.mxu0 %v181_v48  ;;  %v278_v47 = vld [vmem:[%s3047_s1 + $0x750] sm:$0xff]  ;;  %v213_v48 = vld [vmem:[%s3047_s1 + $0x548] sm:$0xff] }
  0x5b   :  { %803 = vmatprep.subr.mxu1 %v245_v49  ;;  %733 = vmatpush1.msra.mxu0 %v180_v50  ;;  %v277_v49 = vld [vmem:[%s3047_s1 + $0x748] sm:$0xff]  ;;  %v212_v50 = vld [vmem:[%s3047_s1 + $0x540] sm:$0xff] }
  0x5c   :  { %804 = vmatpush1.msra.mxu1 %v244_v51  ;;  %734 = vmatprep.subr.mxu0 %v179_v52  ;;  %v276_v51 = vld [vmem:[%s3047_s1 + $0x740] sm:$0xff]  ;;  %v211_v52 = vld [vmem:[%s3047_s1 + $0x538] sm:$0xff] }
  0x5d   :  { %805 = vmatprep.subr.mxu1 %v243_v53  ;;  %735 = vmatpush1.msra.mxu0 %v178_v54  ;;  %v275_v53 = vld [vmem:[%s3047_s1 + $0x738] sm:$0xff]  ;;  %v210_v54 = vld [vmem:[%s3047_s1 + $0x530] sm:$0xff] }
  0x5e   :  { %806 = vmatpush1.msra.mxu1 %v242_v55  ;;  %736 = vmatprep.subr.mxu0 %v177_v56  ;;  %v274_v55 = vld [vmem:[%s3047_s1 + $0x730] sm:$0xff]  ;;  %v209_v56 = vld [vmem:[%s3047_s1 + $0x528] sm:$0xff] }
  0x5f   :  { %807 = vmatprep.subr.mxu1 %v241_v57  ;;  %737 = vmatpush1.msra.mxu0 %v176_v58  ;;  %v273_v57 = vld [vmem:[%s3047_s1 + $0x728] sm:$0xff]  ;;  %v208_v58 = vld [vmem:[%s3047_s1 + $0x520] sm:$0xff] }
  0x60   :  { %808 = vmatpush1.msra.mxu1 %v240_v59  ;;  %738 = vmatprep.subr.mxu0 %v175_v60  ;;  %v272_v59 = vld [vmem:[%s3047_s1 + $0x720] sm:$0xff]  ;;  %v207_v60 = vld [vmem:[%s3047_s1 + $0x518] sm:$0xff] }
  0x61   :  { %809 = vmatprep.subr.mxu1 %v239_v61  ;;  %739 = vmatpush1.msra.mxu0 %v174_v62  ;;  %v271_v61 = vld [vmem:[%s3047_s1 + $0x718] sm:$0xff]  ;;  %v206_v62 = vld [vmem:[%s3047_s1 + $0x510] sm:$0xff] }
  0x62   :  { %810 = vmatpush1.msra.mxu1 %v238_v63  ;;  %740 = vmatprep.subr.mxu0 %v173_v0  ;;  %v270_v63 = vld [vmem:[%s3047_s1 + $0x710] sm:$0xff]  ;;  %v205_v0 = vld [vmem:[%s3047_s1 + $0x508] sm:$0xff] }
  0x63   :  { %811 = vmatprep.subr.mxu1 %v237_v1  ;;  %741 = vmatpush1.msra.mxu0 %v172_v2  ;;  %v269_v1 = vld [vmem:[%s3047_s1 + $0x708] sm:$0xff]  ;;  %v204_v2 = vld [vmem:[%s3047_s1 + $0x500] sm:$0xff] }
  0x64   :  { %812 = vmatpush1.msra.mxu1 %v236_v3  ;;  %742 = vmatprep.subr.mxu0 %v235_v4  ;;  %v33_v3 = vld [vmem:[%s3048_s0 + $0x28] sm:$0xff]  ;;  %v268_v4 = vld [vmem:[%s3047_s1 + $0x700] sm:$0xff] }
  0x65   :  { %813 = vmatprep.subr.mxu1 %v299_v5  ;;  %743 = vmatpush2.msra.mxu0 %v234_v6  ;;  %v32_v5 = vld [vmem:[%s3048_s0 + $0x20] sm:$0xff]  ;;  %v35_v6 = vld [vmem:[%s3048_s0 + $0x38] sm:$0xff] }
  0x66   :  { %814 = vmatpush2.msra.mxu1 %v298_v7  ;;  %744 = vmatprep.subr.mxu0 %v233_v8  ;;  %v331_v7 = vld [vmem:[%s3047_s1 + $0x8f8] sm:$0xff] }
  0x67   :  { %815 = vmatprep.subr.mxu1 %v297_v9  ;;  %745 = vmatpush2.msra.mxu0 %v232_v10  ;;  %v395_v8 = vld [vmem:[%s3047_s1 + $0xaf8] sm:$0xff]  ;;  %v34_v9 = vld [vmem:[%s3048_s0 + $0x30] sm:$0xff] }
  0x68   :  { %816 = vmatpush2.msra.mxu1 %v296_v11  ;;  %746 = vmatprep.subr.mxu0 %v231_v12  ;;  %v330_v10 = vld [vmem:[%s3047_s1 + $0x8f0] sm:$0xff]  ;;  %v329_v12 = vld [vmem:[%s3047_s1 + $0x8e8] sm:$0xff] }
  0x69   :  { %817 = vmatprep.subr.mxu1 %v295_v13  ;;  %747 = vmatpush2.msra.mxu0 %v230_v14  ;;  %v394_v11 = vld [vmem:[%s3047_s1 + $0xaf0] sm:$0xff]  ;;  %v393_v13 = vld [vmem:[%s3047_s1 + $0xae8] sm:$0xff]  ;;  %v328_v14 = vld [vmem:[%s3047_s1 + $0x8e0] sm:$0xff] }
  0x6a   :  { %818 = vmatpush2.msra.mxu1 %v294_v15  ;;  %748 = vmatprep.subr.mxu0 %v229_v16  ;;  %v392_v15 = vld [vmem:[%s3047_s1 + $0xae0] sm:$0xff]  ;;  %v327_v16 = vld [vmem:[%s3047_s1 + $0x8d8] sm:$0xff] }
  0x6b   :  { %819 = vmatprep.subr.mxu1 %v293_v17  ;;  %749 = vmatpush2.msra.mxu0 %v228_v18  ;;  %v391_v17 = vld [vmem:[%s3047_s1 + $0xad8] sm:$0xff]  ;;  %v326_v18 = vld [vmem:[%s3047_s1 + $0x8d0] sm:$0xff] }
  0x6c   :  { %820 = vmatpush2.msra.mxu1 %v292_v19  ;;  %750 = vmatprep.subr.mxu0 %v227_v20  ;;  %v390_v19 = vld [vmem:[%s3047_s1 + $0xad0] sm:$0xff]  ;;  %v325_v20 = vld [vmem:[%s3047_s1 + $0x8c8] sm:$0xff] }
  0x6d   :  { %821 = vmatprep.subr.mxu1 %v291_v21  ;;  %751 = vmatpush2.msra.mxu0 %v226_v22  ;;  %v389_v21 = vld [vmem:[%s3047_s1 + $0xac8] sm:$0xff]  ;;  %v324_v22 = vld [vmem:[%s3047_s1 + $0x8c0] sm:$0xff] }
  0x6e   :  { %822 = vmatpush2.msra.mxu1 %v290_v23  ;;  %752 = vmatprep.subr.mxu0 %v225_v24  ;;  %v388_v23 = vld [vmem:[%s3047_s1 + $0xac0] sm:$0xff]  ;;  %v323_v24 = vld [vmem:[%s3047_s1 + $0x8b8] sm:$0xff] }
  0x6f   :  { %823 = vmatprep.subr.mxu1 %v289_v25  ;;  %753 = vmatpush2.msra.mxu0 %v224_v26  ;;  %v387_v25 = vld [vmem:[%s3047_s1 + $0xab8] sm:$0xff]  ;;  %v322_v26 = vld [vmem:[%s3047_s1 + $0x8b0] sm:$0xff] }
  0x70   :  { %824 = vmatpush2.msra.mxu1 %v288_v27  ;;  %754 = vmatprep.subr.mxu0 %v223_v28  ;;  %v386_v27 = vld [vmem:[%s3047_s1 + $0xab0] sm:$0xff]  ;;  %v321_v28 = vld [vmem:[%s3047_s1 + $0x8a8] sm:$0xff] }
  0x71   :  { %825 = vmatprep.subr.mxu1 %v287_v29  ;;  %755 = vmatpush2.msra.mxu0 %v222_v30  ;;  %v385_v29 = vld [vmem:[%s3047_s1 + $0xaa8] sm:$0xff]  ;;  %v320_v30 = vld [vmem:[%s3047_s1 + $0x8a0] sm:$0xff] }
  0x72   :  { %826 = vmatpush2.msra.mxu1 %v286_v31  ;;  %756 = vmatprep.subr.mxu0 %v221_v32  ;;  %v384_v31 = vld [vmem:[%s3047_s1 + $0xaa0] sm:$0xff]  ;;  %v319_v32 = vld [vmem:[%s3047_s1 + $0x898] sm:$0xff] }
  0x73   :  { %827 = vmatprep.subr.mxu1 %v285_v33  ;;  %757 = vmatpush2.msra.mxu0 %v220_v34  ;;  %v383_v33 = vld [vmem:[%s3047_s1 + $0xa98] sm:$0xff]  ;;  %v318_v34 = vld [vmem:[%s3047_s1 + $0x890] sm:$0xff] }
  0x74   :  { %828 = vmatpush2.msra.mxu1 %v284_v35  ;;  %758 = vmatprep.subr.mxu0 %v219_v36  ;;  %v382_v35 = vld [vmem:[%s3047_s1 + $0xa90] sm:$0xff]  ;;  %v317_v36 = vld [vmem:[%s3047_s1 + $0x888] sm:$0xff] }
  0x75   :  { %829 = vmatprep.subr.mxu1 %v283_v37  ;;  %759 = vmatpush2.msra.mxu0 %v218_v38  ;;  %v381_v37 = vld [vmem:[%s3047_s1 + $0xa88] sm:$0xff]  ;;  %v316_v38 = vld [vmem:[%s3047_s1 + $0x880] sm:$0xff] }
  0x76   :  { %830 = vmatpush2.msra.mxu1 %v282_v39  ;;  %760 = vmatprep.subr.mxu0 %v217_v40  ;;  %v380_v39 = vld [vmem:[%s3047_s1 + $0xa80] sm:$0xff]  ;;  %v315_v40 = vld [vmem:[%s3047_s1 + $0x878] sm:$0xff] }
  0x77   :  { %831 = vmatprep.subr.mxu1 %v281_v41  ;;  %761 = vmatpush2.msra.mxu0 %v216_v42  ;;  %v379_v41 = vld [vmem:[%s3047_s1 + $0xa78] sm:$0xff]  ;;  %v314_v42 = vld [vmem:[%s3047_s1 + $0x870] sm:$0xff] }
  0x78   :  { %832 = vmatpush2.msra.mxu1 %v280_v43  ;;  %762 = vmatprep.subr.mxu0 %v215_v44  ;;  %v378_v43 = vld [vmem:[%s3047_s1 + $0xa70] sm:$0xff]  ;;  %v313_v44 = vld [vmem:[%s3047_s1 + $0x868] sm:$0xff] }
  0x79   :  { %833 = vmatprep.subr.mxu1 %v279_v45  ;;  %763 = vmatpush2.msra.mxu0 %v214_v46  ;;  %v377_v45 = vld [vmem:[%s3047_s1 + $0xa68] sm:$0xff]  ;;  %v312_v46 = vld [vmem:[%s3047_s1 + $0x860] sm:$0xff] }
  0x7a   :  { %834 = vmatpush2.msra.mxu1 %v278_v47  ;;  %764 = vmatprep.subr.mxu0 %v213_v48  ;;  %v376_v47 = vld [vmem:[%s3047_s1 + $0xa60] sm:$0xff]  ;;  %v311_v48 = vld [vmem:[%s3047_s1 + $0x858] sm:$0xff] }
  0x7b   :  { %835 = vmatprep.subr.mxu1 %v277_v49  ;;  %765 = vmatpush2.msra.mxu0 %v212_v50  ;;  %v375_v49 = vld [vmem:[%s3047_s1 + $0xa58] sm:$0xff]  ;;  %v310_v50 = vld [vmem:[%s3047_s1 + $0x850] sm:$0xff] }
  0x7c   :  { %836 = vmatpush2.msra.mxu1 %v276_v51  ;;  %766 = vmatprep.subr.mxu0 %v211_v52  ;;  %v374_v51 = vld [vmem:[%s3047_s1 + $0xa50] sm:$0xff]  ;;  %v309_v52 = vld [vmem:[%s3047_s1 + $0x848] sm:$0xff] }
  0x7d   :  { %837 = vmatprep.subr.mxu1 %v275_v53  ;;  %767 = vmatpush2.msra.mxu0 %v210_v54  ;;  %v373_v53 = vld [vmem:[%s3047_s1 + $0xa48] sm:$0xff]  ;;  %v308_v54 = vld [vmem:[%s3047_s1 + $0x840] sm:$0xff] }
  0x7e   :  { %838 = vmatpush2.msra.mxu1 %v274_v55  ;;  %768 = vmatprep.subr.mxu0 %v209_v56  ;;  %v372_v55 = vld [vmem:[%s3047_s1 + $0xa40] sm:$0xff]  ;;  %v307_v56 = vld [vmem:[%s3047_s1 + $0x838] sm:$0xff] }
  0x7f   :  { %839 = vmatprep.subr.mxu1 %v273_v57  ;;  %769 = vmatpush2.msra.mxu0 %v208_v58  ;;  %v371_v57 = vld [vmem:[%s3047_s1 + $0xa38] sm:$0xff]  ;;  %v306_v58 = vld [vmem:[%s3047_s1 + $0x830] sm:$0xff] }
  0x80   :  { %840 = vmatpush2.msra.mxu1 %v272_v59  ;;  %770 = vmatprep.subr.mxu0 %v207_v60  ;;  %v370_v59 = vld [vmem:[%s3047_s1 + $0xa30] sm:$0xff]  ;;  %v305_v60 = vld [vmem:[%s3047_s1 + $0x828] sm:$0xff] }
  0x81   :  { %841 = vmatprep.subr.mxu1 %v271_v61  ;;  %771 = vmatpush2.msra.mxu0 %v206_v62  ;;  %v369_v61 = vld [vmem:[%s3047_s1 + $0xa28] sm:$0xff]  ;;  %v304_v62 = vld [vmem:[%s3047_s1 + $0x820] sm:$0xff] }
  0x82   :  { %842 = vmatpush2.msra.mxu1 %v270_v63  ;;  %772 = vmatprep.subr.mxu0 %v205_v0  ;;  %v368_v63 = vld [vmem:[%s3047_s1 + $0xa20] sm:$0xff]  ;;  %v303_v0 = vld [vmem:[%s3047_s1 + $0x818] sm:$0xff] }
  0x83   :  { %843 = vmatprep.subr.mxu1 %v269_v1  ;;  %773 = vmatpush2.msra.mxu0 %v204_v2  ;;  %v367_v1 = vld [vmem:[%s3047_s1 + $0xa18] sm:$0xff]  ;;  %v302_v2 = vld [vmem:[%s3047_s1 + $0x810] sm:$0xff] }
  0x84   :  { %774 = vmatprep.mubr.f32.mxu0 %v33_v3  ;;  %844 = vmatpush2.msra.mxu1 %v268_v4  ;;  %v366_v3 = vld [vmem:[%s3047_s1 + $0xa10] sm:$0xff]  ;;  %v301_v4 = vld [vmem:[%s3047_s1 + $0x808] sm:$0xff] }
  0x85   :  { %775 = vmatmul.mubr.f32.vlgmr.msra.gmra.mxu0 %v32_v5  ;;  %845 = vmatprep.mubr.f32.mxu1 %v35_v6  ;;  %v365_v5 = vld [vmem:[%s3047_s1 + $0xa08] sm:$0xff]  ;;  %v300_v6 = vld [vmem:[%s3047_s1 + $0x800] sm:$0xff] }
  0x86   :  { %852 = vmatprep.subr.mxu0 %v331_v7  ;;  %923 = vmatprep.subr.mxu1 %v395_v8  ;;  %v364_v7 = vld [vmem:[%s3047_s1 + $0xa00] sm:$0xff]  ;;  %v363_v8 = vld [vmem:[%s3047_s1 + $0x9f8] sm:$0xff] }
  0x87   :  { %846 = vmatmul.mubr.f32.vlgmr.msra.gmra.mxu1 %v34_v9  ;;  %853 = vmatpush1.msra.mxu0 %v330_v10  ;;  %v427_v9 = vld [vmem:[%s3047_s1 + $0xbf8] sm:$0xff]  ;;  %v362_v10 = vld [vmem:[%s3047_s1 + $0x9f0] sm:$0xff] }
  0x88   :  { %924 = vmatpush1.msra.mxu1 %v394_v11  ;;  %854 = vmatprep.subr.mxu0 %v329_v12  ;;  %v426_v11 = vld [vmem:[%s3047_s1 + $0xbf0] sm:$0xff]  ;;  %v361_v12 = vld [vmem:[%s3047_s1 + $0x9e8] sm:$0xff] }
  0x89   :  { %925 = vmatprep.subr.mxu1 %v393_v13  ;;  %855 = vmatpush1.msra.mxu0 %v328_v14  ;;  %v425_v13 = vld [vmem:[%s3047_s1 + $0xbe8] sm:$0xff]  ;;  %v360_v14 = vld [vmem:[%s3047_s1 + $0x9e0] sm:$0xff] }
  0x8a   :  { %926 = vmatpush1.msra.mxu1 %v392_v15  ;;  %856 = vmatprep.subr.mxu0 %v327_v16  ;;  %v424_v15 = vld [vmem:[%s3047_s1 + $0xbe0] sm:$0xff]  ;;  %v359_v16 = vld [vmem:[%s3047_s1 + $0x9d8] sm:$0xff] }
  0x8b   :  { %927 = vmatprep.subr.mxu1 %v391_v17  ;;  %857 = vmatpush1.msra.mxu0 %v326_v18  ;;  %v423_v17 = vld [vmem:[%s3047_s1 + $0xbd8] sm:$0xff]  ;;  %v358_v18 = vld [vmem:[%s3047_s1 + $0x9d0] sm:$0xff] }
  0x8c   :  { %928 = vmatpush1.msra.mxu1 %v390_v19  ;;  %858 = vmatprep.subr.mxu0 %v325_v20  ;;  %v422_v19 = vld [vmem:[%s3047_s1 + $0xbd0] sm:$0xff]  ;;  %v357_v20 = vld [vmem:[%s3047_s1 + $0x9c8] sm:$0xff] }
  0x8d   :  { %929 = vmatprep.subr.mxu1 %v389_v21  ;;  %859 = vmatpush1.msra.mxu0 %v324_v22  ;;  %v421_v21 = vld [vmem:[%s3047_s1 + $0xbc8] sm:$0xff]  ;;  %v356_v22 = vld [vmem:[%s3047_s1 + $0x9c0] sm:$0xff] }
  0x8e   :  { %930 = vmatpush1.msra.mxu1 %v388_v23  ;;  %860 = vmatprep.subr.mxu0 %v323_v24  ;;  %v420_v23 = vld [vmem:[%s3047_s1 + $0xbc0] sm:$0xff]  ;;  %v355_v24 = vld [vmem:[%s3047_s1 + $0x9b8] sm:$0xff] }
  0x8f   :  { %931 = vmatprep.subr.mxu1 %v387_v25  ;;  %861 = vmatpush1.msra.mxu0 %v322_v26  ;;  %v419_v25 = vld [vmem:[%s3047_s1 + $0xbb8] sm:$0xff]  ;;  %v354_v26 = vld [vmem:[%s3047_s1 + $0x9b0] sm:$0xff] }
  0x90   :  { %932 = vmatpush1.msra.mxu1 %v386_v27  ;;  %862 = vmatprep.subr.mxu0 %v321_v28  ;;  %v418_v27 = vld [vmem:[%s3047_s1 + $0xbb0] sm:$0xff]  ;;  %v353_v28 = vld [vmem:[%s3047_s1 + $0x9a8] sm:$0xff] }
  0x91   :  { %933 = vmatprep.subr.mxu1 %v385_v29  ;;  %863 = vmatpush1.msra.mxu0 %v320_v30  ;;  %v417_v29 = vld [vmem:[%s3047_s1 + $0xba8] sm:$0xff]  ;;  %v352_v30 = vld [vmem:[%s3047_s1 + $0x9a0] sm:$0xff] }
  0x92   :  { %934 = vmatpush1.msra.mxu1 %v384_v31  ;;  %864 = vmatprep.subr.mxu0 %v319_v32  ;;  %v416_v31 = vld [vmem:[%s3047_s1 + $0xba0] sm:$0xff]  ;;  %v351_v32 = vld [vmem:[%s3047_s1 + $0x998] sm:$0xff] }
  0x93   :  { %935 = vmatprep.subr.mxu1 %v383_v33  ;;  %865 = vmatpush1.msra.mxu0 %v318_v34  ;;  %v415_v33 = vld [vmem:[%s3047_s1 + $0xb98] sm:$0xff]  ;;  %v350_v34 = vld [vmem:[%s3047_s1 + $0x990] sm:$0xff] }
  0x94   :  { %936 = vmatpush1.msra.mxu1 %v382_v35  ;;  %866 = vmatprep.subr.mxu0 %v317_v36  ;;  %v414_v35 = vld [vmem:[%s3047_s1 + $0xb90] sm:$0xff]  ;;  %v349_v36 = vld [vmem:[%s3047_s1 + $0x988] sm:$0xff] }
  0x95   :  { %937 = vmatprep.subr.mxu1 %v381_v37  ;;  %867 = vmatpush1.msra.mxu0 %v316_v38  ;;  %v413_v37 = vld [vmem:[%s3047_s1 + $0xb88] sm:$0xff]  ;;  %v348_v38 = vld [vmem:[%s3047_s1 + $0x980] sm:$0xff] }
  0x96   :  { %938 = vmatpush1.msra.mxu1 %v380_v39  ;;  %868 = vmatprep.subr.mxu0 %v315_v40  ;;  %v412_v39 = vld [vmem:[%s3047_s1 + $0xb80] sm:$0xff]  ;;  %v347_v40 = vld [vmem:[%s3047_s1 + $0x978] sm:$0xff] }
  0x97   :  { %939 = vmatprep.subr.mxu1 %v379_v41  ;;  %869 = vmatpush1.msra.mxu0 %v314_v42  ;;  %v411_v41 = vld [vmem:[%s3047_s1 + $0xb78] sm:$0xff]  ;;  %v346_v42 = vld [vmem:[%s3047_s1 + $0x970] sm:$0xff] }
  0x98   :  { %940 = vmatpush1.msra.mxu1 %v378_v43  ;;  %870 = vmatprep.subr.mxu0 %v313_v44  ;;  %v410_v43 = vld [vmem:[%s3047_s1 + $0xb70] sm:$0xff]  ;;  %v345_v44 = vld [vmem:[%s3047_s1 + $0x968] sm:$0xff] }
  0x99   :  { %941 = vmatprep.subr.mxu1 %v377_v45  ;;  %871 = vmatpush1.msra.mxu0 %v312_v46  ;;  %v409_v45 = vld [vmem:[%s3047_s1 + $0xb68] sm:$0xff]  ;;  %v344_v46 = vld [vmem:[%s3047_s1 + $0x960] sm:$0xff] }
  0x9a   :  { %942 = vmatpush1.msra.mxu1 %v376_v47  ;;  %872 = vmatprep.subr.mxu0 %v311_v48  ;;  %v408_v47 = vld [vmem:[%s3047_s1 + $0xb60] sm:$0xff]  ;;  %v343_v48 = vld [vmem:[%s3047_s1 + $0x958] sm:$0xff] }
  0x9b   :  { %943 = vmatprep.subr.mxu1 %v375_v49  ;;  %873 = vmatpush1.msra.mxu0 %v310_v50  ;;  %v407_v49 = vld [vmem:[%s3047_s1 + $0xb58] sm:$0xff]  ;;  %v342_v50 = vld [vmem:[%s3047_s1 + $0x950] sm:$0xff] }
  0x9c   :  { %944 = vmatpush1.msra.mxu1 %v374_v51  ;;  %874 = vmatprep.subr.mxu0 %v309_v52  ;;  %v406_v51 = vld [vmem:[%s3047_s1 + $0xb50] sm:$0xff]  ;;  %v341_v52 = vld [vmem:[%s3047_s1 + $0x948] sm:$0xff] }
  0x9d   :  { %945 = vmatprep.subr.mxu1 %v373_v53  ;;  %875 = vmatpush1.msra.mxu0 %v308_v54  ;;  %v405_v53 = vld [vmem:[%s3047_s1 + $0xb48] sm:$0xff]  ;;  %v340_v54 = vld [vmem:[%s3047_s1 + $0x940] sm:$0xff] }
  0x9e   :  { %946 = vmatpush1.msra.mxu1 %v372_v55  ;;  %876 = vmatprep.subr.mxu0 %v307_v56  ;;  %v404_v55 = vld [vmem:[%s3047_s1 + $0xb40] sm:$0xff]  ;;  %v339_v56 = vld [vmem:[%s3047_s1 + $0x938] sm:$0xff] }
  0x9f   :  { %947 = vmatprep.subr.mxu1 %v371_v57  ;;  %877 = vmatpush1.msra.mxu0 %v306_v58  ;;  %v403_v57 = vld [vmem:[%s3047_s1 + $0xb38] sm:$0xff]  ;;  %v338_v58 = vld [vmem:[%s3047_s1 + $0x930] sm:$0xff] }
  0xa0   :  { %948 = vmatpush1.msra.mxu1 %v370_v59  ;;  %878 = vmatprep.subr.mxu0 %v305_v60  ;;  %v402_v59 = vld [vmem:[%s3047_s1 + $0xb30] sm:$0xff]  ;;  %v337_v60 = vld [vmem:[%s3047_s1 + $0x928] sm:$0xff] }
  0xa1   :  { %949 = vmatprep.subr.mxu1 %v369_v61  ;;  %879 = vmatpush1.msra.mxu0 %v304_v62  ;;  %v401_v61 = vld [vmem:[%s3047_s1 + $0xb28] sm:$0xff]  ;;  %v336_v62 = vld [vmem:[%s3047_s1 + $0x920] sm:$0xff] }
  0xa2   :  { %950 = vmatpush1.msra.mxu1 %v368_v63  ;;  %880 = vmatprep.subr.mxu0 %v303_v0  ;;  %v400_v63 = vld [vmem:[%s3047_s1 + $0xb20] sm:$0xff]  ;;  %v335_v0 = vld [vmem:[%s3047_s1 + $0x918] sm:$0xff] }
  0xa3   :  { %951 = vmatprep.subr.mxu1 %v367_v1  ;;  %881 = vmatpush1.msra.mxu0 %v302_v2  ;;  %v399_v1 = vld [vmem:[%s3047_s1 + $0xb18] sm:$0xff]  ;;  %v334_v2 = vld [vmem:[%s3047_s1 + $0x910] sm:$0xff] }
  0xa4   :  { %952 = vmatpush1.msra.mxu1 %v366_v3  ;;  %882 = vmatprep.subr.mxu0 %v301_v4  ;;  %v398_v3 = vld [vmem:[%s3047_s1 + $0xb10] sm:$0xff]  ;;  %v333_v4 = vld [vmem:[%s3047_s1 + $0x908] sm:$0xff] }
  0xa5   :  { %953 = vmatprep.subr.mxu1 %v365_v5  ;;  %883 = vmatpush1.msra.mxu0 %v300_v6  ;;  %v397_v5 = vld [vmem:[%s3047_s1 + $0xb08] sm:$0xff]  ;;  %v332_v6 = vld [vmem:[%s3047_s1 + $0x900] sm:$0xff] }
  0xa6   :  { %954 = vmatpush1.msra.mxu1 %v364_v7  ;;  %884 = vmatprep.subr.mxu0 %v363_v8  ;;  %v37_v7 = vld [vmem:[%s3048_s0 + $0x48] sm:$0xff]  ;;  %v396_v8 = vld [vmem:[%s3047_s1 + $0xb00] sm:$0xff] }
  0xa7   :  { %955 = vmatprep.subr.mxu1 %v427_v9  ;;  %885 = vmatpush2.msra.mxu0 %v362_v10  ;;  %v36_v9 = vld [vmem:[%s3048_s0 + $0x40] sm:$0xff]  ;;  %v39_v10 = vld [vmem:[%s3048_s0 + $0x58] sm:$0xff] }
  0xa8   :  { %956 = vmatpush2.msra.mxu1 %v426_v11  ;;  %886 = vmatprep.subr.mxu0 %v361_v12  ;;  %v459_v11 = vld [vmem:[%s3047_s1 + $0xcf8] sm:$0xff] }
  0xa9   :  { %957 = vmatprep.subr.mxu1 %v425_v13  ;;  %887 = vmatpush2.msra.mxu0 %v360_v14  ;;  %v523_v12 = vld [vmem:[%s3047_s1 + $0xef8] sm:$0xff]  ;;  %v38_v13 = vld [vmem:[%s3048_s0 + $0x50] sm:$0xff] }
  0xaa   :  { %958 = vmatpush2.msra.mxu1 %v424_v15  ;;  %888 = vmatprep.subr.mxu0 %v359_v16  ;;  %v458_v14 = vld [vmem:[%s3047_s1 + $0xcf0] sm:$0xff]  ;;  %v457_v16 = vld [vmem:[%s3047_s1 + $0xce8] sm:$0xff] }
  0xab   :  { %959 = vmatprep.subr.mxu1 %v423_v17  ;;  %889 = vmatpush2.msra.mxu0 %v358_v18  ;;  %v522_v15 = vld [vmem:[%s3047_s1 + $0xef0] sm:$0xff]  ;;  %v521_v17 = vld [vmem:[%s3047_s1 + $0xee8] sm:$0xff]  ;;  %v456_v18 = vld [vmem:[%s3047_s1 + $0xce0] sm:$0xff] }
  0xac   :  { %960 = vmatpush2.msra.mxu1 %v422_v19  ;;  %890 = vmatprep.subr.mxu0 %v357_v20  ;;  %v520_v19 = vld [vmem:[%s3047_s1 + $0xee0] sm:$0xff]  ;;  %v455_v20 = vld [vmem:[%s3047_s1 + $0xcd8] sm:$0xff] }
  0xad   :  { %961 = vmatprep.subr.mxu1 %v421_v21  ;;  %891 = vmatpush2.msra.mxu0 %v356_v22  ;;  %v519_v21 = vld [vmem:[%s3047_s1 + $0xed8] sm:$0xff]  ;;  %v454_v22 = vld [vmem:[%s3047_s1 + $0xcd0] sm:$0xff] }
  0xae   :  { %962 = vmatpush2.msra.mxu1 %v420_v23  ;;  %892 = vmatprep.subr.mxu0 %v355_v24  ;;  %v518_v23 = vld [vmem:[%s3047_s1 + $0xed0] sm:$0xff]  ;;  %v453_v24 = vld [vmem:[%s3047_s1 + $0xcc8] sm:$0xff] }
  0xaf   :  { %963 = vmatprep.subr.mxu1 %v419_v25  ;;  %893 = vmatpush2.msra.mxu0 %v354_v26  ;;  %v517_v25 = vld [vmem:[%s3047_s1 + $0xec8] sm:$0xff]  ;;  %v452_v26 = vld [vmem:[%s3047_s1 + $0xcc0] sm:$0xff] }
  0xb0   :  { %964 = vmatpush2.msra.mxu1 %v418_v27  ;;  %894 = vmatprep.subr.mxu0 %v353_v28  ;;  %v516_v27 = vld [vmem:[%s3047_s1 + $0xec0] sm:$0xff]  ;;  %v451_v28 = vld [vmem:[%s3047_s1 + $0xcb8] sm:$0xff] }
  0xb1   :  { %965 = vmatprep.subr.mxu1 %v417_v29  ;;  %895 = vmatpush2.msra.mxu0 %v352_v30  ;;  %v515_v29 = vld [vmem:[%s3047_s1 + $0xeb8] sm:$0xff]  ;;  %v450_v30 = vld [vmem:[%s3047_s1 + $0xcb0] sm:$0xff] }
  0xb2   :  { %966 = vmatpush2.msra.mxu1 %v416_v31  ;;  %896 = vmatprep.subr.mxu0 %v351_v32  ;;  %v514_v31 = vld [vmem:[%s3047_s1 + $0xeb0] sm:$0xff]  ;;  %v449_v32 = vld [vmem:[%s3047_s1 + $0xca8] sm:$0xff] }
  0xb3   :  { %967 = vmatprep.subr.mxu1 %v415_v33  ;;  %897 = vmatpush2.msra.mxu0 %v350_v34  ;;  %v513_v33 = vld [vmem:[%s3047_s1 + $0xea8] sm:$0xff]  ;;  %v448_v34 = vld [vmem:[%s3047_s1 + $0xca0] sm:$0xff] }
  0xb4   :  { %968 = vmatpush2.msra.mxu1 %v414_v35  ;;  %898 = vmatprep.subr.mxu0 %v349_v36  ;;  %v512_v35 = vld [vmem:[%s3047_s1 + $0xea0] sm:$0xff]  ;;  %v447_v36 = vld [vmem:[%s3047_s1 + $0xc98] sm:$0xff] }
  0xb5   :  { %969 = vmatprep.subr.mxu1 %v413_v37  ;;  %899 = vmatpush2.msra.mxu0 %v348_v38  ;;  %v511_v37 = vld [vmem:[%s3047_s1 + $0xe98] sm:$0xff]  ;;  %v446_v38 = vld [vmem:[%s3047_s1 + $0xc90] sm:$0xff] }
  0xb6   :  { %970 = vmatpush2.msra.mxu1 %v412_v39  ;;  %900 = vmatprep.subr.mxu0 %v347_v40  ;;  %v510_v39 = vld [vmem:[%s3047_s1 + $0xe90] sm:$0xff]  ;;  %v445_v40 = vld [vmem:[%s3047_s1 + $0xc88] sm:$0xff] }
  0xb7   :  { %971 = vmatprep.subr.mxu1 %v411_v41  ;;  %901 = vmatpush2.msra.mxu0 %v346_v42  ;;  %v509_v41 = vld [vmem:[%s3047_s1 + $0xe88] sm:$0xff]  ;;  %v444_v42 = vld [vmem:[%s3047_s1 + $0xc80] sm:$0xff] }
  0xb8   :  { %972 = vmatpush2.msra.mxu1 %v410_v43  ;;  %902 = vmatprep.subr.mxu0 %v345_v44  ;;  %v508_v43 = vld [vmem:[%s3047_s1 + $0xe80] sm:$0xff]  ;;  %v443_v44 = vld [vmem:[%s3047_s1 + $0xc78] sm:$0xff] }
  0xb9   :  { %973 = vmatprep.subr.mxu1 %v409_v45  ;;  %903 = vmatpush2.msra.mxu0 %v344_v46  ;;  %v507_v45 = vld [vmem:[%s3047_s1 + $0xe78] sm:$0xff]  ;;  %v442_v46 = vld [vmem:[%s3047_s1 + $0xc70] sm:$0xff] }
  0xba   :  { %974 = vmatpush2.msra.mxu1 %v408_v47  ;;  %904 = vmatprep.subr.mxu0 %v343_v48  ;;  %v506_v47 = vld [vmem:[%s3047_s1 + $0xe70] sm:$0xff]  ;;  %v441_v48 = vld [vmem:[%s3047_s1 + $0xc68] sm:$0xff] }
  0xbb   :  { %975 = vmatprep.subr.mxu1 %v407_v49  ;;  %905 = vmatpush2.msra.mxu0 %v342_v50  ;;  %v505_v49 = vld [vmem:[%s3047_s1 + $0xe68] sm:$0xff]  ;;  %v440_v50 = vld [vmem:[%s3047_s1 + $0xc60] sm:$0xff] }
  0xbc   :  { %976 = vmatpush2.msra.mxu1 %v406_v51  ;;  %906 = vmatprep.subr.mxu0 %v341_v52  ;;  %v504_v51 = vld [vmem:[%s3047_s1 + $0xe60] sm:$0xff]  ;;  %v439_v52 = vld [vmem:[%s3047_s1 + $0xc58] sm:$0xff] }
  0xbd   :  { %977 = vmatprep.subr.mxu1 %v405_v53  ;;  %907 = vmatpush2.msra.mxu0 %v340_v54  ;;  %v503_v53 = vld [vmem:[%s3047_s1 + $0xe58] sm:$0xff]  ;;  %v438_v54 = vld [vmem:[%s3047_s1 + $0xc50] sm:$0xff] }
  0xbe   :  { %978 = vmatpush2.msra.mxu1 %v404_v55  ;;  %908 = vmatprep.subr.mxu0 %v339_v56  ;;  %v502_v55 = vld [vmem:[%s3047_s1 + $0xe50] sm:$0xff]  ;;  %v437_v56 = vld [vmem:[%s3047_s1 + $0xc48] sm:$0xff] }
  0xbf   :  { %979 = vmatprep.subr.mxu1 %v403_v57  ;;  %909 = vmatpush2.msra.mxu0 %v338_v58  ;;  %v501_v57 = vld [vmem:[%s3047_s1 + $0xe48] sm:$0xff]  ;;  %v436_v58 = vld [vmem:[%s3047_s1 + $0xc40] sm:$0xff] }
  0xc0   :  { %980 = vmatpush2.msra.mxu1 %v402_v59  ;;  %910 = vmatprep.subr.mxu0 %v337_v60  ;;  %v500_v59 = vld [vmem:[%s3047_s1 + $0xe40] sm:$0xff]  ;;  %v435_v60 = vld [vmem:[%s3047_s1 + $0xc38] sm:$0xff] }
  0xc1   :  { %981 = vmatprep.subr.mxu1 %v401_v61  ;;  %911 = vmatpush2.msra.mxu0 %v336_v62  ;;  %v499_v61 = vld [vmem:[%s3047_s1 + $0xe38] sm:$0xff]  ;;  %v434_v62 = vld [vmem:[%s3047_s1 + $0xc30] sm:$0xff] }
  0xc2   :  { %982 = vmatpush2.msra.mxu1 %v400_v63  ;;  %912 = vmatprep.subr.mxu0 %v335_v0  ;;  %v498_v63 = vld [vmem:[%s3047_s1 + $0xe30] sm:$0xff]  ;;  %v433_v0 = vld [vmem:[%s3047_s1 + $0xc28] sm:$0xff] }
  0xc3   :  { %983 = vmatprep.subr.mxu1 %v399_v1  ;;  %913 = vmatpush2.msra.mxu0 %v334_v2  ;;  %v497_v1 = vld [vmem:[%s3047_s1 + $0xe28] sm:$0xff]  ;;  %v432_v2 = vld [vmem:[%s3047_s1 + $0xc20] sm:$0xff] }
  0xc4   :  { %984 = vmatpush2.msra.mxu1 %v398_v3  ;;  %914 = vmatprep.subr.mxu0 %v333_v4  ;;  %v496_v3 = vld [vmem:[%s3047_s1 + $0xe20] sm:$0xff]  ;;  %v431_v4 = vld [vmem:[%s3047_s1 + $0xc18] sm:$0xff] }
  0xc5   :  { %985 = vmatprep.subr.mxu1 %v397_v5  ;;  %915 = vmatpush2.msra.mxu0 %v332_v6  ;;  %v495_v5 = vld [vmem:[%s3047_s1 + $0xe18] sm:$0xff]  ;;  %v430_v6 = vld [vmem:[%s3047_s1 + $0xc10] sm:$0xff] }
  0xc6   :  { %916 = vmatprep.mubr.f32.mxu0 %v37_v7  ;;  %986 = vmatpush2.msra.mxu1 %v396_v8  ;;  %v494_v7 = vld [vmem:[%s3047_s1 + $0xe10] sm:$0xff]  ;;  %v429_v8 = vld [vmem:[%s3047_s1 + $0xc08] sm:$0xff] }
  0xc7   :  { %917 = vmatmul.mubr.f32.vlgmr.msra.gmra.mxu0 %v36_v9  ;;  %987 = vmatprep.mubr.f32.mxu1 %v39_v10  ;;  %v493_v9 = vld [vmem:[%s3047_s1 + $0xe08] sm:$0xff]  ;;  %v428_v10 = vld [vmem:[%s3047_s1 + $0xc00] sm:$0xff] }
  0xc8   :  { %994 = vmatprep.subr.mxu0 %v459_v11  ;;  %1065 = vmatprep.subr.mxu1 %v523_v12  ;;  %v492_v11 = vld [vmem:[%s3047_s1 + $0xe00] sm:$0xff]  ;;  %v491_v12 = vld [vmem:[%s3047_s1 + $0xdf8] sm:$0xff] }
  0xc9   :  { %988 = vmatmul.mubr.f32.vlgmr.msra.gmra.mxu1 %v38_v13  ;;  %995 = vmatpush1.msra.mxu0 %v458_v14  ;;  %v555_v13 = vld [vmem:[%s3047_s1 + $0xff8] sm:$0xff]  ;;  %v490_v14 = vld [vmem:[%s3047_s1 + $0xdf0] sm:$0xff] }
  0xca   :  { %1066 = vmatpush1.msra.mxu1 %v522_v15  ;;  %996 = vmatprep.subr.mxu0 %v457_v16  ;;  %v554_v15 = vld [vmem:[%s3047_s1 + $0xff0] sm:$0xff]  ;;  %v489_v16 = vld [vmem:[%s3047_s1 + $0xde8] sm:$0xff] }
  0xcb   :  { %1067 = vmatprep.subr.mxu1 %v521_v17  ;;  %997 = vmatpush1.msra.mxu0 %v456_v18  ;;  %v553_v17 = vld [vmem:[%s3047_s1 + $0xfe8] sm:$0xff]  ;;  %v488_v18 = vld [vmem:[%s3047_s1 + $0xde0] sm:$0xff] }
  0xcc   :  { %1068 = vmatpush1.msra.mxu1 %v520_v19  ;;  %998 = vmatprep.subr.mxu0 %v455_v20  ;;  %v552_v19 = vld [vmem:[%s3047_s1 + $0xfe0] sm:$0xff]  ;;  %v487_v20 = vld [vmem:[%s3047_s1 + $0xdd8] sm:$0xff] }
  0xcd   :  { %1069 = vmatprep.subr.mxu1 %v519_v21  ;;  %999 = vmatpush1.msra.mxu0 %v454_v22  ;;  %v551_v21 = vld [vmem:[%s3047_s1 + $0xfd8] sm:$0xff]  ;;  %v486_v22 = vld [vmem:[%s3047_s1 + $0xdd0] sm:$0xff] }
  0xce   :  { %1070 = vmatpush1.msra.mxu1 %v518_v23  ;;  %1000 = vmatprep.subr.mxu0 %v453_v24  ;;  %v550_v23 = vld [vmem:[%s3047_s1 + $0xfd0] sm:$0xff]  ;;  %v485_v24 = vld [vmem:[%s3047_s1 + $0xdc8] sm:$0xff] }
  0xcf   :  { %1071 = vmatprep.subr.mxu1 %v517_v25  ;;  %1001 = vmatpush1.msra.mxu0 %v452_v26  ;;  %v549_v25 = vld [vmem:[%s3047_s1 + $0xfc8] sm:$0xff]  ;;  %v484_v26 = vld [vmem:[%s3047_s1 + $0xdc0] sm:$0xff] }
  0xd0   :  { %1072 = vmatpush1.msra.mxu1 %v516_v27  ;;  %1002 = vmatprep.subr.mxu0 %v451_v28  ;;  %v548_v27 = vld [vmem:[%s3047_s1 + $0xfc0] sm:$0xff]  ;;  %v483_v28 = vld [vmem:[%s3047_s1 + $0xdb8] sm:$0xff] }
  0xd1   :  { %1073 = vmatprep.subr.mxu1 %v515_v29  ;;  %1003 = vmatpush1.msra.mxu0 %v450_v30  ;;  %v547_v29 = vld [vmem:[%s3047_s1 + $0xfb8] sm:$0xff]  ;;  %v482_v30 = vld [vmem:[%s3047_s1 + $0xdb0] sm:$0xff] }
  0xd2   :  { %1074 = vmatpush1.msra.mxu1 %v514_v31  ;;  %1004 = vmatprep.subr.mxu0 %v449_v32  ;;  %v546_v31 = vld [vmem:[%s3047_s1 + $0xfb0] sm:$0xff]  ;;  %v481_v32 = vld [vmem:[%s3047_s1 + $0xda8] sm:$0xff] }
  0xd3   :  { %1075 = vmatprep.subr.mxu1 %v513_v33  ;;  %1005 = vmatpush1.msra.mxu0 %v448_v34  ;;  %v545_v33 = vld [vmem:[%s3047_s1 + $0xfa8] sm:$0xff]  ;;  %v480_v34 = vld [vmem:[%s3047_s1 + $0xda0] sm:$0xff] }
  0xd4   :  { %1076 = vmatpush1.msra.mxu1 %v512_v35  ;;  %1006 = vmatprep.subr.mxu0 %v447_v36  ;;  %v544_v35 = vld [vmem:[%s3047_s1 + $0xfa0] sm:$0xff]  ;;  %v479_v36 = vld [vmem:[%s3047_s1 + $0xd98] sm:$0xff] }
  0xd5   :  { %1077 = vmatprep.subr.mxu1 %v511_v37  ;;  %1007 = vmatpush1.msra.mxu0 %v446_v38  ;;  %v543_v37 = vld [vmem:[%s3047_s1 + $0xf98] sm:$0xff]  ;;  %v478_v38 = vld [vmem:[%s3047_s1 + $0xd90] sm:$0xff] }
  0xd6   :  { %1078 = vmatpush1.msra.mxu1 %v510_v39  ;;  %1008 = vmatprep.subr.mxu0 %v445_v40  ;;  %v542_v39 = vld [vmem:[%s3047_s1 + $0xf90] sm:$0xff]  ;;  %v477_v40 = vld [vmem:[%s3047_s1 + $0xd88] sm:$0xff] }
  0xd7   :  { %1079 = vmatprep.subr.mxu1 %v509_v41  ;;  %1009 = vmatpush1.msra.mxu0 %v444_v42  ;;  %v541_v41 = vld [vmem:[%s3047_s1 + $0xf88] sm:$0xff]  ;;  %v476_v42 = vld [vmem:[%s3047_s1 + $0xd80] sm:$0xff] }
  0xd8   :  { %1080 = vmatpush1.msra.mxu1 %v508_v43  ;;  %1010 = vmatprep.subr.mxu0 %v443_v44  ;;  %v540_v43 = vld [vmem:[%s3047_s1 + $0xf80] sm:$0xff]  ;;  %v475_v44 = vld [vmem:[%s3047_s1 + $0xd78] sm:$0xff] }
  0xd9   :  { %1081 = vmatprep.subr.mxu1 %v507_v45  ;;  %1011 = vmatpush1.msra.mxu0 %v442_v46  ;;  %v539_v45 = vld [vmem:[%s3047_s1 + $0xf78] sm:$0xff]  ;;  %v474_v46 = vld [vmem:[%s3047_s1 + $0xd70] sm:$0xff] }
  0xda   :  { %1082 = vmatpush1.msra.mxu1 %v506_v47  ;;  %1012 = vmatprep.subr.mxu0 %v441_v48  ;;  %v538_v47 = vld [vmem:[%s3047_s1 + $0xf70] sm:$0xff]  ;;  %v473_v48 = vld [vmem:[%s3047_s1 + $0xd68] sm:$0xff] }
  0xdb   :  { %1083 = vmatprep.subr.mxu1 %v505_v49  ;;  %1013 = vmatpush1.msra.mxu0 %v440_v50  ;;  %v537_v49 = vld [vmem:[%s3047_s1 + $0xf68] sm:$0xff]  ;;  %v472_v50 = vld [vmem:[%s3047_s1 + $0xd60] sm:$0xff] }
  0xdc   :  { %1084 = vmatpush1.msra.mxu1 %v504_v51  ;;  %1014 = vmatprep.subr.mxu0 %v439_v52  ;;  %v536_v51 = vld [vmem:[%s3047_s1 + $0xf60] sm:$0xff]  ;;  %v471_v52 = vld [vmem:[%s3047_s1 + $0xd58] sm:$0xff] }
  0xdd   :  { %1085 = vmatprep.subr.mxu1 %v503_v53  ;;  %1015 = vmatpush1.msra.mxu0 %v438_v54  ;;  %v535_v53 = vld [vmem:[%s3047_s1 + $0xf58] sm:$0xff]  ;;  %v470_v54 = vld [vmem:[%s3047_s1 + $0xd50] sm:$0xff] }
  0xde   :  { %1086 = vmatpush1.msra.mxu1 %v502_v55  ;;  %1016 = vmatprep.subr.mxu0 %v437_v56  ;;  %v534_v55 = vld [vmem:[%s3047_s1 + $0xf50] sm:$0xff]  ;;  %v469_v56 = vld [vmem:[%s3047_s1 + $0xd48] sm:$0xff] }
  0xdf   :  { %1087 = vmatprep.subr.mxu1 %v501_v57  ;;  %1017 = vmatpush1.msra.mxu0 %v436_v58  ;;  %v533_v57 = vld [vmem:[%s3047_s1 + $0xf48] sm:$0xff]  ;;  %v468_v58 = vld [vmem:[%s3047_s1 + $0xd40] sm:$0xff] }
  0xe0   :  { %1088 = vmatpush1.msra.mxu1 %v500_v59  ;;  %1018 = vmatprep.subr.mxu0 %v435_v60  ;;  %v532_v59 = vld [vmem:[%s3047_s1 + $0xf40] sm:$0xff]  ;;  %v467_v60 = vld [vmem:[%s3047_s1 + $0xd38] sm:$0xff] }
  0xe1   :  { %1089 = vmatprep.subr.mxu1 %v499_v61  ;;  %1019 = vmatpush1.msra.mxu0 %v434_v62  ;;  %v531_v61 = vld [vmem:[%s3047_s1 + $0xf38] sm:$0xff]  ;;  %v466_v62 = vld [vmem:[%s3047_s1 + $0xd30] sm:$0xff] }
  0xe2   :  { %1090 = vmatpush1.msra.mxu1 %v498_v63  ;;  %1020 = vmatprep.subr.mxu0 %v433_v0  ;;  %v530_v63 = vld [vmem:[%s3047_s1 + $0xf30] sm:$0xff]  ;;  %v465_v0 = vld [vmem:[%s3047_s1 + $0xd28] sm:$0xff] }
  0xe3   :  { %1091 = vmatprep.subr.mxu1 %v497_v1  ;;  %1021 = vmatpush1.msra.mxu0 %v432_v2  ;;  %v529_v1 = vld [vmem:[%s3047_s1 + $0xf28] sm:$0xff]  ;;  %v464_v2 = vld [vmem:[%s3047_s1 + $0xd20] sm:$0xff] }
  0xe4   :  { %1092 = vmatpush1.msra.mxu1 %v496_v3  ;;  %1022 = vmatprep.subr.mxu0 %v431_v4  ;;  %v528_v3 = vld [vmem:[%s3047_s1 + $0xf20] sm:$0xff]  ;;  %v463_v4 = vld [vmem:[%s3047_s1 + $0xd18] sm:$0xff] }
  0xe5   :  { %1093 = vmatprep.subr.mxu1 %v495_v5  ;;  %1023 = vmatpush1.msra.mxu0 %v430_v6  ;;  %v527_v5 = vld [vmem:[%s3047_s1 + $0xf18] sm:$0xff]  ;;  %v462_v6 = vld [vmem:[%s3047_s1 + $0xd10] sm:$0xff] }
  0xe6   :  { %1094 = vmatpush1.msra.mxu1 %v494_v7  ;;  %1024 = vmatprep.subr.mxu0 %v429_v8  ;;  %v526_v7 = vld [vmem:[%s3047_s1 + $0xf10] sm:$0xff]  ;;  %v461_v8 = vld [vmem:[%s3047_s1 + $0xd08] sm:$0xff] }
  0xe7   :  { %1095 = vmatprep.subr.mxu1 %v493_v9  ;;  %1025 = vmatpush1.msra.mxu0 %v428_v10  ;;  %v525_v9 = vld [vmem:[%s3047_s1 + $0xf08] sm:$0xff]  ;;  %v460_v10 = vld [vmem:[%s3047_s1 + $0xd00] sm:$0xff] }
  0xe8   :  { %1096 = vmatpush1.msra.mxu1 %v492_v11  ;;  %1026 = vmatprep.subr.mxu0 %v491_v12  ;;  %v41_v11 = vld [vmem:[%s3048_s0 + $0x68] sm:$0xff]  ;;  %v524_v12 = vld [vmem:[%s3047_s1 + $0xf00] sm:$0xff] }
  0xe9   :  { %1097 = vmatprep.subr.mxu1 %v555_v13  ;;  %1027 = vmatpush2.msra.mxu0 %v490_v14  ;;  %v43_v13 = vld [vmem:[%s3048_s0 + $0x78] sm:$0xff]  ;;  %v40_v14 = vld [vmem:[%s3048_s0 + $0x60] sm:$0xff] }
  0xea   :  { %1098 = vmatpush2.msra.mxu1 %v554_v15  ;;  %1028 = vmatprep.subr.mxu0 %v489_v16  ;;  %v42_v15 = vld [vmem:[%s3048_s0 + $0x70] sm:$0xff]  ;;  %v1169_v16 = vld [vmem:[%s3049_s3 + $0xf8] sm:$0xff] }
  0xeb   :  { %1099 = vmatprep.subr.mxu1 %v553_v17  ;;  %1029 = vmatpush2.msra.mxu0 %v488_v18  ;;  %v1153_v17 = vld [vmem:[%s3049_s3 + $0x78] sm:$0xff]  ;;  %v1168_v18 = vld [vmem:[%s3049_s3 + $0xf0] sm:$0xff] }
  0xec   :  { %1100 = vmatpush2.msra.mxu1 %v552_v19  ;;  %1030 = vmatprep.subr.mxu0 %v487_v20  ;;  %v1152_v19 = vld [vmem:[%s3049_s3 + $0x70] sm:$0xff]  ;;  %v1167_v20 = vld [vmem:[%s3049_s3 + $0xe8] sm:$0xff] }
  0xed   :  { %1101 = vmatprep.subr.mxu1 %v551_v21  ;;  %1031 = vmatpush2.msra.mxu0 %v486_v22  ;;  %v1151_v21 = vld [vmem:[%s3049_s3 + $0x68] sm:$0xff]  ;;  %v1166_v22 = vld [vmem:[%s3049_s3 + $0xe0] sm:$0xff] }
  0xee   :  { %1102 = vmatpush2.msra.mxu1 %v550_v23  ;;  %1032 = vmatprep.subr.mxu0 %v485_v24  ;;  %v1150_v23 = vld [vmem:[%s3049_s3 + $0x60] sm:$0xff]  ;;  %v1165_v24 = vld [vmem:[%s3049_s3 + $0xd8] sm:$0xff] }
  0xef   :  { %1103 = vmatprep.subr.mxu1 %v549_v25  ;;  %1033 = vmatpush2.msra.mxu0 %v484_v26  ;;  %v1149_v25 = vld [vmem:[%s3049_s3 + $0x58] sm:$0xff]  ;;  %v1164_v26 = vld [vmem:[%s3049_s3 + $0xd0] sm:$0xff] }
  0xf0   :  { %1104 = vmatpush2.msra.mxu1 %v548_v27  ;;  %1034 = vmatprep.subr.mxu0 %v483_v28  ;;  %v1148_v27 = vld [vmem:[%s3049_s3 + $0x50] sm:$0xff]  ;;  %v1163_v28 = vld [vmem:[%s3049_s3 + $0xc8] sm:$0xff] }
  0xf1   :  { %1105 = vmatprep.subr.mxu1 %v547_v29  ;;  %1035 = vmatpush2.msra.mxu0 %v482_v30  ;;  %v1147_v29 = vld [vmem:[%s3049_s3 + $0x48] sm:$0xff]  ;;  %v1162_v30 = vld [vmem:[%s3049_s3 + $0xc0] sm:$0xff] }
  0xf2   :  { %1106 = vmatpush2.msra.mxu1 %v546_v31  ;;  %1036 = vmatprep.subr.mxu0 %v481_v32  ;;  %v1146_v31 = vld [vmem:[%s3049_s3 + $0x40] sm:$0xff]  ;;  %v1161_v32 = vld [vmem:[%s3049_s3 + $0xb8] sm:$0xff] }
  0xf3   :  { %1107 = vmatprep.subr.mxu1 %v545_v33  ;;  %1037 = vmatpush2.msra.mxu0 %v480_v34  ;;  %v1145_v33 = vld [vmem:[%s3049_s3 + $0x38] sm:$0xff]  ;;  %v1160_v34 = vld [vmem:[%s3049_s3 + $0xb0] sm:$0xff] }
  0xf4   :  { %1108 = vmatpush2.msra.mxu1 %v544_v35  ;;  %1038 = vmatprep.subr.mxu0 %v479_v36  ;;  %v1144_v35 = vld [vmem:[%s3049_s3 + $0x30] sm:$0xff]  ;;  %v1159_v36 = vld [vmem:[%s3049_s3 + $0xa8] sm:$0xff] }
  0xf5   :  { %1109 = vmatprep.subr.mxu1 %v543_v37  ;;  %1039 = vmatpush2.msra.mxu0 %v478_v38  ;;  %v1143_v37 = vld [vmem:[%s3049_s3 + $0x28] sm:$0xff]  ;;  %v1158_v38 = vld [vmem:[%s3049_s3 + $0xa0] sm:$0xff] }
  0xf6   :  { %1110 = vmatpush2.msra.mxu1 %v542_v39  ;;  %1040 = vmatprep.subr.mxu0 %v477_v40  ;;  %v1142_v39 = vld [vmem:[%s3049_s3 + $0x20] sm:$0xff]  ;;  %v1157_v40 = vld [vmem:[%s3049_s3 + $0x98] sm:$0xff] }
  0xf7   :  { %1111 = vmatprep.subr.mxu1 %v541_v41  ;;  %1041 = vmatpush2.msra.mxu0 %v476_v42  ;;  %v1141_v41 = vld [vmem:[%s3049_s3 + $0x18] sm:$0xff]  ;;  %v1156_v42 = vld [vmem:[%s3049_s3 + $0x90] sm:$0xff] }
  0xf8   :  { %1112 = vmatpush2.msra.mxu1 %v540_v43  ;;  %1042 = vmatprep.subr.mxu0 %v475_v44  ;;  %v1140_v43 = vld [vmem:[%s3049_s3 + $0x10] sm:$0xff]  ;;  %v1155_v44 = vld [vmem:[%s3049_s3 + $0x88] sm:$0xff] }
  0xf9   :  { %1113 = vmatprep.subr.mxu1 %v539_v45  ;;  %1043 = vmatpush2.msra.mxu0 %v474_v46  ;;  %v1139_v45 = vld [vmem:[%s3049_s3 + $0x8] sm:$0xff]  ;;  %v1154_v46 = vld [vmem:[%s3049_s3 + $0x80] sm:$0xff] }
  0xfa   :  { %1114 = vmatpush2.msra.mxu1 %v538_v47  ;;  %1044 = vmatprep.subr.mxu0 %v473_v48  ;;  %v1138_v47 = vld [vmem:[%s3049_s3] sm:$0xff]  ;;  %v558_v48 = vlaneseq }
  0xfb   :  { %1115 = vmatprep.subr.mxu1 %v537_v49  ;;  %1045 = vmatpush2.msra.mxu0 %v472_v50 }
  0xfc   :  { %1116 = vmatpush2.msra.mxu1 %v536_v51  ;;  %1046 = vmatprep.subr.mxu0 %v471_v52  ;;  %v559_v49 = vshrl.u32 %v558_v48, 7  ;;  %v556_v51 = vld [vmem:[%s3050_s2] sm:$0x3] }
  0xfd   :  { %1117 = vmatprep.subr.mxu1 %v535_v53  ;;  %1047 = vmatpush2.msra.mxu0 %v470_v54 }
  0xfe   :  { %1118 = vmatpush2.msra.mxu1 %v534_v55  ;;  %1048 = vmatprep.subr.mxu0 %v469_v56  ;;  %v560_v50 = vsub.s32 0, %v559_v49  ;;  %v564_v52 = vsub.s32 1, %v559_v49 }
  0xff   :  { %1119 = vmatprep.subr.mxu1 %v533_v57  ;;  %1049 = vmatpush2.msra.mxu0 %v468_v58 }
 0x100   :  { %1120 = vmatpush2.msra.mxu1 %v532_v59  ;;  %1050 = vmatprep.subr.mxu0 %v467_v60  ;;  %v561_v54 = vrot.slane %v556_v51, %v560_v50  ;;  %v565_v55 = vrot.slane %v556_v51, %v564_v52 }
 0x101   :  { %1121 = vmatprep.subr.mxu1 %v531_v61  ;;  %1051 = vmatpush2.msra.mxu0 %v466_v62 }
 0x102   :  { %1122 = vmatpush2.msra.mxu1 %v530_v63  ;;  %1052 = vmatprep.subr.mxu0 %v465_v0 }
 0x103   :  { %1123 = vmatprep.subr.mxu1 %v529_v1  ;;  %1053 = vmatpush2.msra.mxu0 %v464_v2  ;;  %v634_v53 = vpop.f32.mrf.mxu0 }
 0x104   :  { %1124 = vmatpush2.msra.mxu1 %v528_v3  ;;  %1054 = vmatprep.subr.mxu0 %v463_v4  ;;  %v635_v58 = vadd.f32 %v634_v53, %v561_v54 }
 0x105   :  { %1125 = vmatprep.subr.mxu1 %v527_v5  ;;  %1055 = vmatpush2.msra.mxu0 %v462_v6  ;;  %v705_v56 = vpop.f32.mrf.mxu1  ;;  %v636_v57 = vpop.f32.mrf.mxu0 }
 0x106   :  { %1126 = vmatpush2.msra.mxu1 %v526_v7  ;;  %1056 = vmatprep.subr.mxu0 %v461_v8  ;;  %v637_v60 = vadd.f32 %v636_v57, %v565_v55  ;;  %v706_v62 = vadd.f32 %v705_v56, %v635_v58 }
 0x107   :  { %1127 = vmatprep.subr.mxu1 %v525_v9  ;;  %1057 = vmatpush2.msra.mxu0 %v460_v10  ;;  %v707_v61 = vpop.f32.mrf.mxu1 }
 0x108   :  { %1058 = vmatprep.mubr.f32.mxu0 %v41_v11  ;;  %1128 = vmatpush2.msra.mxu1 %v524_v12  ;;  %v708_v1 = vadd.f32 %v707_v61, %v637_v60 }
 0x109   :  { %1129 = vmatprep.mubr.f32.mxu1 %v43_v13  ;;  %1059 = vmatmul.mubr.f32.vlgmr.msra.gmra.mxu0 %v40_v14 }
 0x10a   :  { %1130 = vmatmul.mubr.f32.vlgmr.msra.gmra.mxu1 %v42_v15  ;;  %1277 = vmatprep.subr.mxu0 %v1169_v16 }
 0x10b   :  { %1278 = vmatpush3.msra.mxu0 %v1153_v17 }
 0x10c   :  { %1279 = vmatprep.subr.mxu0 %v1168_v18 }
 0x10d   :  { %1280 = vmatpush3.msra.mxu0 %v1152_v19 }
 0x10e   :  { %1281 = vmatprep.subr.mxu0 %v1167_v20 }
 0x10f   :  { %1282 = vmatpush3.msra.mxu0 %v1151_v21 }
 0x110   :  { %1283 = vmatprep.subr.mxu0 %v1166_v22 }
 0x111   :  { %1284 = vmatpush3.msra.mxu0 %v1150_v23 }
 0x112   :  { %1285 = vmatprep.subr.mxu0 %v1165_v24 }
 0x113   :  { %1286 = vmatpush3.msra.mxu0 %v1149_v25  ;;  %v12_v25 = vstv %s3051_s6 }
 0x114   :  { %1287 = vmatprep.subr.mxu0 %v1164_v26  ;;  %13 = vst [vmem:[#allocation2] sm:$0x1] %v12_v25 }
 0x115   :  { %1288 = vmatpush3.msra.mxu0 %v1148_v27  ;;  %v1274_v27 = vld [vmem:[%s3052_s4] ss:$0 sm:$0xff] }
 0x116   :  { %1289 = vmatprep.subr.mxu0 %v1163_v28 }
 0x117   :  { %1290 = vmatpush3.msra.mxu0 %v1147_v29 }
 0x118   :  { %1291 = vmatprep.subr.mxu0 %v1162_v30 }
 0x119   :  { %1292 = vmatpush3.msra.mxu0 %v1146_v31  ;;  %v1275_v31 = vld [vmem:[%s3053_s5] ss:$0 sm:$0xff] }
 0x11a   :  { %1293 = vmatprep.subr.mxu0 %v1161_v32 }
 0x11b   :  { %1294 = vmatpush3.msra.mxu0 %v1145_v33 }
 0x11c   :  { %1295 = vmatprep.subr.mxu0 %v1160_v34 }
 0x11d   :  { %1296 = vmatpush3.msra.mxu0 %v1144_v35  ;;  %v1276_v35 = vld [vmem:[#allocation2] ss:$0 sm:$0xff] }
 0x11e   :  { %1297 = vmatprep.subr.mxu0 %v1159_v36 }
 0x11f   :  { %1298 = vmatpush3.msra.mxu0 %v1143_v37 }
 0x120   :  { %1299 = vmatprep.subr.mxu0 %v1158_v38 }
 0x121   :  { %1300 = vmatpush3.msra.mxu0 %v1142_v39 }
 0x122   :  { %1301 = vmatprep.subr.mxu0 %v1157_v40 }
 0x123   :  { %1302 = vmatpush3.msra.mxu0 %v1141_v41 }
 0x124   :  { %1303 = vmatprep.subr.mxu0 %v1156_v42 }
 0x125   :  { %1304 = vmatpush3.msra.mxu0 %v1140_v43 }
 0x126   :  { %1305 = vmatprep.subr.mxu0 %v1155_v44 }
 0x127   :  { %1306 = vmatpush3.msra.mxu0 %v1139_v45 }
 0x128   :  { %1307 = vmatprep.subr.mxu0 %v1154_v46 }
 0x129   :  { %1308 = vmatpush3.msra.mxu0 %v1138_v47 }
 0x145   :  { %v776_v59 = vpop.f32.mrf.mxu0 }
 0x146   :  { %v777_v2 = vadd.f32 %v776_v59, %v706_v62 }
 0x147   :  { %v847_v63 = vpop.f32.mrf.mxu1  ;;  %v778_v0 = vpop.f32.mrf.mxu0 }
 0x148   :  { %v779_v4 = vadd.f32 %v778_v0, %v708_v1  ;;  %v848_v6 = vadd.f32 %v847_v63, %v777_v2 }
 0x149   :  { %v849_v5 = vpop.f32.mrf.mxu1 }
 0x14a   :  { %v850_v9 = vadd.f32 %v849_v5, %v779_v4 }
 0x187   :  { %v918_v3 = vpop.f32.mrf.mxu0 }
 0x188   :  { %v919_v10 = vadd.f32 %v918_v3, %v848_v6 }
 0x189   :  { %v989_v7 = vpop.f32.mrf.mxu1  ;;  %v920_v8 = vpop.f32.mrf.mxu0 }
 0x18a   :  { %v921_v11 = vadd.f32 %v920_v8, %v850_v9  ;;  %v990_v13 = vadd.f32 %v989_v7, %v919_v10 }
 0x18b   :  { %v991_v12 = vpop.f32.mrf.mxu1 }
 0x18c   :  { %v992_v16 = vadd.f32 %v991_v12, %v921_v11 }
 0x1c9   :  { %v1060_v14 = vpop.f32.mrf.mxu0 }
 0x1ca   :  { %v1131_v15 = vpop.f32.mrf.mxu1  ;;  %v1061_v17 = vadd.f32 %v1060_v14, %v990_v13 }
 0x1cb   :  { %v1062_v18 = vpop.f32.mrf.mxu0 }
 0x1cc   :  { %v1063_v19 = vadd.f32 %v1062_v18, %v992_v16  ;;  %v1132_v20 = vadd.f32 %v1131_v15, %v1061_v17  ;;  %v1133_v21 = vpop.f32.mrf.mxu1 }
 0x1ce   :  { %v1134_v22 = vadd.f32 %v1133_v21, %v1063_v19  ;;  %v1136_v24 = vmax.f32 %v1132_v20, 0.0 }
 0x1d0   :  { %v1137_v23 = vmax.f32 %v1134_v22, 0.0 }
 0x1d2   :  { %1241 = vmatprep.mubr.f32.mxu0 %v1137_v23 }
 0x1d3   :  { %1242 = vmatmul.mubr.f32.vlgmr.msra.gmra.mxu0 %v1136_v24 }
 0x293   :  { %v1309_v26 = vpop.f32.mrf.mxu0 }
 0x295   :  { %v1310_v28 = vpop.f32.mrf.mxu0 }
 0x296   :  { %v1311_v29 = vadd.f32 %v1310_v28, %v1309_v26 }
 0x298   :  { %v1244_v30 = vadd.f32 %v1311_v29, %v1274_v27 }
 0x29a   :  { %v1247_v32 = vmax.f32 %v1244_v30, 0.0 }
 0x29c   :  { %v1255_v33 = vmul.f32 %v1275_v31, %v1247_v32 }
 0x29e   :  { %v1257_v34 = vsel %vm1256_vm0, %v1255_v33, 0.0 }
 0x29f   :  { %1258 = vadd.xlane.f32.xlu0 %v1257_v34 }
 0x328   :  { %v1259_v36 = vpop.xlane.xlu0 %1258 }
 0x329   :  { %v1267_v37 = vadd.f32 %v1276_v35, %v1259_v36 }
 0x32b   :  { %1269 = vst.msk [vmem:[%s3054_s7] sm:$0xff] %vm1268_vm1, %v1267_v37 }

// kernel: solo_classifier_forward.2
= control target key start
LH: loop header
LB: loop body
LE: loop exit
PB: predicated region body
PF: predicated region fallthrough
CT: control target
= control target key end

     0   :  { %s6705_s0 = inlined_call_operand.vmem [shape: f32[8,30464], index: 0, kind: input, shape index: {}]   ;;  %s6706_s1 = inlined_call_operand.hbm [shape: bf16[30464,2048], index: 1, kind: input, shape index: {}]   ;;  %s6707_s2 = inlined_call_operand.hbm [shape: f32[1,2048], index: 2, kind: input, shape index: {}]   ;;  %s6708_s3 = inlined_call_operand.vmem [shape: f32[8,2048], index: 3, kind: output, shape index: {}]  }
   0x1   :  { %6710 = sst [smem:[#allocation10_spill]] %s6705_s0 }
   0x2   :  { %6711 = sst [smem:[#allocation11_spill]] %s6706_s1 }
   0x3   :  { %8 = vsyncpa [#allocation4], 0 }
   0x4   :  { %10 = vsyncpa [#allocation4 + $0x1], 0 }
   0x5   :  { %11 = vsyncpa [#allocation6], 0 }
   0x6   :  { %13 = vsyncpa [#allocation6 + $0x1], 0  ;;  %s5513_s12 = smov 0   ;;  %s5515_s13 = smov 0  }
   0x7   :  { %s5517_s14 = smov 0   ;;  %s5519_s15 = smov 0  }
   0x8   :  { %s5521_s16 = smov 0   ;;  %s5523_s17 = smov 0  }
   0x9   :  { %s5525_s18 = smov 0   ;;  %s5527_s19 = smov 0  }
   0xa   :  { %s5529_s20 = smov 0   ;;  %s5531_s21 = smov 0  }
   0xb   :  { %s5533_s22 = smov 0  }
   0xc LB: > { %6712 = sst [smem:[#allocation9_spill]] %s5469_s18  ;;  %s28_s23 = sadd.s32 1, %s5477_s20  ;;  %s5485_s22 = sphi %s5533_s22, %s19_s22   ;;  %s5481_s21 = sphi %s5531_s21, %s6736_s21   ;;  %s5477_s20 = sphi %s5529_s20, %s6735_s20   ;;  %s5473_s19 = sphi %s5527_s19, %s6734_s19   ;;  %s5469_s18 = sphi %s5525_s18, %s6733_s18   ;;  %s5465_s17 = sphi %s5523_s17, %s6732_s17   ;;  %s5461_s16 = sphi %s5521_s16, %s6731_s16   ;;  %s5457_s15 = sphi %s5519_s15, %s6730_s15   ;;  %s5453_s14 = sphi %s5517_s14, %s6729_s14   ;;  %s5449_s13 = sphi %s5515_s13, %s6728_s13   ;;  %s5445_s12 = sphi %s5513_s12, %s6727_s12  }
   0xd   : > { %p5570_p0 = scmp.ge.s32.totalorder %s28_s23, 17  ;;  %p68_p1 = scmp.ne.s32.totalorder %s5465_s17, %s5461_s16 }
   0xe   : > { %p69_p2 = scmp.eq.s32.totalorder %s5485_s22, 0  ;;  %p5200_p4 = scmp.lt.s32.totalorder %s5485_s22, 34 }
   0xf   : > { %s6738_s23 = smov (%p5570_p0, %s28_s23), 0  ;;  %s153_s27 = sand.u32 1, %s5465_s17  }
  0x10   : > { %p70_p3 = por %p69_p2, %p68_p1  ;;  %s5187_s28 = smul.u32 7168, %s153_s27 }
  0x11   : > { %s5170_s29 = sshll.u32 %s5481_s21, 3  ;;  %s5185_s30 = smul.u32 3584, %s5477_s20 }
  0x12   : > { %p5591_p5 = pnand %p5200_p4, %p70_p3  ;;  %s157_s6 = scalar_lea.vmem [#allocation3], %s5187_s28 }
  0x13   : > { %s164_s5 = sadd.s32 %s5185_s30, %s5170_s29  ;;  %s167_s7 = sshll.u32 %s157_s6, 4  ;;  %s168_s7 = int_to_ptr.vmem [resolvable:$true] %s167_s7 }
  0x14   : > { %s5172_s8 = sshll.u32 %s164_s5, 6  ;;  %s6715_s1 = sld [smem:[#allocation11_spill]] }
  0x15   : > { %p5176_p6 = scmp.ge.s32.totalorder %s5485_s22, 1  ;;  %s154_s24 = scalar_lea.sflag [#allocation4], %s153_s27 }
  0x16   : > { %p5337_p7 = pneg %p5591_p5  ;;  %s5348_s26 = scalar_lea.vmem %s168_s7, 114688 }
  0x17   : > { %p5349_p8 = scmp.ne.s32.totalorder %s168_s7, %s5348_s26  ;;  %s5487_s0 = smov [#allocation3]  }
  0x18   : > { %s5353_s18 = sshll.u32 %s5487_s0, 4  ;;  %s5354_s18 = int_to_ptr.vmem [resolvable:$false] %s5353_s18 }
  0x19   : > { %p5351_p9 = pnand %p5349_p8, %p5337_p7  ;;  %s5355_s29 = scalar_lea.vmem %s5354_s18, 229376 }
  0x1a   : > { %s166_s11 = scalar_lea.hbm %s6715_s1, %s5172_s8  ;;  %p5356_p11 = scmp.lt.s32.totalorder %s168_s7, %s5354_s18 }
  0x1b   : > { %p5352_p10 = pneg %p5351_p9  ;;  %p5357_p12 = scmp.lt.s32.totalorder %s5355_s29, %s5348_s26 }
  0x1d   : > { %p5358_p13 = por %p5357_p12, %p5356_p11 }
  0x1f   : > { %p5359_p1 = pnand %p5358_p13, %p5352_p10 }
  0x21   : > { %5362 = shalt.err (!%p5359_p1)
}
  0x22   : > { %s5488_s28 = smov 1024   ;;  %s5489_s0 = smov 512  }
  0x23   : > { %s5490_s18 = smov 32   ;;  %p194_p3 = scmp.lt.s32.totalorder %s5485_s22, 35 }
  0x24   : > { %5196 = dma.hbm_to_vmem [thread:$0]  (!%p5591_p5), %s166_s11, 114688, %s168_s7, %s154_s24, %s5488_s28, %s5489_s0, %s5490_s18  }
  0x25   : > { %p5606_p7 = pnand %p5176_p6, %p194_p3  ;;  %s5166_s27 = sadd.s32 4294967295, %s5485_s22  }
  0x26   : > { %s31_s30 = sadd.s32 1, %s5481_s21  ;;  %p74_p8 = scmp.ne.s32.totalorder %s5461_s16, %s5457_s15 }
  0x27   : > { %s6740_s30 = smov (!%p5570_p0, %s31_s30), %s5481_s21  ;;  %p5617_p9 = scmp.eq.s32.totalorder %s5166_s27, 0 }
  0x28   : > { %p33_p5 = scmp.ge.s32.totalorder %s6740_s30, 2  ;;  %s87_s24 = sadd.s32 1, %s5453_s14 }
  0x29   : > { %p5624_p6 = por %p5617_p9, %p74_p8  ;;  %p94_p10 = scmp.ne.s32.totalorder %s5453_s14, %s5449_s13 }
  0x2a   : > { %s6742_s30 = smov (%p33_p5, %s6740_s30), 0  ;;  %p100_p11 = scmp.ne.s32.totalorder %s5449_s13, %s5445_s12 }
  0x2b   : > { %p5634_p0 = por %p94_p10, %p69_p2  ;;  %s57_s25 = ssub.s32 %s5481_s21, %s6742_s30 }
  0x2c   : > { %s177_s6 = sand.u32 1, %s5453_s14   ;;  %s6720_s7 = ssub.s32 %s5477_s20, %s6738_s23 }
  0x2d   : > { %s58_s8 = sor.u32 %s57_s25, %s6720_s7  ;;  %p85_p12 = scmp.eq.s32.totalorder %s57_s25, 0 }
  0x2e   : > { %p59_p13 = scmp.eq.s32.totalorder %s58_s8, 0  ;;  %p5648_p1 = por %p100_p11, %p5617_p9 }
  0x2f   : > { %s5653_s10 = scalar_select %p85_p12, %s5453_s14, %s87_s24  }
  0x30   : > { %s6722_s11 = sadd.s32 1, %s5465_s17  ;;  %s5173_s28 = sshll.u32 %s177_s6, 3 }
  0x31   : > { %s5658_s29 = scalar_select %p59_p13, %s5465_s17, %s6722_s11  }
  0x32   : > { %s5186_s0 = sshll.u32 %s5481_s21, 7  ;;  %s181_s1 = scalar_lea.vmem [#allocation5], %s5173_s28 }
  0x33   : > { %s187_s27 = scalar_lea.hbm %s6707_s2, %s5186_s0  ;;  %s189_s7 = sshll.u32 %s181_s1, 4  ;;  %s190_s7 = int_to_ptr.vmem [resolvable:$true] %s189_s7 }
  0x34   : > { %p5668_p2 = pnand %p5200_p4, %p5634_p0  ;;  %s178_s24 = scalar_lea.sflag [#allocation6], %s177_s6 }
  0x35   : > { %s5376_s25 = scalar_lea.vmem %s190_s7, 128  ;;  %s5491_s8 = smov [#allocation5]  }
  0x36   : > { %p5365_p3 = pneg %p5668_p2  ;;  %p5377_p8 = scmp.ne.s32.totalorder %s190_s7, %s5376_s25 }
  0x37   : > { %s5381_s11 = sshll.u32 %s5491_s8, 4  ;;  %s5382_s11 = int_to_ptr.vmem [resolvable:$false] %s5381_s11 }
  0x38   : > { %p5379_p9 = pnand %p5377_p8, %p5365_p3  ;;  %s5383_s28 = scalar_lea.vmem %s5382_s11, 256 }
  0x39   : > { %p5384_p10 = scmp.lt.s32.totalorder %s190_s7, %s5382_s11  ;;  %p5385_p11 = scmp.lt.s32.totalorder %s5383_s28, %s5376_s25 }
  0x3a   : > { %p5380_p5 = pneg %p5379_p9 }
  0x3b   : > { %p5386_p12 = por %p5385_p11, %p5384_p10 }
  0x3d   : > { %p5387_p13 = pnand %p5386_p12, %p5380_p5 }
  0x3f   : > { %5390 = shalt.err (!%p5387_p13)
}
  0x40   : > { %5199 = dma.hbm_to_vmem [thread:$0]  (!%p5668_p2), %s187_s27, 128, %s190_s7, %s178_s24  }
  0x41   : > { %198 = sbr.rel (%p5606_p7) target bundleno = 1237 (0x4d5), region = 32  ;;  %s200_s1 = sand.u32 (!%p5606_p7), 1, %s5461_s16  }
  0x42   : > { %s5188_s15 = smul.u32 (!%p5606_p7), 7168, %s200_s1  ;;  %s201_s6 = scalar_lea.sflag (!%p5606_p7), [#allocation4], %s200_s1 }
  0x44   : > { %s5679_s0 = scalar_lea.vmem (!%p5606_p7), [#allocation3], %s5188_s15 }
  0x46   : > { %5436 = dma.done.wait (%p5624_p6), %s201_s6, 114688  }
  0x47   : > { %5438 = vsyncadd (%p5624_p6), %s201_s6, 4294852608  ;;  %s209_s18 = sand.u32 1, %s5449_s13  }
  0x48   : > { %s5686_s12 = sshll.u32 %s209_s18, 3  ;;  %s210_s26 = scalar_lea.sflag [#allocation6], %s209_s18 }
  0x49   : > { %s213_s27 = scalar_lea.vmem [#allocation5], %s5686_s12 }
  0x4a   : > { %5440 = dma.done.wait (%p5648_p1), %s210_s26, 128  }
  0x4b   : > { %5442 = vsyncadd (%p5648_p1), %s210_s26, 4294967168  ;;  %s5178_s7 = sshll.u32 %s5473_s19, 3  ;;  %s6724_s8 = sld [smem:[#allocation9_spill]] }
  0x4c   : > { %p245_p4 = scmp.lt.s32.totalorder %s5178_s7, 15 }
  0x4e   : > { %s6744_s7 = smov (!%p245_p4, %s5178_s7), 15 }
  0x4f   : > { %s5179_s4 = sshll.u32 %s6744_s7, 3 }
  0x50   : > { %s5697_s25 = scalar_lea.vmem %s6708_s3, %s5179_s4 }
  0x51   : > { %p5180_p7 = scmp.ne.s32.totalorder %s6724_s8, 0 }
  0x53   : > { %253 = sbr.rel (%p5180_p7) target bundleno = 93 (0x5d), region = 44 }
  0x58   : > { %v5492_v0 = vmov 0.0  }
  0x59   : > { %254 = vst [vmem:[#allocation2 + $0x30] sm:$0xff] %v5492_v0  ;;  %255 = vst [vmem:[#allocation2] sm:$0xff] %v5492_v0 }
  0x5a   : > { %256 = vst [vmem:[#allocation2 + $0x18] sm:$0xff] %v5492_v0  ;;  %257 = vst [vmem:[#allocation2 + $0x10] sm:$0xff] %v5492_v0 }
  0x5b   : > { %258 = vst [vmem:[#allocation2 + $0x8] sm:$0xff] %v5492_v0  ;;  %259 = vst [vmem:[#allocation2 + $0x20] sm:$0xff] %v5492_v0 }
  0x5c   : > { %260 = vst [vmem:[#allocation2 + $0x28] sm:$0xff] %v5492_v0  ;;  %261 = vst [vmem:[#allocation2 + $0x38] sm:$0xff] %v5492_v0 }
  0x5d PF: > { %v349_v1 = vld [vmem:[%s5679_s0 + $0x1e0] sm:$0xff]  ;;  %s6725_s19 = sld [smem:[#allocation9_spill]] }
  0x5e   : > { %v477_v2 = vld [vmem:[%s5679_s0 + $0x5e0] sm:$0xff]  ;;  %v1306_v4 = vunpack.c.h.bf16 %v349_v1  ;;  %v1305_v6 = vunpack.c.l.bf16 %v349_v1  ;;  %s6726_s6 = sld [smem:[#allocation10_spill]] }
  0x5f   : > { %v345_v3 = vld [vmem:[%s5679_s0 + $0x1c0] sm:$0xff]  ;;  %v1562_v5 = vunpack.c.h.bf16 %v477_v2  ;;  %v1561_v7 = vunpack.c.l.bf16 %v477_v2 }
  0x60   : > { %v473_v8 = vld [vmem:[%s5679_s0 + $0x5c0] sm:$0xff]  ;;  %v1298_v11 = vunpack.c.h.bf16 %v345_v3  ;;  %v1297_v13 = vunpack.c.l.bf16 %v345_v3  ;;  %2977 = vmatprep.subr.mxu0 %v1306_v4 }
  0x61   : > { %v341_v9 = vld [vmem:[%s5679_s0 + $0x1a0] sm:$0xff]  ;;  %v1554_v12 = vunpack.c.h.bf16 %v473_v8  ;;  %v1553_v14 = vunpack.c.l.bf16 %v473_v8  ;;  %3048 = vmatprep.subr.mxu1 %v1562_v5  ;;  %2978 = vmatpush1.msra.mxu0 %v1305_v6 }
  0x62   : > { %v469_v10 = vld [vmem:[%s5679_s0 + $0x5a0] sm:$0xff]  ;;  %v1290_v17 = vunpack.c.h.bf16 %v341_v9  ;;  %3049 = vmatpush1.msra.mxu1 %v1561_v7  ;;  %v1289_v19 = vunpack.c.l.bf16 %v341_v9  ;;  %2979 = vmatprep.subr.mxu0 %v1298_v11 }
  0x63   : > { %v337_v15 = vld [vmem:[%s5679_s0 + $0x180] sm:$0xff]  ;;  %v1546_v18 = vunpack.c.h.bf16 %v469_v10  ;;  %v1545_v20 = vunpack.c.l.bf16 %v469_v10  ;;  %3050 = vmatprep.subr.mxu1 %v1554_v12  ;;  %2980 = vmatpush1.msra.mxu0 %v1297_v13  ;;  %s262_s9 = smul.u32 1792, %s6725_s19  ;;  %p5182_p6 = scmp.ne.s32.totalorder %s6725_s19, 16 }
  0x64   : > { %v465_v16 = vld [vmem:[%s5679_s0 + $0x580] sm:$0xff]  ;;  %v1282_v23 = vunpack.c.h.bf16 %v337_v15  ;;  %3051 = vmatpush1.msra.mxu1 %v1553_v14  ;;  %v1281_v25 = vunpack.c.l.bf16 %v337_v15  ;;  %2981 = vmatprep.subr.mxu0 %v1290_v17 }
  0x65   : > { %v333_v21 = vld [vmem:[%s5679_s0 + $0x160] sm:$0xff]  ;;  %v1538_v24 = vunpack.c.h.bf16 %v465_v16  ;;  %v1537_v26 = vunpack.c.l.bf16 %v465_v16  ;;  %3052 = vmatprep.subr.mxu1 %v1546_v18  ;;  %2982 = vmatpush1.msra.mxu0 %v1289_v19  ;;  %s5761_s11 = sshra.s32 %s262_s9, 7 }
  0x66   : > { %v461_v22 = vld [vmem:[%s5679_s0 + $0x560] sm:$0xff]  ;;  %v1274_v29 = vunpack.c.h.bf16 %v333_v21  ;;  %3053 = vmatpush1.msra.mxu1 %v1545_v20  ;;  %v1273_v31 = vunpack.c.l.bf16 %v333_v21  ;;  %2983 = vmatprep.subr.mxu0 %v1282_v23  ;;  %s5181_s28 = sshll.u32 %s5761_s11, 3 }
  0x67   : > { %v329_v27 = vld [vmem:[%s5679_s0 + $0x140] sm:$0xff]  ;;  %v1530_v30 = vunpack.c.h.bf16 %v461_v22  ;;  %v1529_v32 = vunpack.c.l.bf16 %v461_v22  ;;  %3054 = vmatprep.subr.mxu1 %v1538_v24  ;;  %2984 = vmatpush1.msra.mxu0 %v1281_v25  ;;  %s5771_s18 = scalar_lea.vmem %s6726_s6, %s5181_s28 }
  0x68   : > { %v457_v28 = vld [vmem:[%s5679_s0 + $0x540] sm:$0xff]  ;;  %v1266_v35 = vunpack.c.h.bf16 %v329_v27  ;;  %3055 = vmatpush1.msra.mxu1 %v1537_v26  ;;  %v1265_v37 = vunpack.c.l.bf16 %v329_v27  ;;  %2985 = vmatprep.subr.mxu0 %v1274_v29 }
  0x69   : > { %v325_v33 = vld [vmem:[%s5679_s0 + $0x120] sm:$0xff]  ;;  %v1522_v36 = vunpack.c.h.bf16 %v457_v28  ;;  %v1521_v38 = vunpack.c.l.bf16 %v457_v28  ;;  %3056 = vmatprep.subr.mxu1 %v1530_v30  ;;  %2986 = vmatpush1.msra.mxu0 %v1273_v31 }
  0x6a   : > { %v453_v34 = vld [vmem:[%s5679_s0 + $0x520] sm:$0xff]  ;;  %v1258_v41 = vunpack.c.h.bf16 %v325_v33  ;;  %3057 = vmatpush1.msra.mxu1 %v1529_v32  ;;  %v1257_v43 = vunpack.c.l.bf16 %v325_v33  ;;  %2987 = vmatprep.subr.mxu0 %v1266_v35 }
  0x6b   : > { %v321_v39 = vld [vmem:[%s5679_s0 + $0x100] sm:$0xff]  ;;  %v1514_v42 = vunpack.c.h.bf16 %v453_v34  ;;  %v1513_v44 = vunpack.c.l.bf16 %v453_v34  ;;  %3058 = vmatprep.subr.mxu1 %v1522_v36  ;;  %2988 = vmatpush1.msra.mxu0 %v1265_v37 }
  0x6c   : > { %v449_v40 = vld [vmem:[%s5679_s0 + $0x500] sm:$0xff]  ;;  %v1250_v47 = vunpack.c.h.bf16 %v321_v39  ;;  %3059 = vmatpush1.msra.mxu1 %v1521_v38  ;;  %v1249_v49 = vunpack.c.l.bf16 %v321_v39  ;;  %2989 = vmatprep.subr.mxu0 %v1258_v41 }
  0x6d   : > { %v317_v45 = vld [vmem:[%s5679_s0 + $0xe0] sm:$0xff]  ;;  %v1506_v48 = vunpack.c.h.bf16 %v449_v40  ;;  %v1505_v50 = vunpack.c.l.bf16 %v449_v40  ;;  %3060 = vmatprep.subr.mxu1 %v1514_v42  ;;  %2990 = vmatpush1.msra.mxu0 %v1257_v43 }
  0x6e   : > { %v445_v46 = vld [vmem:[%s5679_s0 + $0x4e0] sm:$0xff]  ;;  %v1242_v53 = vunpack.c.h.bf16 %v317_v45  ;;  %3061 = vmatpush1.msra.mxu1 %v1513_v44  ;;  %v1241_v55 = vunpack.c.l.bf16 %v317_v45  ;;  %2991 = vmatprep.subr.mxu0 %v1250_v47 }
  0x6f   : > { %v313_v51 = vld [vmem:[%s5679_s0 + $0xc0] sm:$0xff]  ;;  %v1498_v54 = vunpack.c.h.bf16 %v445_v46  ;;  %v1497_v56 = vunpack.c.l.bf16 %v445_v46  ;;  %3062 = vmatprep.subr.mxu1 %v1506_v48  ;;  %2992 = vmatpush1.msra.mxu0 %v1249_v49 }
  0x70   : > { %v441_v52 = vld [vmem:[%s5679_s0 + $0x4c0] sm:$0xff]  ;;  %v1234_v59 = vunpack.c.h.bf16 %v313_v51  ;;  %3063 = vmatpush1.msra.mxu1 %v1505_v50  ;;  %v1233_v61 = vunpack.c.l.bf16 %v313_v51  ;;  %2993 = vmatprep.subr.mxu0 %v1242_v53 }
  0x71   : > { %v309_v57 = vld [vmem:[%s5679_s0 + $0xa0] sm:$0xff]  ;;  %v1490_v60 = vunpack.c.h.bf16 %v441_v52  ;;  %v1489_v62 = vunpack.c.l.bf16 %v441_v52  ;;  %3064 = vmatprep.subr.mxu1 %v1498_v54  ;;  %2994 = vmatpush1.msra.mxu0 %v1241_v55 }
  0x72   : > { %v437_v58 = vld [vmem:[%s5679_s0 + $0x4a0] sm:$0xff]  ;;  %v1226_v1 = vunpack.c.h.bf16 %v309_v57  ;;  %3065 = vmatpush1.msra.mxu1 %v1497_v56  ;;  %v1225_v3 = vunpack.c.l.bf16 %v309_v57  ;;  %2995 = vmatprep.subr.mxu0 %v1234_v59 }
  0x73   : > { %v305_v63 = vld [vmem:[%s5679_s0 + $0x80] sm:$0xff]  ;;  %v1482_v2 = vunpack.c.h.bf16 %v437_v58  ;;  %v1481_v4 = vunpack.c.l.bf16 %v437_v58  ;;  %3066 = vmatprep.subr.mxu1 %v1490_v60  ;;  %2996 = vmatpush1.msra.mxu0 %v1233_v61 }
  0x74   : > { %v433_v0 = vld [vmem:[%s5679_s0 + $0x480] sm:$0xff]  ;;  %v1218_v7 = vunpack.c.h.bf16 %v305_v63  ;;  %3067 = vmatpush1.msra.mxu1 %v1489_v62  ;;  %v1217_v9 = vunpack.c.l.bf16 %v305_v63  ;;  %2997 = vmatprep.subr.mxu0 %v1226_v1 }
  0x75   : > { %v301_v5 = vld [vmem:[%s5679_s0 + $0x60] sm:$0xff]  ;;  %v1474_v8 = vunpack.c.h.bf16 %v433_v0  ;;  %v1473_v10 = vunpack.c.l.bf16 %v433_v0  ;;  %3068 = vmatprep.subr.mxu1 %v1482_v2  ;;  %2998 = vmatpush1.msra.mxu0 %v1225_v3 }
  0x76   : > { %v429_v6 = vld [vmem:[%s5679_s0 + $0x460] sm:$0xff]  ;;  %v1210_v13 = vunpack.c.h.bf16 %v301_v5  ;;  %3069 = vmatpush1.msra.mxu1 %v1481_v4  ;;  %v1209_v15 = vunpack.c.l.bf16 %v301_v5  ;;  %2999 = vmatprep.subr.mxu0 %v1218_v7 }
  0x77   : > { %v297_v11 = vld [vmem:[%s5679_s0 + $0x40] sm:$0xff]  ;;  %v1466_v14 = vunpack.c.h.bf16 %v429_v6  ;;  %v1465_v16 = vunpack.c.l.bf16 %v429_v6  ;;  %3070 = vmatprep.subr.mxu1 %v1474_v8  ;;  %3000 = vmatpush1.msra.mxu0 %v1217_v9 }
  0x78   : > { %v425_v12 = vld [vmem:[%s5679_s0 + $0x440] sm:$0xff]  ;;  %v1202_v19 = vunpack.c.h.bf16 %v297_v11  ;;  %3071 = vmatpush1.msra.mxu1 %v1473_v10  ;;  %v1201_v21 = vunpack.c.l.bf16 %v297_v11  ;;  %3001 = vmatprep.subr.mxu0 %v1210_v13 }
  0x79   : > { %v293_v17 = vld [vmem:[%s5679_s0 + $0x20] sm:$0xff]  ;;  %v1458_v20 = vunpack.c.h.bf16 %v425_v12  ;;  %v1457_v22 = vunpack.c.l.bf16 %v425_v12  ;;  %3072 = vmatprep.subr.mxu1 %v1466_v14  ;;  %3002 = vmatpush1.msra.mxu0 %v1209_v15 }
  0x7a   : > { %v421_v18 = vld [vmem:[%s5679_s0 + $0x420] sm:$0xff]  ;;  %v1194_v25 = vunpack.c.h.bf16 %v293_v17  ;;  %3073 = vmatpush1.msra.mxu1 %v1465_v16  ;;  %v1193_v27 = vunpack.c.l.bf16 %v293_v17  ;;  %3003 = vmatprep.subr.mxu0 %v1202_v19 }
  0x7b   : > { %v289_v23 = vld [vmem:[%s5679_s0] sm:$0xff]  ;;  %v1450_v26 = vunpack.c.h.bf16 %v421_v18  ;;  %v1449_v28 = vunpack.c.l.bf16 %v421_v18  ;;  %3074 = vmatprep.subr.mxu1 %v1458_v20  ;;  %3004 = vmatpush1.msra.mxu0 %v1201_v21 }
  0x7c   : > { %v417_v24 = vld [vmem:[%s5679_s0 + $0x400] sm:$0xff]  ;;  %v1186_v31 = vunpack.c.h.bf16 %v289_v23  ;;  %3075 = vmatpush1.msra.mxu1 %v1457_v22  ;;  %v1185_v33 = vunpack.c.l.bf16 %v289_v23  ;;  %3005 = vmatprep.subr.mxu0 %v1194_v25 }
  0x7d   : > { %v413_v29 = vld [vmem:[%s5679_s0 + $0x3e0] sm:$0xff]  ;;  %v1442_v32 = vunpack.c.h.bf16 %v417_v24  ;;  %v1441_v34 = vunpack.c.l.bf16 %v417_v24  ;;  %3076 = vmatprep.subr.mxu1 %v1450_v26  ;;  %3006 = vmatpush1.msra.mxu0 %v1193_v27 }
  0x7e   : > { %v541_v30 = vld [vmem:[%s5679_s0 + $0x7e0] sm:$0xff]  ;;  %v1434_v37 = vunpack.c.h.bf16 %v413_v29  ;;  %3077 = vmatpush1.msra.mxu1 %v1449_v28  ;;  %v1433_v39 = vunpack.c.l.bf16 %v413_v29  ;;  %3007 = vmatprep.subr.mxu0 %v1186_v31 }
  0x7f   : > { %v409_v35 = vld [vmem:[%s5679_s0 + $0x3c0] sm:$0xff]  ;;  %v1690_v38 = vunpack.c.h.bf16 %v541_v30  ;;  %v1689_v40 = vunpack.c.l.bf16 %v541_v30  ;;  %3078 = vmatprep.subr.mxu1 %v1442_v32  ;;  %3008 = vmatpush1.msra.mxu0 %v1185_v33 }
  0x80   : > { %v537_v36 = vld [vmem:[%s5679_s0 + $0x7c0] sm:$0xff]  ;;  %v1426_v43 = vunpack.c.h.bf16 %v409_v35  ;;  %3079 = vmatpush1.msra.mxu1 %v1441_v34  ;;  %v1425_v45 = vunpack.c.l.bf16 %v409_v35  ;;  %3009 = vmatprep.subr.mxu0 %v1434_v37 }
  0x81   : > { %v405_v41 = vld [vmem:[%s5679_s0 + $0x3a0] sm:$0xff]  ;;  %v1682_v44 = vunpack.c.h.bf16 %v537_v36  ;;  %v1681_v46 = vunpack.c.l.bf16 %v537_v36  ;;  %3080 = vmatprep.subr.mxu1 %v1690_v38  ;;  %3010 = vmatpush2.msra.mxu0 %v1433_v39 }
  0x82   : > { %v533_v42 = vld [vmem:[%s5679_s0 + $0x7a0] sm:$0xff]  ;;  %v1418_v49 = vunpack.c.h.bf16 %v405_v41  ;;  %3081 = vmatpush2.msra.mxu1 %v1689_v40  ;;  %v1417_v51 = vunpack.c.l.bf16 %v405_v41  ;;  %3011 = vmatprep.subr.mxu0 %v1426_v43 }
  0x83   : > { %v401_v47 = vld [vmem:[%s5679_s0 + $0x380] sm:$0xff]  ;;  %v1674_v50 = vunpack.c.h.bf16 %v533_v42  ;;  %v1673_v52 = vunpack.c.l.bf16 %v533_v42  ;;  %3082 = vmatprep.subr.mxu1 %v1682_v44  ;;  %3012 = vmatpush2.msra.mxu0 %v1425_v45 }
  0x84   : > { %v529_v48 = vld [vmem:[%s5679_s0 + $0x780] sm:$0xff]  ;;  %v1410_v55 = vunpack.c.h.bf16 %v401_v47  ;;  %3083 = vmatpush2.msra.mxu1 %v1681_v46  ;;  %v1409_v57 = vunpack.c.l.bf16 %v401_v47  ;;  %3013 = vmatprep.subr.mxu0 %v1418_v49 }
  0x85   : > { %v397_v53 = vld [vmem:[%s5679_s0 + $0x360] sm:$0xff]  ;;  %v1666_v56 = vunpack.c.h.bf16 %v529_v48  ;;  %v1665_v58 = vunpack.c.l.bf16 %v529_v48  ;;  %3084 = vmatprep.subr.mxu1 %v1674_v50  ;;  %3014 = vmatpush2.msra.mxu0 %v1417_v51 }
  0x86   : > { %v525_v54 = vld [vmem:[%s5679_s0 + $0x760] sm:$0xff]  ;;  %v1402_v61 = vunpack.c.h.bf16 %v397_v53  ;;  %3085 = vmatpush2.msra.mxu1 %v1673_v52  ;;  %v1401_v63 = vunpack.c.l.bf16 %v397_v53  ;;  %3015 = vmatprep.subr.mxu0 %v1410_v55 }
  0x87   : > { %v393_v59 = vld [vmem:[%s5679_s0 + $0x340] sm:$0xff]  ;;  %v1658_v62 = vunpack.c.h.bf16 %v525_v54  ;;  %v1657_v0 = vunpack.c.l.bf16 %v525_v54  ;;  %3086 = vmatprep.subr.mxu1 %v1666_v56  ;;  %3016 = vmatpush2.msra.mxu0 %v1409_v57 }
  0x88   : > { %v521_v60 = vld [vmem:[%s5679_s0 + $0x740] sm:$0xff]  ;;  %v1394_v3 = vunpack.c.h.bf16 %v393_v59  ;;  %3087 = vmatpush2.msra.mxu1 %v1665_v58  ;;  %v1393_v5 = vunpack.c.l.bf16 %v393_v59  ;;  %3017 = vmatprep.subr.mxu0 %v1402_v61 }
  0x89   : > { %v389_v1 = vld [vmem:[%s5679_s0 + $0x320] sm:$0xff]  ;;  %v1650_v4 = vunpack.c.h.bf16 %v521_v60  ;;  %v1649_v6 = vunpack.c.l.bf16 %v521_v60  ;;  %3088 = vmatprep.subr.mxu1 %v1658_v62  ;;  %3018 = vmatpush2.msra.mxu0 %v1401_v63 }
  0x8a   : > { %v517_v2 = vld [vmem:[%s5679_s0 + $0x720] sm:$0xff]  ;;  %v1386_v9 = vunpack.c.h.bf16 %v389_v1  ;;  %3089 = vmatpush2.msra.mxu1 %v1657_v0  ;;  %v1385_v11 = vunpack.c.l.bf16 %v389_v1  ;;  %3019 = vmatprep.subr.mxu0 %v1394_v3 }
  0x8b   : > { %v385_v7 = vld [vmem:[%s5679_s0 + $0x300] sm:$0xff]  ;;  %v1642_v10 = vunpack.c.h.bf16 %v517_v2  ;;  %v1641_v12 = vunpack.c.l.bf16 %v517_v2  ;;  %3090 = vmatprep.subr.mxu1 %v1650_v4  ;;  %3020 = vmatpush2.msra.mxu0 %v1393_v5  ;;  %v268_v2 = vld [vmem:[%s5771_s18 + $0x8] sm:$0xff]  ;;  %v270_v4 = vld [vmem:[%s5771_s18 + $0x18] sm:$0xff] }
  0x8c   : > { %v513_v8 = vld [vmem:[%s5679_s0 + $0x700] sm:$0xff]  ;;  %v1378_v15 = vunpack.c.h.bf16 %v385_v7  ;;  %3091 = vmatpush2.msra.mxu1 %v1649_v6  ;;  %v1377_v17 = vunpack.c.l.bf16 %v385_v7  ;;  %3021 = vmatprep.subr.mxu0 %v1386_v9 }
  0x8d   : > { %v381_v13 = vld [vmem:[%s5679_s0 + $0x2e0] sm:$0xff]  ;;  %v1634_v16 = vunpack.c.h.bf16 %v513_v8  ;;  %v1633_v18 = vunpack.c.l.bf16 %v513_v8  ;;  %3092 = vmatprep.subr.mxu1 %v1642_v10  ;;  %3022 = vmatpush2.msra.mxu0 %v1385_v11  ;;  %v269_v8 = vld [vmem:[%s5771_s18 + $0x10] sm:$0xff] }
  0x8e   : > { %v509_v14 = vld [vmem:[%s5679_s0 + $0x6e0] sm:$0xff]  ;;  %v1370_v21 = vunpack.c.h.bf16 %v381_v13  ;;  %3093 = vmatpush2.msra.mxu1 %v1641_v12  ;;  %v1369_v23 = vunpack.c.l.bf16 %v381_v13  ;;  %3023 = vmatprep.subr.mxu0 %v1378_v15 }
  0x8f   : > { %v377_v19 = vld [vmem:[%s5679_s0 + $0x2c0] sm:$0xff]  ;;  %v1626_v22 = vunpack.c.h.bf16 %v509_v14  ;;  %v1625_v24 = vunpack.c.l.bf16 %v509_v14  ;;  %3094 = vmatprep.subr.mxu1 %v1634_v16  ;;  %3024 = vmatpush2.msra.mxu0 %v1377_v17 }
  0x90   : > { %v505_v20 = vld [vmem:[%s5679_s0 + $0x6c0] sm:$0xff]  ;;  %v1362_v27 = vunpack.c.h.bf16 %v377_v19  ;;  %3095 = vmatpush2.msra.mxu1 %v1633_v18  ;;  %v1361_v29 = vunpack.c.l.bf16 %v377_v19  ;;  %3025 = vmatprep.subr.mxu0 %v1370_v21 }
  0x91   : > { %v373_v25 = vld [vmem:[%s5679_s0 + $0x2a0] sm:$0xff]  ;;  %v1618_v28 = vunpack.c.h.bf16 %v505_v20  ;;  %v1617_v30 = vunpack.c.l.bf16 %v505_v20  ;;  %3096 = vmatprep.subr.mxu1 %v1626_v22  ;;  %3026 = vmatpush2.msra.mxu0 %v1369_v23 }
  0x92   : > { %v501_v26 = vld [vmem:[%s5679_s0 + $0x6a0] sm:$0xff]  ;;  %v1354_v33 = vunpack.c.h.bf16 %v373_v25  ;;  %3097 = vmatpush2.msra.mxu1 %v1625_v24  ;;  %v1353_v35 = vunpack.c.l.bf16 %v373_v25  ;;  %3027 = vmatprep.subr.mxu0 %v1362_v27 }
  0x93   : > { %v369_v31 = vld [vmem:[%s5679_s0 + $0x280] sm:$0xff]  ;;  %v1610_v34 = vunpack.c.h.bf16 %v501_v26  ;;  %v1609_v36 = vunpack.c.l.bf16 %v501_v26  ;;  %3098 = vmatprep.subr.mxu1 %v1618_v28  ;;  %3028 = vmatpush2.msra.mxu0 %v1361_v29 }
  0x94   : > { %v497_v32 = vld [vmem:[%s5679_s0 + $0x680] sm:$0xff]  ;;  %v1346_v39 = vunpack.c.h.bf16 %v369_v31  ;;  %3099 = vmatpush2.msra.mxu1 %v1617_v30  ;;  %v1345_v41 = vunpack.c.l.bf16 %v369_v31  ;;  %3029 = vmatprep.subr.mxu0 %v1354_v33 }
  0x95   : > { %v365_v37 = vld [vmem:[%s5679_s0 + $0x260] sm:$0xff]  ;;  %v1602_v40 = vunpack.c.h.bf16 %v497_v32  ;;  %v1601_v42 = vunpack.c.l.bf16 %v497_v32  ;;  %3100 = vmatprep.subr.mxu1 %v1610_v34  ;;  %3030 = vmatpush2.msra.mxu0 %v1353_v35 }
  0x96   : > { %v493_v38 = vld [vmem:[%s5679_s0 + $0x660] sm:$0xff]  ;;  %v1338_v45 = vunpack.c.h.bf16 %v365_v37  ;;  %3101 = vmatpush2.msra.mxu1 %v1609_v36  ;;  %v1337_v47 = vunpack.c.l.bf16 %v365_v37  ;;  %3031 = vmatprep.subr.mxu0 %v1346_v39 }
  0x97   : > { %v361_v43 = vld [vmem:[%s5679_s0 + $0x240] sm:$0xff]  ;;  %v1594_v46 = vunpack.c.h.bf16 %v493_v38  ;;  %v1593_v48 = vunpack.c.l.bf16 %v493_v38  ;;  %3102 = vmatprep.subr.mxu1 %v1602_v40  ;;  %3032 = vmatpush2.msra.mxu0 %v1345_v41 }
  0x98   : > { %v489_v44 = vld [vmem:[%s5679_s0 + $0x640] sm:$0xff]  ;;  %v1330_v51 = vunpack.c.h.bf16 %v361_v43  ;;  %3103 = vmatpush2.msra.mxu1 %v1601_v42  ;;  %v1329_v53 = vunpack.c.l.bf16 %v361_v43  ;;  %3033 = vmatprep.subr.mxu0 %v1338_v45 }
  0x99   : > { %v357_v49 = vld [vmem:[%s5679_s0 + $0x220] sm:$0xff]  ;;  %v1586_v52 = vunpack.c.h.bf16 %v489_v44  ;;  %v1585_v54 = vunpack.c.l.bf16 %v489_v44  ;;  %3104 = vmatprep.subr.mxu1 %v1594_v46  ;;  %3034 = vmatpush2.msra.mxu0 %v1337_v47 }
  0x9a   : > { %v485_v50 = vld [vmem:[%s5679_s0 + $0x620] sm:$0xff]  ;;  %v1322_v57 = vunpack.c.h.bf16 %v357_v49  ;;  %3105 = vmatpush2.msra.mxu1 %v1593_v48  ;;  %v1321_v59 = vunpack.c.l.bf16 %v357_v49  ;;  %3035 = vmatprep.subr.mxu0 %v1330_v51 }
  0x9b   : > { %v353_v55 = vld [vmem:[%s5679_s0 + $0x200] sm:$0xff]  ;;  %v1578_v58 = vunpack.c.h.bf16 %v485_v50  ;;  %v1577_v60 = vunpack.c.l.bf16 %v485_v50  ;;  %3106 = vmatprep.subr.mxu1 %v1586_v52  ;;  %3036 = vmatpush2.msra.mxu0 %v1329_v53 }
  0x9c   : > { %v481_v56 = vld [vmem:[%s5679_s0 + $0x600] sm:$0xff]  ;;  %v1314_v61 = vunpack.c.h.bf16 %v353_v55  ;;  %3107 = vmatpush2.msra.mxu1 %v1585_v54  ;;  %v1313_v63 = vunpack.c.l.bf16 %v353_v55  ;;  %3037 = vmatprep.subr.mxu0 %v1322_v57 }
  0x9d   : > { %v1570_v62 = vunpack.c.h.bf16 %v481_v56  ;;  %v605_v0 = vld [vmem:[%s5679_s0 + $0x9e0] sm:$0xff]  ;;  %3108 = vmatprep.subr.mxu1 %v1578_v58  ;;  %v1569_v3 = vunpack.c.l.bf16 %v481_v56  ;;  %3038 = vmatpush2.msra.mxu0 %v1321_v59 }
  0x9e   : > { %v733_v1 = vld [vmem:[%s5679_s0 + $0xde0] sm:$0xff]  ;;  %3109 = vmatpush2.msra.mxu1 %v1577_v60  ;;  %3039 = vmatprep.subr.mxu0 %v1314_v61  ;;  %v1818_v9 = vunpack.c.h.bf16 %v605_v0  ;;  %v1817_v11 = vunpack.c.l.bf16 %v605_v0 }
  0x9f   : > { %v601_v5 = vld [vmem:[%s5679_s0 + $0x9c0] sm:$0xff]  ;;  %3110 = vmatprep.subr.mxu1 %v1570_v62  ;;  %v2074_v10 = vunpack.c.h.bf16 %v733_v1  ;;  %3040 = vmatpush2.msra.mxu0 %v1313_v63  ;;  %v2073_v12 = vunpack.c.l.bf16 %v733_v1 }
  0xa0   : > { %v729_v6 = vld [vmem:[%s5679_s0 + $0xdc0] sm:$0xff]  ;;  %3041 = vmatprep.mubr.f32.mxu0 %v268_v2  ;;  %3111 = vmatpush2.msra.mxu1 %v1569_v3  ;;  %v1810_v15 = vunpack.c.h.bf16 %v601_v5  ;;  %v1809_v17 = vunpack.c.l.bf16 %v601_v5 }
  0xa1   : > { %v267_v7 = vld [vmem:[%s5771_s18] sm:$0xff]  ;;  %3112 = vmatprep.mubr.f32.mxu1 %v270_v4  ;;  %v2066_v16 = vunpack.c.h.bf16 %v729_v6  ;;  %v2065_v18 = vunpack.c.l.bf16 %v729_v6  ;;  %3119 = vmatprep.subr.mxu0 %v1818_v9 }
  0xa2   : > { %v597_v13 = vld [vmem:[%s5679_s0 + $0x9a0] sm:$0xff]  ;;  %3042 = vmatmul.mubr.f32.vlgmr.msra.gmra.mxu0 %v267_v7  ;;  %3113 = vmatmul.mubr.f32.vlgmr.msra.gmra.mxu1 %v269_v8 }
  0xa3   : > { %v725_v14 = vld [vmem:[%s5679_s0 + $0xda0] sm:$0xff]  ;;  %3190 = vmatprep.subr.mxu1 %v2074_v10  ;;  %v1802_v21 = vunpack.c.h.bf16 %v597_v13  ;;  %3120 = vmatpush1.msra.mxu0 %v1817_v11  ;;  %v1801_v23 = vunpack.c.l.bf16 %v597_v13 }
  0xa4   : > { %v593_v19 = vld [vmem:[%s5679_s0 + $0x980] sm:$0xff]  ;;  %v2058_v22 = vunpack.c.h.bf16 %v725_v14  ;;  %3191 = vmatpush1.msra.mxu1 %v2073_v12  ;;  %v2057_v24 = vunpack.c.l.bf16 %v725_v14  ;;  %3121 = vmatprep.subr.mxu0 %v1810_v15 }
  0xa5   : > { %v721_v20 = vld [vmem:[%s5679_s0 + $0xd80] sm:$0xff]  ;;  %3192 = vmatprep.subr.mxu1 %v2066_v16  ;;  %v1794_v27 = vunpack.c.h.bf16 %v593_v19  ;;  %3122 = vmatpush1.msra.mxu0 %v1809_v17  ;;  %v1793_v29 = vunpack.c.l.bf16 %v593_v19 }
  0xa6   : > { %v589_v25 = vld [vmem:[%s5679_s0 + $0x960] sm:$0xff]  ;;  %v2050_v28 = vunpack.c.h.bf16 %v721_v20  ;;  %3193 = vmatpush1.msra.mxu1 %v2065_v18  ;;  %v2049_v30 = vunpack.c.l.bf16 %v721_v20  ;;  %3123 = vmatprep.subr.mxu0 %v1802_v21 }
  0xa7   : > { %v717_v26 = vld [vmem:[%s5679_s0 + $0xd60] sm:$0xff]  ;;  %3194 = vmatprep.subr.mxu1 %v2058_v22  ;;  %v1786_v33 = vunpack.c.h.bf16 %v589_v25  ;;  %3124 = vmatpush1.msra.mxu0 %v1801_v23  ;;  %v1785_v35 = vunpack.c.l.bf16 %v589_v25 }
  0xa8   : > { %v585_v31 = vld [vmem:[%s5679_s0 + $0x940] sm:$0xff]  ;;  %v2042_v34 = vunpack.c.h.bf16 %v717_v26  ;;  %3195 = vmatpush1.msra.mxu1 %v2057_v24  ;;  %v2041_v36 = vunpack.c.l.bf16 %v717_v26  ;;  %3125 = vmatprep.subr.mxu0 %v1794_v27 }
  0xa9   : > { %v713_v32 = vld [vmem:[%s5679_s0 + $0xd40] sm:$0xff]  ;;  %3196 = vmatprep.subr.mxu1 %v2050_v28  ;;  %v1778_v39 = vunpack.c.h.bf16 %v585_v31  ;;  %3126 = vmatpush1.msra.mxu0 %v1793_v29  ;;  %v1777_v41 = vunpack.c.l.bf16 %v585_v31 }
  0xaa   : > { %v581_v37 = vld [vmem:[%s5679_s0 + $0x920] sm:$0xff]  ;;  %v2034_v40 = vunpack.c.h.bf16 %v713_v32  ;;  %3197 = vmatpush1.msra.mxu1 %v2049_v30  ;;  %v2033_v42 = vunpack.c.l.bf16 %v713_v32  ;;  %3127 = vmatprep.subr.mxu0 %v1786_v33 }
  0xab   : > { %v709_v38 = vld [vmem:[%s5679_s0 + $0xd20] sm:$0xff]  ;;  %3198 = vmatprep.subr.mxu1 %v2042_v34  ;;  %v1770_v45 = vunpack.c.h.bf16 %v581_v37  ;;  %3128 = vmatpush1.msra.mxu0 %v1785_v35  ;;  %v1769_v47 = vunpack.c.l.bf16 %v581_v37 }
  0xac   : > { %v577_v43 = vld [vmem:[%s5679_s0 + $0x900] sm:$0xff]  ;;  %v2026_v46 = vunpack.c.h.bf16 %v709_v38  ;;  %3199 = vmatpush1.msra.mxu1 %v2041_v36  ;;  %v2025_v48 = vunpack.c.l.bf16 %v709_v38  ;;  %3129 = vmatprep.subr.mxu0 %v1778_v39 }
  0xad   : > { %v705_v44 = vld [vmem:[%s5679_s0 + $0xd00] sm:$0xff]  ;;  %3200 = vmatprep.subr.mxu1 %v2034_v40  ;;  %v1762_v51 = vunpack.c.h.bf16 %v577_v43  ;;  %3130 = vmatpush1.msra.mxu0 %v1777_v41  ;;  %v1761_v53 = vunpack.c.l.bf16 %v577_v43 }
  0xae   : > { %v573_v49 = vld [vmem:[%s5679_s0 + $0x8e0] sm:$0xff]  ;;  %v2018_v52 = vunpack.c.h.bf16 %v705_v44  ;;  %3201 = vmatpush1.msra.mxu1 %v2033_v42  ;;  %v2017_v54 = vunpack.c.l.bf16 %v705_v44  ;;  %3131 = vmatprep.subr.mxu0 %v1770_v45 }
  0xaf   : > { %v701_v50 = vld [vmem:[%s5679_s0 + $0xce0] sm:$0xff]  ;;  %3202 = vmatprep.subr.mxu1 %v2026_v46  ;;  %v1754_v57 = vunpack.c.h.bf16 %v573_v49  ;;  %3132 = vmatpush1.msra.mxu0 %v1769_v47  ;;  %v1753_v59 = vunpack.c.l.bf16 %v573_v49 }
  0xb0   : > { %v569_v55 = vld [vmem:[%s5679_s0 + $0x8c0] sm:$0xff]  ;;  %v2010_v58 = vunpack.c.h.bf16 %v701_v50  ;;  %3203 = vmatpush1.msra.mxu1 %v2025_v48  ;;  %v2009_v60 = vunpack.c.l.bf16 %v701_v50  ;;  %3133 = vmatprep.subr.mxu0 %v1762_v51 }
  0xb1   : > { %v697_v56 = vld [vmem:[%s5679_s0 + $0xcc0] sm:$0xff]  ;;  %3204 = vmatprep.subr.mxu1 %v2018_v52  ;;  %v1746_v63 = vunpack.c.h.bf16 %v569_v55  ;;  %3134 = vmatpush1.msra.mxu0 %v1761_v53  ;;  %v1745_v1 = vunpack.c.l.bf16 %v569_v55 }
  0xb2   : > { %v565_v61 = vld [vmem:[%s5679_s0 + $0x8a0] sm:$0xff]  ;;  %v2002_v0 = vunpack.c.h.bf16 %v697_v56  ;;  %3205 = vmatpush1.msra.mxu1 %v2017_v54  ;;  %v2001_v2 = vunpack.c.l.bf16 %v697_v56  ;;  %3135 = vmatprep.subr.mxu0 %v1754_v57 }
  0xb3   : > { %v693_v62 = vld [vmem:[%s5679_s0 + $0xca0] sm:$0xff]  ;;  %3206 = vmatprep.subr.mxu1 %v2010_v58  ;;  %v1738_v5 = vunpack.c.h.bf16 %v565_v61  ;;  %3136 = vmatpush1.msra.mxu0 %v1753_v59  ;;  %v1737_v7 = vunpack.c.l.bf16 %v565_v61 }
  0xb4   : > { %v561_v3 = vld [vmem:[%s5679_s0 + $0x880] sm:$0xff]  ;;  %v1994_v6 = vunpack.c.h.bf16 %v693_v62  ;;  %3207 = vmatpush1.msra.mxu1 %v2009_v60  ;;  %v1993_v8 = vunpack.c.l.bf16 %v693_v62  ;;  %3137 = vmatprep.subr.mxu0 %v1746_v63 }
  0xb5   : > { %v689_v4 = vld [vmem:[%s5679_s0 + $0xc80] sm:$0xff]  ;;  %3208 = vmatprep.subr.mxu1 %v2002_v0  ;;  %v1730_v11 = vunpack.c.h.bf16 %v561_v3  ;;  %3138 = vmatpush1.msra.mxu0 %v1745_v1  ;;  %v1729_v13 = vunpack.c.l.bf16 %v561_v3 }
  0xb6   : > { %v557_v9 = vld [vmem:[%s5679_s0 + $0x860] sm:$0xff]  ;;  %v1986_v12 = vunpack.c.h.bf16 %v689_v4  ;;  %3209 = vmatpush1.msra.mxu1 %v2001_v2  ;;  %v1985_v14 = vunpack.c.l.bf16 %v689_v4  ;;  %3139 = vmatprep.subr.mxu0 %v1738_v5 }
  0xb7   : > { %v685_v10 = vld [vmem:[%s5679_s0 + $0xc60] sm:$0xff]  ;;  %3210 = vmatprep.subr.mxu1 %v1994_v6  ;;  %v1722_v17 = vunpack.c.h.bf16 %v557_v9  ;;  %3140 = vmatpush1.msra.mxu0 %v1737_v7  ;;  %v1721_v19 = vunpack.c.l.bf16 %v557_v9 }
  0xb8   : > { %v553_v15 = vld [vmem:[%s5679_s0 + $0x840] sm:$0xff]  ;;  %v1978_v18 = vunpack.c.h.bf16 %v685_v10  ;;  %3211 = vmatpush1.msra.mxu1 %v1993_v8  ;;  %v1977_v20 = vunpack.c.l.bf16 %v685_v10  ;;  %3141 = vmatprep.subr.mxu0 %v1730_v11 }
  0xb9   : > { %v681_v16 = vld [vmem:[%s5679_s0 + $0xc40] sm:$0xff]  ;;  %3212 = vmatprep.subr.mxu1 %v1986_v12  ;;  %v1714_v23 = vunpack.c.h.bf16 %v553_v15  ;;  %3142 = vmatpush1.msra.mxu0 %v1729_v13  ;;  %v1713_v25 = vunpack.c.l.bf16 %v553_v15 }
  0xba   : > { %v549_v21 = vld [vmem:[%s5679_s0 + $0x820] sm:$0xff]  ;;  %v1970_v24 = vunpack.c.h.bf16 %v681_v16  ;;  %3213 = vmatpush1.msra.mxu1 %v1985_v14  ;;  %v1969_v26 = vunpack.c.l.bf16 %v681_v16  ;;  %3143 = vmatprep.subr.mxu0 %v1722_v17 }
  0xbb   : > { %v677_v22 = vld [vmem:[%s5679_s0 + $0xc20] sm:$0xff]  ;;  %3214 = vmatprep.subr.mxu1 %v1978_v18  ;;  %v1706_v29 = vunpack.c.h.bf16 %v549_v21  ;;  %3144 = vmatpush1.msra.mxu0 %v1721_v19  ;;  %v1705_v31 = vunpack.c.l.bf16 %v549_v21 }
  0xbc   : > { %v545_v27 = vld [vmem:[%s5679_s0 + $0x800] sm:$0xff]  ;;  %v1962_v30 = vunpack.c.h.bf16 %v677_v22  ;;  %3215 = vmatpush1.msra.mxu1 %v1977_v20  ;;  %v1961_v32 = vunpack.c.l.bf16 %v677_v22  ;;  %3145 = vmatprep.subr.mxu0 %v1714_v23 }
  0xbd   : > { %v673_v28 = vld [vmem:[%s5679_s0 + $0xc00] sm:$0xff]  ;;  %3216 = vmatprep.subr.mxu1 %v1970_v24  ;;  %v1698_v35 = vunpack.c.h.bf16 %v545_v27  ;;  %3146 = vmatpush1.msra.mxu0 %v1713_v25  ;;  %v1697_v37 = vunpack.c.l.bf16 %v545_v27 }
  0xbe   : > { %v669_v33 = vld [vmem:[%s5679_s0 + $0xbe0] sm:$0xff]  ;;  %v1954_v36 = vunpack.c.h.bf16 %v673_v28  ;;  %3217 = vmatpush1.msra.mxu1 %v1969_v26  ;;  %v1953_v38 = vunpack.c.l.bf16 %v673_v28  ;;  %3147 = vmatprep.subr.mxu0 %v1706_v29 }
  0xbf   : > { %v797_v34 = vld [vmem:[%s5679_s0 + $0xfe0] sm:$0xff]  ;;  %3218 = vmatprep.subr.mxu1 %v1962_v30  ;;  %v1946_v41 = vunpack.c.h.bf16 %v669_v33  ;;  %3148 = vmatpush1.msra.mxu0 %v1705_v31  ;;  %v1945_v43 = vunpack.c.l.bf16 %v669_v33 }
  0xc0   : > { %v665_v39 = vld [vmem:[%s5679_s0 + $0xbc0] sm:$0xff]  ;;  %v2202_v42 = vunpack.c.h.bf16 %v797_v34  ;;  %3219 = vmatpush1.msra.mxu1 %v1961_v32  ;;  %v2201_v44 = vunpack.c.l.bf16 %v797_v34  ;;  %3149 = vmatprep.subr.mxu0 %v1698_v35 }
  0xc1   : > { %v793_v40 = vld [vmem:[%s5679_s0 + $0xfc0] sm:$0xff]  ;;  %3220 = vmatprep.subr.mxu1 %v1954_v36  ;;  %v1938_v47 = vunpack.c.h.bf16 %v665_v39  ;;  %3150 = vmatpush1.msra.mxu0 %v1697_v37  ;;  %v1937_v49 = vunpack.c.l.bf16 %v665_v39 }
  0xc2   : > { %v661_v45 = vld [vmem:[%s5679_s0 + $0xba0] sm:$0xff]  ;;  %v2194_v48 = vunpack.c.h.bf16 %v793_v40  ;;  %3221 = vmatpush1.msra.mxu1 %v1953_v38  ;;  %v2193_v50 = vunpack.c.l.bf16 %v793_v40  ;;  %3151 = vmatprep.subr.mxu0 %v1946_v41 }
  0xc3   : > { %v789_v46 = vld [vmem:[%s5679_s0 + $0xfa0] sm:$0xff]  ;;  %3222 = vmatprep.subr.mxu1 %v2202_v42  ;;  %v1930_v53 = vunpack.c.h.bf16 %v661_v45  ;;  %3152 = vmatpush2.msra.mxu0 %v1945_v43  ;;  %v1929_v55 = vunpack.c.l.bf16 %v661_v45 }
  0xc4   : > { %v657_v51 = vld [vmem:[%s5679_s0 + $0xb80] sm:$0xff]  ;;  %v2186_v54 = vunpack.c.h.bf16 %v789_v46  ;;  %3223 = vmatpush2.msra.mxu1 %v2201_v44  ;;  %v2185_v56 = vunpack.c.l.bf16 %v789_v46  ;;  %3153 = vmatprep.subr.mxu0 %v1938_v47 }
  0xc5   : > { %v785_v52 = vld [vmem:[%s5679_s0 + $0xf80] sm:$0xff]  ;;  %3224 = vmatprep.subr.mxu1 %v2194_v48  ;;  %v1922_v59 = vunpack.c.h.bf16 %v657_v51  ;;  %3154 = vmatpush2.msra.mxu0 %v1937_v49  ;;  %v1921_v61 = vunpack.c.l.bf16 %v657_v51 }
  0xc6   : > { %v653_v57 = vld [vmem:[%s5679_s0 + $0xb60] sm:$0xff]  ;;  %v2178_v60 = vunpack.c.h.bf16 %v785_v52  ;;  %3225 = vmatpush2.msra.mxu1 %v2193_v50  ;;  %v2177_v62 = vunpack.c.l.bf16 %v785_v52  ;;  %3155 = vmatprep.subr.mxu0 %v1930_v53 }
  0xc7   : > { %v781_v58 = vld [vmem:[%s5679_s0 + $0xf60] sm:$0xff]  ;;  %3226 = vmatprep.subr.mxu1 %v2186_v54  ;;  %v1914_v1 = vunpack.c.h.bf16 %v653_v57  ;;  %3156 = vmatpush2.msra.mxu0 %v1929_v55  ;;  %v1913_v3 = vunpack.c.l.bf16 %v653_v57 }
  0xc8   : > { %v649_v63 = vld [vmem:[%s5679_s0 + $0xb40] sm:$0xff]  ;;  %v2170_v2 = vunpack.c.h.bf16 %v781_v58  ;;  %3227 = vmatpush2.msra.mxu1 %v2185_v56  ;;  %v2169_v4 = vunpack.c.l.bf16 %v781_v58  ;;  %3157 = vmatprep.subr.mxu0 %v1922_v59 }
  0xc9   : > { %v777_v0 = vld [vmem:[%s5679_s0 + $0xf40] sm:$0xff]  ;;  %3228 = vmatprep.subr.mxu1 %v2178_v60  ;;  %v1906_v7 = vunpack.c.h.bf16 %v649_v63  ;;  %3158 = vmatpush2.msra.mxu0 %v1921_v61  ;;  %v1905_v9 = vunpack.c.l.bf16 %v649_v63 }
  0xca   : > { %v645_v5 = vld [vmem:[%s5679_s0 + $0xb20] sm:$0xff]  ;;  %v2162_v8 = vunpack.c.h.bf16 %v777_v0  ;;  %3229 = vmatpush2.msra.mxu1 %v2177_v62  ;;  %v2161_v10 = vunpack.c.l.bf16 %v777_v0  ;;  %3159 = vmatprep.subr.mxu0 %v1914_v1 }
  0xcb   : > { %v773_v6 = vld [vmem:[%s5679_s0 + $0xf20] sm:$0xff]  ;;  %3230 = vmatprep.subr.mxu1 %v2170_v2  ;;  %v1898_v13 = vunpack.c.h.bf16 %v645_v5  ;;  %3160 = vmatpush2.msra.mxu0 %v1913_v3  ;;  %v1897_v15 = vunpack.c.l.bf16 %v645_v5 }
  0xcc   : > { %v641_v11 = vld [vmem:[%s5679_s0 + $0xb00] sm:$0xff]  ;;  %v2154_v14 = vunpack.c.h.bf16 %v773_v6  ;;  %3231 = vmatpush2.msra.mxu1 %v2169_v4  ;;  %v2153_v16 = vunpack.c.l.bf16 %v773_v6  ;;  %3161 = vmatprep.subr.mxu0 %v1906_v7  ;;  %v272_v7 = vld [vmem:[%s5771_s18 + $0x28] sm:$0xff] }
  0xcd   : > { %v769_v12 = vld [vmem:[%s5679_s0 + $0xf00] sm:$0xff]  ;;  %3232 = vmatprep.subr.mxu1 %v2162_v8  ;;  %v1890_v19 = vunpack.c.h.bf16 %v641_v11  ;;  %3162 = vmatpush2.msra.mxu0 %v1905_v9  ;;  %v1889_v21 = vunpack.c.l.bf16 %v641_v11 }
  0xce   : > { %v637_v17 = vld [vmem:[%s5679_s0 + $0xae0] sm:$0xff]  ;;  %v2146_v20 = vunpack.c.h.bf16 %v769_v12  ;;  %3233 = vmatpush2.msra.mxu1 %v2161_v10  ;;  %v2145_v22 = vunpack.c.l.bf16 %v769_v12  ;;  %3163 = vmatprep.subr.mxu0 %v1898_v13  ;;  %v274_v12 = vld [vmem:[%s5771_s18 + $0x38] sm:$0xff] }
  0xcf   : > { %v765_v18 = vld [vmem:[%s5679_s0 + $0xee0] sm:$0xff]  ;;  %3234 = vmatprep.subr.mxu1 %v2154_v14  ;;  %v1882_v25 = vunpack.c.h.bf16 %v637_v17  ;;  %3164 = vmatpush2.msra.mxu0 %v1897_v15  ;;  %v1881_v27 = vunpack.c.l.bf16 %v637_v17 }
  0xd0   : > { %v633_v23 = vld [vmem:[%s5679_s0 + $0xac0] sm:$0xff]  ;;  %v2138_v26 = vunpack.c.h.bf16 %v765_v18  ;;  %3235 = vmatpush2.msra.mxu1 %v2153_v16  ;;  %v2137_v28 = vunpack.c.l.bf16 %v765_v18  ;;  %3165 = vmatprep.subr.mxu0 %v1890_v19  ;;  %v273_v16 = vld [vmem:[%s5771_s18 + $0x30] sm:$0xff] }
  0xd1   : > { %v761_v24 = vld [vmem:[%s5679_s0 + $0xec0] sm:$0xff]  ;;  %3236 = vmatprep.subr.mxu1 %v2146_v20  ;;  %v1874_v31 = vunpack.c.h.bf16 %v633_v23  ;;  %3166 = vmatpush2.msra.mxu0 %v1889_v21  ;;  %v1873_v33 = vunpack.c.l.bf16 %v633_v23 }
  0xd2   : > { %v629_v29 = vld [vmem:[%s5679_s0 + $0xaa0] sm:$0xff]  ;;  %v2130_v32 = vunpack.c.h.bf16 %v761_v24  ;;  %3237 = vmatpush2.msra.mxu1 %v2145_v22  ;;  %v2129_v34 = vunpack.c.l.bf16 %v761_v24  ;;  %3167 = vmatprep.subr.mxu0 %v1882_v25 }
  0xd3   : > { %v757_v30 = vld [vmem:[%s5679_s0 + $0xea0] sm:$0xff]  ;;  %3238 = vmatprep.subr.mxu1 %v2138_v26  ;;  %v1866_v37 = vunpack.c.h.bf16 %v629_v29  ;;  %3168 = vmatpush2.msra.mxu0 %v1881_v27  ;;  %v1865_v39 = vunpack.c.l.bf16 %v629_v29 }
  0xd4   : > { %v625_v35 = vld [vmem:[%s5679_s0 + $0xa80] sm:$0xff]  ;;  %v2122_v38 = vunpack.c.h.bf16 %v757_v30  ;;  %3239 = vmatpush2.msra.mxu1 %v2137_v28  ;;  %v2121_v40 = vunpack.c.l.bf16 %v757_v30  ;;  %3169 = vmatprep.subr.mxu0 %v1874_v31 }
  0xd5   : > { %v753_v36 = vld [vmem:[%s5679_s0 + $0xe80] sm:$0xff]  ;;  %3240 = vmatprep.subr.mxu1 %v2130_v32  ;;  %v1858_v43 = vunpack.c.h.bf16 %v625_v35  ;;  %3170 = vmatpush2.msra.mxu0 %v1873_v33  ;;  %v1857_v45 = vunpack.c.l.bf16 %v625_v35 }
  0xd6   : > { %v621_v41 = vld [vmem:[%s5679_s0 + $0xa60] sm:$0xff]  ;;  %v2114_v44 = vunpack.c.h.bf16 %v753_v36  ;;  %3241 = vmatpush2.msra.mxu1 %v2129_v34  ;;  %v2113_v46 = vunpack.c.l.bf16 %v753_v36  ;;  %3171 = vmatprep.subr.mxu0 %v1866_v37 }
  0xd7   : > { %v749_v42 = vld [vmem:[%s5679_s0 + $0xe60] sm:$0xff]  ;;  %3242 = vmatprep.subr.mxu1 %v2122_v38  ;;  %v1850_v49 = vunpack.c.h.bf16 %v621_v41  ;;  %3172 = vmatpush2.msra.mxu0 %v1865_v39  ;;  %v1849_v51 = vunpack.c.l.bf16 %v621_v41 }
  0xd8   : > { %v617_v47 = vld [vmem:[%s5679_s0 + $0xa40] sm:$0xff]  ;;  %v2106_v50 = vunpack.c.h.bf16 %v749_v42  ;;  %3243 = vmatpush2.msra.mxu1 %v2121_v40  ;;  %v2105_v52 = vunpack.c.l.bf16 %v749_v42  ;;  %3173 = vmatprep.subr.mxu0 %v1858_v43 }
  0xd9   : > { %v745_v48 = vld [vmem:[%s5679_s0 + $0xe40] sm:$0xff]  ;;  %3244 = vmatprep.subr.mxu1 %v2114_v44  ;;  %v1842_v55 = vunpack.c.h.bf16 %v617_v47  ;;  %3174 = vmatpush2.msra.mxu0 %v1857_v45  ;;  %v1841_v57 = vunpack.c.l.bf16 %v617_v47 }
  0xda   : > { %v613_v53 = vld [vmem:[%s5679_s0 + $0xa20] sm:$0xff]  ;;  %v2098_v56 = vunpack.c.h.bf16 %v745_v48  ;;  %3245 = vmatpush2.msra.mxu1 %v2113_v46  ;;  %v2097_v58 = vunpack.c.l.bf16 %v745_v48  ;;  %3175 = vmatprep.subr.mxu0 %v1850_v49 }
  0xdb   : > { %v741_v54 = vld [vmem:[%s5679_s0 + $0xe20] sm:$0xff]  ;;  %3246 = vmatprep.subr.mxu1 %v2106_v50  ;;  %v1834_v61 = vunpack.c.h.bf16 %v613_v53  ;;  %3176 = vmatpush2.msra.mxu0 %v1849_v51  ;;  %v1833_v63 = vunpack.c.l.bf16 %v613_v53 }
  0xdc   : > { %v609_v59 = vld [vmem:[%s5679_s0 + $0xa00] sm:$0xff]  ;;  %v2090_v62 = vunpack.c.h.bf16 %v741_v54  ;;  %3247 = vmatpush2.msra.mxu1 %v2105_v52  ;;  %v2089_v0 = vunpack.c.l.bf16 %v741_v54  ;;  %3177 = vmatprep.subr.mxu0 %v1842_v55 }
  0xdd   : > { %v737_v60 = vld [vmem:[%s5679_s0 + $0xe00] sm:$0xff]  ;;  %3248 = vmatprep.subr.mxu1 %v2098_v56  ;;  %v1826_v1 = vunpack.c.h.bf16 %v609_v59  ;;  %3178 = vmatpush2.msra.mxu0 %v1841_v57  ;;  %v1825_v4 = vunpack.c.l.bf16 %v609_v59 }
  0xde   : > { %v2082_v2 = vunpack.c.h.bf16 %v737_v60  ;;  %v861_v3 = vld [vmem:[%s5679_s0 + $0x11e0] sm:$0xff]  ;;  %3249 = vmatpush2.msra.mxu1 %v2097_v58  ;;  %3179 = vmatprep.subr.mxu0 %v1834_v61  ;;  %v2081_v6 = vunpack.c.l.bf16 %v737_v60 }
  0xdf   : > { %v989_v5 = vld [vmem:[%s5679_s0 + $0x15e0] sm:$0xff]  ;;  %3250 = vmatprep.subr.mxu1 %v2090_v62  ;;  %3180 = vmatpush2.msra.mxu0 %v1833_v63  ;;  %v2330_v9 = vunpack.c.h.bf16 %v861_v3  ;;  %v2329_v14 = vunpack.c.l.bf16 %v861_v3 }
  0xe0   : > { %3251 = vmatpush2.msra.mxu1 %v2089_v0  ;;  %v271_v8 = vld [vmem:[%s5771_s18 + $0x20] sm:$0xff]  ;;  %3181 = vmatprep.subr.mxu0 %v1826_v1  ;;  %v2586_v13 = vunpack.c.h.bf16 %v989_v5  ;;  %v2585_v15 = vunpack.c.l.bf16 %v989_v5 }
  0xe1   : > { %v857_v10 = vld [vmem:[%s5679_s0 + $0x11c0] sm:$0xff]  ;;  %3252 = vmatprep.subr.mxu1 %v2082_v2  ;;  %3182 = vmatpush2.msra.mxu0 %v1825_v4 }
  0xe2   : > { %v985_v11 = vld [vmem:[%s5679_s0 + $0x15c0] sm:$0xff]  ;;  %3183 = vmatprep.mubr.f32.mxu0 %v272_v7  ;;  %3253 = vmatpush2.msra.mxu1 %v2081_v6  ;;  %v2322_v19 = vunpack.c.h.bf16 %v857_v10  ;;  %v2321_v21 = vunpack.c.l.bf16 %v857_v10 }
  0xe3   : > { %v853_v17 = vld [vmem:[%s5679_s0 + $0x11a0] sm:$0xff]  ;;  %3184 = vmatmul.mubr.f32.vlgmr.msra.gmra.mxu0 %v271_v8  ;;  %v2578_v20 = vunpack.c.h.bf16 %v985_v11  ;;  %3254 = vmatprep.mubr.f32.mxu1 %v274_v12  ;;  %v2577_v22 = vunpack.c.l.bf16 %v985_v11 }
  0xe4   : > { %v981_v18 = vld [vmem:[%s5679_s0 + $0x15a0] sm:$0xff]  ;;  %3261 = vmatprep.subr.mxu0 %v2330_v9  ;;  %3332 = vmatprep.subr.mxu1 %v2586_v13  ;;  %v2314_v25 = vunpack.c.h.bf16 %v853_v17  ;;  %v2313_v27 = vunpack.c.l.bf16 %v853_v17 }
  0xe5   : > { %v849_v23 = vld [vmem:[%s5679_s0 + $0x1180] sm:$0xff]  ;;  %3255 = vmatmul.mubr.f32.vlgmr.msra.gmra.mxu1 %v273_v16  ;;  %v2570_v26 = vunpack.c.h.bf16 %v981_v18  ;;  %3262 = vmatpush1.msra.mxu0 %v2329_v14  ;;  %v2569_v28 = vunpack.c.l.bf16 %v981_v18 }
  0xe6   : > { %v977_v24 = vld [vmem:[%s5679_s0 + $0x1580] sm:$0xff]  ;;  %3333 = vmatpush1.msra.mxu1 %v2585_v15  ;;  %3263 = vmatprep.subr.mxu0 %v2322_v19  ;;  %v2306_v31 = vunpack.c.h.bf16 %v849_v23  ;;  %v2305_v33 = vunpack.c.l.bf16 %v849_v23 }
  0xe7   : > { %v845_v29 = vld [vmem:[%s5679_s0 + $0x1160] sm:$0xff]  ;;  %3334 = vmatprep.subr.mxu1 %v2578_v20  ;;  %v2562_v32 = vunpack.c.h.bf16 %v977_v24  ;;  %3264 = vmatpush1.msra.mxu0 %v2321_v21  ;;  %v2561_v34 = vunpack.c.l.bf16 %v977_v24 }
  0xe8   : > { %v973_v30 = vld [vmem:[%s5679_s0 + $0x1560] sm:$0xff]  ;;  %3335 = vmatpush1.msra.mxu1 %v2577_v22  ;;  %3265 = vmatprep.subr.mxu0 %v2314_v25  ;;  %v2298_v37 = vunpack.c.h.bf16 %v845_v29  ;;  %v2297_v39 = vunpack.c.l.bf16 %v845_v29 }
  0xe9   : > { %v841_v35 = vld [vmem:[%s5679_s0 + $0x1140] sm:$0xff]  ;;  %3336 = vmatprep.subr.mxu1 %v2570_v26  ;;  %v2554_v38 = vunpack.c.h.bf16 %v973_v30  ;;  %3266 = vmatpush1.msra.mxu0 %v2313_v27  ;;  %v2553_v40 = vunpack.c.l.bf16 %v973_v30 }
  0xea   : > { %v969_v36 = vld [vmem:[%s5679_s0 + $0x1540] sm:$0xff]  ;;  %3337 = vmatpush1.msra.mxu1 %v2569_v28  ;;  %3267 = vmatprep.subr.mxu0 %v2306_v31  ;;  %v2290_v43 = vunpack.c.h.bf16 %v841_v35  ;;  %v2289_v45 = vunpack.c.l.bf16 %v841_v35 }
  0xeb   : > { %v837_v41 = vld [vmem:[%s5679_s0 + $0x1120] sm:$0xff]  ;;  %3338 = vmatprep.subr.mxu1 %v2562_v32  ;;  %v2546_v44 = vunpack.c.h.bf16 %v969_v36  ;;  %3268 = vmatpush1.msra.mxu0 %v2305_v33  ;;  %v2545_v46 = vunpack.c.l.bf16 %v969_v36 }
  0xec   : > { %v965_v42 = vld [vmem:[%s5679_s0 + $0x1520] sm:$0xff]  ;;  %3339 = vmatpush1.msra.mxu1 %v2561_v34  ;;  %3269 = vmatprep.subr.mxu0 %v2298_v37  ;;  %v2282_v49 = vunpack.c.h.bf16 %v837_v41  ;;  %v2281_v51 = vunpack.c.l.bf16 %v837_v41 }
  0xed   : > { %v833_v47 = vld [vmem:[%s5679_s0 + $0x1100] sm:$0xff]  ;;  %3340 = vmatprep.subr.mxu1 %v2554_v38  ;;  %v2538_v50 = vunpack.c.h.bf16 %v965_v42  ;;  %3270 = vmatpush1.msra.mxu0 %v2297_v39  ;;  %v2537_v52 = vunpack.c.l.bf16 %v965_v42 }
  0xee   : > { %v961_v48 = vld [vmem:[%s5679_s0 + $0x1500] sm:$0xff]  ;;  %3341 = vmatpush1.msra.mxu1 %v2553_v40  ;;  %3271 = vmatprep.subr.mxu0 %v2290_v43  ;;  %v2274_v55 = vunpack.c.h.bf16 %v833_v47  ;;  %v2273_v57 = vunpack.c.l.bf16 %v833_v47 }
  0xef   : > { %v829_v53 = vld [vmem:[%s5679_s0 + $0x10e0] sm:$0xff]  ;;  %3342 = vmatprep.subr.mxu1 %v2546_v44  ;;  %v2530_v56 = vunpack.c.h.bf16 %v961_v48  ;;  %3272 = vmatpush1.msra.mxu0 %v2289_v45  ;;  %v2529_v58 = vunpack.c.l.bf16 %v961_v48 }
  0xf0   : > { %v957_v54 = vld [vmem:[%s5679_s0 + $0x14e0] sm:$0xff]  ;;  %3343 = vmatpush1.msra.mxu1 %v2545_v46  ;;  %3273 = vmatprep.subr.mxu0 %v2282_v49  ;;  %v2266_v61 = vunpack.c.h.bf16 %v829_v53  ;;  %v2265_v63 = vunpack.c.l.bf16 %v829_v53 }
  0xf1   : > { %v825_v59 = vld [vmem:[%s5679_s0 + $0x10c0] sm:$0xff]  ;;  %3344 = vmatprep.subr.mxu1 %v2538_v50  ;;  %v2522_v62 = vunpack.c.h.bf16 %v957_v54  ;;  %3274 = vmatpush1.msra.mxu0 %v2281_v51  ;;  %v2521_v0 = vunpack.c.l.bf16 %v957_v54 }
  0xf2   : > { %v953_v60 = vld [vmem:[%s5679_s0 + $0x14c0] sm:$0xff]  ;;  %3345 = vmatpush1.msra.mxu1 %v2537_v52  ;;  %3275 = vmatprep.subr.mxu0 %v2274_v55  ;;  %v2258_v3 = vunpack.c.h.bf16 %v825_v59  ;;  %v2257_v5 = vunpack.c.l.bf16 %v825_v59 }
  0xf3   : > { %v821_v1 = vld [vmem:[%s5679_s0 + $0x10a0] sm:$0xff]  ;;  %3346 = vmatprep.subr.mxu1 %v2530_v56  ;;  %v2514_v4 = vunpack.c.h.bf16 %v953_v60  ;;  %3276 = vmatpush1.msra.mxu0 %v2273_v57  ;;  %v2513_v6 = vunpack.c.l.bf16 %v953_v60 }
  0xf4   : > { %v949_v2 = vld [vmem:[%s5679_s0 + $0x14a0] sm:$0xff]  ;;  %3347 = vmatpush1.msra.mxu1 %v2529_v58  ;;  %3277 = vmatprep.subr.mxu0 %v2266_v61  ;;  %v2250_v9 = vunpack.c.h.bf16 %v821_v1  ;;  %v2249_v11 = vunpack.c.l.bf16 %v821_v1 }
  0xf5   : > { %v817_v7 = vld [vmem:[%s5679_s0 + $0x1080] sm:$0xff]  ;;  %3348 = vmatprep.subr.mxu1 %v2522_v62  ;;  %v2506_v10 = vunpack.c.h.bf16 %v949_v2  ;;  %3278 = vmatpush1.msra.mxu0 %v2265_v63  ;;  %v2505_v12 = vunpack.c.l.bf16 %v949_v2 }
  0xf6   : > { %v945_v8 = vld [vmem:[%s5679_s0 + $0x1480] sm:$0xff]  ;;  %3349 = vmatpush1.msra.mxu1 %v2521_v0  ;;  %3279 = vmatprep.subr.mxu0 %v2258_v3  ;;  %v2242_v15 = vunpack.c.h.bf16 %v817_v7  ;;  %v2241_v17 = vunpack.c.l.bf16 %v817_v7 }
  0xf7   : > { %v813_v13 = vld [vmem:[%s5679_s0 + $0x1060] sm:$0xff]  ;;  %3350 = vmatprep.subr.mxu1 %v2514_v4  ;;  %v2498_v16 = vunpack.c.h.bf16 %v945_v8  ;;  %3280 = vmatpush1.msra.mxu0 %v2257_v5  ;;  %v2497_v18 = vunpack.c.l.bf16 %v945_v8 }
  0xf8   : > { %v941_v14 = vld [vmem:[%s5679_s0 + $0x1460] sm:$0xff]  ;;  %3351 = vmatpush1.msra.mxu1 %v2513_v6  ;;  %3281 = vmatprep.subr.mxu0 %v2250_v9  ;;  %v2234_v21 = vunpack.c.h.bf16 %v813_v13  ;;  %v2233_v23 = vunpack.c.l.bf16 %v813_v13 }
  0xf9   : > { %v809_v19 = vld [vmem:[%s5679_s0 + $0x1040] sm:$0xff]  ;;  %3352 = vmatprep.subr.mxu1 %v2506_v10  ;;  %v2490_v22 = vunpack.c.h.bf16 %v941_v14  ;;  %3282 = vmatpush1.msra.mxu0 %v2249_v11  ;;  %v2489_v24 = vunpack.c.l.bf16 %v941_v14 }
  0xfa   : > { %v937_v20 = vld [vmem:[%s5679_s0 + $0x1440] sm:$0xff]  ;;  %3353 = vmatpush1.msra.mxu1 %v2505_v12  ;;  %3283 = vmatprep.subr.mxu0 %v2242_v15  ;;  %v2226_v27 = vunpack.c.h.bf16 %v809_v19  ;;  %v2225_v29 = vunpack.c.l.bf16 %v809_v19 }
  0xfb   : > { %v805_v25 = vld [vmem:[%s5679_s0 + $0x1020] sm:$0xff]  ;;  %3354 = vmatprep.subr.mxu1 %v2498_v16  ;;  %v2482_v28 = vunpack.c.h.bf16 %v937_v20  ;;  %3284 = vmatpush1.msra.mxu0 %v2241_v17  ;;  %v2481_v30 = vunpack.c.l.bf16 %v937_v20 }
  0xfc   : > { %v933_v26 = vld [vmem:[%s5679_s0 + $0x1420] sm:$0xff]  ;;  %3355 = vmatpush1.msra.mxu1 %v2497_v18  ;;  %3285 = vmatprep.subr.mxu0 %v2234_v21  ;;  %v2218_v33 = vunpack.c.h.bf16 %v805_v25  ;;  %v2217_v35 = vunpack.c.l.bf16 %v805_v25 }
  0xfd   : > { %v801_v31 = vld [vmem:[%s5679_s0 + $0x1000] sm:$0xff]  ;;  %3356 = vmatprep.subr.mxu1 %v2490_v22  ;;  %v2474_v34 = vunpack.c.h.bf16 %v933_v26  ;;  %3286 = vmatpush1.msra.mxu0 %v2233_v23  ;;  %v2473_v36 = vunpack.c.l.bf16 %v933_v26 }
  0xfe   : > { %v929_v32 = vld [vmem:[%s5679_s0 + $0x1400] sm:$0xff]  ;;  %3357 = vmatpush1.msra.mxu1 %v2489_v24  ;;  %3287 = vmatprep.subr.mxu0 %v2226_v27  ;;  %v2210_v39 = vunpack.c.h.bf16 %v801_v31  ;;  %v2209_v41 = vunpack.c.l.bf16 %v801_v31 }
  0xff   : > { %v925_v37 = vld [vmem:[%s5679_s0 + $0x13e0] sm:$0xff]  ;;  %3358 = vmatprep.subr.mxu1 %v2482_v28  ;;  %v2466_v40 = vunpack.c.h.bf16 %v929_v32  ;;  %3288 = vmatpush1.msra.mxu0 %v2225_v29  ;;  %v2465_v42 = vunpack.c.l.bf16 %v929_v32 }
 0x100   : > { %v1053_v38 = vld [vmem:[%s5679_s0 + $0x17e0] sm:$0xff]  ;;  %3359 = vmatpush1.msra.mxu1 %v2481_v30  ;;  %3289 = vmatprep.subr.mxu0 %v2218_v33  ;;  %v2458_v45 = vunpack.c.h.bf16 %v925_v37  ;;  %v2457_v47 = vunpack.c.l.bf16 %v925_v37 }
 0x101   : > { %v921_v43 = vld [vmem:[%s5679_s0 + $0x13c0] sm:$0xff]  ;;  %3360 = vmatprep.subr.mxu1 %v2474_v34  ;;  %v2714_v46 = vunpack.c.h.bf16 %v1053_v38  ;;  %3290 = vmatpush1.msra.mxu0 %v2217_v35  ;;  %v2713_v48 = vunpack.c.l.bf16 %v1053_v38 }
 0x102   : > { %v1049_v44 = vld [vmem:[%s5679_s0 + $0x17c0] sm:$0xff]  ;;  %3361 = vmatpush1.msra.mxu1 %v2473_v36  ;;  %3291 = vmatprep.subr.mxu0 %v2210_v39  ;;  %v2450_v51 = vunpack.c.h.bf16 %v921_v43  ;;  %v2449_v53 = vunpack.c.l.bf16 %v921_v43 }
 0x103   : > { %v917_v49 = vld [vmem:[%s5679_s0 + $0x13a0] sm:$0xff]  ;;  %3362 = vmatprep.subr.mxu1 %v2466_v40  ;;  %v2706_v52 = vunpack.c.h.bf16 %v1049_v44  ;;  %3292 = vmatpush1.msra.mxu0 %v2209_v41  ;;  %v2705_v54 = vunpack.c.l.bf16 %v1049_v44 }
 0x104   : > { %v1045_v50 = vld [vmem:[%s5679_s0 + $0x17a0] sm:$0xff]  ;;  %3363 = vmatpush1.msra.mxu1 %v2465_v42  ;;  %3293 = vmatprep.subr.mxu0 %v2458_v45  ;;  %v2442_v57 = vunpack.c.h.bf16 %v917_v49  ;;  %v2441_v59 = vunpack.c.l.bf16 %v917_v49 }
 0x105   : > { %v913_v55 = vld [vmem:[%s5679_s0 + $0x1380] sm:$0xff]  ;;  %3364 = vmatprep.subr.mxu1 %v2714_v46  ;;  %v2698_v58 = vunpack.c.h.bf16 %v1045_v50  ;;  %3294 = vmatpush2.msra.mxu0 %v2457_v47  ;;  %v2697_v60 = vunpack.c.l.bf16 %v1045_v50 }
 0x106   : > { %v1041_v56 = vld [vmem:[%s5679_s0 + $0x1780] sm:$0xff]  ;;  %3365 = vmatpush2.msra.mxu1 %v2713_v48  ;;  %3295 = vmatprep.subr.mxu0 %v2450_v51  ;;  %v2434_v63 = vunpack.c.h.bf16 %v913_v55  ;;  %v2433_v1 = vunpack.c.l.bf16 %v913_v55 }
 0x107   : > { %v909_v61 = vld [vmem:[%s5679_s0 + $0x1360] sm:$0xff]  ;;  %3366 = vmatprep.subr.mxu1 %v2706_v52  ;;  %v2690_v0 = vunpack.c.h.bf16 %v1041_v56  ;;  %3296 = vmatpush2.msra.mxu0 %v2449_v53  ;;  %v2689_v2 = vunpack.c.l.bf16 %v1041_v56 }
 0x108   : > { %v1037_v62 = vld [vmem:[%s5679_s0 + $0x1760] sm:$0xff]  ;;  %3367 = vmatpush2.msra.mxu1 %v2705_v54  ;;  %3297 = vmatprep.subr.mxu0 %v2442_v57  ;;  %v2426_v5 = vunpack.c.h.bf16 %v909_v61  ;;  %v2425_v7 = vunpack.c.l.bf16 %v909_v61 }
 0x109   : > { %v905_v3 = vld [vmem:[%s5679_s0 + $0x1340] sm:$0xff]  ;;  %3368 = vmatprep.subr.mxu1 %v2698_v58  ;;  %v2682_v6 = vunpack.c.h.bf16 %v1037_v62  ;;  %3298 = vmatpush2.msra.mxu0 %v2441_v59  ;;  %v2681_v8 = vunpack.c.l.bf16 %v1037_v62 }
 0x10a   : > { %v1033_v4 = vld [vmem:[%s5679_s0 + $0x1740] sm:$0xff]  ;;  %3369 = vmatpush2.msra.mxu1 %v2697_v60  ;;  %3299 = vmatprep.subr.mxu0 %v2434_v63  ;;  %v2418_v11 = vunpack.c.h.bf16 %v905_v3  ;;  %v2417_v13 = vunpack.c.l.bf16 %v905_v3 }
 0x10b   : > { %v901_v9 = vld [vmem:[%s5679_s0 + $0x1320] sm:$0xff]  ;;  %3370 = vmatprep.subr.mxu1 %v2690_v0  ;;  %v2674_v12 = vunpack.c.h.bf16 %v1033_v4  ;;  %3300 = vmatpush2.msra.mxu0 %v2433_v1  ;;  %v2673_v14 = vunpack.c.l.bf16 %v1033_v4 }
 0x10c   : > { %v1029_v10 = vld [vmem:[%s5679_s0 + $0x1720] sm:$0xff]  ;;  %3371 = vmatpush2.msra.mxu1 %v2689_v2  ;;  %3301 = vmatprep.subr.mxu0 %v2426_v5  ;;  %v2410_v17 = vunpack.c.h.bf16 %v901_v9  ;;  %v2409_v19 = vunpack.c.l.bf16 %v901_v9  ;;  %v350_v9 = vld [vmem:[%s5679_s0 + $0x1e8] sm:$0xff] }
 0x10d   : > { %v897_v15 = vld [vmem:[%s5679_s0 + $0x1300] sm:$0xff]  ;;  %3372 = vmatprep.subr.mxu1 %v2682_v6  ;;  %v2666_v18 = vunpack.c.h.bf16 %v1029_v10  ;;  %3302 = vmatpush2.msra.mxu0 %v2425_v7  ;;  %v2665_v20 = vunpack.c.l.bf16 %v1029_v10 }
 0x10e   : > { %v1025_v16 = vld [vmem:[%s5679_s0 + $0x1700] sm:$0xff]  ;;  %3373 = vmatpush2.msra.mxu1 %v2681_v8  ;;  %3303 = vmatprep.subr.mxu0 %v2418_v11  ;;  %v2402_v23 = vunpack.c.h.bf16 %v897_v15  ;;  %v2401_v25 = vunpack.c.l.bf16 %v897_v15  ;;  %v276_v11 = vld [vmem:[%s5771_s18 + $0x48] sm:$0xff] }
 0x10f   : > { %v893_v21 = vld [vmem:[%s5679_s0 + $0x12e0] sm:$0xff]  ;;  %3374 = vmatprep.subr.mxu1 %v2674_v12  ;;  %v2658_v24 = vunpack.c.h.bf16 %v1025_v16  ;;  %3304 = vmatpush2.msra.mxu0 %v2417_v13  ;;  %v2657_v26 = vunpack.c.l.bf16 %v1025_v16  ;;  %v346_v15 = vld [vmem:[%s5679_s0 + $0x1c8] sm:$0xff]  ;;  %v278_v16 = vld [vmem:[%s5771_s18 + $0x58] sm:$0xff] }
 0x110   : > { %v1021_v22 = vld [vmem:[%s5679_s0 + $0x16e0] sm:$0xff]  ;;  %3375 = vmatpush2.msra.mxu1 %v2673_v14  ;;  %3305 = vmatprep.subr.mxu0 %v2410_v17  ;;  %v2394_v29 = vunpack.c.h.bf16 %v893_v21  ;;  %v2393_v31 = vunpack.c.l.bf16 %v893_v21  ;;  %v1308_v17 = vunpack.c.h.bf16 %v350_v9 }
 0x111   : > { %v889_v27 = vld [vmem:[%s5679_s0 + $0x12c0] sm:$0xff]  ;;  %3376 = vmatprep.subr.mxu1 %v2666_v18  ;;  %v2650_v30 = vunpack.c.h.bf16 %v1021_v22  ;;  %3306 = vmatpush2.msra.mxu0 %v2409_v19  ;;  %v2649_v32 = vunpack.c.l.bf16 %v1021_v22  ;;  %v1307_v19 = vunpack.c.l.bf16 %v350_v9  ;;  %v342_v22 = vld [vmem:[%s5679_s0 + $0x1a8] sm:$0xff] }
 0x112   : > { %v1017_v28 = vld [vmem:[%s5679_s0 + $0x16c0] sm:$0xff]  ;;  %3377 = vmatpush2.msra.mxu1 %v2665_v20  ;;  %3307 = vmatprep.subr.mxu0 %v2402_v23  ;;  %v2386_v35 = vunpack.c.h.bf16 %v889_v27  ;;  %v2385_v37 = vunpack.c.l.bf16 %v889_v27  ;;  %v277_v20 = vld [vmem:[%s5771_s18 + $0x50] sm:$0xff] }
 0x113   : > { %v885_v33 = vld [vmem:[%s5679_s0 + $0x12a0] sm:$0xff]  ;;  %3378 = vmatprep.subr.mxu1 %v2658_v24  ;;  %v2642_v36 = vunpack.c.h.bf16 %v1017_v28  ;;  %3308 = vmatpush2.msra.mxu0 %v2401_v25  ;;  %v2641_v38 = vunpack.c.l.bf16 %v1017_v28  ;;  %v1300_v24 = vunpack.c.h.bf16 %v346_v15  ;;  %v338_v28 = vld [vmem:[%s5679_s0 + $0x188] sm:$0xff] }
 0x114   : > { %v1013_v34 = vld [vmem:[%s5679_s0 + $0x16a0] sm:$0xff]  ;;  %3379 = vmatpush2.msra.mxu1 %v2657_v26  ;;  %3309 = vmatprep.subr.mxu0 %v2394_v29  ;;  %v2378_v41 = vunpack.c.h.bf16 %v885_v33  ;;  %v2377_v43 = vunpack.c.l.bf16 %v885_v33  ;;  %v1299_v26 = vunpack.c.l.bf16 %v346_v15 }
 0x115   : > { %v881_v39 = vld [vmem:[%s5679_s0 + $0x1280] sm:$0xff]  ;;  %3380 = vmatprep.subr.mxu1 %v2650_v30  ;;  %v2634_v42 = vunpack.c.h.bf16 %v1013_v34  ;;  %3310 = vmatpush2.msra.mxu0 %v2393_v31  ;;  %v2633_v44 = vunpack.c.l.bf16 %v1013_v34  ;;  %v1292_v30 = vunpack.c.h.bf16 %v342_v22  ;;  %v334_v34 = vld [vmem:[%s5679_s0 + $0x168] sm:$0xff] }
 0x116   : > { %v1009_v40 = vld [vmem:[%s5679_s0 + $0x1680] sm:$0xff]  ;;  %3381 = vmatpush2.msra.mxu1 %v2649_v32  ;;  %3311 = vmatprep.subr.mxu0 %v2386_v35  ;;  %v2370_v47 = vunpack.c.h.bf16 %v881_v39  ;;  %v2369_v49 = vunpack.c.l.bf16 %v881_v39  ;;  %v1291_v32 = vunpack.c.l.bf16 %v342_v22 }
 0x117   : > { %v877_v45 = vld [vmem:[%s5679_s0 + $0x1260] sm:$0xff]  ;;  %3382 = vmatprep.subr.mxu1 %v2642_v36  ;;  %v2626_v48 = vunpack.c.h.bf16 %v1009_v40  ;;  %3312 = vmatpush2.msra.mxu0 %v2385_v37  ;;  %v2625_v50 = vunpack.c.l.bf16 %v1009_v40  ;;  %v1284_v36 = vunpack.c.h.bf16 %v338_v28  ;;  %v330_v40 = vld [vmem:[%s5679_s0 + $0x148] sm:$0xff] }
 0x118   : > { %v1005_v46 = vld [vmem:[%s5679_s0 + $0x1660] sm:$0xff]  ;;  %3383 = vmatpush2.msra.mxu1 %v2641_v38  ;;  %3313 = vmatprep.subr.mxu0 %v2378_v41  ;;  %v2362_v53 = vunpack.c.h.bf16 %v877_v45  ;;  %v2361_v55 = vunpack.c.l.bf16 %v877_v45  ;;  %v1283_v38 = vunpack.c.l.bf16 %v338_v28 }
 0x119   : > { %v873_v51 = vld [vmem:[%s5679_s0 + $0x1240] sm:$0xff]  ;;  %3384 = vmatprep.subr.mxu1 %v2634_v42  ;;  %v2618_v54 = vunpack.c.h.bf16 %v1005_v46  ;;  %3314 = vmatpush2.msra.mxu0 %v2377_v43  ;;  %v2617_v56 = vunpack.c.l.bf16 %v1005_v46  ;;  %v1276_v42 = vunpack.c.h.bf16 %v334_v34  ;;  %v326_v46 = vld [vmem:[%s5679_s0 + $0x128] sm:$0xff] }
 0x11a   : > { %v1001_v52 = vld [vmem:[%s5679_s0 + $0x1640] sm:$0xff]  ;;  %3385 = vmatpush2.msra.mxu1 %v2633_v44  ;;  %3315 = vmatprep.subr.mxu0 %v2370_v47  ;;  %v2354_v59 = vunpack.c.h.bf16 %v873_v51  ;;  %v2353_v61 = vunpack.c.l.bf16 %v873_v51  ;;  %v1275_v44 = vunpack.c.l.bf16 %v334_v34 }
 0x11b   : > { %v869_v57 = vld [vmem:[%s5679_s0 + $0x1220] sm:$0xff]  ;;  %3386 = vmatprep.subr.mxu1 %v2626_v48  ;;  %v2610_v60 = vunpack.c.h.bf16 %v1001_v52  ;;  %3316 = vmatpush2.msra.mxu0 %v2369_v49  ;;  %v2609_v62 = vunpack.c.l.bf16 %v1001_v52  ;;  %v1268_v48 = vunpack.c.h.bf16 %v330_v40  ;;  %v322_v52 = vld [vmem:[%s5679_s0 + $0x108] sm:$0xff] }
 0x11c   : > { %v997_v58 = vld [vmem:[%s5679_s0 + $0x1620] sm:$0xff]  ;;  %3387 = vmatpush2.msra.mxu1 %v2625_v50  ;;  %3317 = vmatprep.subr.mxu0 %v2362_v53  ;;  %v2346_v1 = vunpack.c.h.bf16 %v869_v57  ;;  %v2345_v3 = vunpack.c.l.bf16 %v869_v57  ;;  %v1267_v50 = vunpack.c.l.bf16 %v330_v40 }
 0x11d   : > { %v865_v63 = vld [vmem:[%s5679_s0 + $0x1200] sm:$0xff]  ;;  %3388 = vmatprep.subr.mxu1 %v2618_v54  ;;  %v2602_v2 = vunpack.c.h.bf16 %v997_v58  ;;  %3318 = vmatpush2.msra.mxu0 %v2361_v55  ;;  %v2601_v4 = vunpack.c.l.bf16 %v997_v58  ;;  %v1260_v54 = vunpack.c.h.bf16 %v326_v46  ;;  %v318_v58 = vld [vmem:[%s5679_s0 + $0xe8] sm:$0xff] }
 0x11e   : > { %v993_v0 = vld [vmem:[%s5679_s0 + $0x1600] sm:$0xff]  ;;  %3389 = vmatpush2.msra.mxu1 %v2617_v56  ;;  %3319 = vmatprep.subr.mxu0 %v2354_v59  ;;  %v2338_v5 = vunpack.c.h.bf16 %v865_v63  ;;  %v2337_v8 = vunpack.c.l.bf16 %v865_v63  ;;  %v1259_v56 = vunpack.c.l.bf16 %v326_v46 }
 0x11f   : > { %3390 = vmatprep.subr.mxu1 %v2610_v60  ;;  %v2594_v6 = vunpack.c.h.bf16 %v993_v0  ;;  %v1117_v7 = vld [vmem:[%s5679_s0 + $0x19e0] sm:$0xff]  ;;  %3320 = vmatpush2.msra.mxu0 %v2353_v61  ;;  %v2593_v10 = vunpack.c.l.bf16 %v993_v0  ;;  %v1252_v60 = vunpack.c.h.bf16 %v322_v52  ;;  %v314_v0 = vld [vmem:[%s5679_s0 + $0xc8] sm:$0xff] }
 0x120   : > { %3391 = vmatpush2.msra.mxu1 %v2609_v62  ;;  %3321 = vmatprep.subr.mxu0 %v2346_v1  ;;  %v275_v12 = vld [vmem:[%s5771_s18 + $0x40] sm:$0xff]  ;;  %v2842_v13 = vunpack.c.h.bf16 %v1117_v7  ;;  %v2841_v18 = vunpack.c.l.bf16 %v1117_v7  ;;  %v1251_v62 = vunpack.c.l.bf16 %v322_v52 }
 0x121   : > { %3392 = vmatprep.subr.mxu1 %v2602_v2  ;;  %3322 = vmatpush2.msra.mxu0 %v2345_v3  ;;  %v1113_v14 = vld [vmem:[%s5679_s0 + $0x19c0] sm:$0xff]  ;;  %v1244_v2 = vunpack.c.h.bf16 %v318_v58 }
 0x122   : > { %3393 = vmatpush2.msra.mxu1 %v2601_v4  ;;  %3323 = vmatprep.subr.mxu0 %v2338_v5  ;;  %v1109_v21 = vld [vmem:[%s5679_s0 + $0x19a0] sm:$0xff]  ;;  %v2834_v23 = vunpack.c.h.bf16 %v1113_v14  ;;  %v2833_v25 = vunpack.c.l.bf16 %v1113_v14  ;;  %v1243_v4 = vunpack.c.l.bf16 %v318_v58 }
 0x123   : > { %3394 = vmatprep.subr.mxu1 %v2594_v6  ;;  %3324 = vmatpush2.msra.mxu0 %v2337_v8  ;;  %v1105_v27 = vld [vmem:[%s5679_s0 + $0x1980] sm:$0xff]  ;;  %v2826_v29 = vunpack.c.h.bf16 %v1109_v21  ;;  %v2825_v31 = vunpack.c.l.bf16 %v1109_v21  ;;  %v310_v6 = vld [vmem:[%s5679_s0 + $0xa8] sm:$0xff]  ;;  %v1236_v8 = vunpack.c.h.bf16 %v314_v0 }
 0x124   : > { %3325 = vmatprep.mubr.f32.mxu0 %v276_v11  ;;  %3395 = vmatpush2.msra.mxu1 %v2593_v10  ;;  %v1101_v33 = vld [vmem:[%s5679_s0 + $0x1960] sm:$0xff]  ;;  %v2818_v35 = vunpack.c.h.bf16 %v1105_v27  ;;  %v2817_v37 = vunpack.c.l.bf16 %v1105_v27  ;;  %v1235_v10 = vunpack.c.l.bf16 %v314_v0  ;;  %v1228_v14 = vunpack.c.h.bf16 %v310_v6 }
 0x125   : > { %3326 = vmatmul.mubr.f32.vlgmr.msra.gmra.mxu0 %v275_v12  ;;  %3396 = vmatprep.mubr.f32.mxu1 %v278_v16  ;;  %v1097_v39 = vld [vmem:[%s5679_s0 + $0x1940] sm:$0xff]  ;;  %v2810_v41 = vunpack.c.h.bf16 %v1101_v33  ;;  %v2809_v43 = vunpack.c.l.bf16 %v1101_v33  ;;  %v306_v12 = vld [vmem:[%s5679_s0 + $0x88] sm:$0xff]  ;;  %v1227_v16 = vunpack.c.l.bf16 %v310_v6 }
 0x126   : > { %3403 = vmatprep.subr.mxu0 %v2842_v13  ;;  %3474 = vmatprep.subr.mxu1 %v1308_v17  ;;  %v1093_v45 = vld [vmem:[%s5679_s0 + $0x1920] sm:$0xff]  ;;  %v2802_v47 = vunpack.c.h.bf16 %v1097_v39  ;;  %v2801_v49 = vunpack.c.l.bf16 %v1097_v39  ;;  %v1219_v22 = vunpack.c.l.bf16 %v306_v12 }
 0x127   : > { %3397 = vmatmul.mubr.f32.vlgmr.msra.gmra.mxu1 %v277_v20  ;;  %3404 = vmatpush1.msra.mxu0 %v2841_v18  ;;  %v1089_v51 = vld [vmem:[%s5679_s0 + $0x1900] sm:$0xff]  ;;  %v2794_v53 = vunpack.c.h.bf16 %v1093_v45  ;;  %v2793_v55 = vunpack.c.l.bf16 %v1093_v45  ;;  %v302_v18 = vld [vmem:[%s5679_s0 + $0x68] sm:$0xff]  ;;  %v1220_v20 = vunpack.c.h.bf16 %v306_v12 }
 0x128   : > { %3475 = vmatpush1.msra.mxu1 %v1307_v19  ;;  %3405 = vmatprep.subr.mxu0 %v2834_v23  ;;  %v1085_v57 = vld [vmem:[%s5679_s0 + $0x18e0] sm:$0xff]  ;;  %v2786_v59 = vunpack.c.h.bf16 %v1089_v51  ;;  %v2785_v61 = vunpack.c.l.bf16 %v1089_v51  ;;  %v1211_v28 = vunpack.c.l.bf16 %v302_v18 }
 0x129   : > { %3476 = vmatprep.subr.mxu1 %v1300_v24  ;;  %3406 = vmatpush1.msra.mxu0 %v2833_v25  ;;  %v1081_v63 = vld [vmem:[%s5679_s0 + $0x18c0] sm:$0xff]  ;;  %v2778_v1 = vunpack.c.h.bf16 %v1085_v57  ;;  %v2777_v3 = vunpack.c.l.bf16 %v1085_v57  ;;  %v298_v24 = vld [vmem:[%s5679_s0 + $0x48] sm:$0xff] }
 0x12a   : > { %3477 = vmatpush1.msra.mxu1 %v1299_v26  ;;  %3407 = vmatprep.subr.mxu0 %v2826_v29  ;;  %v1077_v5 = vld [vmem:[%s5679_s0 + $0x18a0] sm:$0xff]  ;;  %v2770_v7 = vunpack.c.h.bf16 %v1081_v63  ;;  %v2769_v9 = vunpack.c.l.bf16 %v1081_v63  ;;  %v1212_v26 = vunpack.c.h.bf16 %v302_v18  ;;  %v1203_v34 = vunpack.c.l.bf16 %v298_v24 }
 0x12b   : > { %3478 = vmatprep.subr.mxu1 %v1292_v30  ;;  %3408 = vmatpush1.msra.mxu0 %v2825_v31  ;;  %v1073_v11 = vld [vmem:[%s5679_s0 + $0x1880] sm:$0xff]  ;;  %v2762_v13 = vunpack.c.h.bf16 %v1077_v5  ;;  %v2761_v15 = vunpack.c.l.bf16 %v1077_v5  ;;  %v294_v30 = vld [vmem:[%s5679_s0 + $0x28] sm:$0xff] }
 0x12c   : > { %3479 = vmatpush1.msra.mxu1 %v1291_v32  ;;  %3409 = vmatprep.subr.mxu0 %v2818_v35  ;;  %v1069_v17 = vld [vmem:[%s5679_s0 + $0x1860] sm:$0xff]  ;;  %v2754_v19 = vunpack.c.h.bf16 %v1073_v11  ;;  %v2753_v21 = vunpack.c.l.bf16 %v1073_v11  ;;  %v1204_v32 = vunpack.c.h.bf16 %v298_v24  ;;  %v1195_v40 = vunpack.c.l.bf16 %v294_v30 }
 0x12d   : > { %3480 = vmatprep.subr.mxu1 %v1284_v36  ;;  %3410 = vmatpush1.msra.mxu0 %v2817_v37  ;;  %v1065_v23 = vld [vmem:[%s5679_s0 + $0x1840] sm:$0xff]  ;;  %v2746_v25 = vunpack.c.h.bf16 %v1069_v17  ;;  %v2745_v27 = vunpack.c.l.bf16 %v1069_v17  ;;  %v290_v36 = vld [vmem:[%s5679_s0 + $0x8] sm:$0xff] }
 0x12e   : > { %3481 = vmatpush1.msra.mxu1 %v1283_v38  ;;  %3411 = vmatprep.subr.mxu0 %v2810_v41  ;;  %v1061_v29 = vld [vmem:[%s5679_s0 + $0x1820] sm:$0xff]  ;;  %v2738_v31 = vunpack.c.h.bf16 %v1065_v23  ;;  %v2737_v33 = vunpack.c.l.bf16 %v1065_v23  ;;  %v1196_v38 = vunpack.c.h.bf16 %v294_v30  ;;  %v1187_v46 = vunpack.c.l.bf16 %v290_v36 }
 0x12f   : > { %3482 = vmatprep.subr.mxu1 %v1276_v42  ;;  %3412 = vmatpush1.msra.mxu0 %v2809_v43  ;;  %v1057_v35 = vld [vmem:[%s5679_s0 + $0x1800] sm:$0xff]  ;;  %v2730_v37 = vunpack.c.h.bf16 %v1061_v29  ;;  %v2729_v39 = vunpack.c.l.bf16 %v1061_v29  ;;  %v414_v42 = vld [vmem:[%s5679_s0 + $0x3e8] sm:$0xff] }
 0x130   : > { %3483 = vmatpush1.msra.mxu1 %v1275_v44  ;;  %3413 = vmatprep.subr.mxu0 %v2802_v47  ;;  %v1181_v41 = vld [vmem:[%s5679_s0 + $0x1be0] sm:$0xff]  ;;  %v2722_v43 = vunpack.c.h.bf16 %v1057_v35  ;;  %v1188_v44 = vunpack.c.h.bf16 %v290_v36  ;;  %v2721_v45 = vunpack.c.l.bf16 %v1057_v35  ;;  %v1435_v52 = vunpack.c.l.bf16 %v414_v42 }
 0x131   : > { %3484 = vmatprep.subr.mxu1 %v1268_v48  ;;  %3414 = vmatpush1.msra.mxu0 %v2801_v49  ;;  %v1177_v47 = vld [vmem:[%s5679_s0 + $0x1bc0] sm:$0xff]  ;;  %v410_v48 = vld [vmem:[%s5679_s0 + $0x3c8] sm:$0xff]  ;;  %v2970_v49 = vunpack.c.h.bf16 %v1181_v41  ;;  %v2969_v51 = vunpack.c.l.bf16 %v1181_v41 }
 0x132   : > { %3485 = vmatpush1.msra.mxu1 %v1267_v50  ;;  %3415 = vmatprep.subr.mxu0 %v2794_v53  ;;  %v1436_v50 = vunpack.c.h.bf16 %v414_v42  ;;  %v1173_v53 = vld [vmem:[%s5679_s0 + $0x1ba0] sm:$0xff]  ;;  %v2961_v57 = vunpack.c.l.bf16 %v1177_v47  ;;  %v1427_v58 = vunpack.c.l.bf16 %v410_v48 }
 0x133   : > { %3486 = vmatprep.subr.mxu1 %v1260_v54  ;;  %3416 = vmatpush1.msra.mxu0 %v2793_v55  ;;  %v406_v54 = vld [vmem:[%s5679_s0 + $0x3a8] sm:$0xff]  ;;  %v2962_v55 = vunpack.c.h.bf16 %v1177_v47  ;;  %v2953_v63 = vunpack.c.l.bf16 %v1173_v53 }
 0x134   : > { %3487 = vmatpush1.msra.mxu1 %v1259_v56  ;;  %3417 = vmatprep.subr.mxu0 %v2786_v59  ;;  %v1428_v56 = vunpack.c.h.bf16 %v410_v48  ;;  %v1169_v59 = vld [vmem:[%s5679_s0 + $0x1b80] sm:$0xff]  ;;  %v1419_v0 = vunpack.c.l.bf16 %v406_v54 }
 0x135   : > { %3488 = vmatprep.subr.mxu1 %v1252_v60  ;;  %3418 = vmatpush1.msra.mxu0 %v2785_v61  ;;  %v402_v60 = vld [vmem:[%s5679_s0 + $0x388] sm:$0xff]  ;;  %v2954_v61 = vunpack.c.h.bf16 %v1173_v53  ;;  %v2945_v5 = vunpack.c.l.bf16 %v1169_v59 }
 0x136   : > { %3489 = vmatpush1.msra.mxu1 %v1251_v62  ;;  %3419 = vmatprep.subr.mxu0 %v2778_v1  ;;  %v1420_v62 = vunpack.c.h.bf16 %v406_v54  ;;  %v1165_v1 = vld [vmem:[%s5679_s0 + $0x1b60] sm:$0xff]  ;;  %v1411_v6 = vunpack.c.l.bf16 %v402_v60 }
 0x137   : > { %3490 = vmatprep.subr.mxu1 %v1244_v2  ;;  %3420 = vmatpush1.msra.mxu0 %v2777_v3  ;;  %v398_v2 = vld [vmem:[%s5679_s0 + $0x368] sm:$0xff]  ;;  %v2946_v3 = vunpack.c.h.bf16 %v1169_v59  ;;  %v2937_v11 = vunpack.c.l.bf16 %v1165_v1 }
 0x138   : > { %3491 = vmatpush1.msra.mxu1 %v1243_v4  ;;  %3421 = vmatprep.subr.mxu0 %v2770_v7  ;;  %v1412_v4 = vunpack.c.h.bf16 %v402_v60  ;;  %v1161_v7 = vld [vmem:[%s5679_s0 + $0x1b40] sm:$0xff]  ;;  %v1403_v12 = vunpack.c.l.bf16 %v398_v2 }
 0x139   : > { %3492 = vmatprep.subr.mxu1 %v1236_v8  ;;  %3422 = vmatpush1.msra.mxu0 %v2769_v9  ;;  %v394_v8 = vld [vmem:[%s5679_s0 + $0x348] sm:$0xff]  ;;  %v2938_v9 = vunpack.c.h.bf16 %v1165_v1  ;;  %v2929_v17 = vunpack.c.l.bf16 %v1161_v7 }
 0x13a   : > { %3493 = vmatpush1.msra.mxu1 %v1235_v10  ;;  %3423 = vmatprep.subr.mxu0 %v2762_v13  ;;  %v1404_v10 = vunpack.c.h.bf16 %v398_v2  ;;  %v1157_v13 = vld [vmem:[%s5679_s0 + $0x1b20] sm:$0xff]  ;;  %v1395_v18 = vunpack.c.l.bf16 %v394_v8 }
 0x13b   : > { %3494 = vmatprep.subr.mxu1 %v1228_v14  ;;  %3424 = vmatpush1.msra.mxu0 %v2761_v15  ;;  %v390_v14 = vld [vmem:[%s5679_s0 + $0x328] sm:$0xff]  ;;  %v2930_v15 = vunpack.c.h.bf16 %v1161_v7  ;;  %v2921_v23 = vunpack.c.l.bf16 %v1157_v13 }
 0x13c   : > { %3495 = vmatpush1.msra.mxu1 %v1227_v16  ;;  %3425 = vmatprep.subr.mxu0 %v2754_v19  ;;  %v1396_v16 = vunpack.c.h.bf16 %v394_v8  ;;  %v1153_v19 = vld [vmem:[%s5679_s0 + $0x1b00] sm:$0xff]  ;;  %v1387_v24 = vunpack.c.l.bf16 %v390_v14 }
 0x13d   : > { %3496 = vmatprep.subr.mxu1 %v1220_v20  ;;  %3426 = vmatpush1.msra.mxu0 %v2753_v21  ;;  %v386_v20 = vld [vmem:[%s5679_s0 + $0x308] sm:$0xff]  ;;  %v2922_v21 = vunpack.c.h.bf16 %v1157_v13  ;;  %v2913_v29 = vunpack.c.l.bf16 %v1153_v19 }
 0x13e   : > { %3497 = vmatpush1.msra.mxu1 %v1219_v22  ;;  %3427 = vmatprep.subr.mxu0 %v2746_v25  ;;  %v1388_v22 = vunpack.c.h.bf16 %v390_v14  ;;  %v1149_v25 = vld [vmem:[%s5679_s0 + $0x1ae0] sm:$0xff]  ;;  %v1379_v30 = vunpack.c.l.bf16 %v386_v20  ;;  %v606_v13 = vld [vmem:[%s5679_s0 + $0x9e8] sm:$0xff] }
 0x13f   : > { %3498 = vmatprep.subr.mxu1 %v1212_v26  ;;  %3428 = vmatpush1.msra.mxu0 %v2745_v27  ;;  %v382_v26 = vld [vmem:[%s5679_s0 + $0x2e8] sm:$0xff]  ;;  %v2914_v27 = vunpack.c.h.bf16 %v1153_v19  ;;  %v2905_v35 = vunpack.c.l.bf16 %v1149_v25 }
 0x140   : > { %3499 = vmatpush1.msra.mxu1 %v1211_v28  ;;  %3429 = vmatprep.subr.mxu0 %v2738_v31  ;;  %v1380_v28 = vunpack.c.h.bf16 %v386_v20  ;;  %v1145_v31 = vld [vmem:[%s5679_s0 + $0x1ac0] sm:$0xff]  ;;  %v1371_v36 = vunpack.c.l.bf16 %v382_v26  ;;  %v602_v19 = vld [vmem:[%s5679_s0 + $0x9c8] sm:$0xff]  ;;  %v1820_v20 = vunpack.c.h.bf16 %v606_v13 }
 0x141   : > { %3500 = vmatprep.subr.mxu1 %v1204_v32  ;;  %3430 = vmatpush1.msra.mxu0 %v2737_v33  ;;  %v378_v32 = vld [vmem:[%s5679_s0 + $0x2c8] sm:$0xff]  ;;  %v2906_v33 = vunpack.c.h.bf16 %v1149_v25  ;;  %v2897_v41 = vunpack.c.l.bf16 %v1145_v31 }
 0x142   : > { %3501 = vmatpush1.msra.mxu1 %v1203_v34  ;;  %3431 = vmatprep.subr.mxu0 %v2730_v37  ;;  %v1372_v34 = vunpack.c.h.bf16 %v382_v26  ;;  %v1141_v37 = vld [vmem:[%s5679_s0 + $0x1aa0] sm:$0xff]  ;;  %v1363_v42 = vunpack.c.l.bf16 %v378_v32  ;;  %v1812_v26 = vunpack.c.h.bf16 %v602_v19 }
 0x143   : > { %3502 = vmatprep.subr.mxu1 %v1196_v38  ;;  %3432 = vmatpush1.msra.mxu0 %v2729_v39  ;;  %v374_v38 = vld [vmem:[%s5679_s0 + $0x2a8] sm:$0xff]  ;;  %v2898_v39 = vunpack.c.h.bf16 %v1145_v31  ;;  %v2889_v47 = vunpack.c.l.bf16 %v1141_v37 }
 0x144   : > { %3503 = vmatpush1.msra.mxu1 %v1195_v40  ;;  %3433 = vmatprep.subr.mxu0 %v2722_v43  ;;  %v1364_v40 = vunpack.c.h.bf16 %v378_v32  ;;  %v1137_v43 = vld [vmem:[%s5679_s0 + $0x1a80] sm:$0xff]  ;;  %v1355_v48 = vunpack.c.l.bf16 %v374_v38  ;;  %v594_v31 = vld [vmem:[%s5679_s0 + $0x988] sm:$0xff] }
 0x145   : > { %3504 = vmatprep.subr.mxu1 %v1188_v44  ;;  %3434 = vmatpush1.msra.mxu0 %v2721_v45  ;;  %v370_v44 = vld [vmem:[%s5679_s0 + $0x288] sm:$0xff]  ;;  %v2890_v45 = vunpack.c.h.bf16 %v1141_v37  ;;  %v2881_v53 = vunpack.c.l.bf16 %v1137_v43  ;;  %v5294_v32 = vld [vmem:[%s5771_s18] sm:$0xff] }
 0x146   : > { %3505 = vmatpush1.msra.mxu1 %v1187_v46  ;;  %3435 = vmatprep.subr.mxu0 %v2970_v49  ;;  %v1356_v46 = vunpack.c.h.bf16 %v374_v38  ;;  %v1133_v49 = vld [vmem:[%s5679_s0 + $0x1a60] sm:$0xff]  ;;  %v1347_v54 = vunpack.c.l.bf16 %v370_v44  ;;  %v462_v37 = vld [vmem:[%s5679_s0 + $0x568] sm:$0xff] }
 0x147   : > { %3506 = vmatprep.subr.mxu1 %v1436_v50  ;;  %3436 = vmatpush2.msra.mxu0 %v2969_v51  ;;  %v366_v50 = vld [vmem:[%s5679_s0 + $0x268] sm:$0xff]  ;;  %v2882_v51 = vunpack.c.h.bf16 %v1137_v43  ;;  %v2873_v59 = vunpack.c.l.bf16 %v1133_v49 }
 0x148   : > { %3507 = vmatpush2.msra.mxu1 %v1435_v52  ;;  %3437 = vmatprep.subr.mxu0 %v2962_v55  ;;  %v1348_v52 = vunpack.c.h.bf16 %v370_v44  ;;  %v1129_v55 = vld [vmem:[%s5679_s0 + $0x1a40] sm:$0xff]  ;;  %v1339_v60 = vunpack.c.l.bf16 %v366_v50  ;;  %v590_v38 = vld [vmem:[%s5679_s0 + $0x968] sm:$0xff] }
 0x149   : > { %3508 = vmatprep.subr.mxu1 %v1428_v56  ;;  %3438 = vmatpush2.msra.mxu0 %v2961_v57  ;;  %v362_v56 = vld [vmem:[%s5679_s0 + $0x248] sm:$0xff]  ;;  %v2874_v57 = vunpack.c.h.bf16 %v1133_v49  ;;  %v2865_v1 = vunpack.c.l.bf16 %v1129_v55 }
 0x14a   : > { %3509 = vmatpush2.msra.mxu1 %v1427_v58  ;;  %3439 = vmatprep.subr.mxu0 %v2954_v61  ;;  %v1340_v58 = vunpack.c.h.bf16 %v366_v50  ;;  %v1125_v61 = vld [vmem:[%s5679_s0 + $0x1a20] sm:$0xff]  ;;  %v1331_v2 = vunpack.c.l.bf16 %v362_v56  ;;  %v458_v43 = vld [vmem:[%s5679_s0 + $0x548] sm:$0xff] }
 0x14b   : > { %3510 = vmatprep.subr.mxu1 %v1420_v62  ;;  %3440 = vmatpush2.msra.mxu0 %v2953_v63  ;;  %v358_v62 = vld [vmem:[%s5679_s0 + $0x228] sm:$0xff]  ;;  %v2866_v63 = vunpack.c.h.bf16 %v1129_v55  ;;  %v2857_v7 = vunpack.c.l.bf16 %v1125_v61 }
 0x14c   : > { %3511 = vmatpush2.msra.mxu1 %v1419_v0  ;;  %3441 = vmatprep.subr.mxu0 %v2946_v3  ;;  %v1332_v0 = vunpack.c.h.bf16 %v362_v56  ;;  %v1121_v3 = vld [vmem:[%s5679_s0 + $0x1a00] sm:$0xff]  ;;  %v1323_v8 = vunpack.c.l.bf16 %v358_v62  ;;  %v586_v44 = vld [vmem:[%s5679_s0 + $0x948] sm:$0xff] }
 0x14d   : > { %3512 = vmatprep.subr.mxu1 %v1412_v4  ;;  %3442 = vmatpush2.msra.mxu0 %v2945_v5  ;;  %v354_v4 = vld [vmem:[%s5679_s0 + $0x208] sm:$0xff]  ;;  %v2858_v5 = vunpack.c.h.bf16 %v1125_v61 }
 0x14e   : > { %3513 = vmatpush2.msra.mxu1 %v1411_v6  ;;  %3443 = vmatprep.subr.mxu0 %v2938_v9  ;;  %v1324_v6 = vunpack.c.h.bf16 %v358_v62  ;;  %v2850_v9 = vunpack.c.h.bf16 %v1121_v3  ;;  %v1315_v14 = vunpack.c.l.bf16 %v354_v4  ;;  %v454_v49 = vld [vmem:[%s5679_s0 + $0x528] sm:$0xff] }
 0x14f   : > { %3514 = vmatprep.subr.mxu1 %v1404_v10  ;;  %3444 = vmatpush2.msra.mxu0 %v2937_v11  ;;  %v1316_v10 = vunpack.c.h.bf16 %v354_v4  ;;  %v478_v11 = vld [vmem:[%s5679_s0 + $0x5e8] sm:$0xff] }
 0x150   : > { %3515 = vmatpush2.msra.mxu1 %v1403_v12  ;;  %3445 = vmatprep.subr.mxu0 %v2930_v15  ;;  %v2849_v12 = vunpack.c.l.bf16 %v1121_v3  ;;  %v280_v15 = vld [vmem:[%s5771_s18 + $0x68] sm:$0xff] }
 0x151   : > { %3516 = vmatprep.subr.mxu1 %v1396_v16  ;;  %3446 = vmatpush2.msra.mxu0 %v2929_v17  ;;  %v279_v16 = vld [vmem:[%s5771_s18 + $0x60] sm:$0xff]  ;;  %v1564_v17 = vunpack.c.h.bf16 %v478_v11  ;;  %v582_v50 = vld [vmem:[%s5679_s0 + $0x928] sm:$0xff] }
 0x152   : > { %3517 = vmatpush2.msra.mxu1 %v1395_v18  ;;  %3447 = vmatprep.subr.mxu0 %v2922_v21  ;;  %v474_v18 = vld [vmem:[%s5679_s0 + $0x5c8] sm:$0xff]  ;;  %v1563_v21 = vunpack.c.l.bf16 %v478_v11 }
 0x153   : > { %3518 = vmatprep.subr.mxu1 %v1388_v22  ;;  %3448 = vmatpush2.msra.mxu0 %v2921_v23  ;;  %v1819_v22 = vunpack.c.l.bf16 %v606_v13  ;;  %v470_v23 = vld [vmem:[%s5679_s0 + $0x5a8] sm:$0xff]  ;;  %v1556_v25 = vunpack.c.h.bf16 %v474_v18 }
 0x154   : > { %3519 = vmatpush2.msra.mxu1 %v1387_v24  ;;  %3449 = vmatprep.subr.mxu0 %v2914_v27  ;;  %v598_v24 = vld [vmem:[%s5679_s0 + $0x9a8] sm:$0xff] }
 0x155   : > { %3520 = vmatprep.subr.mxu1 %v1380_v28  ;;  %3450 = vmatpush2.msra.mxu0 %v2913_v29  ;;  %v5293_v27 = vld [vmem:[%s5771_s18 + $0x8] sm:$0xff]  ;;  %v1555_v28 = vunpack.c.l.bf16 %v474_v18  ;;  %v1811_v29 = vunpack.c.l.bf16 %v602_v19 }
 0x156   : > { %3521 = vmatpush2.msra.mxu1 %v1379_v30  ;;  %3451 = vmatprep.subr.mxu0 %v2906_v33  ;;  %v466_v30 = vld [vmem:[%s5679_s0 + $0x588] sm:$0xff]  ;;  %v1548_v33 = vunpack.c.h.bf16 %v470_v23 }
 0x157   : > { %3522 = vmatprep.subr.mxu1 %v1372_v34  ;;  %3452 = vmatpush2.msra.mxu0 %v2905_v35  ;;  %v1804_v34 = vunpack.c.h.bf16 %v598_v24  ;;  %v1547_v35 = vunpack.c.l.bf16 %v470_v23  ;;  %v450_v55 = vld [vmem:[%s5679_s0 + $0x508] sm:$0xff] }
 0x158   : > { %3523 = vmatpush2.msra.mxu1 %v1371_v36  ;;  %3453 = vmatprep.subr.mxu0 %v2898_v39  ;;  %v1803_v36 = vunpack.c.l.bf16 %v598_v24  ;;  %v1540_v39 = vunpack.c.h.bf16 %v466_v30  ;;  %v578_v56 = vld [vmem:[%s5679_s0 + $0x908] sm:$0xff] }
 0x159   : > { %3524 = vmatprep.subr.mxu1 %v1364_v40  ;;  %3454 = vmatpush2.msra.mxu0 %v2897_v41  ;;  %v1796_v40 = vunpack.c.h.bf16 %v594_v31  ;;  %v1539_v41 = vunpack.c.l.bf16 %v466_v30  ;;  %v446_v61 = vld [vmem:[%s5679_s0 + $0x4e8] sm:$0xff] }
 0x15a   : > { %3525 = vmatpush2.msra.mxu1 %v1363_v42  ;;  %3455 = vmatprep.subr.mxu0 %v2890_v45  ;;  %v1795_v42 = vunpack.c.l.bf16 %v594_v31  ;;  %v1532_v45 = vunpack.c.h.bf16 %v462_v37  ;;  %v574_v62 = vld [vmem:[%s5679_s0 + $0x8e8] sm:$0xff] }
 0x15b   : > { %3526 = vmatprep.subr.mxu1 %v1356_v46  ;;  %3456 = vmatpush2.msra.mxu0 %v2889_v47  ;;  %v1788_v46 = vunpack.c.h.bf16 %v590_v38  ;;  %v1531_v47 = vunpack.c.l.bf16 %v462_v37  ;;  %v442_v3 = vld [vmem:[%s5679_s0 + $0x4c8] sm:$0xff] }
 0x15c   : > { %3527 = vmatpush2.msra.mxu1 %v1355_v48  ;;  %3457 = vmatprep.subr.mxu0 %v2882_v51  ;;  %v1787_v48 = vunpack.c.l.bf16 %v590_v38  ;;  %v1524_v51 = vunpack.c.h.bf16 %v458_v43  ;;  %v570_v4 = vld [vmem:[%s5679_s0 + $0x8c8] sm:$0xff]  ;;  %v1492_v11 = vunpack.c.h.bf16 %v442_v3  ;;  %v1491_v13 = vunpack.c.l.bf16 %v442_v3 }
 0x15d   : > { %3528 = vmatprep.subr.mxu1 %v1348_v52  ;;  %3458 = vmatpush2.msra.mxu0 %v2881_v53  ;;  %v1780_v52 = vunpack.c.h.bf16 %v586_v44  ;;  %v1523_v53 = vunpack.c.l.bf16 %v458_v43 }
 0x15e   : > { %3529 = vmatpush2.msra.mxu1 %v1347_v54  ;;  %3459 = vmatprep.subr.mxu0 %v2874_v57  ;;  %v1779_v54 = vunpack.c.l.bf16 %v586_v44  ;;  %v1516_v57 = vunpack.c.h.bf16 %v454_v49 }
 0x15f   : > { %3530 = vmatprep.subr.mxu1 %v1340_v58  ;;  %3460 = vmatpush2.msra.mxu0 %v2873_v59  ;;  %v1772_v58 = vunpack.c.h.bf16 %v582_v50  ;;  %v1515_v59 = vunpack.c.l.bf16 %v454_v49 }
 0x160   : > { %3531 = vmatpush2.msra.mxu1 %v1339_v60  ;;  %3461 = vmatprep.subr.mxu0 %v2866_v63  ;;  %v1771_v60 = vunpack.c.l.bf16 %v582_v50  ;;  %v1508_v63 = vunpack.c.h.bf16 %v450_v55 }
 0x161   : > { %3532 = vmatprep.subr.mxu1 %v1332_v0  ;;  %3462 = vmatpush2.msra.mxu0 %v2865_v1  ;;  %v1764_v0 = vunpack.c.h.bf16 %v578_v56  ;;  %v1507_v1 = vunpack.c.l.bf16 %v450_v55 }
 0x162   : > { %3533 = vmatpush2.msra.mxu1 %v1331_v2  ;;  %3463 = vmatprep.subr.mxu0 %v2858_v5  ;;  %v1763_v2 = vunpack.c.l.bf16 %v578_v56  ;;  %v1500_v5 = vunpack.c.h.bf16 %v446_v61 }
 0x163   : > { %3534 = vmatprep.subr.mxu1 %v1324_v6  ;;  %3464 = vmatpush2.msra.mxu0 %v2857_v7  ;;  %v1756_v6 = vunpack.c.h.bf16 %v574_v62  ;;  %v1499_v7 = vunpack.c.l.bf16 %v446_v61 }
 0x164   : > { %3535 = vmatpush2.msra.mxu1 %v1323_v8  ;;  %3465 = vmatprep.subr.mxu0 %v2850_v9  ;;  %v1755_v8 = vunpack.c.l.bf16 %v574_v62  ;;  %v438_v9 = vld [vmem:[%s5679_s0 + $0x4a8] sm:$0xff] }
 0x165   : > { %3536 = vmatprep.subr.mxu1 %v1316_v10  ;;  %3466 = vmatpush2.msra.mxu0 %v2849_v12  ;;  %v566_v10 = vld [vmem:[%s5679_s0 + $0x8a8] sm:$0xff]  ;;  %v1748_v12 = vunpack.c.h.bf16 %v570_v4  ;;  %v1483_v19 = vunpack.c.l.bf16 %v438_v9 }
 0x166   : > { %3467 = vmatprep.mubr.f32.mxu0 %v280_v15  ;;  %3537 = vmatpush2.msra.mxu1 %v1315_v14  ;;  %v1747_v14 = vunpack.c.l.bf16 %v570_v4  ;;  %v434_v15 = vld [vmem:[%s5679_s0 + $0x488] sm:$0xff]  ;;  %v1740_v18 = vunpack.c.h.bf16 %v566_v10 }
 0x167   : > { %3468 = vmatmul.mubr.f32.vlgmr.msra.gmra.mxu0 %v279_v16  ;;  %3538 = vmatprep.mubr.f32.mxu1 %v5293_v27  ;;  %v562_v16 = vld [vmem:[%s5679_s0 + $0x888] sm:$0xff]  ;;  %v1476_v23 = vunpack.c.h.bf16 %v434_v15 }
 0x168   : > { %3545 = vmatprep.subr.mxu0 %v1564_v17  ;;  %3616 = vmatprep.subr.mxu1 %v1820_v20  ;;  %v1484_v17 = vunpack.c.h.bf16 %v438_v9  ;;  %v1739_v20 = vunpack.c.l.bf16 %v566_v10  ;;  %v1732_v24 = vunpack.c.h.bf16 %v562_v16  ;;  %v426_v27 = vld [vmem:[%s5679_s0 + $0x448] sm:$0xff] }
 0x169   : > { %3539 = vmatmul.mubr.f32.vlgmr.msra.gmra.mxu1 %v5294_v32  ;;  %3546 = vmatpush1.msra.mxu0 %v1563_v21  ;;  %v430_v21 = vld [vmem:[%s5679_s0 + $0x468] sm:$0xff]  ;;  %v1459_v37 = vunpack.c.l.bf16 %v426_v27 }
 0x16a   : > { %3617 = vmatpush1.msra.mxu1 %v1819_v22  ;;  %3547 = vmatprep.subr.mxu0 %v1556_v25  ;;  %v558_v22 = vld [vmem:[%s5679_s0 + $0x868] sm:$0xff]  ;;  %v1475_v25 = vunpack.c.l.bf16 %v434_v15  ;;  %v1467_v31 = vunpack.c.l.bf16 %v430_v21 }
 0x16b   : > { %3618 = vmatprep.subr.mxu1 %v1812_v26  ;;  %3548 = vmatpush1.msra.mxu0 %v1555_v28  ;;  %v1731_v26 = vunpack.c.l.bf16 %v562_v16  ;;  %v554_v28 = vld [vmem:[%s5679_s0 + $0x848] sm:$0xff]  ;;  %v1724_v30 = vunpack.c.h.bf16 %v558_v22  ;;  %v1723_v32 = vunpack.c.l.bf16 %v558_v22 }
 0x16c   : > { %3619 = vmatpush1.msra.mxu1 %v1811_v29  ;;  %3549 = vmatprep.subr.mxu0 %v1548_v33  ;;  %v1468_v29 = vunpack.c.h.bf16 %v430_v21  ;;  %v422_v33 = vld [vmem:[%s5679_s0 + $0x428] sm:$0xff]  ;;  %v1715_v38 = vunpack.c.l.bf16 %v554_v28 }
 0x16d   : > { %3620 = vmatprep.subr.mxu1 %v1804_v34  ;;  %3550 = vmatpush1.msra.mxu0 %v1547_v35  ;;  %v550_v34 = vld [vmem:[%s5679_s0 + $0x828] sm:$0xff]  ;;  %v1460_v35 = vunpack.c.h.bf16 %v426_v27  ;;  %v1451_v43 = vunpack.c.l.bf16 %v422_v33 }
 0x16e   : > { %3621 = vmatpush1.msra.mxu1 %v1803_v36  ;;  %3551 = vmatprep.subr.mxu0 %v1540_v39  ;;  %v1716_v36 = vunpack.c.h.bf16 %v554_v28  ;;  %v418_v39 = vld [vmem:[%s5679_s0 + $0x408] sm:$0xff]  ;;  %v1707_v44 = vunpack.c.l.bf16 %v550_v34 }
 0x16f   : > { %3622 = vmatprep.subr.mxu1 %v1796_v40  ;;  %3552 = vmatpush1.msra.mxu0 %v1539_v41  ;;  %v546_v40 = vld [vmem:[%s5679_s0 + $0x808] sm:$0xff]  ;;  %v1452_v41 = vunpack.c.h.bf16 %v422_v33  ;;  %v1443_v49 = vunpack.c.l.bf16 %v418_v39 }
 0x170   : > { %3623 = vmatpush1.msra.mxu1 %v1795_v42  ;;  %3553 = vmatprep.subr.mxu0 %v1532_v45  ;;  %v1708_v42 = vunpack.c.h.bf16 %v550_v34  ;;  %v542_v45 = vld [vmem:[%s5679_s0 + $0x7e8] sm:$0xff]  ;;  %v1699_v50 = vunpack.c.l.bf16 %v546_v40 }
 0x171   : > { %3624 = vmatprep.subr.mxu1 %v1788_v46  ;;  %3554 = vmatpush1.msra.mxu0 %v1531_v47  ;;  %v670_v46 = vld [vmem:[%s5679_s0 + $0xbe8] sm:$0xff]  ;;  %v1444_v47 = vunpack.c.h.bf16 %v418_v39  ;;  %v1691_v55 = vunpack.c.l.bf16 %v542_v45 }
 0x172   : > { %3625 = vmatpush1.msra.mxu1 %v1787_v48  ;;  %3555 = vmatprep.subr.mxu0 %v1524_v51  ;;  %v1700_v48 = vunpack.c.h.bf16 %v546_v40  ;;  %v538_v51 = vld [vmem:[%s5679_s0 + $0x7c8] sm:$0xff]  ;;  %v1947_v56 = vunpack.c.l.bf16 %v670_v46 }
 0x173   : > { %3626 = vmatprep.subr.mxu1 %v1780_v52  ;;  %3556 = vmatpush1.msra.mxu0 %v1523_v53  ;;  %v666_v52 = vld [vmem:[%s5679_s0 + $0xbc8] sm:$0xff]  ;;  %v1692_v53 = vunpack.c.h.bf16 %v542_v45  ;;  %v1683_v61 = vunpack.c.l.bf16 %v538_v51 }
 0x174   : > { %3627 = vmatpush1.msra.mxu1 %v1779_v54  ;;  %3557 = vmatprep.subr.mxu0 %v1516_v57  ;;  %v1948_v54 = vunpack.c.h.bf16 %v670_v46  ;;  %v534_v57 = vld [vmem:[%s5679_s0 + $0x7a8] sm:$0xff]  ;;  %v1939_v62 = vunpack.c.l.bf16 %v666_v52 }
 0x175   : > { %3628 = vmatprep.subr.mxu1 %v1772_v58  ;;  %3558 = vmatpush1.msra.mxu0 %v1515_v59  ;;  %v662_v58 = vld [vmem:[%s5679_s0 + $0xba8] sm:$0xff]  ;;  %v1684_v59 = vunpack.c.h.bf16 %v538_v51  ;;  %v1675_v3 = vunpack.c.l.bf16 %v534_v57 }
 0x176   : > { %3629 = vmatpush1.msra.mxu1 %v1771_v60  ;;  %3559 = vmatprep.subr.mxu0 %v1508_v63  ;;  %v1940_v60 = vunpack.c.h.bf16 %v666_v52  ;;  %v530_v63 = vld [vmem:[%s5679_s0 + $0x788] sm:$0xff]  ;;  %v1931_v4 = vunpack.c.l.bf16 %v662_v58 }
 0x177   : > { %3630 = vmatprep.subr.mxu1 %v1764_v0  ;;  %3560 = vmatpush1.msra.mxu0 %v1507_v1  ;;  %v658_v0 = vld [vmem:[%s5679_s0 + $0xb88] sm:$0xff]  ;;  %v1676_v1 = vunpack.c.h.bf16 %v534_v57  ;;  %v1667_v9 = vunpack.c.l.bf16 %v530_v63 }
 0x178   : > { %3631 = vmatpush1.msra.mxu1 %v1763_v2  ;;  %3561 = vmatprep.subr.mxu0 %v1500_v5  ;;  %v1932_v2 = vunpack.c.h.bf16 %v662_v58  ;;  %v526_v5 = vld [vmem:[%s5679_s0 + $0x768] sm:$0xff]  ;;  %v1923_v10 = vunpack.c.l.bf16 %v658_v0 }
 0x179   : > { %3632 = vmatprep.subr.mxu1 %v1756_v6  ;;  %3562 = vmatpush1.msra.mxu0 %v1499_v7  ;;  %v654_v6 = vld [vmem:[%s5679_s0 + $0xb68] sm:$0xff]  ;;  %v1668_v7 = vunpack.c.h.bf16 %v530_v63  ;;  %v1659_v15 = vunpack.c.l.bf16 %v526_v5 }
 0x17a   : > { %3633 = vmatpush1.msra.mxu1 %v1755_v8  ;;  %3563 = vmatprep.subr.mxu0 %v1492_v11  ;;  %v1924_v8 = vunpack.c.h.bf16 %v658_v0  ;;  %v522_v11 = vld [vmem:[%s5679_s0 + $0x748] sm:$0xff]  ;;  %v1915_v16 = vunpack.c.l.bf16 %v654_v6 }
 0x17b   : > { %3634 = vmatprep.subr.mxu1 %v1748_v12  ;;  %3564 = vmatpush1.msra.mxu0 %v1491_v13  ;;  %v650_v12 = vld [vmem:[%s5679_s0 + $0xb48] sm:$0xff]  ;;  %v1660_v13 = vunpack.c.h.bf16 %v526_v5  ;;  %v1651_v21 = vunpack.c.l.bf16 %v522_v11 }
 0x17c   : > { %3635 = vmatpush1.msra.mxu1 %v1747_v14  ;;  %3565 = vmatprep.subr.mxu0 %v1484_v17  ;;  %v1916_v14 = vunpack.c.h.bf16 %v654_v6  ;;  %v518_v17 = vld [vmem:[%s5679_s0 + $0x728] sm:$0xff]  ;;  %v1907_v22 = vunpack.c.l.bf16 %v650_v12 }
 0x17d   : > { %3636 = vmatprep.subr.mxu1 %v1740_v18  ;;  %3566 = vmatpush1.msra.mxu0 %v1483_v19  ;;  %v646_v18 = vld [vmem:[%s5679_s0 + $0xb28] sm:$0xff]  ;;  %v1652_v19 = vunpack.c.h.bf16 %v522_v11  ;;  %v1643_v27 = vunpack.c.l.bf16 %v518_v17 }
 0x17e   : > { %3637 = vmatpush1.msra.mxu1 %v1739_v20  ;;  %3567 = vmatprep.subr.mxu0 %v1476_v23  ;;  %v1908_v20 = vunpack.c.h.bf16 %v650_v12  ;;  %v514_v23 = vld [vmem:[%s5679_s0 + $0x708] sm:$0xff]  ;;  %v1899_v28 = vunpack.c.l.bf16 %v646_v18 }
 0x17f   : > { %3638 = vmatprep.subr.mxu1 %v1732_v24  ;;  %3568 = vmatpush1.msra.mxu0 %v1475_v25  ;;  %v642_v24 = vld [vmem:[%s5679_s0 + $0xb08] sm:$0xff]  ;;  %v1644_v25 = vunpack.c.h.bf16 %v518_v17  ;;  %v1635_v33 = vunpack.c.l.bf16 %v514_v23 }
 0x180   : > { %3639 = vmatpush1.msra.mxu1 %v1731_v26  ;;  %3569 = vmatprep.subr.mxu0 %v1468_v29  ;;  %v1900_v26 = vunpack.c.h.bf16 %v646_v18  ;;  %v510_v29 = vld [vmem:[%s5679_s0 + $0x6e8] sm:$0xff]  ;;  %v1891_v34 = vunpack.c.l.bf16 %v642_v24 }
 0x181   : > { %3640 = vmatprep.subr.mxu1 %v1724_v30  ;;  %3570 = vmatpush1.msra.mxu0 %v1467_v31  ;;  %v638_v30 = vld [vmem:[%s5679_s0 + $0xae8] sm:$0xff]  ;;  %v1636_v31 = vunpack.c.h.bf16 %v514_v23  ;;  %v1627_v39 = vunpack.c.l.bf16 %v510_v29  ;;  %v5295_v23 = vld [vmem:[%s5771_s18 + $0x18] sm:$0xff] }
 0x182   : > { %3641 = vmatpush1.msra.mxu1 %v1723_v32  ;;  %3571 = vmatprep.subr.mxu0 %v1460_v35  ;;  %v1892_v32 = vunpack.c.h.bf16 %v642_v24  ;;  %v506_v35 = vld [vmem:[%s5679_s0 + $0x6c8] sm:$0xff]  ;;  %v1883_v40 = vunpack.c.l.bf16 %v638_v30 }
 0x183   : > { %3642 = vmatprep.subr.mxu1 %v1716_v36  ;;  %3572 = vmatpush1.msra.mxu0 %v1459_v37  ;;  %v634_v36 = vld [vmem:[%s5679_s0 + $0xac8] sm:$0xff]  ;;  %v1628_v37 = vunpack.c.h.bf16 %v510_v29  ;;  %v1619_v45 = vunpack.c.l.bf16 %v506_v35 }
 0x184   : > { %3643 = vmatpush1.msra.mxu1 %v1715_v38  ;;  %3573 = vmatprep.subr.mxu0 %v1452_v41  ;;  %v1884_v38 = vunpack.c.h.bf16 %v638_v30  ;;  %v502_v41 = vld [vmem:[%s5679_s0 + $0x6a8] sm:$0xff]  ;;  %v1875_v46 = vunpack.c.l.bf16 %v634_v36 }
 0x185   : > { %3644 = vmatprep.subr.mxu1 %v1708_v42  ;;  %3574 = vmatpush1.msra.mxu0 %v1451_v43  ;;  %v630_v42 = vld [vmem:[%s5679_s0 + $0xaa8] sm:$0xff]  ;;  %v1620_v43 = vunpack.c.h.bf16 %v506_v35  ;;  %v1611_v51 = vunpack.c.l.bf16 %v502_v41 }
 0x186   : > { %3645 = vmatpush1.msra.mxu1 %v1707_v44  ;;  %3575 = vmatprep.subr.mxu0 %v1444_v47  ;;  %v1876_v44 = vunpack.c.h.bf16 %v634_v36  ;;  %v498_v47 = vld [vmem:[%s5679_s0 + $0x688] sm:$0xff]  ;;  %v1867_v52 = vunpack.c.l.bf16 %v630_v42  ;;  %v5298_v36 = vld [vmem:[%s5771_s18 + $0x20] sm:$0xff] }
 0x187   : > { %3646 = vmatprep.subr.mxu1 %v1700_v48  ;;  %3576 = vmatpush1.msra.mxu0 %v1443_v49  ;;  %v626_v48 = vld [vmem:[%s5679_s0 + $0xa88] sm:$0xff]  ;;  %v1612_v49 = vunpack.c.h.bf16 %v502_v41  ;;  %v1603_v57 = vunpack.c.l.bf16 %v498_v47 }
 0x188   : > { %3647 = vmatpush1.msra.mxu1 %v1699_v50  ;;  %3577 = vmatprep.subr.mxu0 %v1692_v53  ;;  %v1868_v50 = vunpack.c.h.bf16 %v630_v42  ;;  %v494_v53 = vld [vmem:[%s5679_s0 + $0x668] sm:$0xff]  ;;  %v1859_v58 = vunpack.c.l.bf16 %v626_v48 }
 0x189   : > { %3648 = vmatprep.subr.mxu1 %v1948_v54  ;;  %3578 = vmatpush2.msra.mxu0 %v1691_v55  ;;  %v622_v54 = vld [vmem:[%s5679_s0 + $0xa68] sm:$0xff]  ;;  %v1604_v55 = vunpack.c.h.bf16 %v498_v47  ;;  %v1595_v63 = vunpack.c.l.bf16 %v494_v53 }
 0x18a   : > { %3649 = vmatpush2.msra.mxu1 %v1947_v56  ;;  %3579 = vmatprep.subr.mxu0 %v1684_v59  ;;  %v1860_v56 = vunpack.c.h.bf16 %v626_v48  ;;  %v490_v59 = vld [vmem:[%s5679_s0 + $0x648] sm:$0xff]  ;;  %v1851_v0 = vunpack.c.l.bf16 %v622_v54 }
 0x18b   : > { %3650 = vmatprep.subr.mxu1 %v1940_v60  ;;  %3580 = vmatpush2.msra.mxu0 %v1683_v61  ;;  %v618_v60 = vld [vmem:[%s5679_s0 + $0xa48] sm:$0xff]  ;;  %v1596_v61 = vunpack.c.h.bf16 %v494_v53  ;;  %v1587_v5 = vunpack.c.l.bf16 %v490_v59 }
 0x18c   : > { %3651 = vmatpush2.msra.mxu1 %v1939_v62  ;;  %3581 = vmatprep.subr.mxu0 %v1676_v1  ;;  %v1852_v62 = vunpack.c.h.bf16 %v622_v54  ;;  %v486_v1 = vld [vmem:[%s5679_s0 + $0x628] sm:$0xff]  ;;  %v1843_v6 = vunpack.c.l.bf16 %v618_v60 }
 0x18d   : > { %3652 = vmatprep.subr.mxu1 %v1932_v2  ;;  %3582 = vmatpush2.msra.mxu0 %v1675_v3  ;;  %v614_v2 = vld [vmem:[%s5679_s0 + $0xa28] sm:$0xff]  ;;  %v1588_v3 = vunpack.c.h.bf16 %v490_v59  ;;  %v1579_v11 = vunpack.c.l.bf16 %v486_v1 }
 0x18e   : > { %3653 = vmatpush2.msra.mxu1 %v1931_v4  ;;  %3583 = vmatprep.subr.mxu0 %v1668_v7  ;;  %v1844_v4 = vunpack.c.h.bf16 %v618_v60  ;;  %v482_v7 = vld [vmem:[%s5679_s0 + $0x608] sm:$0xff]  ;;  %v1835_v12 = vunpack.c.l.bf16 %v614_v2 }
 0x18f   : > { %3654 = vmatprep.subr.mxu1 %v1924_v8  ;;  %3584 = vmatpush2.msra.mxu0 %v1667_v9  ;;  %v610_v8 = vld [vmem:[%s5679_s0 + $0xa08] sm:$0xff]  ;;  %v1580_v9 = vunpack.c.h.bf16 %v486_v1 }
 0x190   : > { %3655 = vmatpush2.msra.mxu1 %v1923_v10  ;;  %3585 = vmatprep.subr.mxu0 %v1660_v13  ;;  %v1836_v10 = vunpack.c.h.bf16 %v614_v2  ;;  %v1572_v13 = vunpack.c.h.bf16 %v482_v7  ;;  %v862_v17 = vld [vmem:[%s5679_s0 + $0x11e8] sm:$0xff]  ;;  %v1827_v18 = vunpack.c.l.bf16 %v610_v8 }
 0x191   : > { %3656 = vmatprep.subr.mxu1 %v1916_v14  ;;  %3586 = vmatpush2.msra.mxu0 %v1659_v15  ;;  %v1828_v14 = vunpack.c.h.bf16 %v610_v8  ;;  %v734_v15 = vld [vmem:[%s5679_s0 + $0xde8] sm:$0xff] }
 0x192   : > { %3657 = vmatpush2.msra.mxu1 %v1915_v16  ;;  %3587 = vmatprep.subr.mxu0 %v1652_v19  ;;  %v1571_v16 = vunpack.c.l.bf16 %v482_v7  ;;  %v2076_v19 = vunpack.c.h.bf16 %v734_v15  ;;  %v2075_v24 = vunpack.c.l.bf16 %v734_v15  ;;  %v850_v35 = vld [vmem:[%s5679_s0 + $0x1188] sm:$0xff] }
 0x193   : > { %3658 = vmatprep.subr.mxu1 %v1908_v20  ;;  %3588 = vmatpush2.msra.mxu0 %v1651_v21  ;;  %v730_v20 = vld [vmem:[%s5679_s0 + $0xdc8] sm:$0xff] }
 0x194   : > { %3659 = vmatpush2.msra.mxu1 %v1907_v22  ;;  %3589 = vmatprep.subr.mxu0 %v1644_v25  ;;  %v858_v21 = vld [vmem:[%s5679_s0 + $0x11c8] sm:$0xff]  ;;  %v2332_v22 = vunpack.c.h.bf16 %v862_v17  ;;  %v2331_v25 = vunpack.c.l.bf16 %v862_v17  ;;  %v2068_v29 = vunpack.c.h.bf16 %v730_v20 }
 0x195   : > { %3660 = vmatprep.subr.mxu1 %v1900_v26  ;;  %3590 = vmatpush2.msra.mxu0 %v1643_v27  ;;  %v726_v26 = vld [vmem:[%s5679_s0 + $0xda8] sm:$0xff]  ;;  %v2324_v30 = vunpack.c.h.bf16 %v858_v21 }
 0x196   : > { %3661 = vmatpush2.msra.mxu1 %v1899_v28  ;;  %3591 = vmatprep.subr.mxu0 %v1636_v31  ;;  %v854_v27 = vld [vmem:[%s5679_s0 + $0x11a8] sm:$0xff]  ;;  %v5296_v28 = vld [vmem:[%s5771_s18 + $0x10] sm:$0xff] }
 0x197   : > { %3662 = vmatprep.subr.mxu1 %v1892_v32  ;;  %3592 = vmatpush2.msra.mxu0 %v1635_v33  ;;  %v5297_v31 = vld [vmem:[%s5771_s18 + $0x28] sm:$0xff]  ;;  %v2067_v32 = vunpack.c.l.bf16 %v730_v20  ;;  %v2323_v33 = vunpack.c.l.bf16 %v858_v21 }
 0x198   : > { %3663 = vmatpush2.msra.mxu1 %v1891_v34  ;;  %3593 = vmatprep.subr.mxu0 %v1628_v37  ;;  %v722_v34 = vld [vmem:[%s5679_s0 + $0xd88] sm:$0xff]  ;;  %v2060_v37 = vunpack.c.h.bf16 %v726_v26 }
 0x199   : > { %3664 = vmatprep.subr.mxu1 %v1884_v38  ;;  %3594 = vmatpush2.msra.mxu0 %v1627_v39  ;;  %v2316_v38 = vunpack.c.h.bf16 %v854_v27  ;;  %v2059_v39 = vunpack.c.l.bf16 %v726_v26  ;;  %v718_v41 = vld [vmem:[%s5679_s0 + $0xd68] sm:$0xff] }
 0x19a   : > { %3665 = vmatpush2.msra.mxu1 %v1883_v40  ;;  %3595 = vmatprep.subr.mxu0 %v1620_v43  ;;  %v2315_v40 = vunpack.c.l.bf16 %v854_v27  ;;  %v846_v42 = vld [vmem:[%s5679_s0 + $0x1168] sm:$0xff]  ;;  %v2052_v43 = vunpack.c.h.bf16 %v722_v34 }
 0x19b   : > { %3666 = vmatprep.subr.mxu1 %v1876_v44  ;;  %3596 = vmatpush2.msra.mxu0 %v1619_v45  ;;  %v2308_v44 = vunpack.c.h.bf16 %v850_v35  ;;  %v2051_v45 = vunpack.c.l.bf16 %v722_v34  ;;  %v714_v47 = vld [vmem:[%s5679_s0 + $0xd48] sm:$0xff] }
 0x19c   : > { %3667 = vmatpush2.msra.mxu1 %v1875_v46  ;;  %3597 = vmatprep.subr.mxu0 %v1612_v49  ;;  %v2307_v46 = vunpack.c.l.bf16 %v850_v35  ;;  %v842_v48 = vld [vmem:[%s5679_s0 + $0x1148] sm:$0xff]  ;;  %v2044_v49 = vunpack.c.h.bf16 %v718_v41 }
 0x19d   : > { %3668 = vmatprep.subr.mxu1 %v1868_v50  ;;  %3598 = vmatpush2.msra.mxu0 %v1611_v51  ;;  %v2300_v50 = vunpack.c.h.bf16 %v846_v42  ;;  %v2043_v51 = vunpack.c.l.bf16 %v718_v41  ;;  %v710_v53 = vld [vmem:[%s5679_s0 + $0xd28] sm:$0xff] }
 0x19e   : > { %3669 = vmatpush2.msra.mxu1 %v1867_v52  ;;  %3599 = vmatprep.subr.mxu0 %v1604_v55  ;;  %v2299_v52 = vunpack.c.l.bf16 %v846_v42  ;;  %v838_v54 = vld [vmem:[%s5679_s0 + $0x1128] sm:$0xff]  ;;  %v2036_v55 = vunpack.c.h.bf16 %v714_v47 }
 0x19f   : > { %3670 = vmatprep.subr.mxu1 %v1860_v56  ;;  %3600 = vmatpush2.msra.mxu0 %v1603_v57  ;;  %v2292_v56 = vunpack.c.h.bf16 %v842_v48  ;;  %v2035_v57 = vunpack.c.l.bf16 %v714_v47  ;;  %v706_v59 = vld [vmem:[%s5679_s0 + $0xd08] sm:$0xff] }
 0x1a0   : > { %3671 = vmatpush2.msra.mxu1 %v1859_v58  ;;  %3601 = vmatprep.subr.mxu0 %v1596_v61  ;;  %v2291_v58 = vunpack.c.l.bf16 %v842_v48  ;;  %v834_v60 = vld [vmem:[%s5679_s0 + $0x1108] sm:$0xff]  ;;  %v2028_v61 = vunpack.c.h.bf16 %v710_v53 }
 0x1a1   : > { %3672 = vmatprep.subr.mxu1 %v1852_v62  ;;  %3602 = vmatpush2.msra.mxu0 %v1595_v63  ;;  %v2284_v62 = vunpack.c.h.bf16 %v838_v54  ;;  %v2027_v63 = vunpack.c.l.bf16 %v710_v53  ;;  %v702_v1 = vld [vmem:[%s5679_s0 + $0xce8] sm:$0xff] }
 0x1a2   : > { %3673 = vmatpush2.msra.mxu1 %v1851_v0  ;;  %3603 = vmatprep.subr.mxu0 %v1588_v3  ;;  %v2283_v0 = vunpack.c.l.bf16 %v838_v54  ;;  %v830_v2 = vld [vmem:[%s5679_s0 + $0x10e8] sm:$0xff]  ;;  %v2020_v3 = vunpack.c.h.bf16 %v706_v59 }
 0x1a3   : > { %3674 = vmatprep.subr.mxu1 %v1844_v4  ;;  %3604 = vmatpush2.msra.mxu0 %v1587_v5  ;;  %v2276_v4 = vunpack.c.h.bf16 %v834_v60  ;;  %v2019_v5 = vunpack.c.l.bf16 %v706_v59  ;;  %v698_v7 = vld [vmem:[%s5679_s0 + $0xcc8] sm:$0xff] }
 0x1a4   : > { %3675 = vmatpush2.msra.mxu1 %v1843_v6  ;;  %3605 = vmatprep.subr.mxu0 %v1580_v9  ;;  %v2275_v6 = vunpack.c.l.bf16 %v834_v60  ;;  %v826_v8 = vld [vmem:[%s5679_s0 + $0x10c8] sm:$0xff]  ;;  %v2012_v9 = vunpack.c.h.bf16 %v702_v1  ;;  %v2004_v15 = vunpack.c.h.bf16 %v698_v7  ;;  %v2003_v17 = vunpack.c.l.bf16 %v698_v7 }
 0x1a5   : > { %3676 = vmatprep.subr.mxu1 %v1836_v10  ;;  %3606 = vmatpush2.msra.mxu0 %v1579_v11  ;;  %v2268_v10 = vunpack.c.h.bf16 %v830_v2  ;;  %v2011_v11 = vunpack.c.l.bf16 %v702_v1  ;;  %v818_v20 = vld [vmem:[%s5679_s0 + $0x1088] sm:$0xff] }
 0x1a6   : > { %3677 = vmatpush2.msra.mxu1 %v1835_v12  ;;  %3607 = vmatprep.subr.mxu0 %v1572_v13  ;;  %v2267_v12 = vunpack.c.l.bf16 %v830_v2  ;;  %v694_v13 = vld [vmem:[%s5679_s0 + $0xca8] sm:$0xff] }
 0x1a7   : > { %3678 = vmatprep.subr.mxu1 %v1828_v14  ;;  %3608 = vmatpush2.msra.mxu0 %v1571_v16  ;;  %v822_v14 = vld [vmem:[%s5679_s0 + $0x10a8] sm:$0xff]  ;;  %v2260_v16 = vunpack.c.h.bf16 %v826_v8  ;;  %v1996_v21 = vunpack.c.h.bf16 %v694_v13 }
 0x1a8   : > { %3609 = vmatprep.mubr.f32.mxu0 %v5295_v23  ;;  %3679 = vmatpush2.msra.mxu1 %v1827_v18  ;;  %v2259_v18 = vunpack.c.l.bf16 %v826_v8  ;;  %v1995_v23 = vunpack.c.l.bf16 %v694_v13  ;;  %v814_v26 = vld [vmem:[%s5679_s0 + $0x1068] sm:$0xff] }
 0x1a9   : > { %3610 = vmatmul.mubr.f32.vlgmr.msra.gmra.mxu0 %v5296_v28  ;;  %3680 = vmatprep.mubr.f32.mxu1 %v5297_v31  ;;  %v2244_v28 = vunpack.c.h.bf16 %v818_v20  ;;  %v682_v31 = vld [vmem:[%s5679_s0 + $0xc48] sm:$0xff]  ;;  %v2236_v34 = vunpack.c.h.bf16 %v814_v26 }
 0x1aa   : > { %3687 = vmatprep.subr.mxu0 %v2076_v19  ;;  %3758 = vmatprep.subr.mxu1 %v2332_v22  ;;  %v690_v19 = vld [vmem:[%s5679_s0 + $0xc88] sm:$0xff]  ;;  %v2252_v22 = vunpack.c.h.bf16 %v822_v14  ;;  %v1971_v41 = vunpack.c.l.bf16 %v682_v31 }
 0x1ab   : > { %3681 = vmatmul.mubr.f32.vlgmr.msra.gmra.mxu1 %v5298_v36  ;;  %3688 = vmatpush1.msra.mxu0 %v2075_v24  ;;  %v2251_v24 = vunpack.c.l.bf16 %v822_v14  ;;  %v1988_v27 = vunpack.c.h.bf16 %v690_v19  ;;  %v2235_v36 = vunpack.c.l.bf16 %v814_v26 }
 0x1ac   : > { %3759 = vmatpush1.msra.mxu1 %v2331_v25  ;;  %3689 = vmatprep.subr.mxu0 %v2068_v29  ;;  %v686_v25 = vld [vmem:[%s5679_s0 + $0xc68] sm:$0xff]  ;;  %v1987_v29 = vunpack.c.l.bf16 %v690_v19 }
 0x1ad   : > { %3760 = vmatprep.subr.mxu1 %v2324_v30  ;;  %3690 = vmatpush1.msra.mxu0 %v2067_v32  ;;  %v2243_v30 = vunpack.c.l.bf16 %v818_v20  ;;  %v810_v32 = vld [vmem:[%s5679_s0 + $0x1048] sm:$0xff]  ;;  %v1979_v35 = vunpack.c.l.bf16 %v686_v25 }
 0x1ae   : > { %3761 = vmatpush1.msra.mxu1 %v2323_v33  ;;  %3691 = vmatprep.subr.mxu0 %v2060_v37  ;;  %v1980_v33 = vunpack.c.h.bf16 %v686_v25  ;;  %v678_v37 = vld [vmem:[%s5679_s0 + $0xc28] sm:$0xff]  ;;  %v2227_v42 = vunpack.c.l.bf16 %v810_v32 }
 0x1af   : > { %3762 = vmatprep.subr.mxu1 %v2316_v38  ;;  %3692 = vmatpush1.msra.mxu0 %v2059_v39  ;;  %v806_v38 = vld [vmem:[%s5679_s0 + $0x1028] sm:$0xff]  ;;  %v1972_v39 = vunpack.c.h.bf16 %v682_v31  ;;  %v1963_v47 = vunpack.c.l.bf16 %v678_v37 }
 0x1b0   : > { %3763 = vmatpush1.msra.mxu1 %v2315_v40  ;;  %3693 = vmatprep.subr.mxu0 %v2052_v43  ;;  %v2228_v40 = vunpack.c.h.bf16 %v810_v32  ;;  %v674_v43 = vld [vmem:[%s5679_s0 + $0xc08] sm:$0xff]  ;;  %v2219_v48 = vunpack.c.l.bf16 %v806_v38 }
 0x1b1   : > { %3764 = vmatprep.subr.mxu1 %v2308_v44  ;;  %3694 = vmatpush1.msra.mxu0 %v2051_v45  ;;  %v802_v44 = vld [vmem:[%s5679_s0 + $0x1008] sm:$0xff]  ;;  %v1964_v45 = vunpack.c.h.bf16 %v678_v37  ;;  %v1955_v53 = vunpack.c.l.bf16 %v674_v43 }
 0x1b2   : > { %3765 = vmatpush1.msra.mxu1 %v2307_v46  ;;  %3695 = vmatprep.subr.mxu0 %v2044_v49  ;;  %v2220_v46 = vunpack.c.h.bf16 %v806_v38  ;;  %v798_v49 = vld [vmem:[%s5679_s0 + $0xfe8] sm:$0xff]  ;;  %v2211_v54 = vunpack.c.l.bf16 %v802_v44 }
 0x1b3   : > { %3766 = vmatprep.subr.mxu1 %v2300_v50  ;;  %3696 = vmatpush1.msra.mxu0 %v2043_v51  ;;  %v926_v50 = vld [vmem:[%s5679_s0 + $0x13e8] sm:$0xff]  ;;  %v1956_v51 = vunpack.c.h.bf16 %v674_v43  ;;  %v2203_v59 = vunpack.c.l.bf16 %v798_v49 }
 0x1b4   : > { %3767 = vmatpush1.msra.mxu1 %v2299_v52  ;;  %3697 = vmatprep.subr.mxu0 %v2036_v55  ;;  %v2212_v52 = vunpack.c.h.bf16 %v802_v44  ;;  %v794_v55 = vld [vmem:[%s5679_s0 + $0xfc8] sm:$0xff]  ;;  %v2459_v60 = vunpack.c.l.bf16 %v926_v50 }
 0x1b5   : > { %3768 = vmatprep.subr.mxu1 %v2292_v56  ;;  %3698 = vmatpush1.msra.mxu0 %v2035_v57  ;;  %v922_v56 = vld [vmem:[%s5679_s0 + $0x13c8] sm:$0xff]  ;;  %v2204_v57 = vunpack.c.h.bf16 %v798_v49  ;;  %v2195_v1 = vunpack.c.l.bf16 %v794_v55 }
 0x1b6   : > { %3769 = vmatpush1.msra.mxu1 %v2291_v58  ;;  %3699 = vmatprep.subr.mxu0 %v2028_v61  ;;  %v2460_v58 = vunpack.c.h.bf16 %v926_v50  ;;  %v790_v61 = vld [vmem:[%s5679_s0 + $0xfa8] sm:$0xff]  ;;  %v2451_v2 = vunpack.c.l.bf16 %v922_v56 }
 0x1b7   : > { %3770 = vmatprep.subr.mxu1 %v2284_v62  ;;  %3700 = vmatpush1.msra.mxu0 %v2027_v63  ;;  %v918_v62 = vld [vmem:[%s5679_s0 + $0x13a8] sm:$0xff]  ;;  %v2196_v63 = vunpack.c.h.bf16 %v794_v55  ;;  %v2187_v7 = vunpack.c.l.bf16 %v790_v61 }
 0x1b8   : > { %3771 = vmatpush1.msra.mxu1 %v2283_v0  ;;  %3701 = vmatprep.subr.mxu0 %v2020_v3  ;;  %v2452_v0 = vunpack.c.h.bf16 %v922_v56  ;;  %v786_v3 = vld [vmem:[%s5679_s0 + $0xf88] sm:$0xff]  ;;  %v2443_v8 = vunpack.c.l.bf16 %v918_v62 }
 0x1b9   : > { %3772 = vmatprep.subr.mxu1 %v2276_v4  ;;  %3702 = vmatpush1.msra.mxu0 %v2019_v5  ;;  %v914_v4 = vld [vmem:[%s5679_s0 + $0x1388] sm:$0xff]  ;;  %v2188_v5 = vunpack.c.h.bf16 %v790_v61  ;;  %v2179_v13 = vunpack.c.l.bf16 %v786_v3 }
 0x1ba   : > { %3773 = vmatpush1.msra.mxu1 %v2275_v6  ;;  %3703 = vmatprep.subr.mxu0 %v2012_v9  ;;  %v2444_v6 = vunpack.c.h.bf16 %v918_v62  ;;  %v782_v9 = vld [vmem:[%s5679_s0 + $0xf68] sm:$0xff]  ;;  %v2435_v14 = vunpack.c.l.bf16 %v914_v4 }
 0x1bb   : > { %3774 = vmatprep.subr.mxu1 %v2268_v10  ;;  %3704 = vmatpush1.msra.mxu0 %v2011_v11  ;;  %v910_v10 = vld [vmem:[%s5679_s0 + $0x1368] sm:$0xff]  ;;  %v2180_v11 = vunpack.c.h.bf16 %v786_v3  ;;  %v2171_v19 = vunpack.c.l.bf16 %v782_v9 }
 0x1bc   : > { %3775 = vmatpush1.msra.mxu1 %v2267_v12  ;;  %3705 = vmatprep.subr.mxu0 %v2004_v15  ;;  %v2436_v12 = vunpack.c.h.bf16 %v914_v4  ;;  %v778_v15 = vld [vmem:[%s5679_s0 + $0xf48] sm:$0xff]  ;;  %v2427_v20 = vunpack.c.l.bf16 %v910_v10 }
 0x1bd   : > { %3776 = vmatprep.subr.mxu1 %v2260_v16  ;;  %3706 = vmatpush1.msra.mxu0 %v2003_v17  ;;  %v906_v16 = vld [vmem:[%s5679_s0 + $0x1348] sm:$0xff]  ;;  %v2172_v17 = vunpack.c.h.bf16 %v782_v9  ;;  %v2163_v25 = vunpack.c.l.bf16 %v778_v15 }
 0x1be   : > { %3777 = vmatpush1.msra.mxu1 %v2259_v18  ;;  %3707 = vmatprep.subr.mxu0 %v1996_v21  ;;  %v2428_v18 = vunpack.c.h.bf16 %v910_v10  ;;  %v774_v21 = vld [vmem:[%s5679_s0 + $0xf28] sm:$0xff]  ;;  %v2419_v26 = vunpack.c.l.bf16 %v906_v16 }
 0x1bf   : > { %3778 = vmatprep.subr.mxu1 %v2252_v22  ;;  %3708 = vmatpush1.msra.mxu0 %v1995_v23  ;;  %v902_v22 = vld [vmem:[%s5679_s0 + $0x1328] sm:$0xff]  ;;  %v2164_v23 = vunpack.c.h.bf16 %v778_v15  ;;  %v2155_v31 = vunpack.c.l.bf16 %v774_v21 }
 0x1c0   : > { %3779 = vmatpush1.msra.mxu1 %v2251_v24  ;;  %3709 = vmatprep.subr.mxu0 %v1988_v27  ;;  %v2420_v24 = vunpack.c.h.bf16 %v906_v16  ;;  %v770_v27 = vld [vmem:[%s5679_s0 + $0xf08] sm:$0xff]  ;;  %v2411_v32 = vunpack.c.l.bf16 %v902_v22 }
 0x1c1   : > { %3780 = vmatprep.subr.mxu1 %v2244_v28  ;;  %3710 = vmatpush1.msra.mxu0 %v1987_v29  ;;  %v898_v28 = vld [vmem:[%s5679_s0 + $0x1308] sm:$0xff]  ;;  %v2156_v29 = vunpack.c.h.bf16 %v774_v21  ;;  %v2147_v37 = vunpack.c.l.bf16 %v770_v27 }
 0x1c2   : > { %3781 = vmatpush1.msra.mxu1 %v2243_v30  ;;  %3711 = vmatprep.subr.mxu0 %v1980_v33  ;;  %v2412_v30 = vunpack.c.h.bf16 %v902_v22  ;;  %v766_v33 = vld [vmem:[%s5679_s0 + $0xee8] sm:$0xff]  ;;  %v2403_v38 = vunpack.c.l.bf16 %v898_v28 }
 0x1c3   : > { %3782 = vmatprep.subr.mxu1 %v2236_v34  ;;  %3712 = vmatpush1.msra.mxu0 %v1979_v35  ;;  %v894_v34 = vld [vmem:[%s5679_s0 + $0x12e8] sm:$0xff]  ;;  %v2148_v35 = vunpack.c.h.bf16 %v770_v27  ;;  %v2139_v43 = vunpack.c.l.bf16 %v766_v33  ;;  %v5299_v27 = vld [vmem:[%s5771_s18 + $0x38] sm:$0xff] }
 0x1c4   : > { %3783 = vmatpush1.msra.mxu1 %v2235_v36  ;;  %3713 = vmatprep.subr.mxu0 %v1972_v39  ;;  %v2404_v36 = vunpack.c.h.bf16 %v898_v28  ;;  %v762_v39 = vld [vmem:[%s5679_s0 + $0xec8] sm:$0xff]  ;;  %v2395_v44 = vunpack.c.l.bf16 %v894_v34 }
 0x1c5   : > { %3784 = vmatprep.subr.mxu1 %v2228_v40  ;;  %3714 = vmatpush1.msra.mxu0 %v1971_v41  ;;  %v890_v40 = vld [vmem:[%s5679_s0 + $0x12c8] sm:$0xff]  ;;  %v2140_v41 = vunpack.c.h.bf16 %v766_v33  ;;  %v2131_v49 = vunpack.c.l.bf16 %v762_v39 }
 0x1c6   : > { %3785 = vmatpush1.msra.mxu1 %v2227_v42  ;;  %3715 = vmatprep.subr.mxu0 %v1964_v45  ;;  %v2396_v42 = vunpack.c.h.bf16 %v894_v34  ;;  %v758_v45 = vld [vmem:[%s5679_s0 + $0xea8] sm:$0xff]  ;;  %v2387_v50 = vunpack.c.l.bf16 %v890_v40 }
 0x1c7   : > { %3786 = vmatprep.subr.mxu1 %v2220_v46  ;;  %3716 = vmatpush1.msra.mxu0 %v1963_v47  ;;  %v886_v46 = vld [vmem:[%s5679_s0 + $0x12a8] sm:$0xff]  ;;  %v2132_v47 = vunpack.c.h.bf16 %v762_v39  ;;  %v2123_v55 = vunpack.c.l.bf16 %v758_v45 }
 0x1c8   : > { %3787 = vmatpush1.msra.mxu1 %v2219_v48  ;;  %3717 = vmatprep.subr.mxu0 %v1956_v51  ;;  %v2388_v48 = vunpack.c.h.bf16 %v890_v40  ;;  %v754_v51 = vld [vmem:[%s5679_s0 + $0xe88] sm:$0xff]  ;;  %v2379_v56 = vunpack.c.l.bf16 %v886_v46  ;;  %v5302_v40 = vld [vmem:[%s5771_s18 + $0x40] sm:$0xff] }
 0x1c9   : > { %3788 = vmatprep.subr.mxu1 %v2212_v52  ;;  %3718 = vmatpush1.msra.mxu0 %v1955_v53  ;;  %v882_v52 = vld [vmem:[%s5679_s0 + $0x1288] sm:$0xff]  ;;  %v2124_v53 = vunpack.c.h.bf16 %v758_v45  ;;  %v2115_v61 = vunpack.c.l.bf16 %v754_v51 }
 0x1ca   : > { %3789 = vmatpush1.msra.mxu1 %v2211_v54  ;;  %3719 = vmatprep.subr.mxu0 %v2204_v57  ;;  %v2380_v54 = vunpack.c.h.bf16 %v886_v46  ;;  %v750_v57 = vld [vmem:[%s5679_s0 + $0xe68] sm:$0xff]  ;;  %v2371_v62 = vunpack.c.l.bf16 %v882_v52 }
 0x1cb   : > { %3790 = vmatprep.subr.mxu1 %v2460_v58  ;;  %3720 = vmatpush2.msra.mxu0 %v2203_v59  ;;  %v878_v58 = vld [vmem:[%s5679_s0 + $0x1268] sm:$0xff]  ;;  %v2116_v59 = vunpack.c.h.bf16 %v754_v51  ;;  %v2107_v3 = vunpack.c.l.bf16 %v750_v57 }
 0x1cc   : > { %3791 = vmatpush2.msra.mxu1 %v2459_v60  ;;  %3721 = vmatprep.subr.mxu0 %v2196_v63  ;;  %v2372_v60 = vunpack.c.h.bf16 %v882_v52  ;;  %v746_v63 = vld [vmem:[%s5679_s0 + $0xe48] sm:$0xff]  ;;  %v2363_v4 = vunpack.c.l.bf16 %v878_v58 }
 0x1cd   : > { %3792 = vmatprep.subr.mxu1 %v2452_v0  ;;  %3722 = vmatpush2.msra.mxu0 %v2195_v1  ;;  %v874_v0 = vld [vmem:[%s5679_s0 + $0x1248] sm:$0xff]  ;;  %v2108_v1 = vunpack.c.h.bf16 %v750_v57  ;;  %v2099_v9 = vunpack.c.l.bf16 %v746_v63 }
 0x1ce   : > { %3793 = vmatpush2.msra.mxu1 %v2451_v2  ;;  %3723 = vmatprep.subr.mxu0 %v2188_v5  ;;  %v2364_v2 = vunpack.c.h.bf16 %v878_v58  ;;  %v742_v5 = vld [vmem:[%s5679_s0 + $0xe28] sm:$0xff]  ;;  %v2355_v10 = vunpack.c.l.bf16 %v874_v0 }
 0x1cf   : > { %3794 = vmatprep.subr.mxu1 %v2444_v6  ;;  %3724 = vmatpush2.msra.mxu0 %v2187_v7  ;;  %v870_v6 = vld [vmem:[%s5679_s0 + $0x1228] sm:$0xff]  ;;  %v2100_v7 = vunpack.c.h.bf16 %v746_v63  ;;  %v2091_v15 = vunpack.c.l.bf16 %v742_v5 }
 0x1d0   : > { %3795 = vmatpush2.msra.mxu1 %v2443_v8  ;;  %3725 = vmatprep.subr.mxu0 %v2180_v11  ;;  %v2356_v8 = vunpack.c.h.bf16 %v874_v0  ;;  %v738_v11 = vld [vmem:[%s5679_s0 + $0xe08] sm:$0xff]  ;;  %v2347_v16 = vunpack.c.l.bf16 %v870_v6 }
 0x1d1   : > { %3796 = vmatprep.subr.mxu1 %v2436_v12  ;;  %3726 = vmatpush2.msra.mxu0 %v2179_v13  ;;  %v866_v12 = vld [vmem:[%s5679_s0 + $0x1208] sm:$0xff]  ;;  %v2092_v13 = vunpack.c.h.bf16 %v742_v5 }
 0x1d2   : > { %3797 = vmatpush2.msra.mxu1 %v2435_v14  ;;  %3727 = vmatprep.subr.mxu0 %v2172_v17  ;;  %v2348_v14 = vunpack.c.h.bf16 %v870_v6  ;;  %v2084_v17 = vunpack.c.h.bf16 %v738_v11  ;;  %v1118_v21 = vld [vmem:[%s5679_s0 + $0x19e8] sm:$0xff]  ;;  %v2339_v22 = vunpack.c.l.bf16 %v866_v12 }
 0x1d3   : > { %3798 = vmatprep.subr.mxu1 %v2428_v18  ;;  %3728 = vmatpush2.msra.mxu0 %v2171_v19  ;;  %v2340_v18 = vunpack.c.h.bf16 %v866_v12  ;;  %v990_v19 = vld [vmem:[%s5679_s0 + $0x15e8] sm:$0xff] }
 0x1d4   : > { %3799 = vmatpush2.msra.mxu1 %v2427_v20  ;;  %3729 = vmatprep.subr.mxu0 %v2164_v23  ;;  %v2083_v20 = vunpack.c.l.bf16 %v738_v11  ;;  %v2588_v23 = vunpack.c.h.bf16 %v990_v19  ;;  %v2587_v28 = vunpack.c.l.bf16 %v990_v19  ;;  %v1106_v39 = vld [vmem:[%s5679_s0 + $0x1988] sm:$0xff] }
 0x1d5   : > { %3800 = vmatprep.subr.mxu1 %v2420_v24  ;;  %3730 = vmatpush2.msra.mxu0 %v2163_v25  ;;  %v986_v24 = vld [vmem:[%s5679_s0 + $0x15c8] sm:$0xff] }
 0x1d6   : > { %3801 = vmatpush2.msra.mxu1 %v2419_v26  ;;  %3731 = vmatprep.subr.mxu0 %v2156_v29  ;;  %v1114_v25 = vld [vmem:[%s5679_s0 + $0x19c8] sm:$0xff]  ;;  %v2844_v26 = vunpack.c.h.bf16 %v1118_v21  ;;  %v2843_v29 = vunpack.c.l.bf16 %v1118_v21  ;;  %v2580_v33 = vunpack.c.h.bf16 %v986_v24 }
 0x1d7   : > { %3802 = vmatprep.subr.mxu1 %v2412_v30  ;;  %3732 = vmatpush2.msra.mxu0 %v2155_v31  ;;  %v982_v30 = vld [vmem:[%s5679_s0 + $0x15a8] sm:$0xff]  ;;  %v2836_v34 = vunpack.c.h.bf16 %v1114_v25 }
 0x1d8   : > { %3803 = vmatpush2.msra.mxu1 %v2411_v32  ;;  %3733 = vmatprep.subr.mxu0 %v2148_v35  ;;  %v1110_v31 = vld [vmem:[%s5679_s0 + $0x19a8] sm:$0xff]  ;;  %v5300_v32 = vld [vmem:[%s5771_s18 + $0x30] sm:$0xff] }
 0x1d9   : > { %3804 = vmatprep.subr.mxu1 %v2404_v36  ;;  %3734 = vmatpush2.msra.mxu0 %v2147_v37  ;;  %v5301_v35 = vld [vmem:[%s5771_s18 + $0x48] sm:$0xff]  ;;  %v2579_v36 = vunpack.c.l.bf16 %v986_v24  ;;  %v2835_v37 = vunpack.c.l.bf16 %v1114_v25 }
 0x1da   : > { %3805 = vmatpush2.msra.mxu1 %v2403_v38  ;;  %3735 = vmatprep.subr.mxu0 %v2140_v41  ;;  %v978_v38 = vld [vmem:[%s5679_s0 + $0x1588] sm:$0xff]  ;;  %v2572_v41 = vunpack.c.h.bf16 %v982_v30 }
 0x1db   : > { %3806 = vmatprep.subr.mxu1 %v2396_v42  ;;  %3736 = vmatpush2.msra.mxu0 %v2139_v43  ;;  %v2828_v42 = vunpack.c.h.bf16 %v1110_v31  ;;  %v2571_v43 = vunpack.c.l.bf16 %v982_v30  ;;  %v974_v45 = vld [vmem:[%s5679_s0 + $0x1568] sm:$0xff] }
 0x1dc   : > { %3807 = vmatpush2.msra.mxu1 %v2395_v44  ;;  %3737 = vmatprep.subr.mxu0 %v2132_v47  ;;  %v2827_v44 = vunpack.c.l.bf16 %v1110_v31  ;;  %v1102_v46 = vld [vmem:[%s5679_s0 + $0x1968] sm:$0xff]  ;;  %v2564_v47 = vunpack.c.h.bf16 %v978_v38 }
 0x1dd   : > { %3808 = vmatprep.subr.mxu1 %v2388_v48  ;;  %3738 = vmatpush2.msra.mxu0 %v2131_v49  ;;  %v2820_v48 = vunpack.c.h.bf16 %v1106_v39  ;;  %v2563_v49 = vunpack.c.l.bf16 %v978_v38  ;;  %v970_v51 = vld [vmem:[%s5679_s0 + $0x1548] sm:$0xff] }
 0x1de   : > { %3809 = vmatpush2.msra.mxu1 %v2387_v50  ;;  %3739 = vmatprep.subr.mxu0 %v2124_v53  ;;  %v2819_v50 = vunpack.c.l.bf16 %v1106_v39  ;;  %v1098_v52 = vld [vmem:[%s5679_s0 + $0x1948] sm:$0xff]  ;;  %v2556_v53 = vunpack.c.h.bf16 %v974_v45 }
 0x1df   : > { %3810 = vmatprep.subr.mxu1 %v2380_v54  ;;  %3740 = vmatpush2.msra.mxu0 %v2123_v55  ;;  %v2812_v54 = vunpack.c.h.bf16 %v1102_v46  ;;  %v2555_v55 = vunpack.c.l.bf16 %v974_v45  ;;  %v966_v57 = vld [vmem:[%s5679_s0 + $0x1528] sm:$0xff] }
 0x1e0   : > { %3811 = vmatpush2.msra.mxu1 %v2379_v56  ;;  %3741 = vmatprep.subr.mxu0 %v2116_v59  ;;  %v2811_v56 = vunpack.c.l.bf16 %v1102_v46  ;;  %v1094_v58 = vld [vmem:[%s5679_s0 + $0x1928] sm:$0xff]  ;;  %v2548_v59 = vunpack.c.h.bf16 %v970_v51 }
 0x1e1   : > { %3812 = vmatprep.subr.mxu1 %v2372_v60  ;;  %3742 = vmatpush2.msra.mxu0 %v2115_v61  ;;  %v2804_v60 = vunpack.c.h.bf16 %v1098_v52  ;;  %v2547_v61 = vunpack.c.l.bf16 %v970_v51  ;;  %v962_v63 = vld [vmem:[%s5679_s0 + $0x1508] sm:$0xff] }
 0x1e2   : > { %3813 = vmatpush2.msra.mxu1 %v2371_v62  ;;  %3743 = vmatprep.subr.mxu0 %v2108_v1  ;;  %v2803_v62 = vunpack.c.l.bf16 %v1098_v52  ;;  %v1090_v0 = vld [vmem:[%s5679_s0 + $0x1908] sm:$0xff]  ;;  %v2540_v1 = vunpack.c.h.bf16 %v966_v57 }
 0x1e3   : > { %3814 = vmatprep.subr.mxu1 %v2364_v2  ;;  %3744 = vmatpush2.msra.mxu0 %v2107_v3  ;;  %v2796_v2 = vunpack.c.h.bf16 %v1094_v58  ;;  %v2539_v3 = vunpack.c.l.bf16 %v966_v57  ;;  %v958_v5 = vld [vmem:[%s5679_s0 + $0x14e8] sm:$0xff] }
 0x1e4   : > { %3815 = vmatpush2.msra.mxu1 %v2363_v4  ;;  %3745 = vmatprep.subr.mxu0 %v2100_v7  ;;  %v2795_v4 = vunpack.c.l.bf16 %v1094_v58  ;;  %v1086_v6 = vld [vmem:[%s5679_s0 + $0x18e8] sm:$0xff]  ;;  %v2532_v7 = vunpack.c.h.bf16 %v962_v63 }
 0x1e5   : > { %3816 = vmatprep.subr.mxu1 %v2356_v8  ;;  %3746 = vmatpush2.msra.mxu0 %v2099_v9  ;;  %v2788_v8 = vunpack.c.h.bf16 %v1090_v0  ;;  %v2531_v9 = vunpack.c.l.bf16 %v962_v63  ;;  %v954_v11 = vld [vmem:[%s5679_s0 + $0x14c8] sm:$0xff] }
 0x1e6   : > { %3817 = vmatpush2.msra.mxu1 %v2355_v10  ;;  %3747 = vmatprep.subr.mxu0 %v2092_v13  ;;  %v2787_v10 = vunpack.c.l.bf16 %v1090_v0  ;;  %v1082_v12 = vld [vmem:[%s5679_s0 + $0x18c8] sm:$0xff]  ;;  %v2524_v13 = vunpack.c.h.bf16 %v958_v5  ;;  %v2516_v19 = vunpack.c.h.bf16 %v954_v11  ;;  %v2515_v21 = vunpack.c.l.bf16 %v954_v11 }
 0x1e7   : > { %3818 = vmatprep.subr.mxu1 %v2348_v14  ;;  %3748 = vmatpush2.msra.mxu0 %v2091_v15  ;;  %v2780_v14 = vunpack.c.h.bf16 %v1086_v6  ;;  %v2523_v15 = vunpack.c.l.bf16 %v958_v5  ;;  %v1074_v24 = vld [vmem:[%s5679_s0 + $0x1888] sm:$0xff] }
 0x1e8   : > { %3819 = vmatpush2.msra.mxu1 %v2347_v16  ;;  %3749 = vmatprep.subr.mxu0 %v2084_v17  ;;  %v2779_v16 = vunpack.c.l.bf16 %v1086_v6  ;;  %v950_v17 = vld [vmem:[%s5679_s0 + $0x14a8] sm:$0xff] }
 0x1e9   : > { %3820 = vmatprep.subr.mxu1 %v2340_v18  ;;  %3750 = vmatpush2.msra.mxu0 %v2083_v20  ;;  %v1078_v18 = vld [vmem:[%s5679_s0 + $0x18a8] sm:$0xff]  ;;  %v2772_v20 = vunpack.c.h.bf16 %v1082_v12  ;;  %v2508_v25 = vunpack.c.h.bf16 %v950_v17 }
 0x1ea   : > { %3751 = vmatprep.mubr.f32.mxu0 %v5299_v27  ;;  %3821 = vmatpush2.msra.mxu1 %v2339_v22  ;;  %v2771_v22 = vunpack.c.l.bf16 %v1082_v12  ;;  %v2507_v27 = vunpack.c.l.bf16 %v950_v17  ;;  %v1070_v30 = vld [vmem:[%s5679_s0 + $0x1868] sm:$0xff] }
 0x1eb   : > { %3752 = vmatmul.mubr.f32.vlgmr.msra.gmra.mxu0 %v5300_v32  ;;  %3822 = vmatprep.mubr.f32.mxu1 %v5301_v35  ;;  %v2756_v32 = vunpack.c.h.bf16 %v1074_v24  ;;  %v938_v35 = vld [vmem:[%s5679_s0 + $0x1448] sm:$0xff]  ;;  %v2748_v38 = vunpack.c.h.bf16 %v1070_v30 }
 0x1ec   : > { %3829 = vmatprep.subr.mxu0 %v2588_v23  ;;  %3900 = vmatprep.subr.mxu1 %v2844_v26  ;;  %v946_v23 = vld [vmem:[%s5679_s0 + $0x1488] sm:$0xff]  ;;  %v2764_v26 = vunpack.c.h.bf16 %v1078_v18  ;;  %v2483_v45 = vunpack.c.l.bf16 %v938_v35 }
 0x1ed   : > { %3823 = vmatmul.mubr.f32.vlgmr.msra.gmra.mxu1 %v5302_v40  ;;  %3830 = vmatpush1.msra.mxu0 %v2587_v28  ;;  %v2763_v28 = vunpack.c.l.bf16 %v1078_v18  ;;  %v2500_v31 = vunpack.c.h.bf16 %v946_v23  ;;  %v2747_v40 = vunpack.c.l.bf16 %v1070_v30 }
 0x1ee   : > { %3901 = vmatpush1.msra.mxu1 %v2843_v29  ;;  %3831 = vmatprep.subr.mxu0 %v2580_v33  ;;  %v942_v29 = vld [vmem:[%s5679_s0 + $0x1468] sm:$0xff]  ;;  %v2499_v33 = vunpack.c.l.bf16 %v946_v23 }
 0x1ef   : > { %3902 = vmatprep.subr.mxu1 %v2836_v34  ;;  %3832 = vmatpush1.msra.mxu0 %v2579_v36  ;;  %v2755_v34 = vunpack.c.l.bf16 %v1074_v24  ;;  %v1066_v36 = vld [vmem:[%s5679_s0 + $0x1848] sm:$0xff]  ;;  %v2491_v39 = vunpack.c.l.bf16 %v942_v29 }
 0x1f0   : > { %3903 = vmatpush1.msra.mxu1 %v2835_v37  ;;  %3833 = vmatprep.subr.mxu0 %v2572_v41  ;;  %v2492_v37 = vunpack.c.h.bf16 %v942_v29  ;;  %v934_v41 = vld [vmem:[%s5679_s0 + $0x1428] sm:$0xff]  ;;  %v2739_v46 = vunpack.c.l.bf16 %v1066_v36 }
 0x1f1   : > { %3904 = vmatprep.subr.mxu1 %v2828_v42  ;;  %3834 = vmatpush1.msra.mxu0 %v2571_v43  ;;  %v1062_v42 = vld [vmem:[%s5679_s0 + $0x1828] sm:$0xff]  ;;  %v2484_v43 = vunpack.c.h.bf16 %v938_v35  ;;  %v2475_v51 = vunpack.c.l.bf16 %v934_v41 }
 0x1f2   : > { %3905 = vmatpush1.msra.mxu1 %v2827_v44  ;;  %3835 = vmatprep.subr.mxu0 %v2564_v47  ;;  %v2740_v44 = vunpack.c.h.bf16 %v1066_v36  ;;  %v930_v47 = vld [vmem:[%s5679_s0 + $0x1408] sm:$0xff]  ;;  %v2731_v52 = vunpack.c.l.bf16 %v1062_v42 }
 0x1f3   : > { %3906 = vmatprep.subr.mxu1 %v2820_v48  ;;  %3836 = vmatpush1.msra.mxu0 %v2563_v49  ;;  %v1058_v48 = vld [vmem:[%s5679_s0 + $0x1808] sm:$0xff]  ;;  %v2476_v49 = vunpack.c.h.bf16 %v934_v41  ;;  %v2467_v57 = vunpack.c.l.bf16 %v930_v47 }
 0x1f4   : > { %3907 = vmatpush1.msra.mxu1 %v2819_v50  ;;  %3837 = vmatprep.subr.mxu0 %v2556_v53  ;;  %v2732_v50 = vunpack.c.h.bf16 %v1062_v42  ;;  %v1054_v53 = vld [vmem:[%s5679_s0 + $0x17e8] sm:$0xff]  ;;  %v2723_v58 = vunpack.c.l.bf16 %v1058_v48 }
 0x1f5   : > { %3908 = vmatprep.subr.mxu1 %v2812_v54  ;;  %3838 = vmatpush1.msra.mxu0 %v2555_v55  ;;  %v1182_v54 = vld [vmem:[%s5679_s0 + $0x1be8] sm:$0xff]  ;;  %v2468_v55 = vunpack.c.h.bf16 %v930_v47  ;;  %v2715_v63 = vunpack.c.l.bf16 %v1054_v53 }
 0x1f6   : > { %3909 = vmatpush1.msra.mxu1 %v2811_v56  ;;  %3839 = vmatprep.subr.mxu0 %v2548_v59  ;;  %v2724_v56 = vunpack.c.h.bf16 %v1058_v48  ;;  %v1050_v59 = vld [vmem:[%s5679_s0 + $0x17c8] sm:$0xff]  ;;  %v2971_v0 = vunpack.c.l.bf16 %v1182_v54 }
 0x1f7   : > { %3910 = vmatprep.subr.mxu1 %v2804_v60  ;;  %3840 = vmatpush1.msra.mxu0 %v2547_v61  ;;  %v1178_v60 = vld [vmem:[%s5679_s0 + $0x1bc8] sm:$0xff]  ;;  %v2716_v61 = vunpack.c.h.bf16 %v1054_v53  ;;  %v2707_v5 = vunpack.c.l.bf16 %v1050_v59 }
 0x1f8   : > { %3911 = vmatpush1.msra.mxu1 %v2803_v62  ;;  %3841 = vmatprep.subr.mxu0 %v2540_v1  ;;  %v2972_v62 = vunpack.c.h.bf16 %v1182_v54  ;;  %v1046_v1 = vld [vmem:[%s5679_s0 + $0x17a8] sm:$0xff]  ;;  %v2963_v6 = vunpack.c.l.bf16 %v1178_v60 }
 0x1f9   : > { %3912 = vmatprep.subr.mxu1 %v2796_v2  ;;  %3842 = vmatpush1.msra.mxu0 %v2539_v3  ;;  %v1174_v2 = vld [vmem:[%s5679_s0 + $0x1ba8] sm:$0xff]  ;;  %v2708_v3 = vunpack.c.h.bf16 %v1050_v59  ;;  %v2699_v11 = vunpack.c.l.bf16 %v1046_v1 }
 0x1fa   : > { %3913 = vmatpush1.msra.mxu1 %v2795_v4  ;;  %3843 = vmatprep.subr.mxu0 %v2532_v7  ;;  %v2964_v4 = vunpack.c.h.bf16 %v1178_v60  ;;  %v1042_v7 = vld [vmem:[%s5679_s0 + $0x1788] sm:$0xff]  ;;  %v2955_v12 = vunpack.c.l.bf16 %v1174_v2 }
 0x1fb   : > { %3914 = vmatprep.subr.mxu1 %v2788_v8  ;;  %3844 = vmatpush1.msra.mxu0 %v2531_v9  ;;  %v1170_v8 = vld [vmem:[%s5679_s0 + $0x1b88] sm:$0xff]  ;;  %v2700_v9 = vunpack.c.h.bf16 %v1046_v1  ;;  %v2691_v17 = vunpack.c.l.bf16 %v1042_v7 }
 0x1fc   : > { %3915 = vmatpush1.msra.mxu1 %v2787_v10  ;;  %3845 = vmatprep.subr.mxu0 %v2524_v13  ;;  %v2956_v10 = vunpack.c.h.bf16 %v1174_v2  ;;  %v1038_v13 = vld [vmem:[%s5679_s0 + $0x1768] sm:$0xff]  ;;  %v2947_v18 = vunpack.c.l.bf16 %v1170_v8 }
 0x1fd   : > { %3916 = vmatprep.subr.mxu1 %v2780_v14  ;;  %3846 = vmatpush1.msra.mxu0 %v2523_v15  ;;  %v1166_v14 = vld [vmem:[%s5679_s0 + $0x1b68] sm:$0xff]  ;;  %v2692_v15 = vunpack.c.h.bf16 %v1042_v7  ;;  %v2683_v24 = vunpack.c.l.bf16 %v1038_v13 }
 0x1fe   : > { %3917 = vmatpush1.msra.mxu1 %v2779_v16  ;;  %3847 = vmatprep.subr.mxu0 %v2516_v19  ;;  %v2948_v16 = vunpack.c.h.bf16 %v1170_v8  ;;  %v1034_v19 = vld [vmem:[%s5679_s0 + $0x1748] sm:$0xff]  ;;  %v2940_v23 = vunpack.c.h.bf16 %v1166_v14 }
 0x1ff   : > { %3918 = vmatprep.subr.mxu1 %v2772_v20  ;;  %3848 = vmatpush1.msra.mxu0 %v2515_v21  ;;  %v1162_v20 = vld [vmem:[%s5679_s0 + $0x1b48] sm:$0xff]  ;;  %v3043_v21 = vpop.f32.mrf.mxu0  ;;  %v2675_v30 = vunpack.c.l.bf16 %v1034_v19 }
 0x200   : > { %3919 = vmatpush1.msra.mxu1 %v2771_v22  ;;  %3849 = vmatprep.subr.mxu0 %v2508_v25  ;;  %v2684_v22 = vunpack.c.h.bf16 %v1038_v13  ;;  %v2939_v25 = vunpack.c.l.bf16 %v1166_v14  ;;  %v2932_v29 = vunpack.c.h.bf16 %v1162_v20  ;;  %v1150_v41 = vld [vmem:[%s5679_s0 + $0x1ae8] sm:$0xff] }
 0x201   : > { %3920 = vmatprep.subr.mxu1 %v2764_v26  ;;  %3850 = vmatpush1.msra.mxu0 %v2507_v27  ;;  %v1030_v26 = vld [vmem:[%s5679_s0 + $0x1728] sm:$0xff]  ;;  %v3045_v35 = vpop.f32.mrf.mxu0  ;;  %v2907_v54 = vunpack.c.l.bf16 %v1150_v41 }
 0x202   : > { %3921 = vmatpush1.msra.mxu1 %v2763_v28  ;;  %3851 = vmatprep.subr.mxu0 %v2500_v31  ;;  %v1158_v27 = vld [vmem:[%s5679_s0 + $0x1b28] sm:$0xff]  ;;  %v2676_v28 = vunpack.c.h.bf16 %v1034_v19  ;;  %v2931_v31 = vunpack.c.l.bf16 %v1162_v20  ;;  %v2668_v36 = vunpack.c.h.bf16 %v1030_v26 }
 0x203   : > { %3922 = vmatprep.subr.mxu1 %v2756_v32  ;;  %3852 = vmatpush1.msra.mxu0 %v2499_v33  ;;  %v1026_v32 = vld [vmem:[%s5679_s0 + $0x1708] sm:$0xff]  ;;  %v3185_v42 = vpop.f32.mrf.mxu0 }
 0x204   : > { %3923 = vmatpush1.msra.mxu1 %v2755_v34  ;;  %3853 = vmatprep.subr.mxu0 %v2492_v37  ;;  %v1154_v33 = vld [vmem:[%s5679_s0 + $0x1b08] sm:$0xff]  ;;  %v3114_v34 = vpop.f32.mrf.mxu1  ;;  %v2924_v37 = vunpack.c.h.bf16 %v1158_v27 }
 0x205   : > { %3924 = vmatprep.subr.mxu1 %v2748_v38  ;;  %3854 = vmatpush1.msra.mxu0 %v2491_v39  ;;  %v2667_v38 = vunpack.c.l.bf16 %v1030_v26  ;;  %v2923_v39 = vunpack.c.l.bf16 %v1158_v27  ;;  %v1018_v47 = vld [vmem:[%s5679_s0 + $0x16c8] sm:$0xff] }
 0x206   : > { %3925 = vmatpush1.msra.mxu1 %v2747_v40  ;;  %3855 = vmatprep.subr.mxu0 %v2484_v43  ;;  %v1022_v40 = vld [vmem:[%s5679_s0 + $0x16e8] sm:$0xff]  ;;  %v2660_v43 = vunpack.c.h.bf16 %v1026_v32  ;;  %v2644_v59 = vunpack.c.h.bf16 %v1018_v47 }
 0x207   : > { %3926 = vmatprep.subr.mxu1 %v2740_v44  ;;  %3856 = vmatpush1.msra.mxu0 %v2483_v45  ;;  %v2916_v44 = vunpack.c.h.bf16 %v1154_v33  ;;  %v2659_v45 = vunpack.c.l.bf16 %v1026_v32  ;;  %v1146_v48 = vld [vmem:[%s5679_s0 + $0x1ac8] sm:$0xff]  ;;  %v2651_v53 = vunpack.c.l.bf16 %v1022_v40 }
 0x208   : > { %3927 = vmatpush1.msra.mxu1 %v2739_v46  ;;  %3857 = vmatprep.subr.mxu0 %v2476_v49  ;;  %v2915_v46 = vunpack.c.l.bf16 %v1154_v33  ;;  %v3116_v49 = vpop.f32.mrf.mxu1  ;;  %v2900_v60 = vunpack.c.h.bf16 %v1146_v48  ;;  %v1010_v1 = vld [vmem:[%s5679_s0 + $0x1688] sm:$0xff] }
 0x209   : > { %3928 = vmatprep.subr.mxu1 %v2732_v50  ;;  %3858 = vmatpush1.msra.mxu0 %v2475_v51  ;;  %v2652_v50 = vunpack.c.h.bf16 %v1022_v40  ;;  %v2908_v51 = vunpack.c.h.bf16 %v1150_v41  ;;  %v1138_v2 = vld [vmem:[%s5679_s0 + $0x1a88] sm:$0xff] }
 0x20a   : > { %3929 = vmatpush1.msra.mxu1 %v2731_v52  ;;  %3859 = vmatprep.subr.mxu0 %v2468_v55  ;;  %v3115_v52 = vadd.f32 %v3114_v34, %v3043_v21  ;;  %v1014_v55 = vld [vmem:[%s5679_s0 + $0x16a8] sm:$0xff]  ;;  %v2884_v13 = vunpack.c.h.bf16 %v1138_v2 }
 0x20b   : > { %3930 = vmatprep.subr.mxu1 %v2724_v56  ;;  %3860 = vmatpush1.msra.mxu0 %v2467_v57  ;;  %v1142_v56 = vld [vmem:[%s5679_s0 + $0x1aa8] sm:$0xff]  ;;  %v3256_v57 = vpop.f32.mrf.mxu1  ;;  %v2635_v7 = vunpack.c.l.bf16 %v1014_v55 }
 0x20c   : > { %3931 = vmatpush1.msra.mxu1 %v2723_v58  ;;  %3861 = vmatprep.subr.mxu0 %v2716_v61  ;;  %v3187_v58 = vpop.f32.mrf.mxu0  ;;  %v3117_v61 = vadd.f32 %v3116_v49, %v3045_v35  ;;  %v2891_v8 = vunpack.c.l.bf16 %v1142_v56  ;;  %v998_v27 = vld [vmem:[%s5679_s0 + $0x1628] sm:$0xff] }
 0x20d   : > { %3932 = vmatprep.subr.mxu1 %v2972_v62  ;;  %3862 = vmatpush2.msra.mxu0 %v2715_v63  ;;  %v3186_v62 = vadd.f32 %v3185_v42, %v3115_v52  ;;  %v2643_v63 = vunpack.c.l.bf16 %v1018_v47  ;;  %v994_v34 = vld [vmem:[%s5679_s0 + $0x1608] sm:$0xff]  ;;  %v2603_v40 = vunpack.c.l.bf16 %v998_v27  ;;  %v282_v52 = vld [vmem:[#allocation2] sm:$0xff] }
 0x20e   : > { %3933 = vmatpush2.msra.mxu1 %v2971_v0  ;;  %3863 = vmatprep.subr.mxu0 %v2708_v3  ;;  %v2899_v0 = vunpack.c.l.bf16 %v1146_v48  ;;  %v3327_v3 = vpop.f32.mrf.mxu0  ;;  %v1122_v35 = vld [vmem:[%s5679_s0 + $0x1a08] sm:$0xff]  ;;  %v2596_v42 = vunpack.c.h.bf16 %v994_v34  ;;  %v2595_v48 = vunpack.c.l.bf16 %v994_v34  ;;  %v451_v34 = vld [vmem:[%s5679_s0 + $0x510] sm:$0xff] }
 0x20f   : > { %3934 = vmatprep.subr.mxu1 %v2964_v4  ;;  %3864 = vmatpush2.msra.mxu0 %v2707_v5  ;;  %v2636_v4 = vunpack.c.h.bf16 %v1014_v55  ;;  %v2892_v5 = vunpack.c.h.bf16 %v1142_v56  ;;  %v3257_v14 = vadd.f32 %v3256_v57, %v3186_v62  ;;  %v347_v57 = vld [vmem:[%s5679_s0 + $0x1d0] sm:$0xff] }
 0x210   : > { %3935 = vmatpush2.msra.mxu1 %v2963_v6  ;;  %3865 = vmatprep.subr.mxu0 %v2700_v9  ;;  %v3188_v6 = vadd.f32 %v3187_v58, %v3117_v61  ;;  %v1006_v9 = vld [vmem:[%s5679_s0 + $0x1668] sm:$0xff]  ;;  %v3329_v20 = vpop.f32.mrf.mxu0  ;;  %v475_v58 = vld [vmem:[%s5679_s0 + $0x5d0] sm:$0xff] }
 0x211   : > { %3936 = vmatprep.subr.mxu1 %v2956_v10  ;;  %3866 = vmatpush2.msra.mxu0 %v2699_v11  ;;  %v1134_v10 = vld [vmem:[%s5679_s0 + $0x1a68] sm:$0xff]  ;;  %v3258_v11 = vpop.f32.mrf.mxu1  ;;  %v2620_v21 = vunpack.c.h.bf16 %v1006_v9 }
 0x212   : > { %3937 = vmatpush2.msra.mxu1 %v2955_v12  ;;  %3867 = vmatprep.subr.mxu0 %v2692_v15  ;;  %v2628_v12 = vunpack.c.h.bf16 %v1010_v1  ;;  %v2627_v15 = vunpack.c.l.bf16 %v1010_v1  ;;  %v2875_v26 = vunpack.c.l.bf16 %v1134_v10  ;;  %v471_v1 = vld [vmem:[%s5679_s0 + $0x5b0] sm:$0xff] }
 0x213   : > { %3938 = vmatprep.subr.mxu1 %v2948_v16  ;;  %3868 = vmatpush2.msra.mxu0 %v2691_v17  ;;  %v2883_v16 = vunpack.c.l.bf16 %v1138_v2  ;;  %v1002_v17 = vld [vmem:[%s5679_s0 + $0x1648] sm:$0xff]  ;;  %v3398_v19 = vpop.f32.mrf.mxu1  ;;  %v5304_v2 = vld [vmem:[%s5771_s18 + $0x50] sm:$0xff] }
 0x214   : > { %3939 = vmatpush2.msra.mxu1 %v2947_v18  ;;  %3869 = vmatprep.subr.mxu0 %v2684_v22  ;;  %v1130_v18 = vld [vmem:[%s5679_s0 + $0x1a48] sm:$0xff]  ;;  %v2876_v22 = vunpack.c.h.bf16 %v1134_v10  ;;  %v2611_v32 = vunpack.c.l.bf16 %v1002_v17  ;;  %v5306_v10 = vld [vmem:[%s5771_s18 + $0x60] sm:$0xff] }
 0x215   : > { %3940 = vmatprep.subr.mxu1 %v2940_v23  ;;  %3870 = vmatpush2.msra.mxu0 %v2683_v24  ;;  %v3259_v23 = vadd.f32 %v3258_v11, %v3188_v6  ;;  %v3328_v24 = vadd.f32 %v3327_v3, %v3257_v14  ;;  %v2867_v33 = vunpack.c.l.bf16 %v1130_v18  ;;  %v1302_v3 = vunpack.c.h.bf16 %v347_v57 }
 0x216   : > { %3941 = vmatpush2.msra.mxu1 %v2939_v25  ;;  %3871 = vmatprep.subr.mxu0 %v2676_v28  ;;  %v2619_v25 = vunpack.c.l.bf16 %v1006_v9  ;;  %v1126_v28 = vld [vmem:[%s5679_s0 + $0x1a28] sm:$0xff]  ;;  %v1301_v6 = vunpack.c.l.bf16 %v347_v57  ;;  %v467_v9 = vld [vmem:[%s5679_s0 + $0x590] sm:$0xff]  ;;  %v1549_v14 = vunpack.c.l.bf16 %v471_v1 }
 0x217   : > { %3942 = vmatprep.subr.mxu1 %v2932_v29  ;;  %3872 = vmatpush2.msra.mxu0 %v2675_v30  ;;  %v2612_v29 = vunpack.c.h.bf16 %v1002_v17  ;;  %v2868_v30 = vunpack.c.h.bf16 %v1130_v18  ;;  %v2859_v41 = vunpack.c.l.bf16 %v1126_v28  ;;  %v1542_v18 = vunpack.c.h.bf16 %v467_v9  ;;  %v307_v57 = vld [vmem:[%s5679_s0 + $0x90] sm:$0xff] }
 0x218   : > { %3943 = vmatpush2.msra.mxu1 %v2931_v31  ;;  %3873 = vmatprep.subr.mxu0 %v2668_v36  ;;  %v3330_v31 = vadd.f32 %v3329_v20, %v3259_v23  ;;  %v3400_v36 = vpop.f32.mrf.mxu1  ;;  %v1541_v20 = vunpack.c.l.bf16 %v467_v9 }
 0x219   : > { %3944 = vmatprep.subr.mxu1 %v2924_v37  ;;  %3874 = vmatpush2.msra.mxu0 %v2667_v38  ;;  %v2604_v37 = vunpack.c.h.bf16 %v998_v27  ;;  %v2860_v38 = vunpack.c.h.bf16 %v1126_v28  ;;  %v327_v27 = vld [vmem:[%s5679_s0 + $0x130] sm:$0xff] }
 0x21a   : > { %3945 = vmatpush2.msra.mxu1 %v2923_v39  ;;  %3875 = vmatprep.subr.mxu0 %v2660_v43  ;;  %v3399_v39 = vadd.f32 %v3398_v19, %v3328_v24  ;;  %v2852_v43 = vunpack.c.h.bf16 %v1122_v35  ;;  %v3401_v47 = vadd.f32 %v3400_v36, %v3330_v31  ;;  %v455_v28 = vld [vmem:[%s5679_s0 + $0x530] sm:$0xff] }
 0x21b   : > { %3946 = vmatprep.subr.mxu1 %v2916_v44  ;;  %3876 = vmatpush2.msra.mxu0 %v2659_v45  ;;  %v281_v44 = vld [vmem:[#allocation2 + $0x30] sm:$0xff]  ;;  %v1518_v36 = vunpack.c.h.bf16 %v455_v28 }
 0x21c   : > { %3947 = vmatpush2.msra.mxu1 %v2915_v46  ;;  %3877 = vmatprep.subr.mxu0 %v2652_v50  ;;  %v351_v46 = vld [vmem:[%s5679_s0 + $0x1f0] sm:$0xff] }
 0x21d   : > { %3948 = vmatprep.subr.mxu1 %v2908_v51  ;;  %3878 = vmatpush2.msra.mxu0 %v2651_v53  ;;  %v479_v50 = vld [vmem:[%s5679_s0 + $0x5f0] sm:$0xff]  ;;  %v2851_v51 = vunpack.c.l.bf16 %v1122_v35  ;;  %v1310_v55 = vunpack.c.h.bf16 %v351_v46  ;;  %v1309_v61 = vunpack.c.l.bf16 %v351_v46  ;;  %v1262_v35 = vunpack.c.h.bf16 %v327_v27 }
 0x21e   : > { %3949 = vmatpush2.msra.mxu1 %v2907_v54  ;;  %3879 = vmatprep.subr.mxu0 %v2644_v59  ;;  %v1566_v59 = vunpack.c.h.bf16 %v479_v50  ;;  %v1565_v62 = vunpack.c.l.bf16 %v479_v50  ;;  %v443_v46 = vld [vmem:[%s5679_s0 + $0x4d0] sm:$0xff] }
 0x21f   : > { %3950 = vmatprep.subr.mxu1 %v2900_v60  ;;  %3880 = vmatpush2.msra.mxu0 %v2643_v63  ;;  %v5303_v60 = vld [vmem:[%s5771_s18 + $0x58] sm:$0xff] }
 0x220   : > { %3951 = vmatpush2.msra.mxu1 %v2899_v0  ;;  %3881 = vmatprep.subr.mxu0 %v2636_v4  ;;  %v343_v0 = vld [vmem:[%s5679_s0 + $0x1b0] sm:$0xff]  ;;  %v1558_v4 = vunpack.c.h.bf16 %v475_v58 }
 0x221   : > { %3952 = vmatprep.subr.mxu1 %v2892_v5  ;;  %3882 = vmatpush2.msra.mxu0 %v2635_v7  ;;  %v5305_v5 = vld [vmem:[%s5771_s18 + $0x68] sm:$0xff]  ;;  %v1557_v7 = vunpack.c.l.bf16 %v475_v58  ;;  %v1294_v11 = vunpack.c.h.bf16 %v343_v0  ;;  %v435_v58 = vld [vmem:[%s5679_s0 + $0x490] sm:$0xff] }
 0x222   : > { %3953 = vmatpush2.msra.mxu1 %v2891_v8  ;;  %3883 = vmatprep.subr.mxu0 %v2628_v12  ;;  %v339_v8 = vld [vmem:[%s5679_s0 + $0x190] sm:$0xff]  ;;  %v1550_v12 = vunpack.c.h.bf16 %v471_v1  ;;  %v1222_v1 = vunpack.c.h.bf16 %v307_v57 }
 0x223   : > { %3954 = vmatprep.subr.mxu1 %v2884_v13  ;;  %3884 = vmatpush2.msra.mxu0 %v2627_v15  ;;  %v1293_v13 = vunpack.c.l.bf16 %v343_v0  ;;  %v335_v15 = vld [vmem:[%s5679_s0 + $0x170] sm:$0xff]  ;;  %v1286_v17 = vunpack.c.h.bf16 %v339_v8  ;;  %v1285_v19 = vunpack.c.l.bf16 %v339_v8 }
 0x224   : > { %3955 = vmatpush2.msra.mxu1 %v2883_v16  ;;  %3885 = vmatprep.subr.mxu0 %v2620_v21  ;;  %v463_v16 = vld [vmem:[%s5679_s0 + $0x570] sm:$0xff]  ;;  %v1278_v23 = vunpack.c.h.bf16 %v335_v15 }
 0x225   : > { %3956 = vmatprep.subr.mxu1 %v2876_v22  ;;  %3886 = vmatpush2.msra.mxu0 %v2619_v25  ;;  %v331_v21 = vld [vmem:[%s5679_s0 + $0x150] sm:$0xff]  ;;  %v1534_v24 = vunpack.c.h.bf16 %v463_v16  ;;  %v1277_v25 = vunpack.c.l.bf16 %v335_v15 }
 0x226   : > { %3957 = vmatpush2.msra.mxu1 %v2875_v26  ;;  %3887 = vmatprep.subr.mxu0 %v2612_v29  ;;  %v459_v22 = vld [vmem:[%s5679_s0 + $0x550] sm:$0xff]  ;;  %v1533_v26 = vunpack.c.l.bf16 %v463_v16  ;;  %v1270_v29 = vunpack.c.h.bf16 %v331_v21  ;;  %v1269_v31 = vunpack.c.l.bf16 %v331_v21 }
 0x227   : > { %3958 = vmatprep.subr.mxu1 %v2868_v30  ;;  %v3469_v45 = vpop.f32.mrf.mxu0  ;;  %3888 = vmatpush2.msra.mxu0 %v2611_v32  ;;  %v1526_v30 = vunpack.c.h.bf16 %v459_v22  ;;  %v1525_v32 = vunpack.c.l.bf16 %v459_v22  ;;  %v431_v0 = vld [vmem:[%s5679_s0 + $0x470] sm:$0xff] }
 0x228   : > { %3959 = vmatpush2.msra.mxu1 %v2867_v33  ;;  %v3470_v49 = vadd.f32 %v3469_v45, %v3399_v39  ;;  %3889 = vmatprep.subr.mxu0 %v2604_v37  ;;  %v323_v33 = vld [vmem:[%s5679_s0 + $0x110] sm:$0xff]  ;;  %v1261_v37 = vunpack.c.l.bf16 %v327_v27  ;;  %v1470_v8 = vunpack.c.h.bf16 %v431_v0 }
 0x229   : > { %3960 = vmatprep.subr.mxu1 %v2860_v38  ;;  %v3471_v53 = vpop.f32.mrf.mxu0  ;;  %3890 = vmatpush2.msra.mxu0 %v2603_v40  ;;  %v1517_v38 = vunpack.c.l.bf16 %v455_v28  ;;  %v319_v39 = vld [vmem:[%s5679_s0 + $0xf0] sm:$0xff] }
 0x22a   : > { %3961 = vmatpush2.msra.mxu1 %v2859_v41  ;;  %v4965_v54 = vadd.f32 %v3470_v49, %v281_v44  ;;  %v3472_v56 = vadd.f32 %v3471_v53, %v3401_v47  ;;  %3891 = vmatprep.subr.mxu0 %v2596_v42  ;;  %v447_v40 = vld [vmem:[%s5679_s0 + $0x4f0] sm:$0xff]  ;;  %v1254_v41 = vunpack.c.h.bf16 %v323_v33  ;;  %v1510_v42 = vunpack.c.h.bf16 %v451_v34 }
 0x22b   : > { %3962 = vmatprep.subr.mxu1 %v2852_v43  ;;  %3892 = vmatpush2.msra.mxu0 %v2595_v48  ;;  %v1253_v43 = vunpack.c.l.bf16 %v323_v33  ;;  %v1509_v44 = vunpack.c.l.bf16 %v451_v34  ;;  %v315_v45 = vld [vmem:[%s5679_s0 + $0xd0] sm:$0xff]  ;;  %v1246_v47 = vunpack.c.h.bf16 %v319_v39  ;;  %v1502_v48 = vunpack.c.h.bf16 %v447_v40 }
 0x22c   : > { %3893 = vmatprep.mubr.f32.mxu0 %v5303_v60  ;;  %4973 = vst [vmem:[#allocation2 + $0x30] sm:$0xff] %v4965_v54  ;;  %v4966_v63 = vadd.f32 %v3472_v56, %v282_v52  ;;  %3963 = vmatpush2.msra.mxu1 %v2851_v51  ;;  %v1245_v49 = vunpack.c.l.bf16 %v319_v39  ;;  %v1501_v50 = vunpack.c.l.bf16 %v447_v40  ;;  %v311_v51 = vld [vmem:[%s5679_s0 + $0xb0] sm:$0xff]  ;;  %v1238_v53 = vunpack.c.h.bf16 %v315_v45 }
 0x22d   : > { %3894 = vmatmul.mubr.f32.vlgmr.msra.gmra.mxu0 %v5304_v2  ;;  %3964 = vmatprep.mubr.f32.mxu1 %v5305_v5  ;;  %v439_v52 = vld [vmem:[%s5679_s0 + $0x4b0] sm:$0xff]  ;;  %v1494_v54 = vunpack.c.h.bf16 %v443_v46  ;;  %v1493_v56 = vunpack.c.l.bf16 %v443_v46  ;;  %v1478_v2 = vunpack.c.h.bf16 %v435_v58 }
 0x22e   : > { %3971 = vmatprep.subr.mxu0 %v1310_v55  ;;  %4974 = vst [vmem:[#allocation2] sm:$0xff] %v4966_v63  ;;  %4042 = vmatprep.subr.mxu1 %v1566_v59  ;;  %v1237_v55 = vunpack.c.l.bf16 %v315_v45  ;;  %v1230_v59 = vunpack.c.h.bf16 %v311_v51  ;;  %v1486_v60 = vunpack.c.h.bf16 %v439_v52  ;;  %v303_v63 = vld [vmem:[%s5679_s0 + $0x70] sm:$0xff] }
 0x22f   : > { %3965 = vmatmul.mubr.f32.vlgmr.msra.gmra.mxu1 %v5306_v10  ;;  %3972 = vmatpush1.msra.mxu0 %v1309_v61  ;;  %v1229_v61 = vunpack.c.l.bf16 %v311_v51  ;;  %v299_v5 = vld [vmem:[%s5679_s0 + $0x50] sm:$0xff]  ;;  %v1213_v9 = vunpack.c.l.bf16 %v303_v63  ;;  %v1469_v10 = vunpack.c.l.bf16 %v431_v0 }
 0x230   : > { %4043 = vmatpush1.msra.mxu1 %v1565_v62  ;;  %3973 = vmatprep.subr.mxu0 %v1302_v3  ;;  %v1485_v62 = vunpack.c.l.bf16 %v439_v52  ;;  %v1221_v3 = vunpack.c.l.bf16 %v307_v57  ;;  %v1205_v15 = vunpack.c.l.bf16 %v299_v5 }
 0x231   : > { %4044 = vmatprep.subr.mxu1 %v1558_v4  ;;  %3974 = vmatpush1.msra.mxu0 %v1301_v6  ;;  %v1477_v4 = vunpack.c.l.bf16 %v435_v58  ;;  %v427_v6 = vld [vmem:[%s5679_s0 + $0x450] sm:$0xff] }
 0x232   : > { %4045 = vmatpush1.msra.mxu1 %v1557_v7  ;;  %3975 = vmatprep.subr.mxu0 %v1294_v11  ;;  %v1214_v7 = vunpack.c.h.bf16 %v303_v63  ;;  %v295_v11 = vld [vmem:[%s5679_s0 + $0x30] sm:$0xff]  ;;  %v1461_v16 = vunpack.c.l.bf16 %v427_v6 }
 0x233   : > { %4046 = vmatprep.subr.mxu1 %v1550_v12  ;;  %3976 = vmatpush1.msra.mxu0 %v1293_v13  ;;  %v423_v12 = vld [vmem:[%s5679_s0 + $0x430] sm:$0xff]  ;;  %v1206_v13 = vunpack.c.h.bf16 %v299_v5  ;;  %v1197_v21 = vunpack.c.l.bf16 %v295_v11 }
 0x234   : > { %4047 = vmatpush1.msra.mxu1 %v1549_v14  ;;  %3977 = vmatprep.subr.mxu0 %v1286_v17  ;;  %v1462_v14 = vunpack.c.h.bf16 %v427_v6  ;;  %v291_v17 = vld [vmem:[%s5679_s0 + $0x10] sm:$0xff]  ;;  %v1453_v22 = vunpack.c.l.bf16 %v423_v12 }
 0x235   : > { %4048 = vmatprep.subr.mxu1 %v1542_v18  ;;  %3978 = vmatpush1.msra.mxu0 %v1285_v19  ;;  %v419_v18 = vld [vmem:[%s5679_s0 + $0x410] sm:$0xff]  ;;  %v1198_v19 = vunpack.c.h.bf16 %v295_v11  ;;  %v1189_v27 = vunpack.c.l.bf16 %v291_v17 }
 0x236   : > { %4049 = vmatpush1.msra.mxu1 %v1541_v20  ;;  %3979 = vmatprep.subr.mxu0 %v1278_v23  ;;  %v1454_v20 = vunpack.c.h.bf16 %v423_v12  ;;  %v415_v23 = vld [vmem:[%s5679_s0 + $0x3f0] sm:$0xff]  ;;  %v1445_v28 = vunpack.c.l.bf16 %v419_v18 }
 0x237   : > { %4050 = vmatprep.subr.mxu1 %v1534_v24  ;;  %3980 = vmatpush1.msra.mxu0 %v1277_v25  ;;  %v543_v24 = vld [vmem:[%s5679_s0 + $0x7f0] sm:$0xff]  ;;  %v1190_v25 = vunpack.c.h.bf16 %v291_v17  ;;  %v1437_v33 = vunpack.c.l.bf16 %v415_v23 }
 0x238   : > { %4051 = vmatpush1.msra.mxu1 %v1533_v26  ;;  %3981 = vmatprep.subr.mxu0 %v1270_v29  ;;  %v1446_v26 = vunpack.c.h.bf16 %v419_v18  ;;  %v411_v29 = vld [vmem:[%s5679_s0 + $0x3d0] sm:$0xff]  ;;  %v1693_v34 = vunpack.c.l.bf16 %v543_v24 }
 0x239   : > { %4052 = vmatprep.subr.mxu1 %v1526_v30  ;;  %3982 = vmatpush1.msra.mxu0 %v1269_v31  ;;  %v539_v30 = vld [vmem:[%s5679_s0 + $0x7d0] sm:$0xff]  ;;  %v1438_v31 = vunpack.c.h.bf16 %v415_v23  ;;  %v1429_v39 = vunpack.c.l.bf16 %v411_v29 }
 0x23a   : > { %4053 = vmatpush1.msra.mxu1 %v1525_v32  ;;  %3983 = vmatprep.subr.mxu0 %v1262_v35  ;;  %v1694_v32 = vunpack.c.h.bf16 %v543_v24  ;;  %v407_v35 = vld [vmem:[%s5679_s0 + $0x3b0] sm:$0xff]  ;;  %v1685_v40 = vunpack.c.l.bf16 %v539_v30 }
 0x23b   : > { %4054 = vmatprep.subr.mxu1 %v1518_v36  ;;  %3984 = vmatpush1.msra.mxu0 %v1261_v37  ;;  %v535_v36 = vld [vmem:[%s5679_s0 + $0x7b0] sm:$0xff]  ;;  %v1430_v37 = vunpack.c.h.bf16 %v411_v29  ;;  %v1421_v45 = vunpack.c.l.bf16 %v407_v35 }
 0x23c   : > { %4055 = vmatpush1.msra.mxu1 %v1517_v38  ;;  %3985 = vmatprep.subr.mxu0 %v1254_v41  ;;  %v1686_v38 = vunpack.c.h.bf16 %v539_v30  ;;  %v403_v41 = vld [vmem:[%s5679_s0 + $0x390] sm:$0xff]  ;;  %v1677_v46 = vunpack.c.l.bf16 %v535_v36 }
 0x23d   : > { %4056 = vmatprep.subr.mxu1 %v1510_v42  ;;  %3986 = vmatpush1.msra.mxu0 %v1253_v43  ;;  %v531_v42 = vld [vmem:[%s5679_s0 + $0x790] sm:$0xff]  ;;  %v1422_v43 = vunpack.c.h.bf16 %v407_v35  ;;  %v1413_v51 = vunpack.c.l.bf16 %v403_v41 }
 0x23e   : > { %4057 = vmatpush1.msra.mxu1 %v1509_v44  ;;  %3987 = vmatprep.subr.mxu0 %v1246_v47  ;;  %v1678_v44 = vunpack.c.h.bf16 %v535_v36  ;;  %v399_v47 = vld [vmem:[%s5679_s0 + $0x370] sm:$0xff]  ;;  %v1669_v52 = vunpack.c.l.bf16 %v531_v42 }
 0x23f   : > { %4058 = vmatprep.subr.mxu1 %v1502_v48  ;;  %3988 = vmatpush1.msra.mxu0 %v1245_v49  ;;  %v527_v48 = vld [vmem:[%s5679_s0 + $0x770] sm:$0xff]  ;;  %v1414_v49 = vunpack.c.h.bf16 %v403_v41  ;;  %v1405_v57 = vunpack.c.l.bf16 %v399_v47 }
 0x240   : > { %4059 = vmatpush1.msra.mxu1 %v1501_v50  ;;  %3989 = vmatprep.subr.mxu0 %v1238_v53  ;;  %v1670_v50 = vunpack.c.h.bf16 %v531_v42  ;;  %v395_v53 = vld [vmem:[%s5679_s0 + $0x350] sm:$0xff]  ;;  %v1661_v58 = vunpack.c.l.bf16 %v527_v48 }
 0x241   : > { %4060 = vmatprep.subr.mxu1 %v1494_v54  ;;  %3990 = vmatpush1.msra.mxu0 %v1237_v55  ;;  %v523_v54 = vld [vmem:[%s5679_s0 + $0x750] sm:$0xff]  ;;  %v1406_v55 = vunpack.c.h.bf16 %v399_v47  ;;  %v1397_v63 = vunpack.c.l.bf16 %v395_v53 }
 0x242   : > { %4061 = vmatpush1.msra.mxu1 %v1493_v56  ;;  %3991 = vmatprep.subr.mxu0 %v1230_v59  ;;  %v1662_v56 = vunpack.c.h.bf16 %v527_v48  ;;  %v391_v59 = vld [vmem:[%s5679_s0 + $0x330] sm:$0xff]  ;;  %v1653_v0 = vunpack.c.l.bf16 %v523_v54 }
 0x243   : > { %4062 = vmatprep.subr.mxu1 %v1486_v60  ;;  %3992 = vmatpush1.msra.mxu0 %v1229_v61  ;;  %v519_v60 = vld [vmem:[%s5679_s0 + $0x730] sm:$0xff]  ;;  %v1398_v61 = vunpack.c.h.bf16 %v395_v53  ;;  %v1389_v5 = vunpack.c.l.bf16 %v391_v59 }
 0x244   : > { %4063 = vmatpush1.msra.mxu1 %v1485_v62  ;;  %3993 = vmatprep.subr.mxu0 %v1222_v1  ;;  %v1654_v62 = vunpack.c.h.bf16 %v523_v54  ;;  %v387_v1 = vld [vmem:[%s5679_s0 + $0x310] sm:$0xff]  ;;  %v1645_v6 = vunpack.c.l.bf16 %v519_v60 }
 0x245   : > { %4064 = vmatprep.subr.mxu1 %v1478_v2  ;;  %3994 = vmatpush1.msra.mxu0 %v1221_v3  ;;  %v515_v2 = vld [vmem:[%s5679_s0 + $0x710] sm:$0xff]  ;;  %v1390_v3 = vunpack.c.h.bf16 %v391_v59  ;;  %v1381_v11 = vunpack.c.l.bf16 %v387_v1 }
 0x246   : > { %4065 = vmatpush1.msra.mxu1 %v1477_v4  ;;  %3995 = vmatprep.subr.mxu0 %v1214_v7  ;;  %v1646_v4 = vunpack.c.h.bf16 %v519_v60  ;;  %v383_v7 = vld [vmem:[%s5679_s0 + $0x2f0] sm:$0xff]  ;;  %v1637_v12 = vunpack.c.l.bf16 %v515_v2 }
 0x247   : > { %4066 = vmatprep.subr.mxu1 %v1470_v8  ;;  %3996 = vmatpush1.msra.mxu0 %v1213_v9  ;;  %v511_v8 = vld [vmem:[%s5679_s0 + $0x6f0] sm:$0xff]  ;;  %v1382_v9 = vunpack.c.h.bf16 %v387_v1  ;;  %v1373_v17 = vunpack.c.l.bf16 %v383_v7  ;;  %v5307_v1 = vld [vmem:[%s5771_s18 + $0x8] sm:$0xff] }
 0x248   : > { %4067 = vmatpush1.msra.mxu1 %v1469_v10  ;;  %3997 = vmatprep.subr.mxu0 %v1206_v13  ;;  %v1638_v10 = vunpack.c.h.bf16 %v515_v2  ;;  %v379_v13 = vld [vmem:[%s5679_s0 + $0x2d0] sm:$0xff]  ;;  %v1629_v18 = vunpack.c.l.bf16 %v511_v8 }
 0x249   : > { %4068 = vmatprep.subr.mxu1 %v1462_v14  ;;  %3998 = vmatpush1.msra.mxu0 %v1205_v15  ;;  %v507_v14 = vld [vmem:[%s5679_s0 + $0x6d0] sm:$0xff]  ;;  %v1374_v15 = vunpack.c.h.bf16 %v383_v7  ;;  %v1365_v23 = vunpack.c.l.bf16 %v379_v13 }
 0x24a   : > { %4069 = vmatpush1.msra.mxu1 %v1461_v16  ;;  %3999 = vmatprep.subr.mxu0 %v1198_v19  ;;  %v1630_v16 = vunpack.c.h.bf16 %v511_v8  ;;  %v375_v19 = vld [vmem:[%s5679_s0 + $0x2b0] sm:$0xff]  ;;  %v1621_v24 = vunpack.c.l.bf16 %v507_v14 }
 0x24b   : > { %4070 = vmatprep.subr.mxu1 %v1454_v20  ;;  %4000 = vmatpush1.msra.mxu0 %v1197_v21  ;;  %v503_v20 = vld [vmem:[%s5679_s0 + $0x6b0] sm:$0xff]  ;;  %v1366_v21 = vunpack.c.h.bf16 %v379_v13  ;;  %v1357_v29 = vunpack.c.l.bf16 %v375_v19 }
 0x24c   : > { %4071 = vmatpush1.msra.mxu1 %v1453_v22  ;;  %4001 = vmatprep.subr.mxu0 %v1190_v25  ;;  %v1622_v22 = vunpack.c.h.bf16 %v507_v14  ;;  %v371_v25 = vld [vmem:[%s5679_s0 + $0x290] sm:$0xff]  ;;  %v1613_v30 = vunpack.c.l.bf16 %v503_v20 }
 0x24d   : > { %4072 = vmatprep.subr.mxu1 %v1446_v26  ;;  %4002 = vmatpush1.msra.mxu0 %v1189_v27  ;;  %v499_v26 = vld [vmem:[%s5679_s0 + $0x690] sm:$0xff]  ;;  %v1358_v27 = vunpack.c.h.bf16 %v375_v19  ;;  %v1349_v35 = vunpack.c.l.bf16 %v371_v25 }
 0x24e   : > { %4073 = vmatpush1.msra.mxu1 %v1445_v28  ;;  %4003 = vmatprep.subr.mxu0 %v1438_v31  ;;  %v1614_v28 = vunpack.c.h.bf16 %v503_v20  ;;  %v367_v31 = vld [vmem:[%s5679_s0 + $0x270] sm:$0xff]  ;;  %v1605_v36 = vunpack.c.l.bf16 %v499_v26 }
 0x24f   : > { %4074 = vmatprep.subr.mxu1 %v1694_v32  ;;  %4004 = vmatpush2.msra.mxu0 %v1437_v33  ;;  %v495_v32 = vld [vmem:[%s5679_s0 + $0x670] sm:$0xff]  ;;  %v1350_v33 = vunpack.c.h.bf16 %v371_v25  ;;  %v1341_v41 = vunpack.c.l.bf16 %v367_v31 }
 0x250   : > { %4075 = vmatpush2.msra.mxu1 %v1693_v34  ;;  %4005 = vmatprep.subr.mxu0 %v1430_v37  ;;  %v1606_v34 = vunpack.c.h.bf16 %v499_v26  ;;  %v363_v37 = vld [vmem:[%s5679_s0 + $0x250] sm:$0xff]  ;;  %v1597_v42 = vunpack.c.l.bf16 %v495_v32 }
 0x251   : > { %4076 = vmatprep.subr.mxu1 %v1686_v38  ;;  %4006 = vmatpush2.msra.mxu0 %v1429_v39  ;;  %v491_v38 = vld [vmem:[%s5679_s0 + $0x650] sm:$0xff]  ;;  %v1342_v39 = vunpack.c.h.bf16 %v367_v31  ;;  %v1333_v47 = vunpack.c.l.bf16 %v363_v37 }
 0x252   : > { %4077 = vmatpush2.msra.mxu1 %v1685_v40  ;;  %4007 = vmatprep.subr.mxu0 %v1422_v43  ;;  %v1598_v40 = vunpack.c.h.bf16 %v495_v32  ;;  %v359_v43 = vld [vmem:[%s5679_s0 + $0x230] sm:$0xff]  ;;  %v1589_v48 = vunpack.c.l.bf16 %v491_v38 }
 0x253   : > { %4078 = vmatprep.subr.mxu1 %v1678_v44  ;;  %4008 = vmatpush2.msra.mxu0 %v1421_v45  ;;  %v487_v44 = vld [vmem:[%s5679_s0 + $0x630] sm:$0xff]  ;;  %v1334_v45 = vunpack.c.h.bf16 %v363_v37  ;;  %v1325_v53 = vunpack.c.l.bf16 %v359_v43 }
 0x254   : > { %4079 = vmatpush2.msra.mxu1 %v1677_v46  ;;  %4009 = vmatprep.subr.mxu0 %v1414_v49  ;;  %v1590_v46 = vunpack.c.h.bf16 %v491_v38  ;;  %v355_v49 = vld [vmem:[%s5679_s0 + $0x210] sm:$0xff]  ;;  %v1581_v54 = vunpack.c.l.bf16 %v487_v44 }
 0x255   : > { %4080 = vmatprep.subr.mxu1 %v1670_v50  ;;  %4010 = vmatpush2.msra.mxu0 %v1413_v51  ;;  %v483_v50 = vld [vmem:[%s5679_s0 + $0x610] sm:$0xff]  ;;  %v1326_v51 = vunpack.c.h.bf16 %v359_v43 }
 0x256   : > { %4081 = vmatpush2.msra.mxu1 %v1669_v52  ;;  %4011 = vmatprep.subr.mxu0 %v1406_v55  ;;  %v1582_v52 = vunpack.c.h.bf16 %v487_v44  ;;  %v1318_v55 = vunpack.c.h.bf16 %v355_v49  ;;  %v735_v59 = vld [vmem:[%s5679_s0 + $0xdf0] sm:$0xff]  ;;  %v1573_v60 = vunpack.c.l.bf16 %v483_v50 }
 0x257   : > { %4082 = vmatprep.subr.mxu1 %v1662_v56  ;;  %4012 = vmatpush2.msra.mxu0 %v1405_v57  ;;  %v1574_v56 = vunpack.c.h.bf16 %v483_v50  ;;  %v1317_v57 = vunpack.c.l.bf16 %v355_v49  ;;  %v595_v13 = vld [vmem:[%s5679_s0 + $0x990] sm:$0xff] }
 0x258   : > { %4083 = vmatpush2.msra.mxu1 %v1661_v58  ;;  %4013 = vmatprep.subr.mxu0 %v1398_v61  ;;  %v607_v58 = vld [vmem:[%s5679_s0 + $0x9f0] sm:$0xff] }
 0x259   : > { %4084 = vmatprep.subr.mxu1 %v1654_v62  ;;  %4014 = vmatpush2.msra.mxu0 %v1397_v63  ;;  %v603_v61 = vld [vmem:[%s5679_s0 + $0x9d0] sm:$0xff]  ;;  %v1822_v63 = vunpack.c.h.bf16 %v607_v58  ;;  %v1821_v2 = vunpack.c.l.bf16 %v607_v58 }
 0x25a   : > { %4085 = vmatpush2.msra.mxu1 %v1653_v0  ;;  %4015 = vmatprep.subr.mxu0 %v1390_v3  ;;  %v731_v62 = vld [vmem:[%s5679_s0 + $0xdd0] sm:$0xff]  ;;  %v2078_v0 = vunpack.c.h.bf16 %v735_v59  ;;  %v2077_v3 = vunpack.c.l.bf16 %v735_v59  ;;  %v1814_v7 = vunpack.c.h.bf16 %v603_v61 }
 0x25b   : > { %4086 = vmatprep.subr.mxu1 %v1646_v4  ;;  %4016 = vmatpush2.msra.mxu0 %v1389_v5  ;;  %v599_v4 = vld [vmem:[%s5679_s0 + $0x9b0] sm:$0xff]  ;;  %v2070_v8 = vunpack.c.h.bf16 %v731_v62 }
 0x25c   : > { %4087 = vmatpush2.msra.mxu1 %v1645_v6  ;;  %4017 = vmatprep.subr.mxu0 %v1382_v9  ;;  %v727_v5 = vld [vmem:[%s5679_s0 + $0xdb0] sm:$0xff]  ;;  %v5308_v6 = vld [vmem:[%s5771_s18 + $0x18] sm:$0xff]  ;;  %v5309_v9 = vld [vmem:[%s5771_s18] sm:$0xff] }
 0x25d   : > { %4088 = vmatprep.subr.mxu1 %v1638_v10  ;;  %4018 = vmatpush2.msra.mxu0 %v1381_v11  ;;  %v5310_v10 = vld [vmem:[%s5771_s18 + $0x10] sm:$0xff]  ;;  %v1813_v11 = vunpack.c.l.bf16 %v603_v61 }
 0x25e   : > { %4089 = vmatpush2.msra.mxu1 %v1637_v12  ;;  %4019 = vmatprep.subr.mxu0 %v1374_v15  ;;  %v2069_v12 = vunpack.c.l.bf16 %v731_v62  ;;  %v723_v14 = vld [vmem:[%s5679_s0 + $0xd90] sm:$0xff]  ;;  %v1806_v15 = vunpack.c.h.bf16 %v599_v4 }
 0x25f   : > { %4090 = vmatprep.subr.mxu1 %v1630_v16  ;;  %4020 = vmatpush2.msra.mxu0 %v1373_v17  ;;  %v2062_v16 = vunpack.c.h.bf16 %v727_v5  ;;  %v1805_v17 = vunpack.c.l.bf16 %v599_v4  ;;  %v591_v19 = vld [vmem:[%s5679_s0 + $0x970] sm:$0xff] }
 0x260   : > { %4091 = vmatpush2.msra.mxu1 %v1629_v18  ;;  %4021 = vmatprep.subr.mxu0 %v1366_v21  ;;  %v2061_v18 = vunpack.c.l.bf16 %v727_v5  ;;  %v719_v20 = vld [vmem:[%s5679_s0 + $0xd70] sm:$0xff]  ;;  %v1798_v21 = vunpack.c.h.bf16 %v595_v13 }
 0x261   : > { %4092 = vmatprep.subr.mxu1 %v1622_v22  ;;  %4022 = vmatpush2.msra.mxu0 %v1365_v23  ;;  %v2054_v22 = vunpack.c.h.bf16 %v723_v14  ;;  %v1797_v23 = vunpack.c.l.bf16 %v595_v13  ;;  %v587_v25 = vld [vmem:[%s5679_s0 + $0x950] sm:$0xff] }
 0x262   : > { %4093 = vmatpush2.msra.mxu1 %v1621_v24  ;;  %4023 = vmatprep.subr.mxu0 %v1358_v27  ;;  %v2053_v24 = vunpack.c.l.bf16 %v723_v14  ;;  %v715_v26 = vld [vmem:[%s5679_s0 + $0xd50] sm:$0xff]  ;;  %v1790_v27 = vunpack.c.h.bf16 %v591_v19 }
 0x263   : > { %4094 = vmatprep.subr.mxu1 %v1614_v28  ;;  %4024 = vmatpush2.msra.mxu0 %v1357_v29  ;;  %v2046_v28 = vunpack.c.h.bf16 %v719_v20  ;;  %v1789_v29 = vunpack.c.l.bf16 %v591_v19  ;;  %v583_v31 = vld [vmem:[%s5679_s0 + $0x930] sm:$0xff] }
 0x264   : > { %4095 = vmatpush2.msra.mxu1 %v1613_v30  ;;  %4025 = vmatprep.subr.mxu0 %v1350_v33  ;;  %v2045_v30 = vunpack.c.l.bf16 %v719_v20  ;;  %v711_v32 = vld [vmem:[%s5679_s0 + $0xd30] sm:$0xff]  ;;  %v1782_v33 = vunpack.c.h.bf16 %v587_v25 }
 0x265   : > { %4096 = vmatprep.subr.mxu1 %v1606_v34  ;;  %4026 = vmatpush2.msra.mxu0 %v1349_v35  ;;  %v2038_v34 = vunpack.c.h.bf16 %v715_v26  ;;  %v1781_v35 = vunpack.c.l.bf16 %v587_v25  ;;  %v579_v37 = vld [vmem:[%s5679_s0 + $0x910] sm:$0xff] }
 0x266   : > { %4097 = vmatpush2.msra.mxu1 %v1605_v36  ;;  %4027 = vmatprep.subr.mxu0 %v1342_v39  ;;  %v2037_v36 = vunpack.c.l.bf16 %v715_v26  ;;  %v707_v38 = vld [vmem:[%s5679_s0 + $0xd10] sm:$0xff]  ;;  %v1774_v39 = vunpack.c.h.bf16 %v583_v31 }
 0x267   : > { %4098 = vmatprep.subr.mxu1 %v1598_v40  ;;  %4028 = vmatpush2.msra.mxu0 %v1341_v41  ;;  %v2030_v40 = vunpack.c.h.bf16 %v711_v32  ;;  %v1773_v41 = vunpack.c.l.bf16 %v583_v31  ;;  %v575_v43 = vld [vmem:[%s5679_s0 + $0x8f0] sm:$0xff] }
 0x268   : > { %4099 = vmatpush2.msra.mxu1 %v1597_v42  ;;  %4029 = vmatprep.subr.mxu0 %v1334_v45  ;;  %v2029_v42 = vunpack.c.l.bf16 %v711_v32  ;;  %v703_v44 = vld [vmem:[%s5679_s0 + $0xcf0] sm:$0xff]  ;;  %v1766_v45 = vunpack.c.h.bf16 %v579_v37 }
 0x269   : > { %4100 = vmatprep.subr.mxu1 %v1590_v46  ;;  %4030 = vmatpush2.msra.mxu0 %v1333_v47  ;;  %v2022_v46 = vunpack.c.h.bf16 %v707_v38  ;;  %v1765_v47 = vunpack.c.l.bf16 %v579_v37  ;;  %v571_v49 = vld [vmem:[%s5679_s0 + $0x8d0] sm:$0xff] }
 0x26a   : > { %4101 = vmatpush2.msra.mxu1 %v1589_v48  ;;  %4031 = vmatprep.subr.mxu0 %v1326_v51  ;;  %v2021_v48 = vunpack.c.l.bf16 %v707_v38  ;;  %v699_v50 = vld [vmem:[%s5679_s0 + $0xcd0] sm:$0xff]  ;;  %v1758_v51 = vunpack.c.h.bf16 %v575_v43  ;;  %v1749_v59 = vunpack.c.l.bf16 %v571_v49 }
 0x26b   : > { %4102 = vmatprep.subr.mxu1 %v1582_v52  ;;  %4032 = vmatpush2.msra.mxu0 %v1325_v53  ;;  %v2014_v52 = vunpack.c.h.bf16 %v703_v44  ;;  %v1757_v53 = vunpack.c.l.bf16 %v575_v43  ;;  %v2006_v58 = vunpack.c.h.bf16 %v699_v50  ;;  %v563_v61 = vld [vmem:[%s5679_s0 + $0x890] sm:$0xff] }
 0x26c   : > { %4103 = vmatpush2.msra.mxu1 %v1581_v54  ;;  %4033 = vmatprep.subr.mxu0 %v1318_v55  ;;  %v2013_v54 = vunpack.c.l.bf16 %v703_v44  ;;  %v567_v55 = vld [vmem:[%s5679_s0 + $0x8b0] sm:$0xff]  ;;  %v1734_v5 = vunpack.c.h.bf16 %v563_v61 }
 0x26d   : > { %4104 = vmatprep.subr.mxu1 %v1574_v56  ;;  %4034 = vmatpush2.msra.mxu0 %v1317_v57  ;;  %v695_v56 = vld [vmem:[%s5679_s0 + $0xcb0] sm:$0xff]  ;;  %v1750_v57 = vunpack.c.h.bf16 %v571_v49 }
 0x26e   : > { %4035 = vmatprep.mubr.f32.mxu0 %v5307_v1  ;;  %4105 = vmatpush2.msra.mxu1 %v1573_v60  ;;  %v2005_v60 = vunpack.c.l.bf16 %v699_v50  ;;  %v691_v62 = vld [vmem:[%s5679_s0 + $0xc90] sm:$0xff]  ;;  %v1741_v1 = vunpack.c.l.bf16 %v567_v55 }
 0x26f   : > { %4106 = vmatprep.mubr.f32.mxu1 %v5308_v6  ;;  %4036 = vmatmul.mubr.f32.vlgmr.msra.gmra.mxu0 %v5309_v9  ;;  %v687_v4 = vld [vmem:[%s5679_s0 + $0xc70] sm:$0xff]  ;;  %v1990_v6 = vunpack.c.h.bf16 %v691_v62 }
 0x270   : > { %4107 = vmatmul.mubr.f32.vlgmr.msra.gmra.mxu1 %v5310_v10  ;;  %4113 = vmatprep.subr.mxu0 %v1822_v63  ;;  %v1742_v63 = vunpack.c.h.bf16 %v567_v55  ;;  %v555_v9 = vld [vmem:[%s5679_s0 + $0x850] sm:$0xff]  ;;  %v1981_v14 = vunpack.c.l.bf16 %v687_v4 }
 0x271   : > { %4184 = vmatprep.subr.mxu1 %v2078_v0  ;;  %4114 = vmatpush1.msra.mxu0 %v1821_v2  ;;  %v1998_v0 = vunpack.c.h.bf16 %v695_v56  ;;  %v1997_v2 = vunpack.c.l.bf16 %v695_v56  ;;  %v683_v10 = vld [vmem:[%s5679_s0 + $0xc50] sm:$0xff]  ;;  %v1717_v19 = vunpack.c.l.bf16 %v555_v9 }
 0x272   : > { %4185 = vmatpush1.msra.mxu1 %v2077_v3  ;;  %4115 = vmatprep.subr.mxu0 %v1814_v7  ;;  %v559_v3 = vld [vmem:[%s5679_s0 + $0x870] sm:$0xff]  ;;  %v1733_v7 = vunpack.c.l.bf16 %v563_v61  ;;  %v1973_v20 = vunpack.c.l.bf16 %v683_v10 }
 0x273   : > { %4186 = vmatprep.subr.mxu1 %v2070_v8  ;;  %4116 = vmatpush1.msra.mxu0 %v1813_v11  ;;  %v1989_v8 = vunpack.c.l.bf16 %v691_v62  ;;  %v1726_v11 = vunpack.c.h.bf16 %v559_v3  ;;  %v1725_v13 = vunpack.c.l.bf16 %v559_v3 }
 0x274   : > { %4187 = vmatpush1.msra.mxu1 %v2069_v12  ;;  %4117 = vmatprep.subr.mxu0 %v1806_v15  ;;  %v1982_v12 = vunpack.c.h.bf16 %v687_v4  ;;  %v551_v15 = vld [vmem:[%s5679_s0 + $0x830] sm:$0xff] }
 0x275   : > { %4188 = vmatprep.subr.mxu1 %v2062_v16  ;;  %4118 = vmatpush1.msra.mxu0 %v1805_v17  ;;  %v679_v16 = vld [vmem:[%s5679_s0 + $0xc30] sm:$0xff]  ;;  %v1718_v17 = vunpack.c.h.bf16 %v555_v9  ;;  %v1709_v25 = vunpack.c.l.bf16 %v551_v15 }
 0x276   : > { %4189 = vmatpush1.msra.mxu1 %v2061_v18  ;;  %4119 = vmatprep.subr.mxu0 %v1798_v21  ;;  %v1974_v18 = vunpack.c.h.bf16 %v683_v10  ;;  %v547_v21 = vld [vmem:[%s5679_s0 + $0x810] sm:$0xff]  ;;  %v1965_v26 = vunpack.c.l.bf16 %v679_v16 }
 0x277   : > { %4190 = vmatprep.subr.mxu1 %v2054_v22  ;;  %4120 = vmatpush1.msra.mxu0 %v1797_v23  ;;  %v675_v22 = vld [vmem:[%s5679_s0 + $0xc10] sm:$0xff]  ;;  %v1710_v23 = vunpack.c.h.bf16 %v551_v15  ;;  %v1701_v31 = vunpack.c.l.bf16 %v547_v21 }
 0x278   : > { %4191 = vmatpush1.msra.mxu1 %v2053_v24  ;;  %4121 = vmatprep.subr.mxu0 %v1790_v27  ;;  %v1966_v24 = vunpack.c.h.bf16 %v679_v16  ;;  %v671_v27 = vld [vmem:[%s5679_s0 + $0xbf0] sm:$0xff]  ;;  %v1957_v32 = vunpack.c.l.bf16 %v675_v22 }
 0x279   : > { %4192 = vmatprep.subr.mxu1 %v2046_v28  ;;  %4122 = vmatpush1.msra.mxu0 %v1789_v29  ;;  %v799_v28 = vld [vmem:[%s5679_s0 + $0xff0] sm:$0xff]  ;;  %v1702_v29 = vunpack.c.h.bf16 %v547_v21  ;;  %v1949_v37 = vunpack.c.l.bf16 %v671_v27 }
 0x27a   : > { %4193 = vmatpush1.msra.mxu1 %v2045_v30  ;;  %4123 = vmatprep.subr.mxu0 %v1782_v33  ;;  %v1958_v30 = vunpack.c.h.bf16 %v675_v22  ;;  %v667_v33 = vld [vmem:[%s5679_s0 + $0xbd0] sm:$0xff]  ;;  %v2205_v38 = vunpack.c.l.bf16 %v799_v28 }
 0x27b   : > { %4194 = vmatprep.subr.mxu1 %v2038_v34  ;;  %4124 = vmatpush1.msra.mxu0 %v1781_v35  ;;  %v795_v34 = vld [vmem:[%s5679_s0 + $0xfd0] sm:$0xff]  ;;  %v1950_v35 = vunpack.c.h.bf16 %v671_v27  ;;  %v1941_v43 = vunpack.c.l.bf16 %v667_v33 }
 0x27c   : > { %4195 = vmatpush1.msra.mxu1 %v2037_v36  ;;  %4125 = vmatprep.subr.mxu0 %v1774_v39  ;;  %v2206_v36 = vunpack.c.h.bf16 %v799_v28  ;;  %v663_v39 = vld [vmem:[%s5679_s0 + $0xbb0] sm:$0xff]  ;;  %v2197_v44 = vunpack.c.l.bf16 %v795_v34 }
 0x27d   : > { %4196 = vmatprep.subr.mxu1 %v2030_v40  ;;  %4126 = vmatpush1.msra.mxu0 %v1773_v41  ;;  %v791_v40 = vld [vmem:[%s5679_s0 + $0xfb0] sm:$0xff]  ;;  %v1942_v41 = vunpack.c.h.bf16 %v667_v33  ;;  %v1933_v49 = vunpack.c.l.bf16 %v663_v39 }
 0x27e   : > { %4197 = vmatpush1.msra.mxu1 %v2029_v42  ;;  %4127 = vmatprep.subr.mxu0 %v1766_v45  ;;  %v2198_v42 = vunpack.c.h.bf16 %v795_v34  ;;  %v659_v45 = vld [vmem:[%s5679_s0 + $0xb90] sm:$0xff]  ;;  %v2189_v50 = vunpack.c.l.bf16 %v791_v40 }
 0x27f   : > { %4198 = vmatprep.subr.mxu1 %v2022_v46  ;;  %4128 = vmatpush1.msra.mxu0 %v1765_v47  ;;  %v787_v46 = vld [vmem:[%s5679_s0 + $0xf90] sm:$0xff]  ;;  %v1934_v47 = vunpack.c.h.bf16 %v663_v39  ;;  %v1925_v55 = vunpack.c.l.bf16 %v659_v45 }
 0x280   : > { %4199 = vmatpush1.msra.mxu1 %v2021_v48  ;;  %4129 = vmatprep.subr.mxu0 %v1758_v51  ;;  %v2190_v48 = vunpack.c.h.bf16 %v791_v40  ;;  %v655_v51 = vld [vmem:[%s5679_s0 + $0xb70] sm:$0xff]  ;;  %v2181_v56 = vunpack.c.l.bf16 %v787_v46 }
 0x281   : > { %4200 = vmatprep.subr.mxu1 %v2014_v52  ;;  %4130 = vmatpush1.msra.mxu0 %v1757_v53  ;;  %v783_v52 = vld [vmem:[%s5679_s0 + $0xf70] sm:$0xff]  ;;  %v1926_v53 = vunpack.c.h.bf16 %v659_v45  ;;  %v1917_v61 = vunpack.c.l.bf16 %v655_v51 }
 0x282   : > { %4201 = vmatpush1.msra.mxu1 %v2013_v54  ;;  %4131 = vmatprep.subr.mxu0 %v1750_v57  ;;  %v2182_v54 = vunpack.c.h.bf16 %v787_v46  ;;  %v651_v57 = vld [vmem:[%s5679_s0 + $0xb50] sm:$0xff]  ;;  %v2173_v62 = vunpack.c.l.bf16 %v783_v52 }
 0x283   : > { %4202 = vmatprep.subr.mxu1 %v2006_v58  ;;  %4132 = vmatpush1.msra.mxu0 %v1749_v59  ;;  %v779_v58 = vld [vmem:[%s5679_s0 + $0xf50] sm:$0xff]  ;;  %v1918_v59 = vunpack.c.h.bf16 %v655_v51  ;;  %v1909_v3 = vunpack.c.l.bf16 %v651_v57 }
 0x284   : > { %4203 = vmatpush1.msra.mxu1 %v2005_v60  ;;  %4133 = vmatprep.subr.mxu0 %v1742_v63  ;;  %v2174_v60 = vunpack.c.h.bf16 %v783_v52  ;;  %v647_v63 = vld [vmem:[%s5679_s0 + $0xb30] sm:$0xff]  ;;  %v2165_v4 = vunpack.c.l.bf16 %v779_v58 }
 0x285   : > { %4204 = vmatprep.subr.mxu1 %v1998_v0  ;;  %4134 = vmatpush1.msra.mxu0 %v1741_v1  ;;  %v775_v0 = vld [vmem:[%s5679_s0 + $0xf30] sm:$0xff]  ;;  %v1910_v1 = vunpack.c.h.bf16 %v651_v57  ;;  %v1901_v9 = vunpack.c.l.bf16 %v647_v63 }
 0x286   : > { %4205 = vmatpush1.msra.mxu1 %v1997_v2  ;;  %4135 = vmatprep.subr.mxu0 %v1734_v5  ;;  %v2166_v2 = vunpack.c.h.bf16 %v779_v58  ;;  %v643_v5 = vld [vmem:[%s5679_s0 + $0xb10] sm:$0xff]  ;;  %v2157_v10 = vunpack.c.l.bf16 %v775_v0 }
 0x287   : > { %4206 = vmatprep.subr.mxu1 %v1990_v6  ;;  %4136 = vmatpush1.msra.mxu0 %v1733_v7  ;;  %v771_v6 = vld [vmem:[%s5679_s0 + $0xf10] sm:$0xff]  ;;  %v1902_v7 = vunpack.c.h.bf16 %v647_v63  ;;  %v1893_v15 = vunpack.c.l.bf16 %v643_v5 }
 0x288   : > { %4207 = vmatpush1.msra.mxu1 %v1989_v8  ;;  %4137 = vmatprep.subr.mxu0 %v1726_v11  ;;  %v2158_v8 = vunpack.c.h.bf16 %v775_v0  ;;  %v639_v11 = vld [vmem:[%s5679_s0 + $0xaf0] sm:$0xff]  ;;  %v2149_v16 = vunpack.c.l.bf16 %v771_v6 }
 0x289   : > { %4208 = vmatprep.subr.mxu1 %v1982_v12  ;;  %4138 = vmatpush1.msra.mxu0 %v1725_v13  ;;  %v767_v12 = vld [vmem:[%s5679_s0 + $0xef0] sm:$0xff]  ;;  %v1894_v13 = vunpack.c.h.bf16 %v643_v5  ;;  %v1885_v21 = vunpack.c.l.bf16 %v639_v11  ;;  %v5311_v5 = vld [vmem:[%s5771_s18 + $0x28] sm:$0xff] }
 0x28a   : > { %4209 = vmatpush1.msra.mxu1 %v1981_v14  ;;  %4139 = vmatprep.subr.mxu0 %v1718_v17  ;;  %v2150_v14 = vunpack.c.h.bf16 %v771_v6  ;;  %v635_v17 = vld [vmem:[%s5679_s0 + $0xad0] sm:$0xff]  ;;  %v2141_v22 = vunpack.c.l.bf16 %v767_v12 }
 0x28b   : > { %4210 = vmatprep.subr.mxu1 %v1974_v18  ;;  %4140 = vmatpush1.msra.mxu0 %v1717_v19  ;;  %v763_v18 = vld [vmem:[%s5679_s0 + $0xed0] sm:$0xff]  ;;  %v1886_v19 = vunpack.c.h.bf16 %v639_v11  ;;  %v1877_v27 = vunpack.c.l.bf16 %v635_v17 }
 0x28c   : > { %4211 = vmatpush1.msra.mxu1 %v1973_v20  ;;  %4141 = vmatprep.subr.mxu0 %v1710_v23  ;;  %v2142_v20 = vunpack.c.h.bf16 %v767_v12  ;;  %v631_v23 = vld [vmem:[%s5679_s0 + $0xab0] sm:$0xff]  ;;  %v2133_v28 = vunpack.c.l.bf16 %v763_v18 }
 0x28d   : > { %4212 = vmatprep.subr.mxu1 %v1966_v24  ;;  %4142 = vmatpush1.msra.mxu0 %v1709_v25  ;;  %v759_v24 = vld [vmem:[%s5679_s0 + $0xeb0] sm:$0xff]  ;;  %v1878_v25 = vunpack.c.h.bf16 %v635_v17  ;;  %v1869_v33 = vunpack.c.l.bf16 %v631_v23 }
 0x28e   : > { %4213 = vmatpush1.msra.mxu1 %v1965_v26  ;;  %4143 = vmatprep.subr.mxu0 %v1702_v29  ;;  %v2134_v26 = vunpack.c.h.bf16 %v763_v18  ;;  %v627_v29 = vld [vmem:[%s5679_s0 + $0xa90] sm:$0xff]  ;;  %v2125_v34 = vunpack.c.l.bf16 %v759_v24 }
 0x28f   : > { %4214 = vmatprep.subr.mxu1 %v1958_v30  ;;  %4144 = vmatpush1.msra.mxu0 %v1701_v31  ;;  %v755_v30 = vld [vmem:[%s5679_s0 + $0xe90] sm:$0xff]  ;;  %v1870_v31 = vunpack.c.h.bf16 %v631_v23  ;;  %v1861_v39 = vunpack.c.l.bf16 %v627_v29 }
 0x290   : > { %4215 = vmatpush1.msra.mxu1 %v1957_v32  ;;  %4145 = vmatprep.subr.mxu0 %v1950_v35  ;;  %v2126_v32 = vunpack.c.h.bf16 %v759_v24  ;;  %v623_v35 = vld [vmem:[%s5679_s0 + $0xa70] sm:$0xff]  ;;  %v2117_v40 = vunpack.c.l.bf16 %v755_v30 }
 0x291   : > { %4216 = vmatprep.subr.mxu1 %v2206_v36  ;;  %4146 = vmatpush2.msra.mxu0 %v1949_v37  ;;  %v751_v36 = vld [vmem:[%s5679_s0 + $0xe70] sm:$0xff]  ;;  %v1862_v37 = vunpack.c.h.bf16 %v627_v29  ;;  %v1853_v45 = vunpack.c.l.bf16 %v623_v35 }
 0x292   : > { %4217 = vmatpush2.msra.mxu1 %v2205_v38  ;;  %4147 = vmatprep.subr.mxu0 %v1942_v41  ;;  %v2118_v38 = vunpack.c.h.bf16 %v755_v30  ;;  %v619_v41 = vld [vmem:[%s5679_s0 + $0xa50] sm:$0xff]  ;;  %v2109_v46 = vunpack.c.l.bf16 %v751_v36 }
 0x293   : > { %4218 = vmatprep.subr.mxu1 %v2198_v42  ;;  %4148 = vmatpush2.msra.mxu0 %v1941_v43  ;;  %v747_v42 = vld [vmem:[%s5679_s0 + $0xe50] sm:$0xff]  ;;  %v1854_v43 = vunpack.c.h.bf16 %v623_v35  ;;  %v1845_v51 = vunpack.c.l.bf16 %v619_v41 }
 0x294   : > { %4219 = vmatpush2.msra.mxu1 %v2197_v44  ;;  %4149 = vmatprep.subr.mxu0 %v1934_v47  ;;  %v2110_v44 = vunpack.c.h.bf16 %v751_v36  ;;  %v615_v47 = vld [vmem:[%s5679_s0 + $0xa30] sm:$0xff]  ;;  %v2101_v52 = vunpack.c.l.bf16 %v747_v42 }
 0x295   : > { %4220 = vmatprep.subr.mxu1 %v2190_v48  ;;  %4150 = vmatpush2.msra.mxu0 %v1933_v49  ;;  %v743_v48 = vld [vmem:[%s5679_s0 + $0xe30] sm:$0xff]  ;;  %v1846_v49 = vunpack.c.h.bf16 %v619_v41  ;;  %v1837_v57 = vunpack.c.l.bf16 %v615_v47 }
 0x296   : > { %4221 = vmatpush2.msra.mxu1 %v2189_v50  ;;  %4151 = vmatprep.subr.mxu0 %v1926_v53  ;;  %v2102_v50 = vunpack.c.h.bf16 %v747_v42  ;;  %v611_v53 = vld [vmem:[%s5679_s0 + $0xa10] sm:$0xff]  ;;  %v2093_v58 = vunpack.c.l.bf16 %v743_v48 }
 0x297   : > { %4222 = vmatprep.subr.mxu1 %v2182_v54  ;;  %4152 = vmatpush2.msra.mxu0 %v1925_v55  ;;  %v739_v54 = vld [vmem:[%s5679_s0 + $0xe10] sm:$0xff]  ;;  %v1838_v55 = vunpack.c.h.bf16 %v615_v47 }
 0x298   : > { %4223 = vmatpush2.msra.mxu1 %v2181_v56  ;;  %4153 = vmatprep.subr.mxu0 %v1918_v59  ;;  %v2094_v56 = vunpack.c.h.bf16 %v743_v48  ;;  %v1830_v59 = vunpack.c.h.bf16 %v611_v53  ;;  %v991_v63 = vld [vmem:[%s5679_s0 + $0x15f0] sm:$0xff]  ;;  %v2085_v0 = vunpack.c.l.bf16 %v739_v54 }
 0x299   : > { %4224 = vmatprep.subr.mxu1 %v2174_v60  ;;  %4154 = vmatpush2.msra.mxu0 %v1917_v61  ;;  %v2086_v60 = vunpack.c.h.bf16 %v739_v54  ;;  %v863_v61 = vld [vmem:[%s5679_s0 + $0x11f0] sm:$0xff] }
 0x29a   : > { %4225 = vmatpush2.msra.mxu1 %v2173_v62  ;;  %4155 = vmatprep.subr.mxu0 %v1910_v1  ;;  %v1829_v62 = vunpack.c.l.bf16 %v611_v53  ;;  %v2334_v1 = vunpack.c.h.bf16 %v863_v61  ;;  %v2333_v6 = vunpack.c.l.bf16 %v863_v61  ;;  %v979_v17 = vld [vmem:[%s5679_s0 + $0x1590] sm:$0xff] }
 0x29b   : > { %4226 = vmatprep.subr.mxu1 %v2166_v2  ;;  %4156 = vmatpush2.msra.mxu0 %v1909_v3  ;;  %v859_v2 = vld [vmem:[%s5679_s0 + $0x11d0] sm:$0xff] }
 0x29c   : > { %4227 = vmatpush2.msra.mxu1 %v2165_v4  ;;  %4157 = vmatprep.subr.mxu0 %v1902_v7  ;;  %v987_v3 = vld [vmem:[%s5679_s0 + $0x15d0] sm:$0xff]  ;;  %v2590_v4 = vunpack.c.h.bf16 %v991_v63  ;;  %v2589_v7 = vunpack.c.l.bf16 %v991_v63  ;;  %v2326_v11 = vunpack.c.h.bf16 %v859_v2 }
 0x29d   : > { %4228 = vmatprep.subr.mxu1 %v2158_v8  ;;  %4158 = vmatpush2.msra.mxu0 %v1901_v9  ;;  %v855_v8 = vld [vmem:[%s5679_s0 + $0x11b0] sm:$0xff]  ;;  %v2582_v12 = vunpack.c.h.bf16 %v987_v3 }
 0x29e   : > { %4229 = vmatpush2.msra.mxu1 %v2157_v10  ;;  %4159 = vmatprep.subr.mxu0 %v1894_v13  ;;  %v983_v9 = vld [vmem:[%s5679_s0 + $0x15b0] sm:$0xff]  ;;  %v5312_v10 = vld [vmem:[%s5771_s18 + $0x20] sm:$0xff]  ;;  %v5313_v13 = vld [vmem:[%s5771_s18 + $0x38] sm:$0xff] }
 0x29f   : > { %4230 = vmatprep.subr.mxu1 %v2150_v14  ;;  %4160 = vmatpush2.msra.mxu0 %v1893_v15  ;;  %v2325_v14 = vunpack.c.l.bf16 %v859_v2  ;;  %v2581_v15 = vunpack.c.l.bf16 %v987_v3  ;;  %v5314_v18 = vld [vmem:[%s5771_s18 + $0x30] sm:$0xff] }
 0x2a0   : > { %4231 = vmatpush2.msra.mxu1 %v2149_v16  ;;  %4161 = vmatprep.subr.mxu0 %v1886_v19  ;;  %v851_v16 = vld [vmem:[%s5679_s0 + $0x1190] sm:$0xff]  ;;  %v2318_v19 = vunpack.c.h.bf16 %v855_v8 }
 0x2a1   : > { %4232 = vmatprep.subr.mxu1 %v2142_v20  ;;  %4162 = vmatpush2.msra.mxu0 %v1885_v21  ;;  %v2574_v20 = vunpack.c.h.bf16 %v983_v9  ;;  %v2317_v21 = vunpack.c.l.bf16 %v855_v8  ;;  %v847_v23 = vld [vmem:[%s5679_s0 + $0x1170] sm:$0xff] }
 0x2a2   : > { %4233 = vmatpush2.msra.mxu1 %v2141_v22  ;;  %4163 = vmatprep.subr.mxu0 %v1878_v25  ;;  %v2573_v22 = vunpack.c.l.bf16 %v983_v9  ;;  %v975_v24 = vld [vmem:[%s5679_s0 + $0x1570] sm:$0xff]  ;;  %v2310_v25 = vunpack.c.h.bf16 %v851_v16 }
 0x2a3   : > { %4234 = vmatprep.subr.mxu1 %v2134_v26  ;;  %4164 = vmatpush2.msra.mxu0 %v1877_v27  ;;  %v2566_v26 = vunpack.c.h.bf16 %v979_v17  ;;  %v2309_v27 = vunpack.c.l.bf16 %v851_v16  ;;  %v843_v29 = vld [vmem:[%s5679_s0 + $0x1150] sm:$0xff] }
 0x2a4   : > { %4235 = vmatpush2.msra.mxu1 %v2133_v28  ;;  %4165 = vmatprep.subr.mxu0 %v1870_v31  ;;  %v2565_v28 = vunpack.c.l.bf16 %v979_v17  ;;  %v971_v30 = vld [vmem:[%s5679_s0 + $0x1550] sm:$0xff]  ;;  %v2302_v31 = vunpack.c.h.bf16 %v847_v23 }
 0x2a5   : > { %4236 = vmatprep.subr.mxu1 %v2126_v32  ;;  %4166 = vmatpush2.msra.mxu0 %v1869_v33  ;;  %v2558_v32 = vunpack.c.h.bf16 %v975_v24  ;;  %v2301_v33 = vunpack.c.l.bf16 %v847_v23  ;;  %v839_v35 = vld [vmem:[%s5679_s0 + $0x1130] sm:$0xff] }
 0x2a6   : > { %4237 = vmatpush2.msra.mxu1 %v2125_v34  ;;  %4167 = vmatprep.subr.mxu0 %v1862_v37  ;;  %v2557_v34 = vunpack.c.l.bf16 %v975_v24  ;;  %v967_v36 = vld [vmem:[%s5679_s0 + $0x1530] sm:$0xff]  ;;  %v2294_v37 = vunpack.c.h.bf16 %v843_v29 }
 0x2a7   : > { %4238 = vmatprep.subr.mxu1 %v2118_v38  ;;  %4168 = vmatpush2.msra.mxu0 %v1861_v39  ;;  %v2550_v38 = vunpack.c.h.bf16 %v971_v30  ;;  %v2293_v39 = vunpack.c.l.bf16 %v843_v29  ;;  %v835_v41 = vld [vmem:[%s5679_s0 + $0x1110] sm:$0xff] }
 0x2a8   : > { %4239 = vmatpush2.msra.mxu1 %v2117_v40  ;;  %4169 = vmatprep.subr.mxu0 %v1854_v43  ;;  %v2549_v40 = vunpack.c.l.bf16 %v971_v30  ;;  %v963_v42 = vld [vmem:[%s5679_s0 + $0x1510] sm:$0xff]  ;;  %v2286_v43 = vunpack.c.h.bf16 %v839_v35 }
 0x2a9   : > { %4240 = vmatprep.subr.mxu1 %v2110_v44  ;;  %4170 = vmatpush2.msra.mxu0 %v1853_v45  ;;  %v2542_v44 = vunpack.c.h.bf16 %v967_v36  ;;  %v2285_v45 = vunpack.c.l.bf16 %v839_v35  ;;  %v831_v47 = vld [vmem:[%s5679_s0 + $0x10f0] sm:$0xff] }
 0x2aa   : > { %4241 = vmatpush2.msra.mxu1 %v2109_v46  ;;  %4171 = vmatprep.subr.mxu0 %v1846_v49  ;;  %v2541_v46 = vunpack.c.l.bf16 %v967_v36  ;;  %v959_v48 = vld [vmem:[%s5679_s0 + $0x14f0] sm:$0xff]  ;;  %v2278_v49 = vunpack.c.h.bf16 %v835_v41 }
 0x2ab   : > { %4242 = vmatprep.subr.mxu1 %v2102_v50  ;;  %4172 = vmatpush2.msra.mxu0 %v1845_v51  ;;  %v2534_v50 = vunpack.c.h.bf16 %v963_v42  ;;  %v2277_v51 = vunpack.c.l.bf16 %v835_v41  ;;  %v827_v53 = vld [vmem:[%s5679_s0 + $0x10d0] sm:$0xff] }
 0x2ac   : > { %4243 = vmatpush2.msra.mxu1 %v2101_v52  ;;  %4173 = vmatprep.subr.mxu0 %v1838_v55  ;;  %v2533_v52 = vunpack.c.l.bf16 %v963_v42  ;;  %v955_v54 = vld [vmem:[%s5679_s0 + $0x14d0] sm:$0xff]  ;;  %v2270_v55 = vunpack.c.h.bf16 %v831_v47  ;;  %v2262_v61 = vunpack.c.h.bf16 %v827_v53  ;;  %v2261_v63 = vunpack.c.l.bf16 %v827_v53 }
 0x2ad   : > { %4244 = vmatprep.subr.mxu1 %v2094_v56  ;;  %4174 = vmatpush2.msra.mxu0 %v1837_v57  ;;  %v2526_v56 = vunpack.c.h.bf16 %v959_v48  ;;  %v2269_v57 = vunpack.c.l.bf16 %v831_v47  ;;  %v947_v2 = vld [vmem:[%s5679_s0 + $0x1490] sm:$0xff] }
 0x2ae   : > { %4245 = vmatpush2.msra.mxu1 %v2093_v58  ;;  %4175 = vmatprep.subr.mxu0 %v1830_v59  ;;  %v2525_v58 = vunpack.c.l.bf16 %v959_v48  ;;  %v823_v59 = vld [vmem:[%s5679_s0 + $0x10b0] sm:$0xff] }
 0x2af   : > { %4246 = vmatprep.subr.mxu1 %v2086_v60  ;;  %4176 = vmatpush2.msra.mxu0 %v1829_v62  ;;  %v951_v60 = vld [vmem:[%s5679_s0 + $0x14b0] sm:$0xff]  ;;  %v2518_v62 = vunpack.c.h.bf16 %v955_v54  ;;  %v2254_v3 = vunpack.c.h.bf16 %v823_v59 }
 0x2b0   : > { %4177 = vmatprep.mubr.f32.mxu0 %v5311_v5  ;;  %4247 = vmatpush2.msra.mxu1 %v2085_v0  ;;  %v2517_v0 = vunpack.c.l.bf16 %v955_v54  ;;  %v2253_v5 = vunpack.c.l.bf16 %v823_v59  ;;  %v943_v8 = vld [vmem:[%s5679_s0 + $0x1470] sm:$0xff] }
 0x2b1   : > { %4178 = vmatmul.mubr.f32.vlgmr.msra.gmra.mxu0 %v5312_v10  ;;  %4248 = vmatprep.mubr.f32.mxu1 %v5313_v13  ;;  %v2502_v10 = vunpack.c.h.bf16 %v947_v2  ;;  %v811_v13 = vld [vmem:[%s5679_s0 + $0x1050] sm:$0xff]  ;;  %v2494_v16 = vunpack.c.h.bf16 %v943_v8 }
 0x2b2   : > { %4255 = vmatprep.subr.mxu0 %v2334_v1  ;;  %4326 = vmatprep.subr.mxu1 %v2590_v4  ;;  %v819_v1 = vld [vmem:[%s5679_s0 + $0x1090] sm:$0xff]  ;;  %v2510_v4 = vunpack.c.h.bf16 %v951_v60  ;;  %v2229_v23 = vunpack.c.l.bf16 %v811_v13 }
 0x2b3   : > { %4249 = vmatmul.mubr.f32.vlgmr.msra.gmra.mxu1 %v5314_v18  ;;  %4256 = vmatpush1.msra.mxu0 %v2333_v6  ;;  %v2509_v6 = vunpack.c.l.bf16 %v951_v60  ;;  %v2246_v9 = vunpack.c.h.bf16 %v819_v1  ;;  %v2493_v18 = vunpack.c.l.bf16 %v943_v8 }
 0x2b4   : > { %4327 = vmatpush1.msra.mxu1 %v2589_v7  ;;  %4257 = vmatprep.subr.mxu0 %v2326_v11  ;;  %v815_v7 = vld [vmem:[%s5679_s0 + $0x1070] sm:$0xff]  ;;  %v2245_v11 = vunpack.c.l.bf16 %v819_v1 }
 0x2b5   : > { %4328 = vmatprep.subr.mxu1 %v2582_v12  ;;  %4258 = vmatpush1.msra.mxu0 %v2325_v14  ;;  %v2501_v12 = vunpack.c.l.bf16 %v947_v2  ;;  %v939_v14 = vld [vmem:[%s5679_s0 + $0x1450] sm:$0xff]  ;;  %v2237_v17 = vunpack.c.l.bf16 %v815_v7 }
 0x2b6   : > { %4329 = vmatpush1.msra.mxu1 %v2581_v15  ;;  %4259 = vmatprep.subr.mxu0 %v2318_v19  ;;  %v2238_v15 = vunpack.c.h.bf16 %v815_v7  ;;  %v807_v19 = vld [vmem:[%s5679_s0 + $0x1030] sm:$0xff]  ;;  %v2485_v24 = vunpack.c.l.bf16 %v939_v14 }
 0x2b7   : > { %4330 = vmatprep.subr.mxu1 %v2574_v20  ;;  %4260 = vmatpush1.msra.mxu0 %v2317_v21  ;;  %v935_v20 = vld [vmem:[%s5679_s0 + $0x1430] sm:$0xff]  ;;  %v2230_v21 = vunpack.c.h.bf16 %v811_v13  ;;  %v2221_v29 = vunpack.c.l.bf16 %v807_v19 }
 0x2b8   : > { %4331 = vmatpush1.msra.mxu1 %v2573_v22  ;;  %4261 = vmatprep.subr.mxu0 %v2310_v25  ;;  %v2486_v22 = vunpack.c.h.bf16 %v939_v14  ;;  %v803_v25 = vld [vmem:[%s5679_s0 + $0x1010] sm:$0xff]  ;;  %v2477_v30 = vunpack.c.l.bf16 %v935_v20 }
 0x2b9   : > { %4332 = vmatprep.subr.mxu1 %v2566_v26  ;;  %4262 = vmatpush1.msra.mxu0 %v2309_v27  ;;  %v931_v26 = vld [vmem:[%s5679_s0 + $0x1410] sm:$0xff]  ;;  %v2222_v27 = vunpack.c.h.bf16 %v807_v19  ;;  %v2213_v35 = vunpack.c.l.bf16 %v803_v25 }
 0x2ba   : > { %4333 = vmatpush1.msra.mxu1 %v2565_v28  ;;  %4263 = vmatprep.subr.mxu0 %v2302_v31  ;;  %v2478_v28 = vunpack.c.h.bf16 %v935_v20  ;;  %v927_v31 = vld [vmem:[%s5679_s0 + $0x13f0] sm:$0xff]  ;;  %v2469_v36 = vunpack.c.l.bf16 %v931_v26 }
 0x2bb   : > { %4334 = vmatprep.subr.mxu1 %v2558_v32  ;;  %4264 = vmatpush1.msra.mxu0 %v2301_v33  ;;  %v1055_v32 = vld [vmem:[%s5679_s0 + $0x17f0] sm:$0xff]  ;;  %v2214_v33 = vunpack.c.h.bf16 %v803_v25  ;;  %v2461_v41 = vunpack.c.l.bf16 %v927_v31 }
 0x2bc   : > { %4335 = vmatpush1.msra.mxu1 %v2557_v34  ;;  %4265 = vmatprep.subr.mxu0 %v2294_v37  ;;  %v2470_v34 = vunpack.c.h.bf16 %v931_v26  ;;  %v923_v37 = vld [vmem:[%s5679_s0 + $0x13d0] sm:$0xff]  ;;  %v2717_v42 = vunpack.c.l.bf16 %v1055_v32 }
 0x2bd   : > { %4336 = vmatprep.subr.mxu1 %v2550_v38  ;;  %4266 = vmatpush1.msra.mxu0 %v2293_v39  ;;  %v1051_v38 = vld [vmem:[%s5679_s0 + $0x17d0] sm:$0xff]  ;;  %v2462_v39 = vunpack.c.h.bf16 %v927_v31  ;;  %v2453_v47 = vunpack.c.l.bf16 %v923_v37 }
 0x2be   : > { %4337 = vmatpush1.msra.mxu1 %v2549_v40  ;;  %4267 = vmatprep.subr.mxu0 %v2286_v43  ;;  %v2718_v40 = vunpack.c.h.bf16 %v1055_v32  ;;  %v919_v43 = vld [vmem:[%s5679_s0 + $0x13b0] sm:$0xff]  ;;  %v2709_v48 = vunpack.c.l.bf16 %v1051_v38 }
 0x2bf   : > { %4338 = vmatprep.subr.mxu1 %v2542_v44  ;;  %4268 = vmatpush1.msra.mxu0 %v2285_v45  ;;  %v1047_v44 = vld [vmem:[%s5679_s0 + $0x17b0] sm:$0xff]  ;;  %v2454_v45 = vunpack.c.h.bf16 %v923_v37  ;;  %v2445_v53 = vunpack.c.l.bf16 %v919_v43 }
 0x2c0   : > { %4339 = vmatpush1.msra.mxu1 %v2541_v46  ;;  %4269 = vmatprep.subr.mxu0 %v2278_v49  ;;  %v2710_v46 = vunpack.c.h.bf16 %v1051_v38  ;;  %v915_v49 = vld [vmem:[%s5679_s0 + $0x1390] sm:$0xff]  ;;  %v2701_v54 = vunpack.c.l.bf16 %v1047_v44 }
 0x2c1   : > { %4340 = vmatprep.subr.mxu1 %v2534_v50  ;;  %4270 = vmatpush1.msra.mxu0 %v2277_v51  ;;  %v1043_v50 = vld [vmem:[%s5679_s0 + $0x1790] sm:$0xff]  ;;  %v2446_v51 = vunpack.c.h.bf16 %v919_v43  ;;  %v2437_v59 = vunpack.c.l.bf16 %v915_v49 }
 0x2c2   : > { %4341 = vmatpush1.msra.mxu1 %v2533_v52  ;;  %4271 = vmatprep.subr.mxu0 %v2270_v55  ;;  %v2702_v52 = vunpack.c.h.bf16 %v1047_v44  ;;  %v911_v55 = vld [vmem:[%s5679_s0 + $0x1370] sm:$0xff]  ;;  %v2693_v60 = vunpack.c.l.bf16 %v1043_v50 }
 0x2c3   : > { %4342 = vmatprep.subr.mxu1 %v2526_v56  ;;  %4272 = vmatpush1.msra.mxu0 %v2269_v57  ;;  %v1039_v56 = vld [vmem:[%s5679_s0 + $0x1770] sm:$0xff]  ;;  %v2438_v57 = vunpack.c.h.bf16 %v915_v49  ;;  %v2429_v1 = vunpack.c.l.bf16 %v911_v55 }
 0x2c4   : > { %4343 = vmatpush1.msra.mxu1 %v2525_v58  ;;  %4273 = vmatprep.subr.mxu0 %v2262_v61  ;;  %v2694_v58 = vunpack.c.h.bf16 %v1043_v50  ;;  %v907_v61 = vld [vmem:[%s5679_s0 + $0x1350] sm:$0xff]  ;;  %v2685_v2 = vunpack.c.l.bf16 %v1039_v56 }
 0x2c5   : > { %4344 = vmatprep.subr.mxu1 %v2518_v62  ;;  %4274 = vmatpush1.msra.mxu0 %v2261_v63  ;;  %v1035_v62 = vld [vmem:[%s5679_s0 + $0x1750] sm:$0xff]  ;;  %v2430_v63 = vunpack.c.h.bf16 %v911_v55  ;;  %v2421_v7 = vunpack.c.l.bf16 %v907_v61 }
 0x2c6   : > { %4345 = vmatpush1.msra.mxu1 %v2517_v0  ;;  %4275 = vmatprep.subr.mxu0 %v2254_v3  ;;  %v2686_v0 = vunpack.c.h.bf16 %v1039_v56  ;;  %v903_v3 = vld [vmem:[%s5679_s0 + $0x1330] sm:$0xff]  ;;  %v2677_v8 = vunpack.c.l.bf16 %v1035_v62 }
 0x2c7   : > { %4346 = vmatprep.subr.mxu1 %v2510_v4  ;;  %4276 = vmatpush1.msra.mxu0 %v2253_v5  ;;  %v1031_v4 = vld [vmem:[%s5679_s0 + $0x1730] sm:$0xff]  ;;  %v2422_v5 = vunpack.c.h.bf16 %v907_v61  ;;  %v2413_v14 = vunpack.c.l.bf16 %v903_v3 }
 0x2c8   : > { %4347 = vmatpush1.msra.mxu1 %v2509_v6  ;;  %4277 = vmatprep.subr.mxu0 %v2246_v9  ;;  %v2678_v6 = vunpack.c.h.bf16 %v1035_v62  ;;  %v899_v9 = vld [vmem:[%s5679_s0 + $0x1310] sm:$0xff]  ;;  %v2670_v13 = vunpack.c.h.bf16 %v1031_v4 }
 0x2c9   : > { %4348 = vmatprep.subr.mxu1 %v2502_v10  ;;  %4278 = vmatpush1.msra.mxu0 %v2245_v11  ;;  %v1027_v10 = vld [vmem:[%s5679_s0 + $0x1710] sm:$0xff]  ;;  %v3540_v11 = vpop.f32.mrf.mxu1  ;;  %v2406_v19 = vunpack.c.h.bf16 %v899_v9 }
 0x2ca   : > { %4349 = vmatpush1.msra.mxu1 %v2501_v12  ;;  %4279 = vmatprep.subr.mxu0 %v2238_v15  ;;  %v2414_v12 = vunpack.c.h.bf16 %v903_v3  ;;  %v2669_v15 = vunpack.c.l.bf16 %v1031_v4  ;;  %v2662_v20 = vunpack.c.h.bf16 %v1027_v10  ;;  %v1015_v31 = vld [vmem:[%s5679_s0 + $0x16b0] sm:$0xff] }
 0x2cb   : > { %4350 = vmatprep.subr.mxu1 %v2494_v16  ;;  %4280 = vmatpush1.msra.mxu0 %v2237_v17  ;;  %v895_v16 = vld [vmem:[%s5679_s0 + $0x12f0] sm:$0xff]  ;;  %v3542_v25 = vpop.f32.mrf.mxu1  ;;  %v2638_v43 = vunpack.c.h.bf16 %v1015_v31 }
 0x2cc   : > { %4351 = vmatpush1.msra.mxu1 %v2493_v18  ;;  %4281 = vmatprep.subr.mxu0 %v2230_v21  ;;  %v1023_v17 = vld [vmem:[%s5679_s0 + $0x16f0] sm:$0xff]  ;;  %v3611_v18 = vpop.f32.mrf.mxu0  ;;  %v2405_v21 = vunpack.c.l.bf16 %v899_v9  ;;  %v2398_v26 = vunpack.c.h.bf16 %v895_v16 }
 0x2cd   : > { %4352 = vmatprep.subr.mxu1 %v2486_v22  ;;  %4282 = vmatpush1.msra.mxu0 %v2229_v23  ;;  %v2661_v22 = vunpack.c.l.bf16 %v1027_v10  ;;  %v891_v23 = vld [vmem:[%s5679_s0 + $0x12d0] sm:$0xff]  ;;  %v3682_v32 = vpop.f32.mrf.mxu1 }
 0x2ce   : > { %4353 = vmatpush1.msra.mxu1 %v2485_v24  ;;  %4283 = vmatprep.subr.mxu0 %v2222_v27  ;;  %v1019_v24 = vld [vmem:[%s5679_s0 + $0x16d0] sm:$0xff]  ;;  %v2654_v27 = vunpack.c.h.bf16 %v1023_v17  ;;  %v2389_v37 = vunpack.c.l.bf16 %v891_v23 }
 0x2cf   : > { %4354 = vmatprep.subr.mxu1 %v2478_v28  ;;  %4284 = vmatpush1.msra.mxu0 %v2221_v29  ;;  %v2397_v28 = vunpack.c.l.bf16 %v895_v16  ;;  %v2653_v29 = vunpack.c.l.bf16 %v1023_v17  ;;  %v2645_v38 = vunpack.c.l.bf16 %v1019_v24  ;;  %v3684_v49 = vpop.f32.mrf.mxu1  ;;  %v875_v55 = vld [vmem:[%s5679_s0 + $0x1250] sm:$0xff] }
 0x2d0   : > { %4355 = vmatpush1.msra.mxu1 %v2477_v30  ;;  %4285 = vmatprep.subr.mxu0 %v2214_v33  ;;  %v887_v30 = vld [vmem:[%s5679_s0 + $0x12b0] sm:$0xff]  ;;  %v3613_v33 = vpop.f32.mrf.mxu0  ;;  %v2358_v3 = vunpack.c.h.bf16 %v875_v55 }
 0x2d1   : > { %4356 = vmatprep.subr.mxu1 %v2470_v34  ;;  %4286 = vmatpush1.msra.mxu0 %v2213_v35  ;;  %v2390_v34 = vunpack.c.h.bf16 %v891_v23  ;;  %v2646_v35 = vunpack.c.h.bf16 %v1019_v24  ;;  %v3614_v44 = vadd.f32 %v3613_v33, %v3542_v25  ;;  %v1003_v56 = vld [vmem:[%s5679_s0 + $0x1650] sm:$0xff]  ;;  %v352_v23 = vld [vmem:[%s5679_s0 + $0x1f8] sm:$0xff] }
 0x2d2   : > { %4357 = vmatpush1.msra.mxu1 %v2469_v36  ;;  %4287 = vmatprep.subr.mxu0 %v2462_v39  ;;  %v3612_v36 = vadd.f32 %v3611_v18, %v3540_v11  ;;  %v883_v39 = vld [vmem:[%s5679_s0 + $0x1290] sm:$0xff]  ;;  %v2614_v4 = vunpack.c.h.bf16 %v1003_v56  ;;  %v283_v25 = vld [vmem:[#allocation2 + $0x18] sm:$0xff]  ;;  %v1312_v33 = vunpack.c.h.bf16 %v352_v23 }
 0x2d3   : > { %4358 = vmatprep.subr.mxu1 %v2718_v40  ;;  %4288 = vmatpush2.msra.mxu0 %v2461_v41  ;;  %v1011_v40 = vld [vmem:[%s5679_s0 + $0x1690] sm:$0xff]  ;;  %v3753_v41 = vpop.f32.mrf.mxu0  ;;  %v2374_v50 = vunpack.c.h.bf16 %v883_v39  ;;  %v3685_v61 = vadd.f32 %v3684_v49, %v3614_v44 }
 0x2d4   : > { %4359 = vmatpush2.msra.mxu1 %v2717_v42  ;;  %4289 = vmatprep.subr.mxu0 %v2454_v45  ;;  %v2382_v42 = vunpack.c.h.bf16 %v887_v30  ;;  %v2381_v45 = vunpack.c.l.bf16 %v887_v30  ;;  %v995_v9 = vld [vmem:[%s5679_s0 + $0x1610] sm:$0xff] }
 0x2d5   : > { %4360 = vmatprep.subr.mxu1 %v2710_v46  ;;  %4290 = vmatpush2.msra.mxu0 %v2453_v47  ;;  %v2637_v46 = vunpack.c.l.bf16 %v1015_v31  ;;  %v879_v47 = vld [vmem:[%s5679_s0 + $0x1270] sm:$0xff]  ;;  %v2598_v17 = vunpack.c.h.bf16 %v995_v9  ;;  %v2597_v24 = vunpack.c.l.bf16 %v995_v9 }
 0x2d6   : > { %4361 = vmatpush2.msra.mxu1 %v2709_v48  ;;  %4291 = vmatprep.subr.mxu0 %v2446_v51  ;;  %v1007_v48 = vld [vmem:[%s5679_s0 + $0x1670] sm:$0xff]  ;;  %v2630_v51 = vunpack.c.h.bf16 %v1011_v40 }
 0x2d7   : > { %4362 = vmatprep.subr.mxu1 %v2702_v52  ;;  %4292 = vmatpush2.msra.mxu0 %v2445_v53  ;;  %v3683_v52 = vadd.f32 %v3682_v32, %v3612_v36  ;;  %v2373_v53 = vunpack.c.l.bf16 %v883_v39  ;;  %v1115_v31 = vld [vmem:[%s5679_s0 + $0x19d0] sm:$0xff]  ;;  %v348_v32 = vld [vmem:[%s5679_s0 + $0x1d8] sm:$0xff]  ;;  %v5315_v36 = vld [vmem:[%s5771_s18 + $0x48] sm:$0xff] }
 0x2d8   : > { %4363 = vmatpush2.msra.mxu1 %v2701_v54  ;;  %4293 = vmatprep.subr.mxu0 %v2438_v57  ;;  %v2629_v54 = vunpack.c.l.bf16 %v1011_v40  ;;  %v3824_v57 = vpop.f32.mrf.mxu1  ;;  %v2838_v44 = vunpack.c.h.bf16 %v1115_v31 }
 0x2d9   : > { %4364 = vmatprep.subr.mxu1 %v2694_v58  ;;  %4294 = vmatpush2.msra.mxu0 %v2437_v59  ;;  %v3755_v58 = vpop.f32.mrf.mxu0  ;;  %v2366_v59 = vunpack.c.h.bf16 %v879_v47  ;;  %v3754_v62 = vadd.f32 %v3753_v41, %v3683_v52  ;;  %v1111_v41 = vld [vmem:[%s5679_s0 + $0x19b0] sm:$0xff] }
 0x2da   : > { %4365 = vmatpush2.msra.mxu1 %v2693_v60  ;;  %4295 = vmatprep.subr.mxu0 %v2430_v63  ;;  %v2622_v60 = vunpack.c.h.bf16 %v1007_v48  ;;  %v2365_v63 = vunpack.c.l.bf16 %v879_v47  ;;  %v3826_v10 = vpop.f32.mrf.mxu1  ;;  %v2837_v47 = vunpack.c.l.bf16 %v1115_v31  ;;  %v5318_v52 = vld [vmem:[%s5771_s18 + $0x50] sm:$0xff] }
 0x2db   : > { %4366 = vmatprep.subr.mxu1 %v2686_v0  ;;  %4296 = vmatpush2.msra.mxu0 %v2429_v1  ;;  %v2621_v0 = vunpack.c.l.bf16 %v1007_v48  ;;  %v871_v1 = vld [vmem:[%s5679_s0 + $0x1230] sm:$0xff]  ;;  %v1303_v48 = vunpack.c.l.bf16 %v348_v32 }
 0x2dc   : > { %4367 = vmatpush2.msra.mxu1 %v2685_v2  ;;  %4297 = vmatprep.subr.mxu0 %v2422_v5  ;;  %v999_v2 = vld [vmem:[%s5679_s0 + $0x1630] sm:$0xff]  ;;  %v3756_v5 = vadd.f32 %v3755_v58, %v3685_v61  ;;  %v2350_v11 = vunpack.c.h.bf16 %v871_v1  ;;  %v336_v58 = vld [vmem:[%s5679_s0 + $0x178] sm:$0xff] }
 0x2dd   : > { %4368 = vmatprep.subr.mxu1 %v2678_v6  ;;  %4298 = vmatpush2.msra.mxu0 %v2421_v7  ;;  %v2357_v6 = vunpack.c.l.bf16 %v875_v55  ;;  %v2613_v7 = vunpack.c.l.bf16 %v1003_v56  ;;  %v2829_v55 = vunpack.c.l.bf16 %v1111_v41 }
 0x2de   : > { %4369 = vmatpush2.msra.mxu1 %v2677_v8  ;;  %4299 = vmatprep.subr.mxu0 %v2414_v12  ;;  %v867_v8 = vld [vmem:[%s5679_s0 + $0x1210] sm:$0xff]  ;;  %v2606_v12 = vunpack.c.h.bf16 %v999_v2 }
 0x2df   : > { %4370 = vmatprep.subr.mxu1 %v2670_v13  ;;  %4300 = vmatpush2.msra.mxu0 %v2413_v14  ;;  %v3825_v13 = vadd.f32 %v3824_v57, %v3754_v62  ;;  %v2349_v14 = vunpack.c.l.bf16 %v871_v1  ;;  %v2342_v16 = vunpack.c.h.bf16 %v867_v8  ;;  %v1103_v57 = vld [vmem:[%s5679_s0 + $0x1970] sm:$0xff] }
 0x2e0   : > { %4371 = vmatpush2.msra.mxu1 %v2669_v15  ;;  %4301 = vmatprep.subr.mxu0 %v2406_v19  ;;  %v2605_v15 = vunpack.c.l.bf16 %v999_v2  ;;  %v1119_v19 = vld [vmem:[%s5679_s0 + $0x19f0] sm:$0xff]  ;;  %v2814_v1 = vunpack.c.h.bf16 %v1103_v57  ;;  %v1280_v2 = vunpack.c.h.bf16 %v336_v58 }
 0x2e1   : > { %4372 = vmatprep.subr.mxu1 %v2662_v20  ;;  %4302 = vmatpush2.msra.mxu0 %v2405_v21  ;;  %v3827_v20 = vadd.f32 %v3826_v10, %v3756_v5  ;;  %v2341_v21 = vunpack.c.l.bf16 %v867_v8  ;;  %v1095_v5 = vld [vmem:[%s5679_s0 + $0x1930] sm:$0xff] }
 0x2e2   : > { %4373 = vmatpush2.msra.mxu1 %v2661_v22  ;;  %4303 = vmatprep.subr.mxu0 %v2398_v26 }
 0x2e3   : > { %4374 = vmatprep.subr.mxu1 %v2654_v27  ;;  %4304 = vmatpush2.msra.mxu0 %v2397_v28  ;;  %v2846_v28 = vunpack.c.h.bf16 %v1119_v19 }
 0x2e4   : > { %4375 = vmatpush2.msra.mxu1 %v2653_v29  ;;  %4305 = vmatprep.subr.mxu0 %v2390_v34  ;;  %v284_v34 = vld [vmem:[#allocation2 + $0x10] sm:$0xff] }
 0x2e5   : > { %4376 = vmatprep.subr.mxu1 %v2646_v35  ;;  %4306 = vmatpush2.msra.mxu0 %v2389_v37  ;;  %v2845_v37 = vunpack.c.l.bf16 %v1119_v19 }
 0x2e6   : > { %4377 = vmatpush2.msra.mxu1 %v2645_v38  ;;  %4307 = vmatprep.subr.mxu0 %v2382_v42  ;;  %v1311_v38 = vunpack.c.l.bf16 %v352_v23  ;;  %v344_v42 = vld [vmem:[%s5679_s0 + $0x1b8] sm:$0xff]  ;;  %v1083_v23 = vld [vmem:[%s5679_s0 + $0x18d0] sm:$0xff] }
 0x2e7   : > { %4378 = vmatprep.subr.mxu1 %v2638_v43  ;;  %4308 = vmatpush2.msra.mxu0 %v2381_v45  ;;  %v5316_v43 = vld [vmem:[%s5771_s18 + $0x40] sm:$0xff]  ;;  %v1304_v45 = vunpack.c.h.bf16 %v348_v32  ;;  %v1295_v56 = vunpack.c.l.bf16 %v344_v42  ;;  %v2774_v31 = vunpack.c.h.bf16 %v1083_v23 }
 0x2e8   : > { %4379 = vmatpush2.msra.mxu1 %v2637_v46  ;;  %4309 = vmatprep.subr.mxu0 %v2374_v50  ;;  %v5317_v46 = vld [vmem:[%s5771_s18 + $0x58] sm:$0xff]  ;;  %v1107_v50 = vld [vmem:[%s5679_s0 + $0x1990] sm:$0xff] }
 0x2e9   : > { %4380 = vmatprep.subr.mxu1 %v2630_v51  ;;  %4310 = vmatpush2.msra.mxu0 %v2373_v53  ;;  %v340_v51 = vld [vmem:[%s5679_s0 + $0x198] sm:$0xff]  ;;  %v2830_v53 = vunpack.c.h.bf16 %v1111_v41  ;;  %v2821_v61 = vunpack.c.l.bf16 %v1107_v50  ;;  %v1071_v41 = vld [vmem:[%s5679_s0 + $0x1870] sm:$0xff] }
 0x2ea   : > { %4381 = vmatpush2.msra.mxu1 %v2629_v54  ;;  %4311 = vmatprep.subr.mxu0 %v2366_v59  ;;  %v1296_v54 = vunpack.c.h.bf16 %v344_v42  ;;  %v2822_v59 = vunpack.c.h.bf16 %v1107_v50  ;;  %v1287_v62 = vunpack.c.l.bf16 %v340_v51  ;;  %v304_v42 = vld [vmem:[%s5679_s0 + $0x78] sm:$0xff] }
 0x2eb   : > { %4382 = vmatprep.subr.mxu1 %v2622_v60  ;;  %4312 = vmatpush2.msra.mxu0 %v2365_v63  ;;  %v1288_v60 = vunpack.c.h.bf16 %v340_v51  ;;  %v1099_v63 = vld [vmem:[%s5679_s0 + $0x1950] sm:$0xff]  ;;  %v1216_v50 = vunpack.c.h.bf16 %v304_v42  ;;  %v2749_v51 = vunpack.c.l.bf16 %v1071_v41 }
 0x2ec   : > { %4383 = vmatpush2.msra.mxu1 %v2621_v0  ;;  %4313 = vmatprep.subr.mxu0 %v2358_v3  ;;  %v332_v0 = vld [vmem:[%s5679_s0 + $0x158] sm:$0xff]  ;;  %v2813_v3 = vunpack.c.l.bf16 %v1103_v57  ;;  %v2805_v9 = vunpack.c.l.bf16 %v1099_v63 }
 0x2ed   : > { %4384 = vmatprep.subr.mxu1 %v2614_v4  ;;  %v3895_v18 = vpop.f32.mrf.mxu0  ;;  %4314 = vmatpush2.msra.mxu0 %v2357_v6  ;;  %v1279_v4 = vunpack.c.l.bf16 %v336_v58  ;;  %v328_v6 = vld [vmem:[%s5679_s0 + $0x138] sm:$0xff]  ;;  %v1272_v8 = vunpack.c.h.bf16 %v332_v0  ;;  %v1271_v10 = vunpack.c.l.bf16 %v332_v0 }
 0x2ee   : > { %4385 = vmatpush2.msra.mxu1 %v2613_v7  ;;  %v3896_v22 = vadd.f32 %v3895_v18, %v3825_v13  ;;  %4315 = vmatprep.subr.mxu0 %v2350_v11  ;;  %v2806_v7 = vunpack.c.h.bf16 %v1099_v63  ;;  %v1091_v11 = vld [vmem:[%s5679_s0 + $0x1910] sm:$0xff]  ;;  %v2798_v13 = vunpack.c.h.bf16 %v1095_v5  ;;  %v320_v18 = vld [vmem:[%s5679_s0 + $0xf8] sm:$0xff] }
 0x2ef   : > { %4386 = vmatprep.subr.mxu1 %v2606_v12  ;;  %v3966_v26 = vpop.f32.mrf.mxu1  ;;  %v3897_v27 = vpop.f32.mrf.mxu0  ;;  %4316 = vmatpush2.msra.mxu0 %v2349_v14  ;;  %v324_v12 = vld [vmem:[%s5679_s0 + $0x118] sm:$0xff]  ;;  %v1264_v14 = vunpack.c.h.bf16 %v328_v6  ;;  %v2790_v19 = vunpack.c.h.bf16 %v1091_v11 }
 0x2f0   : > { %4387 = vmatpush2.msra.mxu1 %v2605_v15  ;;  %v3967_v29 = vadd.f32 %v3966_v26, %v3896_v22  ;;  %v3898_v30 = vadd.f32 %v3897_v27, %v3827_v20  ;;  %4317 = vmatprep.subr.mxu0 %v2342_v16  ;;  %v2797_v15 = vunpack.c.l.bf16 %v1095_v5  ;;  %v1263_v16 = vunpack.c.l.bf16 %v328_v6 }
 0x2f1   : > { %4388 = vmatprep.subr.mxu1 %v2598_v17  ;;  %v3968_v35 = vpop.f32.mrf.mxu1  ;;  %4318 = vmatpush2.msra.mxu0 %v2341_v21  ;;  %v1087_v17 = vld [vmem:[%s5679_s0 + $0x18f0] sm:$0xff]  ;;  %v1256_v20 = vunpack.c.h.bf16 %v324_v12  ;;  %v2789_v21 = vunpack.c.l.bf16 %v1091_v11  ;;  %v1255_v22 = vunpack.c.l.bf16 %v324_v12  ;;  %v1248_v26 = vunpack.c.h.bf16 %v320_v18 }
 0x2f2   : > { %4319 = vmatprep.mubr.f32.mxu0 %v5315_v36  ;;  %v4967_v39 = vadd.f32 %v3967_v29, %v283_v25  ;;  %v3969_v40 = vadd.f32 %v3968_v35, %v3898_v30  ;;  %4389 = vmatpush2.msra.mxu1 %v2597_v24  ;;  %v316_v24 = vld [vmem:[%s5679_s0 + $0xd8] sm:$0xff]  ;;  %v2782_v25 = vunpack.c.h.bf16 %v1087_v17  ;;  %v2781_v27 = vunpack.c.l.bf16 %v1087_v17  ;;  %v1079_v29 = vld [vmem:[%s5679_s0 + $0x18b0] sm:$0xff] }
 0x2f3   : > { %4320 = vmatmul.mubr.f32.vlgmr.msra.gmra.mxu0 %v5316_v43  ;;  %4390 = vmatprep.mubr.f32.mxu1 %v5317_v46  ;;  %v312_v30 = vld [vmem:[%s5679_s0 + $0xb8] sm:$0xff]  ;;  %v1240_v32 = vunpack.c.h.bf16 %v316_v24  ;;  %v1075_v35 = vld [vmem:[%s5679_s0 + $0x1890] sm:$0xff] }
 0x2f4   : > { %4397 = vmatprep.subr.mxu0 %v2846_v28  ;;  %4975 = vst [vmem:[#allocation2 + $0x18] sm:$0xff] %v4967_v39  ;;  %v4968_v49 = vadd.f32 %v3969_v40, %v284_v34  ;;  %4468 = vmatprep.subr.mxu1 %v1312_v33  ;;  %v1247_v28 = vunpack.c.l.bf16 %v320_v18  ;;  %v2773_v33 = vunpack.c.l.bf16 %v1083_v23  ;;  %v1239_v34 = vunpack.c.l.bf16 %v316_v24  ;;  %v308_v36 = vld [vmem:[%s5679_s0 + $0x98] sm:$0xff] }
 0x2f5   : > { %4391 = vmatmul.mubr.f32.vlgmr.msra.gmra.mxu1 %v5318_v52  ;;  %4398 = vmatpush1.msra.mxu0 %v2845_v37  ;;  %v2766_v37 = vunpack.c.h.bf16 %v1079_v29  ;;  %v2765_v39 = vunpack.c.l.bf16 %v1079_v29  ;;  %v1231_v40 = vunpack.c.l.bf16 %v312_v30  ;;  %v2758_v43 = vunpack.c.h.bf16 %v1075_v35 }
 0x2f6   : > { %4469 = vmatpush1.msra.mxu1 %v1311_v38  ;;  %4976 = vst [vmem:[#allocation2 + $0x10] sm:$0xff] %v4968_v49  ;;  %4399 = vmatprep.subr.mxu0 %v2838_v44  ;;  %v1232_v38 = vunpack.c.h.bf16 %v312_v30  ;;  %v1224_v44 = vunpack.c.h.bf16 %v308_v36  ;;  %v1223_v46 = vunpack.c.l.bf16 %v308_v36  ;;  %v2750_v49 = vunpack.c.h.bf16 %v1071_v41 }
 0x2f7   : > { %4470 = vmatprep.subr.mxu1 %v1304_v45  ;;  %4400 = vmatpush1.msra.mxu0 %v2837_v47  ;;  %v2757_v45 = vunpack.c.l.bf16 %v1075_v35  ;;  %v1067_v47 = vld [vmem:[%s5679_s0 + $0x1850] sm:$0xff]  ;;  %v1215_v52 = vunpack.c.l.bf16 %v304_v42 }
 0x2f8   : > { %4471 = vmatpush1.msra.mxu1 %v1303_v48  ;;  %4401 = vmatprep.subr.mxu0 %v2830_v53  ;;  %v300_v48 = vld [vmem:[%s5679_s0 + $0x58] sm:$0xff]  ;;  %v1063_v53 = vld [vmem:[%s5679_s0 + $0x1830] sm:$0xff]  ;;  %v2741_v57 = vunpack.c.l.bf16 %v1067_v47 }
 0x2f9   : > { %4472 = vmatprep.subr.mxu1 %v1296_v54  ;;  %4402 = vmatpush1.msra.mxu0 %v2829_v55  ;;  %v296_v54 = vld [vmem:[%s5679_s0 + $0x38] sm:$0xff]  ;;  %v2742_v55 = vunpack.c.h.bf16 %v1067_v47  ;;  %v1207_v58 = vunpack.c.l.bf16 %v300_v48  ;;  %v2733_v63 = vunpack.c.l.bf16 %v1063_v53 }
 0x2fa   : > { %4473 = vmatpush1.msra.mxu1 %v1295_v56  ;;  %4403 = vmatprep.subr.mxu0 %v2822_v59  ;;  %v1208_v56 = vunpack.c.h.bf16 %v300_v48  ;;  %v1059_v59 = vld [vmem:[%s5679_s0 + $0x1810] sm:$0xff]  ;;  %v1199_v0 = vunpack.c.l.bf16 %v296_v54 }
 0x2fb   : > { %4474 = vmatprep.subr.mxu1 %v1288_v60  ;;  %4404 = vmatpush1.msra.mxu0 %v2821_v61  ;;  %v292_v60 = vld [vmem:[%s5679_s0 + $0x18] sm:$0xff]  ;;  %v2734_v61 = vunpack.c.h.bf16 %v1063_v53  ;;  %v2725_v5 = vunpack.c.l.bf16 %v1059_v59 }
 0x2fc   : > { %4475 = vmatpush1.msra.mxu1 %v1287_v62  ;;  %4405 = vmatprep.subr.mxu0 %v2814_v1  ;;  %v1200_v62 = vunpack.c.h.bf16 %v296_v54  ;;  %v1183_v1 = vld [vmem:[%s5679_s0 + $0x1bf0] sm:$0xff]  ;;  %v1191_v6 = vunpack.c.l.bf16 %v292_v60 }
 0x2fd   : > { %4476 = vmatprep.subr.mxu1 %v1280_v2  ;;  %4406 = vmatpush1.msra.mxu0 %v2813_v3  ;;  %v416_v2 = vld [vmem:[%s5679_s0 + $0x3f8] sm:$0xff]  ;;  %v2726_v3 = vunpack.c.h.bf16 %v1059_v59  ;;  %v2973_v11 = vunpack.c.l.bf16 %v1183_v1 }
 0x2fe   : > { %4477 = vmatpush1.msra.mxu1 %v1279_v4  ;;  %4407 = vmatprep.subr.mxu0 %v2806_v7  ;;  %v1192_v4 = vunpack.c.h.bf16 %v292_v60  ;;  %v1179_v7 = vld [vmem:[%s5679_s0 + $0x1bd0] sm:$0xff]  ;;  %v1439_v12 = vunpack.c.l.bf16 %v416_v2 }
 0x2ff   : > { %4478 = vmatprep.subr.mxu1 %v1272_v8  ;;  %4408 = vmatpush1.msra.mxu0 %v2805_v9  ;;  %v412_v8 = vld [vmem:[%s5679_s0 + $0x3d8] sm:$0xff]  ;;  %v2974_v9 = vunpack.c.h.bf16 %v1183_v1  ;;  %v2965_v17 = vunpack.c.l.bf16 %v1179_v7 }
 0x300   : > { %4479 = vmatpush1.msra.mxu1 %v1271_v10  ;;  %4409 = vmatprep.subr.mxu0 %v2798_v13  ;;  %v1440_v10 = vunpack.c.h.bf16 %v416_v2  ;;  %v1175_v13 = vld [vmem:[%s5679_s0 + $0x1bb0] sm:$0xff]  ;;  %v1431_v18 = vunpack.c.l.bf16 %v412_v8 }
 0x301   : > { %4480 = vmatprep.subr.mxu1 %v1264_v14  ;;  %4410 = vmatpush1.msra.mxu0 %v2797_v15  ;;  %v408_v14 = vld [vmem:[%s5679_s0 + $0x3b8] sm:$0xff]  ;;  %v2966_v15 = vunpack.c.h.bf16 %v1179_v7  ;;  %v2957_v23 = vunpack.c.l.bf16 %v1175_v13 }
 0x302   : > { %4481 = vmatpush1.msra.mxu1 %v1263_v16  ;;  %4411 = vmatprep.subr.mxu0 %v2790_v19  ;;  %v1432_v16 = vunpack.c.h.bf16 %v412_v8  ;;  %v1171_v19 = vld [vmem:[%s5679_s0 + $0x1b90] sm:$0xff]  ;;  %v1423_v24 = vunpack.c.l.bf16 %v408_v14 }
 0x303   : > { %4482 = vmatprep.subr.mxu1 %v1256_v20  ;;  %4412 = vmatpush1.msra.mxu0 %v2789_v21  ;;  %v404_v20 = vld [vmem:[%s5679_s0 + $0x398] sm:$0xff]  ;;  %v2958_v21 = vunpack.c.h.bf16 %v1175_v13  ;;  %v2949_v29 = vunpack.c.l.bf16 %v1171_v19 }
 0x304   : > { %4483 = vmatpush1.msra.mxu1 %v1255_v22  ;;  %4413 = vmatprep.subr.mxu0 %v2782_v25  ;;  %v1424_v22 = vunpack.c.h.bf16 %v408_v14  ;;  %v1167_v25 = vld [vmem:[%s5679_s0 + $0x1b70] sm:$0xff]  ;;  %v1415_v30 = vunpack.c.l.bf16 %v404_v20 }
 0x305   : > { %4484 = vmatprep.subr.mxu1 %v1248_v26  ;;  %4414 = vmatpush1.msra.mxu0 %v2781_v27  ;;  %v400_v26 = vld [vmem:[%s5679_s0 + $0x378] sm:$0xff]  ;;  %v2950_v27 = vunpack.c.h.bf16 %v1171_v19  ;;  %v2941_v35 = vunpack.c.l.bf16 %v1167_v25 }
 0x306   : > { %4485 = vmatpush1.msra.mxu1 %v1247_v28  ;;  %4415 = vmatprep.subr.mxu0 %v2774_v31  ;;  %v1416_v28 = vunpack.c.h.bf16 %v404_v20  ;;  %v1163_v31 = vld [vmem:[%s5679_s0 + $0x1b50] sm:$0xff]  ;;  %v1407_v36 = vunpack.c.l.bf16 %v400_v26 }
 0x307   : > { %4486 = vmatprep.subr.mxu1 %v1240_v32  ;;  %4416 = vmatpush1.msra.mxu0 %v2773_v33  ;;  %v396_v32 = vld [vmem:[%s5679_s0 + $0x358] sm:$0xff]  ;;  %v2942_v33 = vunpack.c.h.bf16 %v1167_v25  ;;  %v2933_v41 = vunpack.c.l.bf16 %v1163_v31 }
 0x308   : > { %4487 = vmatpush1.msra.mxu1 %v1239_v34  ;;  %4417 = vmatprep.subr.mxu0 %v2766_v37  ;;  %v1408_v34 = vunpack.c.h.bf16 %v400_v26  ;;  %v1159_v37 = vld [vmem:[%s5679_s0 + $0x1b30] sm:$0xff]  ;;  %v1399_v42 = vunpack.c.l.bf16 %v396_v32 }
 0x309   : > { %4488 = vmatprep.subr.mxu1 %v1232_v38  ;;  %4418 = vmatpush1.msra.mxu0 %v2765_v39  ;;  %v392_v38 = vld [vmem:[%s5679_s0 + $0x338] sm:$0xff]  ;;  %v2934_v39 = vunpack.c.h.bf16 %v1163_v31  ;;  %v2925_v47 = vunpack.c.l.bf16 %v1159_v37 }
 0x30a   : > { %4489 = vmatpush1.msra.mxu1 %v1231_v40  ;;  %4419 = vmatprep.subr.mxu0 %v2758_v43  ;;  %v1400_v40 = vunpack.c.h.bf16 %v396_v32  ;;  %v1155_v43 = vld [vmem:[%s5679_s0 + $0x1b10] sm:$0xff]  ;;  %v1391_v48 = vunpack.c.l.bf16 %v392_v38 }
 0x30b   : > { %4490 = vmatprep.subr.mxu1 %v1224_v44  ;;  %4420 = vmatpush1.msra.mxu0 %v2757_v45  ;;  %v388_v44 = vld [vmem:[%s5679_s0 + $0x318] sm:$0xff]  ;;  %v2926_v45 = vunpack.c.h.bf16 %v1159_v37  ;;  %v2917_v53 = vunpack.c.l.bf16 %v1155_v43 }
 0x30c   : > { %4491 = vmatpush1.msra.mxu1 %v1223_v46  ;;  %4421 = vmatprep.subr.mxu0 %v2750_v49  ;;  %v1392_v46 = vunpack.c.h.bf16 %v392_v38  ;;  %v1151_v49 = vld [vmem:[%s5679_s0 + $0x1af0] sm:$0xff]  ;;  %v1383_v54 = vunpack.c.l.bf16 %v388_v44  ;;  %v608_v37 = vld [vmem:[%s5679_s0 + $0x9f8] sm:$0xff] }
 0x30d   : > { %4492 = vmatprep.subr.mxu1 %v1216_v50  ;;  %4422 = vmatpush1.msra.mxu0 %v2749_v51  ;;  %v384_v50 = vld [vmem:[%s5679_s0 + $0x2f8] sm:$0xff]  ;;  %v2918_v51 = vunpack.c.h.bf16 %v1155_v43  ;;  %v2909_v59 = vunpack.c.l.bf16 %v1151_v49  ;;  %v5319_v43 = vld [vmem:[%s5771_s18 + $0x68] sm:$0xff] }
 0x30e   : > { %4493 = vmatpush1.msra.mxu1 %v1215_v52  ;;  %4423 = vmatprep.subr.mxu0 %v2742_v55  ;;  %v1384_v52 = vunpack.c.h.bf16 %v388_v44  ;;  %v1147_v55 = vld [vmem:[%s5679_s0 + $0x1ad0] sm:$0xff]  ;;  %v1375_v60 = vunpack.c.l.bf16 %v384_v50 }
 0x30f   : > { %4494 = vmatprep.subr.mxu1 %v1208_v56  ;;  %4424 = vmatpush1.msra.mxu0 %v2741_v57  ;;  %v380_v56 = vld [vmem:[%s5679_s0 + $0x2d8] sm:$0xff]  ;;  %v2910_v57 = vunpack.c.h.bf16 %v1151_v49  ;;  %v2901_v1 = vunpack.c.l.bf16 %v1147_v55 }
 0x310   : > { %4495 = vmatpush1.msra.mxu1 %v1207_v58  ;;  %4425 = vmatprep.subr.mxu0 %v2734_v61  ;;  %v1376_v58 = vunpack.c.h.bf16 %v384_v50  ;;  %v1143_v61 = vld [vmem:[%s5679_s0 + $0x1ab0] sm:$0xff]  ;;  %v1367_v2 = vunpack.c.l.bf16 %v380_v56 }
 0x311   : > { %4496 = vmatprep.subr.mxu1 %v1200_v62  ;;  %4426 = vmatpush1.msra.mxu0 %v2733_v63  ;;  %v376_v62 = vld [vmem:[%s5679_s0 + $0x2b8] sm:$0xff]  ;;  %v2902_v63 = vunpack.c.h.bf16 %v1147_v55  ;;  %v2893_v7 = vunpack.c.l.bf16 %v1143_v61 }
 0x312   : > { %4497 = vmatpush1.msra.mxu1 %v1199_v0  ;;  %4427 = vmatprep.subr.mxu0 %v2726_v3  ;;  %v1368_v0 = vunpack.c.h.bf16 %v380_v56  ;;  %v1139_v3 = vld [vmem:[%s5679_s0 + $0x1a90] sm:$0xff]  ;;  %v1359_v8 = vunpack.c.l.bf16 %v376_v62  ;;  %v596_v55 = vld [vmem:[%s5679_s0 + $0x998] sm:$0xff]  ;;  %v5322_v56 = vld [vmem:[%s5771_s18] sm:$0xff] }
 0x313   : > { %4498 = vmatprep.subr.mxu1 %v1192_v4  ;;  %4428 = vmatpush1.msra.mxu0 %v2725_v5  ;;  %v372_v4 = vld [vmem:[%s5679_s0 + $0x298] sm:$0xff]  ;;  %v2894_v5 = vunpack.c.h.bf16 %v1143_v61  ;;  %v2885_v13 = vunpack.c.l.bf16 %v1139_v3 }
 0x314   : > { %4499 = vmatpush1.msra.mxu1 %v1191_v6  ;;  %4429 = vmatprep.subr.mxu0 %v2974_v9  ;;  %v1360_v6 = vunpack.c.h.bf16 %v376_v62  ;;  %v1135_v9 = vld [vmem:[%s5679_s0 + $0x1a70] sm:$0xff]  ;;  %v1351_v14 = vunpack.c.l.bf16 %v372_v4  ;;  %v464_v61 = vld [vmem:[%s5679_s0 + $0x578] sm:$0xff] }
 0x315   : > { %4500 = vmatprep.subr.mxu1 %v1440_v10  ;;  %4430 = vmatpush2.msra.mxu0 %v2973_v11  ;;  %v368_v10 = vld [vmem:[%s5679_s0 + $0x278] sm:$0xff]  ;;  %v2886_v11 = vunpack.c.h.bf16 %v1139_v3  ;;  %v2877_v19 = vunpack.c.l.bf16 %v1135_v9 }
 0x316   : > { %4501 = vmatpush2.msra.mxu1 %v1439_v12  ;;  %4431 = vmatprep.subr.mxu0 %v2966_v15  ;;  %v1352_v12 = vunpack.c.h.bf16 %v372_v4  ;;  %v1131_v15 = vld [vmem:[%s5679_s0 + $0x1a50] sm:$0xff]  ;;  %v1343_v20 = vunpack.c.l.bf16 %v368_v10  ;;  %v592_v62 = vld [vmem:[%s5679_s0 + $0x978] sm:$0xff] }
 0x317   : > { %4502 = vmatprep.subr.mxu1 %v1432_v16  ;;  %4432 = vmatpush2.msra.mxu0 %v2965_v17  ;;  %v364_v16 = vld [vmem:[%s5679_s0 + $0x258] sm:$0xff]  ;;  %v2878_v17 = vunpack.c.h.bf16 %v1135_v9  ;;  %v2869_v25 = vunpack.c.l.bf16 %v1131_v15 }
 0x318   : > { %4503 = vmatpush2.msra.mxu1 %v1431_v18  ;;  %4433 = vmatprep.subr.mxu0 %v2958_v21  ;;  %v1344_v18 = vunpack.c.h.bf16 %v368_v10  ;;  %v1127_v21 = vld [vmem:[%s5679_s0 + $0x1a30] sm:$0xff]  ;;  %v1335_v26 = vunpack.c.l.bf16 %v364_v16  ;;  %v460_v3 = vld [vmem:[%s5679_s0 + $0x558] sm:$0xff] }
 0x319   : > { %4504 = vmatprep.subr.mxu1 %v1424_v22  ;;  %4434 = vmatpush2.msra.mxu0 %v2957_v23  ;;  %v360_v22 = vld [vmem:[%s5679_s0 + $0x238] sm:$0xff]  ;;  %v2870_v23 = vunpack.c.h.bf16 %v1131_v15  ;;  %v2861_v31 = vunpack.c.l.bf16 %v1127_v21 }
 0x31a   : > { %4505 = vmatpush2.msra.mxu1 %v1423_v24  ;;  %4435 = vmatprep.subr.mxu0 %v2950_v27  ;;  %v1336_v24 = vunpack.c.h.bf16 %v364_v16  ;;  %v1123_v27 = vld [vmem:[%s5679_s0 + $0x1a10] sm:$0xff]  ;;  %v1327_v32 = vunpack.c.l.bf16 %v360_v22  ;;  %v588_v4 = vld [vmem:[%s5679_s0 + $0x958] sm:$0xff] }
 0x31b   : > { %4506 = vmatprep.subr.mxu1 %v1416_v28  ;;  %4436 = vmatpush2.msra.mxu0 %v2949_v29  ;;  %v356_v28 = vld [vmem:[%s5679_s0 + $0x218] sm:$0xff]  ;;  %v2862_v29 = vunpack.c.h.bf16 %v1127_v21 }
 0x31c   : > { %4507 = vmatpush2.msra.mxu1 %v1415_v30  ;;  %4437 = vmatprep.subr.mxu0 %v2942_v33  ;;  %v1328_v30 = vunpack.c.h.bf16 %v360_v22  ;;  %v2854_v33 = vunpack.c.h.bf16 %v1123_v27  ;;  %v1319_v38 = vunpack.c.l.bf16 %v356_v28  ;;  %v456_v9 = vld [vmem:[%s5679_s0 + $0x538] sm:$0xff] }
 0x31d   : > { %4508 = vmatprep.subr.mxu1 %v1408_v34  ;;  %4438 = vmatpush2.msra.mxu0 %v2941_v35  ;;  %v1320_v34 = vunpack.c.h.bf16 %v356_v28  ;;  %v480_v35 = vld [vmem:[%s5679_s0 + $0x5f8] sm:$0xff] }
 0x31e   : > { %4509 = vmatpush2.msra.mxu1 %v1407_v36  ;;  %4439 = vmatprep.subr.mxu0 %v2934_v39  ;;  %v2853_v36 = vunpack.c.l.bf16 %v1123_v27  ;;  %v1568_v39 = vunpack.c.h.bf16 %v480_v35  ;;  %v1567_v44 = vunpack.c.l.bf16 %v480_v35  ;;  %v584_v10 = vld [vmem:[%s5679_s0 + $0x938] sm:$0xff] }
 0x31f   : > { %4510 = vmatprep.subr.mxu1 %v1400_v40  ;;  %4440 = vmatpush2.msra.mxu0 %v2933_v41  ;;  %v476_v40 = vld [vmem:[%s5679_s0 + $0x5d8] sm:$0xff] }
 0x320   : > { %4511 = vmatpush2.msra.mxu1 %v1399_v42  ;;  %4441 = vmatprep.subr.mxu0 %v2926_v45  ;;  %v604_v41 = vld [vmem:[%s5679_s0 + $0x9d8] sm:$0xff]  ;;  %v1824_v42 = vunpack.c.h.bf16 %v608_v37  ;;  %v1823_v45 = vunpack.c.l.bf16 %v608_v37  ;;  %v1560_v49 = vunpack.c.h.bf16 %v476_v40 }
 0x321   : > { %4512 = vmatprep.subr.mxu1 %v1392_v46  ;;  %4442 = vmatpush2.msra.mxu0 %v2925_v47  ;;  %v472_v46 = vld [vmem:[%s5679_s0 + $0x5b8] sm:$0xff]  ;;  %v1816_v50 = vunpack.c.h.bf16 %v604_v41 }
 0x322   : > { %4513 = vmatpush2.msra.mxu1 %v1391_v48  ;;  %4443 = vmatprep.subr.mxu0 %v2918_v51  ;;  %v600_v47 = vld [vmem:[%s5679_s0 + $0x9b8] sm:$0xff]  ;;  %v5320_v48 = vld [vmem:[%s5771_s18 + $0x60] sm:$0xff]  ;;  %v5321_v51 = vld [vmem:[%s5771_s18 + $0x8] sm:$0xff] }
 0x323   : > { %4514 = vmatprep.subr.mxu1 %v1384_v52  ;;  %4444 = vmatpush2.msra.mxu0 %v2917_v53  ;;  %v1559_v52 = vunpack.c.l.bf16 %v476_v40  ;;  %v1815_v53 = vunpack.c.l.bf16 %v604_v41  ;;  %v452_v15 = vld [vmem:[%s5679_s0 + $0x518] sm:$0xff] }
 0x324   : > { %4515 = vmatpush2.msra.mxu1 %v1383_v54  ;;  %4445 = vmatprep.subr.mxu0 %v2910_v57  ;;  %v468_v54 = vld [vmem:[%s5679_s0 + $0x598] sm:$0xff]  ;;  %v1552_v57 = vunpack.c.h.bf16 %v472_v46 }
 0x325   : > { %4516 = vmatprep.subr.mxu1 %v1376_v58  ;;  %4446 = vmatpush2.msra.mxu0 %v2909_v59  ;;  %v1808_v58 = vunpack.c.h.bf16 %v600_v47  ;;  %v1551_v59 = vunpack.c.l.bf16 %v472_v46  ;;  %v580_v16 = vld [vmem:[%s5679_s0 + $0x918] sm:$0xff] }
 0x326   : > { %4517 = vmatpush2.msra.mxu1 %v1375_v60  ;;  %4447 = vmatprep.subr.mxu0 %v2902_v63  ;;  %v1807_v60 = vunpack.c.l.bf16 %v600_v47  ;;  %v1544_v63 = vunpack.c.h.bf16 %v468_v54  ;;  %v448_v21 = vld [vmem:[%s5679_s0 + $0x4f8] sm:$0xff] }
 0x327   : > { %4518 = vmatprep.subr.mxu1 %v1368_v0  ;;  %4448 = vmatpush2.msra.mxu0 %v2901_v1  ;;  %v1800_v0 = vunpack.c.h.bf16 %v596_v55  ;;  %v1543_v1 = vunpack.c.l.bf16 %v468_v54  ;;  %v576_v22 = vld [vmem:[%s5679_s0 + $0x8f8] sm:$0xff] }
 0x328   : > { %4519 = vmatpush2.msra.mxu1 %v1367_v2  ;;  %4449 = vmatprep.subr.mxu0 %v2894_v5  ;;  %v1799_v2 = vunpack.c.l.bf16 %v596_v55  ;;  %v1536_v5 = vunpack.c.h.bf16 %v464_v61  ;;  %v444_v27 = vld [vmem:[%s5679_s0 + $0x4d8] sm:$0xff] }
 0x329   : > { %4520 = vmatprep.subr.mxu1 %v1360_v6  ;;  %4450 = vmatpush2.msra.mxu0 %v2893_v7  ;;  %v1792_v6 = vunpack.c.h.bf16 %v592_v62  ;;  %v1535_v7 = vunpack.c.l.bf16 %v464_v61  ;;  %v572_v28 = vld [vmem:[%s5679_s0 + $0x8d8] sm:$0xff]  ;;  %v1496_v35 = vunpack.c.h.bf16 %v444_v27  ;;  %v1495_v37 = vunpack.c.l.bf16 %v444_v27 }
 0x32a   : > { %4521 = vmatpush2.msra.mxu1 %v1359_v8  ;;  %4451 = vmatprep.subr.mxu0 %v2886_v11  ;;  %v1791_v8 = vunpack.c.l.bf16 %v592_v62  ;;  %v1528_v11 = vunpack.c.h.bf16 %v460_v3  ;;  %v564_v40 = vld [vmem:[%s5679_s0 + $0x898] sm:$0xff] }
 0x32b   : > { %4522 = vmatprep.subr.mxu1 %v1352_v12  ;;  %4452 = vmatpush2.msra.mxu0 %v2885_v13  ;;  %v1784_v12 = vunpack.c.h.bf16 %v588_v4  ;;  %v1527_v13 = vunpack.c.l.bf16 %v460_v3  ;;  %v560_v46 = vld [vmem:[%s5679_s0 + $0x878] sm:$0xff] }
 0x32c   : > { %4523 = vmatpush2.msra.mxu1 %v1351_v14  ;;  %4453 = vmatprep.subr.mxu0 %v2878_v17  ;;  %v1783_v14 = vunpack.c.l.bf16 %v588_v4  ;;  %v1520_v17 = vunpack.c.h.bf16 %v456_v9  ;;  %v1728_v54 = vunpack.c.h.bf16 %v560_v46 }
 0x32d   : > { %4524 = vmatprep.subr.mxu1 %v1344_v18  ;;  %4454 = vmatpush2.msra.mxu0 %v2877_v19  ;;  %v1776_v18 = vunpack.c.h.bf16 %v584_v10  ;;  %v1519_v19 = vunpack.c.l.bf16 %v456_v9 }
 0x32e   : > { %4525 = vmatpush2.msra.mxu1 %v1343_v20  ;;  %4455 = vmatprep.subr.mxu0 %v2870_v23  ;;  %v1775_v20 = vunpack.c.l.bf16 %v584_v10  ;;  %v1512_v23 = vunpack.c.h.bf16 %v452_v15 }
 0x32f   : > { %4526 = vmatprep.subr.mxu1 %v1336_v24  ;;  %4456 = vmatpush2.msra.mxu0 %v2869_v25  ;;  %v1768_v24 = vunpack.c.h.bf16 %v580_v16  ;;  %v1511_v25 = vunpack.c.l.bf16 %v452_v15 }
 0x330   : > { %4527 = vmatpush2.msra.mxu1 %v1335_v26  ;;  %4457 = vmatprep.subr.mxu0 %v2862_v29  ;;  %v1767_v26 = vunpack.c.l.bf16 %v580_v16  ;;  %v1504_v29 = vunpack.c.h.bf16 %v448_v21 }
 0x331   : > { %4528 = vmatprep.subr.mxu1 %v1328_v30  ;;  %4458 = vmatpush2.msra.mxu0 %v2861_v31  ;;  %v1760_v30 = vunpack.c.h.bf16 %v576_v22  ;;  %v1503_v31 = vunpack.c.l.bf16 %v448_v21 }
 0x332   : > { %4529 = vmatpush2.msra.mxu1 %v1327_v32  ;;  %4459 = vmatprep.subr.mxu0 %v2854_v33  ;;  %v1759_v32 = vunpack.c.l.bf16 %v576_v22  ;;  %v440_v33 = vld [vmem:[%s5679_s0 + $0x4b8] sm:$0xff] }
 0x333   : > { %4530 = vmatprep.subr.mxu1 %v1320_v34  ;;  %4460 = vmatpush2.msra.mxu0 %v2853_v36  ;;  %v568_v34 = vld [vmem:[%s5679_s0 + $0x8b8] sm:$0xff]  ;;  %v1752_v36 = vunpack.c.h.bf16 %v572_v28  ;;  %v1488_v41 = vunpack.c.h.bf16 %v440_v33 }
 0x334   : > { %4461 = vmatprep.mubr.f32.mxu0 %v5319_v43  ;;  %4531 = vmatpush2.msra.mxu1 %v1319_v38  ;;  %v1751_v38 = vunpack.c.l.bf16 %v572_v28  ;;  %v1487_v43 = vunpack.c.l.bf16 %v440_v33 }
 0x335   : > { %4462 = vmatmul.mubr.f32.vlgmr.msra.gmra.mxu0 %v5320_v48  ;;  %4532 = vmatprep.mubr.f32.mxu1 %v5321_v51  ;;  %v1736_v48 = vunpack.c.h.bf16 %v564_v40  ;;  %v428_v51 = vld [vmem:[%s5679_s0 + $0x458] sm:$0xff] }
 0x336   : > { %4539 = vmatprep.subr.mxu0 %v1568_v39  ;;  %4610 = vmatprep.subr.mxu1 %v1824_v42  ;;  %v436_v39 = vld [vmem:[%s5679_s0 + $0x498] sm:$0xff]  ;;  %v1744_v42 = vunpack.c.h.bf16 %v568_v34  ;;  %v1463_v61 = vunpack.c.l.bf16 %v428_v51 }
 0x337   : > { %4533 = vmatmul.mubr.f32.vlgmr.msra.gmra.mxu1 %v5322_v56  ;;  %4540 = vmatpush1.msra.mxu0 %v1567_v44  ;;  %v1743_v44 = vunpack.c.l.bf16 %v568_v34  ;;  %v1480_v47 = vunpack.c.h.bf16 %v436_v39  ;;  %v1727_v56 = vunpack.c.l.bf16 %v560_v46 }
 0x338   : > { %4611 = vmatpush1.msra.mxu1 %v1823_v45  ;;  %4541 = vmatprep.subr.mxu0 %v1560_v49  ;;  %v432_v45 = vld [vmem:[%s5679_s0 + $0x478] sm:$0xff]  ;;  %v1479_v49 = vunpack.c.l.bf16 %v436_v39 }
 0x339   : > { %4612 = vmatprep.subr.mxu1 %v1816_v50  ;;  %4542 = vmatpush1.msra.mxu0 %v1559_v52  ;;  %v1735_v50 = vunpack.c.l.bf16 %v564_v40  ;;  %v556_v52 = vld [vmem:[%s5679_s0 + $0x858] sm:$0xff]  ;;  %v1471_v55 = vunpack.c.l.bf16 %v432_v45 }
 0x33a   : > { %4613 = vmatpush1.msra.mxu1 %v1815_v53  ;;  %4543 = vmatprep.subr.mxu0 %v1552_v57  ;;  %v1472_v53 = vunpack.c.h.bf16 %v432_v45  ;;  %v424_v57 = vld [vmem:[%s5679_s0 + $0x438] sm:$0xff]  ;;  %v1719_v62 = vunpack.c.l.bf16 %v556_v52 }
 0x33b   : > { %4614 = vmatprep.subr.mxu1 %v1808_v58  ;;  %4544 = vmatpush1.msra.mxu0 %v1551_v59  ;;  %v552_v58 = vld [vmem:[%s5679_s0 + $0x838] sm:$0xff]  ;;  %v1464_v59 = vunpack.c.h.bf16 %v428_v51  ;;  %v1455_v3 = vunpack.c.l.bf16 %v424_v57 }
 0x33c   : > { %4615 = vmatpush1.msra.mxu1 %v1807_v60  ;;  %4545 = vmatprep.subr.mxu0 %v1544_v63  ;;  %v1720_v60 = vunpack.c.h.bf16 %v556_v52  ;;  %v420_v63 = vld [vmem:[%s5679_s0 + $0x418] sm:$0xff]  ;;  %v1711_v4 = vunpack.c.l.bf16 %v552_v58 }
 0x33d   : > { %4616 = vmatprep.subr.mxu1 %v1800_v0  ;;  %4546 = vmatpush1.msra.mxu0 %v1543_v1  ;;  %v548_v0 = vld [vmem:[%s5679_s0 + $0x818] sm:$0xff]  ;;  %v1456_v1 = vunpack.c.h.bf16 %v424_v57  ;;  %v1447_v9 = vunpack.c.l.bf16 %v420_v63 }
 0x33e   : > { %4617 = vmatpush1.msra.mxu1 %v1799_v2  ;;  %4547 = vmatprep.subr.mxu0 %v1536_v5  ;;  %v1712_v2 = vunpack.c.h.bf16 %v552_v58  ;;  %v544_v5 = vld [vmem:[%s5679_s0 + $0x7f8] sm:$0xff]  ;;  %v1703_v10 = vunpack.c.l.bf16 %v548_v0 }
 0x33f   : > { %4618 = vmatprep.subr.mxu1 %v1792_v6  ;;  %4548 = vmatpush1.msra.mxu0 %v1535_v7  ;;  %v672_v6 = vld [vmem:[%s5679_s0 + $0xbf8] sm:$0xff]  ;;  %v1448_v7 = vunpack.c.h.bf16 %v420_v63  ;;  %v1695_v15 = vunpack.c.l.bf16 %v544_v5 }
 0x340   : > { %4619 = vmatpush1.msra.mxu1 %v1791_v8  ;;  %4549 = vmatprep.subr.mxu0 %v1528_v11  ;;  %v1704_v8 = vunpack.c.h.bf16 %v548_v0  ;;  %v540_v11 = vld [vmem:[%s5679_s0 + $0x7d8] sm:$0xff]  ;;  %v1951_v16 = vunpack.c.l.bf16 %v672_v6 }
 0x341   : > { %4620 = vmatprep.subr.mxu1 %v1784_v12  ;;  %4550 = vmatpush1.msra.mxu0 %v1527_v13  ;;  %v668_v12 = vld [vmem:[%s5679_s0 + $0xbd8] sm:$0xff]  ;;  %v1696_v13 = vunpack.c.h.bf16 %v544_v5  ;;  %v1687_v21 = vunpack.c.l.bf16 %v540_v11 }
 0x342   : > { %4621 = vmatpush1.msra.mxu1 %v1783_v14  ;;  %4551 = vmatprep.subr.mxu0 %v1520_v17  ;;  %v1952_v14 = vunpack.c.h.bf16 %v672_v6  ;;  %v536_v17 = vld [vmem:[%s5679_s0 + $0x7b8] sm:$0xff]  ;;  %v1943_v22 = vunpack.c.l.bf16 %v668_v12 }
 0x343   : > { %4622 = vmatprep.subr.mxu1 %v1776_v18  ;;  %4552 = vmatpush1.msra.mxu0 %v1519_v19  ;;  %v664_v18 = vld [vmem:[%s5679_s0 + $0xbb8] sm:$0xff]  ;;  %v1688_v19 = vunpack.c.h.bf16 %v540_v11  ;;  %v1679_v27 = vunpack.c.l.bf16 %v536_v17 }
 0x344   : > { %4623 = vmatpush1.msra.mxu1 %v1775_v20  ;;  %4553 = vmatprep.subr.mxu0 %v1512_v23  ;;  %v1944_v20 = vunpack.c.h.bf16 %v668_v12  ;;  %v532_v23 = vld [vmem:[%s5679_s0 + $0x798] sm:$0xff]  ;;  %v1935_v28 = vunpack.c.l.bf16 %v664_v18 }
 0x345   : > { %4624 = vmatprep.subr.mxu1 %v1768_v24  ;;  %4554 = vmatpush1.msra.mxu0 %v1511_v25  ;;  %v660_v24 = vld [vmem:[%s5679_s0 + $0xb98] sm:$0xff]  ;;  %v1680_v25 = vunpack.c.h.bf16 %v536_v17  ;;  %v1671_v33 = vunpack.c.l.bf16 %v532_v23 }
 0x346   : > { %4625 = vmatpush1.msra.mxu1 %v1767_v26  ;;  %4555 = vmatprep.subr.mxu0 %v1504_v29  ;;  %v1936_v26 = vunpack.c.h.bf16 %v664_v18  ;;  %v528_v29 = vld [vmem:[%s5679_s0 + $0x778] sm:$0xff]  ;;  %v1927_v34 = vunpack.c.l.bf16 %v660_v24 }
 0x347   : > { %4626 = vmatprep.subr.mxu1 %v1760_v30  ;;  %4556 = vmatpush1.msra.mxu0 %v1503_v31  ;;  %v656_v30 = vld [vmem:[%s5679_s0 + $0xb78] sm:$0xff]  ;;  %v1672_v31 = vunpack.c.h.bf16 %v532_v23  ;;  %v1663_v39 = vunpack.c.l.bf16 %v528_v29 }
 0x348   : > { %4627 = vmatpush1.msra.mxu1 %v1759_v32  ;;  %4557 = vmatprep.subr.mxu0 %v1496_v35  ;;  %v1928_v32 = vunpack.c.h.bf16 %v660_v24  ;;  %v524_v35 = vld [vmem:[%s5679_s0 + $0x758] sm:$0xff]  ;;  %v1919_v40 = vunpack.c.l.bf16 %v656_v30 }
 0x349   : > { %4628 = vmatprep.subr.mxu1 %v1752_v36  ;;  %4558 = vmatpush1.msra.mxu0 %v1495_v37  ;;  %v652_v36 = vld [vmem:[%s5679_s0 + $0xb58] sm:$0xff]  ;;  %v1664_v37 = vunpack.c.h.bf16 %v528_v29  ;;  %v1655_v45 = vunpack.c.l.bf16 %v524_v35 }
 0x34a   : > { %4629 = vmatpush1.msra.mxu1 %v1751_v38  ;;  %4559 = vmatprep.subr.mxu0 %v1488_v41  ;;  %v1920_v38 = vunpack.c.h.bf16 %v656_v30  ;;  %v520_v41 = vld [vmem:[%s5679_s0 + $0x738] sm:$0xff]  ;;  %v1911_v46 = vunpack.c.l.bf16 %v652_v36 }
 0x34b   : > { %4630 = vmatprep.subr.mxu1 %v1744_v42  ;;  %4560 = vmatpush1.msra.mxu0 %v1487_v43  ;;  %v648_v42 = vld [vmem:[%s5679_s0 + $0xb38] sm:$0xff]  ;;  %v1656_v43 = vunpack.c.h.bf16 %v524_v35  ;;  %v1647_v51 = vunpack.c.l.bf16 %v520_v41 }
 0x34c   : > { %4631 = vmatpush1.msra.mxu1 %v1743_v44  ;;  %4561 = vmatprep.subr.mxu0 %v1480_v47  ;;  %v1912_v44 = vunpack.c.h.bf16 %v652_v36  ;;  %v516_v47 = vld [vmem:[%s5679_s0 + $0x718] sm:$0xff]  ;;  %v1903_v52 = vunpack.c.l.bf16 %v648_v42 }
 0x34d   : > { %4632 = vmatprep.subr.mxu1 %v1736_v48  ;;  %4562 = vmatpush1.msra.mxu0 %v1479_v49  ;;  %v644_v48 = vld [vmem:[%s5679_s0 + $0xb18] sm:$0xff]  ;;  %v1648_v49 = vunpack.c.h.bf16 %v520_v41  ;;  %v1639_v57 = vunpack.c.l.bf16 %v516_v47 }
 0x34e   : > { %4633 = vmatpush1.msra.mxu1 %v1735_v50  ;;  %4563 = vmatprep.subr.mxu0 %v1472_v53  ;;  %v1904_v50 = vunpack.c.h.bf16 %v648_v42  ;;  %v512_v53 = vld [vmem:[%s5679_s0 + $0x6f8] sm:$0xff]  ;;  %v1895_v58 = vunpack.c.l.bf16 %v644_v48 }
 0x34f   : > { %4634 = vmatprep.subr.mxu1 %v1728_v54  ;;  %4564 = vmatpush1.msra.mxu0 %v1471_v55  ;;  %v640_v54 = vld [vmem:[%s5679_s0 + $0xaf8] sm:$0xff]  ;;  %v1640_v55 = vunpack.c.h.bf16 %v516_v47  ;;  %v1631_v63 = vunpack.c.l.bf16 %v512_v53 }
 0x350   : > { %4635 = vmatpush1.msra.mxu1 %v1727_v56  ;;  %4565 = vmatprep.subr.mxu0 %v1464_v59  ;;  %v1896_v56 = vunpack.c.h.bf16 %v644_v48  ;;  %v508_v59 = vld [vmem:[%s5679_s0 + $0x6d8] sm:$0xff]  ;;  %v1887_v0 = vunpack.c.l.bf16 %v640_v54 }
 0x351   : > { %4636 = vmatprep.subr.mxu1 %v1720_v60  ;;  %4566 = vmatpush1.msra.mxu0 %v1463_v61  ;;  %v636_v60 = vld [vmem:[%s5679_s0 + $0xad8] sm:$0xff]  ;;  %v1632_v61 = vunpack.c.h.bf16 %v512_v53  ;;  %v1623_v5 = vunpack.c.l.bf16 %v508_v59 }
 0x352   : > { %4637 = vmatpush1.msra.mxu1 %v1719_v62  ;;  %4567 = vmatprep.subr.mxu0 %v1456_v1  ;;  %v1888_v62 = vunpack.c.h.bf16 %v640_v54  ;;  %v504_v1 = vld [vmem:[%s5679_s0 + $0x6b8] sm:$0xff]  ;;  %v1879_v6 = vunpack.c.l.bf16 %v636_v60 }
 0x353   : > { %4638 = vmatprep.subr.mxu1 %v1712_v2  ;;  %4568 = vmatpush1.msra.mxu0 %v1455_v3  ;;  %v632_v2 = vld [vmem:[%s5679_s0 + $0xab8] sm:$0xff]  ;;  %v1624_v3 = vunpack.c.h.bf16 %v508_v59  ;;  %v1615_v11 = vunpack.c.l.bf16 %v504_v1 }
 0x354   : > { %4639 = vmatpush1.msra.mxu1 %v1711_v4  ;;  %4569 = vmatprep.subr.mxu0 %v1448_v7  ;;  %v1880_v4 = vunpack.c.h.bf16 %v636_v60  ;;  %v500_v7 = vld [vmem:[%s5679_s0 + $0x698] sm:$0xff]  ;;  %v1871_v12 = vunpack.c.l.bf16 %v632_v2  ;;  %v5326_v60 = vld [vmem:[%s5771_s18 + $0x20] sm:$0xff] }
 0x355   : > { %4640 = vmatprep.subr.mxu1 %v1704_v8  ;;  %4570 = vmatpush1.msra.mxu0 %v1447_v9  ;;  %v628_v8 = vld [vmem:[%s5679_s0 + $0xa98] sm:$0xff]  ;;  %v1616_v9 = vunpack.c.h.bf16 %v504_v1  ;;  %v1607_v17 = vunpack.c.l.bf16 %v500_v7 }
 0x356   : > { %4641 = vmatpush1.msra.mxu1 %v1703_v10  ;;  %4571 = vmatprep.subr.mxu0 %v1696_v13  ;;  %v1872_v10 = vunpack.c.h.bf16 %v632_v2  ;;  %v496_v13 = vld [vmem:[%s5679_s0 + $0x678] sm:$0xff]  ;;  %v1863_v18 = vunpack.c.l.bf16 %v628_v8 }
 0x357   : > { %4642 = vmatprep.subr.mxu1 %v1952_v14  ;;  %4572 = vmatpush2.msra.mxu0 %v1695_v15  ;;  %v624_v14 = vld [vmem:[%s5679_s0 + $0xa78] sm:$0xff]  ;;  %v1608_v15 = vunpack.c.h.bf16 %v500_v7  ;;  %v1599_v23 = vunpack.c.l.bf16 %v496_v13 }
 0x358   : > { %4643 = vmatpush2.msra.mxu1 %v1951_v16  ;;  %4573 = vmatprep.subr.mxu0 %v1688_v19  ;;  %v1864_v16 = vunpack.c.h.bf16 %v628_v8  ;;  %v492_v19 = vld [vmem:[%s5679_s0 + $0x658] sm:$0xff]  ;;  %v1855_v24 = vunpack.c.l.bf16 %v624_v14 }
 0x359   : > { %4644 = vmatprep.subr.mxu1 %v1944_v20  ;;  %4574 = vmatpush2.msra.mxu0 %v1687_v21  ;;  %v620_v20 = vld [vmem:[%s5679_s0 + $0xa58] sm:$0xff]  ;;  %v1600_v21 = vunpack.c.h.bf16 %v496_v13  ;;  %v1591_v29 = vunpack.c.l.bf16 %v492_v19 }
 0x35a   : > { %4645 = vmatpush2.msra.mxu1 %v1943_v22  ;;  %4575 = vmatprep.subr.mxu0 %v1680_v25  ;;  %v1856_v22 = vunpack.c.h.bf16 %v624_v14  ;;  %v488_v25 = vld [vmem:[%s5679_s0 + $0x638] sm:$0xff]  ;;  %v1847_v30 = vunpack.c.l.bf16 %v620_v20 }
 0x35b   : > { %4646 = vmatprep.subr.mxu1 %v1936_v26  ;;  %4576 = vmatpush2.msra.mxu0 %v1679_v27  ;;  %v616_v26 = vld [vmem:[%s5679_s0 + $0xa38] sm:$0xff]  ;;  %v1592_v27 = vunpack.c.h.bf16 %v492_v19  ;;  %v1583_v35 = vunpack.c.l.bf16 %v488_v25 }
 0x35c   : > { %4647 = vmatpush2.msra.mxu1 %v1935_v28  ;;  %4577 = vmatprep.subr.mxu0 %v1672_v31  ;;  %v1848_v28 = vunpack.c.h.bf16 %v620_v20  ;;  %v484_v31 = vld [vmem:[%s5679_s0 + $0x618] sm:$0xff]  ;;  %v1839_v36 = vunpack.c.l.bf16 %v616_v26 }
 0x35d   : > { %4648 = vmatprep.subr.mxu1 %v1928_v32  ;;  %4578 = vmatpush2.msra.mxu0 %v1671_v33  ;;  %v612_v32 = vld [vmem:[%s5679_s0 + $0xa18] sm:$0xff]  ;;  %v1584_v33 = vunpack.c.h.bf16 %v488_v25 }
 0x35e   : > { %4649 = vmatpush2.msra.mxu1 %v1927_v34  ;;  %4579 = vmatprep.subr.mxu0 %v1664_v37  ;;  %v1840_v34 = vunpack.c.h.bf16 %v616_v26  ;;  %v1576_v37 = vunpack.c.h.bf16 %v484_v31  ;;  %v864_v41 = vld [vmem:[%s5679_s0 + $0x11f8] sm:$0xff]  ;;  %v1831_v42 = vunpack.c.l.bf16 %v612_v32 }
 0x35f   : > { %4650 = vmatprep.subr.mxu1 %v1920_v38  ;;  %4580 = vmatpush2.msra.mxu0 %v1663_v39  ;;  %v1832_v38 = vunpack.c.h.bf16 %v612_v32  ;;  %v736_v39 = vld [vmem:[%s5679_s0 + $0xdf8] sm:$0xff] }
 0x360   : > { %4651 = vmatpush2.msra.mxu1 %v1919_v40  ;;  %4581 = vmatprep.subr.mxu0 %v1656_v43  ;;  %v1575_v40 = vunpack.c.l.bf16 %v484_v31  ;;  %v2080_v43 = vunpack.c.h.bf16 %v736_v39  ;;  %v5323_v47 = vld [vmem:[%s5771_s18 + $0x18] sm:$0xff]  ;;  %v2079_v48 = vunpack.c.l.bf16 %v736_v39 }
 0x361   : > { %4652 = vmatprep.subr.mxu1 %v1912_v44  ;;  %4582 = vmatpush2.msra.mxu0 %v1655_v45  ;;  %v732_v44 = vld [vmem:[%s5679_s0 + $0xdd8] sm:$0xff] }
 0x362   : > { %4653 = vmatpush2.msra.mxu1 %v1911_v46  ;;  %4583 = vmatprep.subr.mxu0 %v1648_v49  ;;  %v860_v45 = vld [vmem:[%s5679_s0 + $0x11d8] sm:$0xff]  ;;  %v2336_v46 = vunpack.c.h.bf16 %v864_v41  ;;  %v2335_v49 = vunpack.c.l.bf16 %v864_v41  ;;  %v2072_v53 = vunpack.c.h.bf16 %v732_v44 }
 0x363   : > { %4654 = vmatprep.subr.mxu1 %v1904_v50  ;;  %4584 = vmatpush2.msra.mxu0 %v1647_v51  ;;  %v728_v50 = vld [vmem:[%s5679_s0 + $0xdb8] sm:$0xff]  ;;  %v2328_v54 = vunpack.c.h.bf16 %v860_v45 }
 0x364   : > { %4655 = vmatpush2.msra.mxu1 %v1903_v52  ;;  %4585 = vmatprep.subr.mxu0 %v1640_v55  ;;  %v856_v51 = vld [vmem:[%s5679_s0 + $0x11b8] sm:$0xff]  ;;  %v5324_v52 = vld [vmem:[%s5771_s18 + $0x10] sm:$0xff]  ;;  %v5325_v55 = vld [vmem:[%s5771_s18 + $0x28] sm:$0xff] }
 0x365   : > { %4656 = vmatprep.subr.mxu1 %v1896_v56  ;;  %4586 = vmatpush2.msra.mxu0 %v1639_v57  ;;  %v2071_v56 = vunpack.c.l.bf16 %v732_v44  ;;  %v2327_v57 = vunpack.c.l.bf16 %v860_v45  ;;  %v852_v59 = vld [vmem:[%s5679_s0 + $0x1198] sm:$0xff] }
 0x366   : > { %4657 = vmatpush2.msra.mxu1 %v1895_v58  ;;  %4587 = vmatprep.subr.mxu0 %v1632_v61  ;;  %v724_v58 = vld [vmem:[%s5679_s0 + $0xd98] sm:$0xff]  ;;  %v2064_v61 = vunpack.c.h.bf16 %v728_v50 }
 0x367   : > { %4658 = vmatprep.subr.mxu1 %v1888_v62  ;;  %4588 = vmatpush2.msra.mxu0 %v1631_v63  ;;  %v2320_v62 = vunpack.c.h.bf16 %v856_v51  ;;  %v2063_v63 = vunpack.c.l.bf16 %v728_v50  ;;  %v720_v1 = vld [vmem:[%s5679_s0 + $0xd78] sm:$0xff] }
 0x368   : > { %4659 = vmatpush2.msra.mxu1 %v1887_v0  ;;  %4589 = vmatprep.subr.mxu0 %v1624_v3  ;;  %v2319_v0 = vunpack.c.l.bf16 %v856_v51  ;;  %v848_v2 = vld [vmem:[%s5679_s0 + $0x1178] sm:$0xff]  ;;  %v2056_v3 = vunpack.c.h.bf16 %v724_v58 }
 0x369   : > { %4660 = vmatprep.subr.mxu1 %v1880_v4  ;;  %4590 = vmatpush2.msra.mxu0 %v1623_v5  ;;  %v2312_v4 = vunpack.c.h.bf16 %v852_v59  ;;  %v2055_v5 = vunpack.c.l.bf16 %v724_v58  ;;  %v716_v7 = vld [vmem:[%s5679_s0 + $0xd58] sm:$0xff] }
 0x36a   : > { %4661 = vmatpush2.msra.mxu1 %v1879_v6  ;;  %4591 = vmatprep.subr.mxu0 %v1616_v9  ;;  %v2311_v6 = vunpack.c.l.bf16 %v852_v59  ;;  %v844_v8 = vld [vmem:[%s5679_s0 + $0x1158] sm:$0xff]  ;;  %v2048_v9 = vunpack.c.h.bf16 %v720_v1 }
 0x36b   : > { %4662 = vmatprep.subr.mxu1 %v1872_v10  ;;  %4592 = vmatpush2.msra.mxu0 %v1615_v11  ;;  %v2304_v10 = vunpack.c.h.bf16 %v848_v2  ;;  %v2047_v11 = vunpack.c.l.bf16 %v720_v1  ;;  %v712_v13 = vld [vmem:[%s5679_s0 + $0xd38] sm:$0xff] }
 0x36c   : > { %4663 = vmatpush2.msra.mxu1 %v1871_v12  ;;  %4593 = vmatprep.subr.mxu0 %v1608_v15  ;;  %v2303_v12 = vunpack.c.l.bf16 %v848_v2  ;;  %v840_v14 = vld [vmem:[%s5679_s0 + $0x1138] sm:$0xff]  ;;  %v2040_v15 = vunpack.c.h.bf16 %v716_v7 }
 0x36d   : > { %4664 = vmatprep.subr.mxu1 %v1864_v16  ;;  %4594 = vmatpush2.msra.mxu0 %v1607_v17  ;;  %v2296_v16 = vunpack.c.h.bf16 %v844_v8  ;;  %v2039_v17 = vunpack.c.l.bf16 %v716_v7  ;;  %v708_v19 = vld [vmem:[%s5679_s0 + $0xd18] sm:$0xff] }
 0x36e   : > { %4665 = vmatpush2.msra.mxu1 %v1863_v18  ;;  %4595 = vmatprep.subr.mxu0 %v1600_v21  ;;  %v2295_v18 = vunpack.c.l.bf16 %v844_v8  ;;  %v836_v20 = vld [vmem:[%s5679_s0 + $0x1118] sm:$0xff]  ;;  %v2032_v21 = vunpack.c.h.bf16 %v712_v13 }
 0x36f   : > { %4666 = vmatprep.subr.mxu1 %v1856_v22  ;;  %4596 = vmatpush2.msra.mxu0 %v1599_v23  ;;  %v2288_v22 = vunpack.c.h.bf16 %v840_v14  ;;  %v2031_v23 = vunpack.c.l.bf16 %v712_v13  ;;  %v704_v25 = vld [vmem:[%s5679_s0 + $0xcf8] sm:$0xff] }
 0x370   : > { %4667 = vmatpush2.msra.mxu1 %v1855_v24  ;;  %4597 = vmatprep.subr.mxu0 %v1592_v27  ;;  %v2287_v24 = vunpack.c.l.bf16 %v840_v14  ;;  %v832_v26 = vld [vmem:[%s5679_s0 + $0x10f8] sm:$0xff]  ;;  %v2024_v27 = vunpack.c.h.bf16 %v708_v19 }
 0x371   : > { %4668 = vmatprep.subr.mxu1 %v1848_v28  ;;  %4598 = vmatpush2.msra.mxu0 %v1591_v29  ;;  %v2280_v28 = vunpack.c.h.bf16 %v836_v20  ;;  %v2023_v29 = vunpack.c.l.bf16 %v708_v19  ;;  %v700_v31 = vld [vmem:[%s5679_s0 + $0xcd8] sm:$0xff] }
 0x372   : > { %4669 = vmatpush2.msra.mxu1 %v1847_v30  ;;  %4599 = vmatprep.subr.mxu0 %v1584_v33  ;;  %v2279_v30 = vunpack.c.l.bf16 %v836_v20  ;;  %v828_v32 = vld [vmem:[%s5679_s0 + $0x10d8] sm:$0xff]  ;;  %v2016_v33 = vunpack.c.h.bf16 %v704_v25  ;;  %v2008_v39 = vunpack.c.h.bf16 %v700_v31  ;;  %v2007_v41 = vunpack.c.l.bf16 %v700_v31 }
 0x373   : > { %4670 = vmatprep.subr.mxu1 %v1840_v34  ;;  %4600 = vmatpush2.msra.mxu0 %v1583_v35  ;;  %v2272_v34 = vunpack.c.h.bf16 %v832_v26  ;;  %v2015_v35 = vunpack.c.l.bf16 %v704_v25  ;;  %v820_v44 = vld [vmem:[%s5679_s0 + $0x1098] sm:$0xff] }
 0x374   : > { %4671 = vmatpush2.msra.mxu1 %v1839_v36  ;;  %4601 = vmatprep.subr.mxu0 %v1576_v37  ;;  %v2271_v36 = vunpack.c.l.bf16 %v832_v26  ;;  %v696_v37 = vld [vmem:[%s5679_s0 + $0xcb8] sm:$0xff] }
 0x375   : > { %4672 = vmatprep.subr.mxu1 %v1832_v38  ;;  %4602 = vmatpush2.msra.mxu0 %v1575_v40  ;;  %v824_v38 = vld [vmem:[%s5679_s0 + $0x10b8] sm:$0xff]  ;;  %v2264_v40 = vunpack.c.h.bf16 %v828_v32  ;;  %v2000_v45 = vunpack.c.h.bf16 %v696_v37 }
 0x376   : > { %4603 = vmatprep.mubr.f32.mxu0 %v5323_v47  ;;  %4673 = vmatpush2.msra.mxu1 %v1831_v42  ;;  %v2263_v42 = vunpack.c.l.bf16 %v828_v32  ;;  %v1999_v47 = vunpack.c.l.bf16 %v696_v37  ;;  %v816_v50 = vld [vmem:[%s5679_s0 + $0x1078] sm:$0xff] }
 0x377   : > { %4604 = vmatmul.mubr.f32.vlgmr.msra.gmra.mxu0 %v5324_v52  ;;  %4674 = vmatprep.mubr.f32.mxu1 %v5325_v55  ;;  %v2248_v52 = vunpack.c.h.bf16 %v820_v44  ;;  %v684_v55 = vld [vmem:[%s5679_s0 + $0xc58] sm:$0xff]  ;;  %v2240_v58 = vunpack.c.h.bf16 %v816_v50 }
 0x378   : > { %4681 = vmatprep.subr.mxu0 %v2080_v43  ;;  %4752 = vmatprep.subr.mxu1 %v2336_v46  ;;  %v692_v43 = vld [vmem:[%s5679_s0 + $0xc98] sm:$0xff]  ;;  %v2256_v46 = vunpack.c.h.bf16 %v824_v38  ;;  %v1975_v1 = vunpack.c.l.bf16 %v684_v55 }
 0x379   : > { %4675 = vmatmul.mubr.f32.vlgmr.msra.gmra.mxu1 %v5326_v60  ;;  %4682 = vmatpush1.msra.mxu0 %v2079_v48  ;;  %v2255_v48 = vunpack.c.l.bf16 %v824_v38  ;;  %v1992_v51 = vunpack.c.h.bf16 %v692_v43  ;;  %v2239_v60 = vunpack.c.l.bf16 %v816_v50 }
 0x37a   : > { %4753 = vmatpush1.msra.mxu1 %v2335_v49  ;;  %4683 = vmatprep.subr.mxu0 %v2072_v53  ;;  %v688_v49 = vld [vmem:[%s5679_s0 + $0xc78] sm:$0xff]  ;;  %v1991_v53 = vunpack.c.l.bf16 %v692_v43 }
 0x37b   : > { %4754 = vmatprep.subr.mxu1 %v2328_v54  ;;  %4684 = vmatpush1.msra.mxu0 %v2071_v56  ;;  %v2247_v54 = vunpack.c.l.bf16 %v820_v44  ;;  %v812_v56 = vld [vmem:[%s5679_s0 + $0x1058] sm:$0xff]  ;;  %v1983_v59 = vunpack.c.l.bf16 %v688_v49 }
 0x37c   : > { %4755 = vmatpush1.msra.mxu1 %v2327_v57  ;;  %4685 = vmatprep.subr.mxu0 %v2064_v61  ;;  %v1984_v57 = vunpack.c.h.bf16 %v688_v49  ;;  %v680_v61 = vld [vmem:[%s5679_s0 + $0xc38] sm:$0xff]  ;;  %v2231_v2 = vunpack.c.l.bf16 %v812_v56 }
 0x37d   : > { %4756 = vmatprep.subr.mxu1 %v2320_v62  ;;  %4686 = vmatpush1.msra.mxu0 %v2063_v63  ;;  %v808_v62 = vld [vmem:[%s5679_s0 + $0x1038] sm:$0xff]  ;;  %v1976_v63 = vunpack.c.h.bf16 %v684_v55  ;;  %v1967_v7 = vunpack.c.l.bf16 %v680_v61 }
 0x37e   : > { %4757 = vmatpush1.msra.mxu1 %v2319_v0  ;;  %4687 = vmatprep.subr.mxu0 %v2056_v3  ;;  %v2232_v0 = vunpack.c.h.bf16 %v812_v56  ;;  %v676_v3 = vld [vmem:[%s5679_s0 + $0xc18] sm:$0xff]  ;;  %v2223_v8 = vunpack.c.l.bf16 %v808_v62 }
 0x37f   : > { %4758 = vmatprep.subr.mxu1 %v2312_v4  ;;  %4688 = vmatpush1.msra.mxu0 %v2055_v5  ;;  %v804_v4 = vld [vmem:[%s5679_s0 + $0x1018] sm:$0xff]  ;;  %v1968_v5 = vunpack.c.h.bf16 %v680_v61  ;;  %v1959_v13 = vunpack.c.l.bf16 %v676_v3 }
 0x380   : > { %4759 = vmatpush1.msra.mxu1 %v2311_v6  ;;  %4689 = vmatprep.subr.mxu0 %v2048_v9  ;;  %v2224_v6 = vunpack.c.h.bf16 %v808_v62  ;;  %v800_v9 = vld [vmem:[%s5679_s0 + $0xff8] sm:$0xff]  ;;  %v2215_v14 = vunpack.c.l.bf16 %v804_v4 }
 0x381   : > { %4760 = vmatprep.subr.mxu1 %v2304_v10  ;;  %4690 = vmatpush1.msra.mxu0 %v2047_v11  ;;  %v928_v10 = vld [vmem:[%s5679_s0 + $0x13f8] sm:$0xff]  ;;  %v1960_v11 = vunpack.c.h.bf16 %v676_v3  ;;  %v2207_v19 = vunpack.c.l.bf16 %v800_v9 }
 0x382   : > { %4761 = vmatpush1.msra.mxu1 %v2303_v12  ;;  %4691 = vmatprep.subr.mxu0 %v2040_v15  ;;  %v2216_v12 = vunpack.c.h.bf16 %v804_v4  ;;  %v796_v15 = vld [vmem:[%s5679_s0 + $0xfd8] sm:$0xff]  ;;  %v2463_v20 = vunpack.c.l.bf16 %v928_v10 }
 0x383   : > { %4762 = vmatprep.subr.mxu1 %v2296_v16  ;;  %4692 = vmatpush1.msra.mxu0 %v2039_v17  ;;  %v924_v16 = vld [vmem:[%s5679_s0 + $0x13d8] sm:$0xff]  ;;  %v2208_v17 = vunpack.c.h.bf16 %v800_v9  ;;  %v2199_v25 = vunpack.c.l.bf16 %v796_v15 }
 0x384   : > { %4763 = vmatpush1.msra.mxu1 %v2295_v18  ;;  %4693 = vmatprep.subr.mxu0 %v2032_v21  ;;  %v2464_v18 = vunpack.c.h.bf16 %v928_v10  ;;  %v792_v21 = vld [vmem:[%s5679_s0 + $0xfb8] sm:$0xff]  ;;  %v2455_v26 = vunpack.c.l.bf16 %v924_v16 }
 0x385   : > { %4764 = vmatprep.subr.mxu1 %v2288_v22  ;;  %4694 = vmatpush1.msra.mxu0 %v2031_v23  ;;  %v920_v22 = vld [vmem:[%s5679_s0 + $0x13b8] sm:$0xff]  ;;  %v2200_v23 = vunpack.c.h.bf16 %v796_v15  ;;  %v2191_v31 = vunpack.c.l.bf16 %v792_v21 }
 0x386   : > { %4765 = vmatpush1.msra.mxu1 %v2287_v24  ;;  %4695 = vmatprep.subr.mxu0 %v2024_v27  ;;  %v2456_v24 = vunpack.c.h.bf16 %v924_v16  ;;  %v788_v27 = vld [vmem:[%s5679_s0 + $0xf98] sm:$0xff]  ;;  %v2447_v32 = vunpack.c.l.bf16 %v920_v22 }
 0x387   : > { %4766 = vmatprep.subr.mxu1 %v2280_v28  ;;  %4696 = vmatpush1.msra.mxu0 %v2023_v29  ;;  %v916_v28 = vld [vmem:[%s5679_s0 + $0x1398] sm:$0xff]  ;;  %v2192_v29 = vunpack.c.h.bf16 %v792_v21  ;;  %v2183_v37 = vunpack.c.l.bf16 %v788_v27 }
 0x388   : > { %4767 = vmatpush1.msra.mxu1 %v2279_v30  ;;  %4697 = vmatprep.subr.mxu0 %v2016_v33  ;;  %v2448_v30 = vunpack.c.h.bf16 %v920_v22  ;;  %v784_v33 = vld [vmem:[%s5679_s0 + $0xf78] sm:$0xff]  ;;  %v2439_v38 = vunpack.c.l.bf16 %v916_v28 }
 0x389   : > { %4768 = vmatprep.subr.mxu1 %v2272_v34  ;;  %4698 = vmatpush1.msra.mxu0 %v2015_v35  ;;  %v912_v34 = vld [vmem:[%s5679_s0 + $0x1378] sm:$0xff]  ;;  %v2184_v35 = vunpack.c.h.bf16 %v788_v27  ;;  %v2175_v43 = vunpack.c.l.bf16 %v784_v33 }
 0x38a   : > { %4769 = vmatpush1.msra.mxu1 %v2271_v36  ;;  %4699 = vmatprep.subr.mxu0 %v2008_v39  ;;  %v2440_v36 = vunpack.c.h.bf16 %v916_v28  ;;  %v780_v39 = vld [vmem:[%s5679_s0 + $0xf58] sm:$0xff]  ;;  %v2431_v44 = vunpack.c.l.bf16 %v912_v34 }
 0x38b   : > { %4770 = vmatprep.subr.mxu1 %v2264_v40  ;;  %4700 = vmatpush1.msra.mxu0 %v2007_v41  ;;  %v908_v40 = vld [vmem:[%s5679_s0 + $0x1358] sm:$0xff]  ;;  %v2176_v41 = vunpack.c.h.bf16 %v784_v33  ;;  %v2167_v49 = vunpack.c.l.bf16 %v780_v39 }
 0x38c   : > { %4771 = vmatpush1.msra.mxu1 %v2263_v42  ;;  %4701 = vmatprep.subr.mxu0 %v2000_v45  ;;  %v2432_v42 = vunpack.c.h.bf16 %v912_v34  ;;  %v776_v45 = vld [vmem:[%s5679_s0 + $0xf38] sm:$0xff]  ;;  %v2423_v50 = vunpack.c.l.bf16 %v908_v40 }
 0x38d   : > { %4772 = vmatprep.subr.mxu1 %v2256_v46  ;;  %4702 = vmatpush1.msra.mxu0 %v1999_v47  ;;  %v904_v46 = vld [vmem:[%s5679_s0 + $0x1338] sm:$0xff]  ;;  %v2168_v47 = vunpack.c.h.bf16 %v780_v39  ;;  %v2159_v55 = vunpack.c.l.bf16 %v776_v45 }
 0x38e   : > { %4773 = vmatpush1.msra.mxu1 %v2255_v48  ;;  %4703 = vmatprep.subr.mxu0 %v1992_v51  ;;  %v2424_v48 = vunpack.c.h.bf16 %v908_v40  ;;  %v772_v51 = vld [vmem:[%s5679_s0 + $0xf18] sm:$0xff]  ;;  %v2415_v56 = vunpack.c.l.bf16 %v904_v46 }
 0x38f   : > { %4774 = vmatprep.subr.mxu1 %v2248_v52  ;;  %4704 = vmatpush1.msra.mxu0 %v1991_v53  ;;  %v900_v52 = vld [vmem:[%s5679_s0 + $0x1318] sm:$0xff]  ;;  %v2160_v53 = vunpack.c.h.bf16 %v776_v45  ;;  %v2151_v61 = vunpack.c.l.bf16 %v772_v51 }
 0x390   : > { %4775 = vmatpush1.msra.mxu1 %v2247_v54  ;;  %4705 = vmatprep.subr.mxu0 %v1984_v57  ;;  %v2416_v54 = vunpack.c.h.bf16 %v904_v46  ;;  %v768_v57 = vld [vmem:[%s5679_s0 + $0xef8] sm:$0xff]  ;;  %v2407_v62 = vunpack.c.l.bf16 %v900_v52 }
 0x391   : > { %4776 = vmatprep.subr.mxu1 %v2240_v58  ;;  %4706 = vmatpush1.msra.mxu0 %v1983_v59  ;;  %v896_v58 = vld [vmem:[%s5679_s0 + $0x12f8] sm:$0xff]  ;;  %v2152_v59 = vunpack.c.h.bf16 %v772_v51  ;;  %v2143_v3 = vunpack.c.l.bf16 %v768_v57 }
 0x392   : > { %4777 = vmatpush1.msra.mxu1 %v2239_v60  ;;  %4707 = vmatprep.subr.mxu0 %v1976_v63  ;;  %v2408_v60 = vunpack.c.h.bf16 %v900_v52  ;;  %v764_v63 = vld [vmem:[%s5679_s0 + $0xed8] sm:$0xff]  ;;  %v2399_v4 = vunpack.c.l.bf16 %v896_v58 }
 0x393   : > { %4778 = vmatprep.subr.mxu1 %v2232_v0  ;;  %4708 = vmatpush1.msra.mxu0 %v1975_v1  ;;  %v892_v0 = vld [vmem:[%s5679_s0 + $0x12d8] sm:$0xff]  ;;  %v2144_v1 = vunpack.c.h.bf16 %v768_v57  ;;  %v2135_v9 = vunpack.c.l.bf16 %v764_v63 }
 0x394   : > { %4779 = vmatpush1.msra.mxu1 %v2231_v2  ;;  %4709 = vmatprep.subr.mxu0 %v1968_v5  ;;  %v2400_v2 = vunpack.c.h.bf16 %v896_v58  ;;  %v760_v5 = vld [vmem:[%s5679_s0 + $0xeb8] sm:$0xff]  ;;  %v2391_v10 = vunpack.c.l.bf16 %v892_v0 }
 0x395   : > { %4780 = vmatprep.subr.mxu1 %v2224_v6  ;;  %4710 = vmatpush1.msra.mxu0 %v1967_v7  ;;  %v888_v6 = vld [vmem:[%s5679_s0 + $0x12b8] sm:$0xff]  ;;  %v2136_v7 = vunpack.c.h.bf16 %v764_v63  ;;  %v2127_v15 = vunpack.c.l.bf16 %v760_v5 }
 0x396   : > { %4781 = vmatpush1.msra.mxu1 %v2223_v8  ;;  %4711 = vmatprep.subr.mxu0 %v1960_v11  ;;  %v2392_v8 = vunpack.c.h.bf16 %v892_v0  ;;  %v756_v11 = vld [vmem:[%s5679_s0 + $0xe98] sm:$0xff]  ;;  %v2383_v16 = vunpack.c.l.bf16 %v888_v6  ;;  %v5330_v0 = vld [vmem:[%s5771_s18 + $0x40] sm:$0xff] }
 0x397   : > { %4782 = vmatprep.subr.mxu1 %v2216_v12  ;;  %4712 = vmatpush1.msra.mxu0 %v1959_v13  ;;  %v884_v12 = vld [vmem:[%s5679_s0 + $0x1298] sm:$0xff]  ;;  %v2128_v13 = vunpack.c.h.bf16 %v760_v5  ;;  %v2119_v21 = vunpack.c.l.bf16 %v756_v11 }
 0x398   : > { %4783 = vmatpush1.msra.mxu1 %v2215_v14  ;;  %4713 = vmatprep.subr.mxu0 %v2208_v17  ;;  %v2384_v14 = vunpack.c.h.bf16 %v888_v6  ;;  %v752_v17 = vld [vmem:[%s5679_s0 + $0xe78] sm:$0xff]  ;;  %v2375_v22 = vunpack.c.l.bf16 %v884_v12 }
 0x399   : > { %4784 = vmatprep.subr.mxu1 %v2464_v18  ;;  %4714 = vmatpush2.msra.mxu0 %v2207_v19  ;;  %v880_v18 = vld [vmem:[%s5679_s0 + $0x1278] sm:$0xff]  ;;  %v2120_v19 = vunpack.c.h.bf16 %v756_v11  ;;  %v2111_v27 = vunpack.c.l.bf16 %v752_v17 }
 0x39a   : > { %4785 = vmatpush2.msra.mxu1 %v2463_v20  ;;  %4715 = vmatprep.subr.mxu0 %v2200_v23  ;;  %v2376_v20 = vunpack.c.h.bf16 %v884_v12  ;;  %v748_v23 = vld [vmem:[%s5679_s0 + $0xe58] sm:$0xff]  ;;  %v2367_v28 = vunpack.c.l.bf16 %v880_v18 }
 0x39b   : > { %4786 = vmatprep.subr.mxu1 %v2456_v24  ;;  %4716 = vmatpush2.msra.mxu0 %v2199_v25  ;;  %v876_v24 = vld [vmem:[%s5679_s0 + $0x1258] sm:$0xff]  ;;  %v2112_v25 = vunpack.c.h.bf16 %v752_v17  ;;  %v2103_v33 = vunpack.c.l.bf16 %v748_v23 }
 0x39c   : > { %4787 = vmatpush2.msra.mxu1 %v2455_v26  ;;  %4717 = vmatprep.subr.mxu0 %v2192_v29  ;;  %v2368_v26 = vunpack.c.h.bf16 %v880_v18  ;;  %v744_v29 = vld [vmem:[%s5679_s0 + $0xe38] sm:$0xff]  ;;  %v2359_v34 = vunpack.c.l.bf16 %v876_v24 }
 0x39d   : > { %4788 = vmatprep.subr.mxu1 %v2448_v30  ;;  %4718 = vmatpush2.msra.mxu0 %v2191_v31  ;;  %v872_v30 = vld [vmem:[%s5679_s0 + $0x1238] sm:$0xff]  ;;  %v2104_v31 = vunpack.c.h.bf16 %v748_v23  ;;  %v2095_v39 = vunpack.c.l.bf16 %v744_v29 }
 0x39e   : > { %4789 = vmatpush2.msra.mxu1 %v2447_v32  ;;  %4719 = vmatprep.subr.mxu0 %v2184_v35  ;;  %v2360_v32 = vunpack.c.h.bf16 %v876_v24  ;;  %v740_v35 = vld [vmem:[%s5679_s0 + $0xe18] sm:$0xff]  ;;  %v2351_v40 = vunpack.c.l.bf16 %v872_v30 }
 0x39f   : > { %4790 = vmatprep.subr.mxu1 %v2440_v36  ;;  %4720 = vmatpush2.msra.mxu0 %v2183_v37  ;;  %v868_v36 = vld [vmem:[%s5679_s0 + $0x1218] sm:$0xff]  ;;  %v2096_v37 = vunpack.c.h.bf16 %v744_v29 }
 0x3a0   : > { %4791 = vmatpush2.msra.mxu1 %v2439_v38  ;;  %4721 = vmatprep.subr.mxu0 %v2176_v41  ;;  %v2352_v38 = vunpack.c.h.bf16 %v872_v30  ;;  %v2088_v41 = vunpack.c.h.bf16 %v740_v35  ;;  %v1120_v45 = vld [vmem:[%s5679_s0 + $0x19f8] sm:$0xff]  ;;  %v2343_v46 = vunpack.c.l.bf16 %v868_v36 }
 0x3a1   : > { %4792 = vmatprep.subr.mxu1 %v2432_v42  ;;  %4722 = vmatpush2.msra.mxu0 %v2175_v43  ;;  %v2344_v42 = vunpack.c.h.bf16 %v868_v36  ;;  %v992_v43 = vld [vmem:[%s5679_s0 + $0x15f8] sm:$0xff] }
 0x3a2   : > { %4793 = vmatpush2.msra.mxu1 %v2431_v44  ;;  %4723 = vmatprep.subr.mxu0 %v2168_v47  ;;  %v2087_v44 = vunpack.c.l.bf16 %v740_v35  ;;  %v2592_v47 = vunpack.c.h.bf16 %v992_v43  ;;  %v5327_v51 = vld [vmem:[%s5771_s18 + $0x38] sm:$0xff]  ;;  %v2591_v52 = vunpack.c.l.bf16 %v992_v43 }
 0x3a3   : > { %4794 = vmatprep.subr.mxu1 %v2424_v48  ;;  %4724 = vmatpush2.msra.mxu0 %v2167_v49  ;;  %v988_v48 = vld [vmem:[%s5679_s0 + $0x15d8] sm:$0xff] }
 0x3a4   : > { %4795 = vmatpush2.msra.mxu1 %v2423_v50  ;;  %4725 = vmatprep.subr.mxu0 %v2160_v53  ;;  %v1116_v49 = vld [vmem:[%s5679_s0 + $0x19d8] sm:$0xff]  ;;  %v2848_v50 = vunpack.c.h.bf16 %v1120_v45  ;;  %v2847_v53 = vunpack.c.l.bf16 %v1120_v45  ;;  %v2584_v57 = vunpack.c.h.bf16 %v988_v48 }
 0x3a5   : > { %4796 = vmatprep.subr.mxu1 %v2416_v54  ;;  %4726 = vmatpush2.msra.mxu0 %v2159_v55  ;;  %v984_v54 = vld [vmem:[%s5679_s0 + $0x15b8] sm:$0xff]  ;;  %v2840_v58 = vunpack.c.h.bf16 %v1116_v49 }
 0x3a6   : > { %4797 = vmatpush2.msra.mxu1 %v2415_v56  ;;  %4727 = vmatprep.subr.mxu0 %v2152_v59  ;;  %v1112_v55 = vld [vmem:[%s5679_s0 + $0x19b8] sm:$0xff]  ;;  %v5328_v56 = vld [vmem:[%s5771_s18 + $0x30] sm:$0xff]  ;;  %v5329_v59 = vld [vmem:[%s5771_s18 + $0x48] sm:$0xff] }
 0x3a7   : > { %4798 = vmatprep.subr.mxu1 %v2408_v60  ;;  %4728 = vmatpush2.msra.mxu0 %v2151_v61  ;;  %v2583_v60 = vunpack.c.l.bf16 %v988_v48  ;;  %v2839_v61 = vunpack.c.l.bf16 %v1116_v49  ;;  %v1108_v63 = vld [vmem:[%s5679_s0 + $0x1998] sm:$0xff] }
 0x3a8   : > { %4799 = vmatpush2.msra.mxu1 %v2407_v62  ;;  %4729 = vmatprep.subr.mxu0 %v2144_v1  ;;  %v980_v62 = vld [vmem:[%s5679_s0 + $0x1598] sm:$0xff]  ;;  %v2576_v1 = vunpack.c.h.bf16 %v984_v54 }
 0x3a9   : > { %4800 = vmatprep.subr.mxu1 %v2400_v2  ;;  %4730 = vmatpush2.msra.mxu0 %v2143_v3  ;;  %v2832_v2 = vunpack.c.h.bf16 %v1112_v55  ;;  %v2575_v3 = vunpack.c.l.bf16 %v984_v54  ;;  %v976_v5 = vld [vmem:[%s5679_s0 + $0x1578] sm:$0xff] }
 0x3aa   : > { %4801 = vmatpush2.msra.mxu1 %v2399_v4  ;;  %4731 = vmatprep.subr.mxu0 %v2136_v7  ;;  %v2831_v4 = vunpack.c.l.bf16 %v1112_v55  ;;  %v1104_v6 = vld [vmem:[%s5679_s0 + $0x1978] sm:$0xff]  ;;  %v2568_v7 = vunpack.c.h.bf16 %v980_v62 }
 0x3ab   : > { %4802 = vmatprep.subr.mxu1 %v2392_v8  ;;  %4732 = vmatpush2.msra.mxu0 %v2135_v9  ;;  %v2824_v8 = vunpack.c.h.bf16 %v1108_v63  ;;  %v2567_v9 = vunpack.c.l.bf16 %v980_v62  ;;  %v972_v11 = vld [vmem:[%s5679_s0 + $0x1558] sm:$0xff] }
 0x3ac   : > { %4803 = vmatpush2.msra.mxu1 %v2391_v10  ;;  %4733 = vmatprep.subr.mxu0 %v2128_v13  ;;  %v2823_v10 = vunpack.c.l.bf16 %v1108_v63  ;;  %v1100_v12 = vld [vmem:[%s5679_s0 + $0x1958] sm:$0xff]  ;;  %v2560_v13 = vunpack.c.h.bf16 %v976_v5 }
 0x3ad   : > { %4804 = vmatprep.subr.mxu1 %v2384_v14  ;;  %4734 = vmatpush2.msra.mxu0 %v2127_v15  ;;  %v2816_v14 = vunpack.c.h.bf16 %v1104_v6  ;;  %v2559_v15 = vunpack.c.l.bf16 %v976_v5  ;;  %v968_v17 = vld [vmem:[%s5679_s0 + $0x1538] sm:$0xff] }
 0x3ae   : > { %4805 = vmatpush2.msra.mxu1 %v2383_v16  ;;  %4735 = vmatprep.subr.mxu0 %v2120_v19  ;;  %v2815_v16 = vunpack.c.l.bf16 %v1104_v6  ;;  %v1096_v18 = vld [vmem:[%s5679_s0 + $0x1938] sm:$0xff]  ;;  %v2552_v19 = vunpack.c.h.bf16 %v972_v11 }
 0x3af   : > { %4806 = vmatprep.subr.mxu1 %v2376_v20  ;;  %4736 = vmatpush2.msra.mxu0 %v2119_v21  ;;  %v2808_v20 = vunpack.c.h.bf16 %v1100_v12  ;;  %v2551_v21 = vunpack.c.l.bf16 %v972_v11  ;;  %v964_v23 = vld [vmem:[%s5679_s0 + $0x1518] sm:$0xff] }
 0x3b0   : > { %4807 = vmatpush2.msra.mxu1 %v2375_v22  ;;  %4737 = vmatprep.subr.mxu0 %v2112_v25  ;;  %v2807_v22 = vunpack.c.l.bf16 %v1100_v12  ;;  %v1092_v24 = vld [vmem:[%s5679_s0 + $0x1918] sm:$0xff]  ;;  %v2544_v25 = vunpack.c.h.bf16 %v968_v17 }
 0x3b1   : > { %4808 = vmatprep.subr.mxu1 %v2368_v26  ;;  %4738 = vmatpush2.msra.mxu0 %v2111_v27  ;;  %v2800_v26 = vunpack.c.h.bf16 %v1096_v18  ;;  %v2543_v27 = vunpack.c.l.bf16 %v968_v17  ;;  %v960_v29 = vld [vmem:[%s5679_s0 + $0x14f8] sm:$0xff] }
 0x3b2   : > { %4809 = vmatpush2.msra.mxu1 %v2367_v28  ;;  %4739 = vmatprep.subr.mxu0 %v2104_v31  ;;  %v2799_v28 = vunpack.c.l.bf16 %v1096_v18  ;;  %v1088_v30 = vld [vmem:[%s5679_s0 + $0x18f8] sm:$0xff]  ;;  %v2536_v31 = vunpack.c.h.bf16 %v964_v23 }
 0x3b3   : > { %4810 = vmatprep.subr.mxu1 %v2360_v32  ;;  %4740 = vmatpush2.msra.mxu0 %v2103_v33  ;;  %v2792_v32 = vunpack.c.h.bf16 %v1092_v24  ;;  %v2535_v33 = vunpack.c.l.bf16 %v964_v23  ;;  %v956_v35 = vld [vmem:[%s5679_s0 + $0x14d8] sm:$0xff] }
 0x3b4   : > { %4811 = vmatpush2.msra.mxu1 %v2359_v34  ;;  %4741 = vmatprep.subr.mxu0 %v2096_v37  ;;  %v2791_v34 = vunpack.c.l.bf16 %v1092_v24  ;;  %v1084_v36 = vld [vmem:[%s5679_s0 + $0x18d8] sm:$0xff]  ;;  %v2528_v37 = vunpack.c.h.bf16 %v960_v29  ;;  %v2520_v43 = vunpack.c.h.bf16 %v956_v35  ;;  %v2519_v45 = vunpack.c.l.bf16 %v956_v35 }
 0x3b5   : > { %4812 = vmatprep.subr.mxu1 %v2352_v38  ;;  %4742 = vmatpush2.msra.mxu0 %v2095_v39  ;;  %v2784_v38 = vunpack.c.h.bf16 %v1088_v30  ;;  %v2527_v39 = vunpack.c.l.bf16 %v960_v29  ;;  %v1076_v48 = vld [vmem:[%s5679_s0 + $0x1898] sm:$0xff] }
 0x3b6   : > { %4813 = vmatpush2.msra.mxu1 %v2351_v40  ;;  %4743 = vmatprep.subr.mxu0 %v2088_v41  ;;  %v2783_v40 = vunpack.c.l.bf16 %v1088_v30  ;;  %v952_v41 = vld [vmem:[%s5679_s0 + $0x14b8] sm:$0xff] }
 0x3b7   : > { %4814 = vmatprep.subr.mxu1 %v2344_v42  ;;  %4744 = vmatpush2.msra.mxu0 %v2087_v44  ;;  %v1080_v42 = vld [vmem:[%s5679_s0 + $0x18b8] sm:$0xff]  ;;  %v2776_v44 = vunpack.c.h.bf16 %v1084_v36  ;;  %v2512_v49 = vunpack.c.h.bf16 %v952_v41 }
 0x3b8   : > { %4745 = vmatprep.mubr.f32.mxu0 %v5327_v51  ;;  %4815 = vmatpush2.msra.mxu1 %v2343_v46  ;;  %v2775_v46 = vunpack.c.l.bf16 %v1084_v36  ;;  %v2511_v51 = vunpack.c.l.bf16 %v952_v41  ;;  %v1072_v54 = vld [vmem:[%s5679_s0 + $0x1878] sm:$0xff] }
 0x3b9   : > { %4746 = vmatmul.mubr.f32.vlgmr.msra.gmra.mxu0 %v5328_v56  ;;  %4816 = vmatprep.mubr.f32.mxu1 %v5329_v59  ;;  %v2760_v56 = vunpack.c.h.bf16 %v1076_v48  ;;  %v940_v59 = vld [vmem:[%s5679_s0 + $0x1458] sm:$0xff]  ;;  %v2752_v62 = vunpack.c.h.bf16 %v1072_v54 }
 0x3ba   : > { %4823 = vmatprep.subr.mxu0 %v2592_v47  ;;  %4894 = vmatprep.subr.mxu1 %v2848_v50  ;;  %v948_v47 = vld [vmem:[%s5679_s0 + $0x1498] sm:$0xff]  ;;  %v2768_v50 = vunpack.c.h.bf16 %v1080_v42  ;;  %v2487_v5 = vunpack.c.l.bf16 %v940_v59 }
 0x3bb   : > { %4817 = vmatmul.mubr.f32.vlgmr.msra.gmra.mxu1 %v5330_v0  ;;  %4824 = vmatpush1.msra.mxu0 %v2591_v52  ;;  %v2767_v52 = vunpack.c.l.bf16 %v1080_v42  ;;  %v2504_v55 = vunpack.c.h.bf16 %v948_v47  ;;  %v2751_v0 = vunpack.c.l.bf16 %v1072_v54 }
 0x3bc   : > { %4895 = vmatpush1.msra.mxu1 %v2847_v53  ;;  %4825 = vmatprep.subr.mxu0 %v2584_v57  ;;  %v944_v53 = vld [vmem:[%s5679_s0 + $0x1478] sm:$0xff]  ;;  %v2503_v57 = vunpack.c.l.bf16 %v948_v47 }
 0x3bd   : > { %4896 = vmatprep.subr.mxu1 %v2840_v58  ;;  %4826 = vmatpush1.msra.mxu0 %v2583_v60  ;;  %v2759_v58 = vunpack.c.l.bf16 %v1076_v48  ;;  %v1068_v60 = vld [vmem:[%s5679_s0 + $0x1858] sm:$0xff]  ;;  %v2495_v63 = vunpack.c.l.bf16 %v944_v53 }
 0x3be   : > { %4897 = vmatpush1.msra.mxu1 %v2839_v61  ;;  %4827 = vmatprep.subr.mxu0 %v2576_v1  ;;  %v2496_v61 = vunpack.c.h.bf16 %v944_v53  ;;  %v936_v1 = vld [vmem:[%s5679_s0 + $0x1438] sm:$0xff]  ;;  %v2743_v6 = vunpack.c.l.bf16 %v1068_v60 }
 0x3bf   : > { %4898 = vmatprep.subr.mxu1 %v2832_v2  ;;  %4828 = vmatpush1.msra.mxu0 %v2575_v3  ;;  %v1064_v2 = vld [vmem:[%s5679_s0 + $0x1838] sm:$0xff]  ;;  %v2488_v3 = vunpack.c.h.bf16 %v940_v59  ;;  %v2479_v11 = vunpack.c.l.bf16 %v936_v1 }
 0x3c0   : > { %4899 = vmatpush1.msra.mxu1 %v2831_v4  ;;  %4829 = vmatprep.subr.mxu0 %v2568_v7  ;;  %v2744_v4 = vunpack.c.h.bf16 %v1068_v60  ;;  %v932_v7 = vld [vmem:[%s5679_s0 + $0x1418] sm:$0xff]  ;;  %v2735_v12 = vunpack.c.l.bf16 %v1064_v2 }
 0x3c1   : > { %4900 = vmatprep.subr.mxu1 %v2824_v8  ;;  %4830 = vmatpush1.msra.mxu0 %v2567_v9  ;;  %v1060_v8 = vld [vmem:[%s5679_s0 + $0x1818] sm:$0xff]  ;;  %v2480_v9 = vunpack.c.h.bf16 %v936_v1  ;;  %v2471_v17 = vunpack.c.l.bf16 %v932_v7 }
 0x3c2   : > { %4901 = vmatpush1.msra.mxu1 %v2823_v10  ;;  %4831 = vmatprep.subr.mxu0 %v2560_v13  ;;  %v2736_v10 = vunpack.c.h.bf16 %v1064_v2  ;;  %v1056_v13 = vld [vmem:[%s5679_s0 + $0x17f8] sm:$0xff]  ;;  %v2727_v18 = vunpack.c.l.bf16 %v1060_v8 }
 0x3c3   : > { %4902 = vmatprep.subr.mxu1 %v2816_v14  ;;  %4832 = vmatpush1.msra.mxu0 %v2559_v15  ;;  %v1184_v14 = vld [vmem:[%s5679_s0 + $0x1bf8] sm:$0xff]  ;;  %v2472_v15 = vunpack.c.h.bf16 %v932_v7  ;;  %v2719_v23 = vunpack.c.l.bf16 %v1056_v13 }
 0x3c4   : > { %4903 = vmatpush1.msra.mxu1 %v2815_v16  ;;  %4833 = vmatprep.subr.mxu0 %v2552_v19  ;;  %v2728_v16 = vunpack.c.h.bf16 %v1060_v8  ;;  %v1052_v19 = vld [vmem:[%s5679_s0 + $0x17d8] sm:$0xff]  ;;  %v2975_v24 = vunpack.c.l.bf16 %v1184_v14 }
 0x3c5   : > { %4904 = vmatprep.subr.mxu1 %v2808_v20  ;;  %4834 = vmatpush1.msra.mxu0 %v2551_v21  ;;  %v1180_v20 = vld [vmem:[%s5679_s0 + $0x1bd8] sm:$0xff]  ;;  %v2720_v21 = vunpack.c.h.bf16 %v1056_v13  ;;  %v2711_v29 = vunpack.c.l.bf16 %v1052_v19 }
 0x3c6   : > { %4905 = vmatpush1.msra.mxu1 %v2807_v22  ;;  %4835 = vmatprep.subr.mxu0 %v2544_v25  ;;  %v2976_v22 = vunpack.c.h.bf16 %v1184_v14  ;;  %v1048_v25 = vld [vmem:[%s5679_s0 + $0x17b8] sm:$0xff]  ;;  %v2967_v30 = vunpack.c.l.bf16 %v1180_v20 }
 0x3c7   : > { %4906 = vmatprep.subr.mxu1 %v2800_v26  ;;  %4836 = vmatpush1.msra.mxu0 %v2543_v27  ;;  %v1176_v26 = vld [vmem:[%s5679_s0 + $0x1bb8] sm:$0xff]  ;;  %v2712_v27 = vunpack.c.h.bf16 %v1052_v19  ;;  %v2703_v35 = vunpack.c.l.bf16 %v1048_v25 }
 0x3c8   : > { %4907 = vmatpush1.msra.mxu1 %v2799_v28  ;;  %4837 = vmatprep.subr.mxu0 %v2536_v31  ;;  %v2968_v28 = vunpack.c.h.bf16 %v1180_v20  ;;  %v1044_v31 = vld [vmem:[%s5679_s0 + $0x1798] sm:$0xff]  ;;  %v2959_v36 = vunpack.c.l.bf16 %v1176_v26 }
 0x3c9   : > { %4908 = vmatprep.subr.mxu1 %v2792_v32  ;;  %4838 = vmatpush1.msra.mxu0 %v2535_v33  ;;  %v1172_v32 = vld [vmem:[%s5679_s0 + $0x1b98] sm:$0xff]  ;;  %v2704_v33 = vunpack.c.h.bf16 %v1048_v25  ;;  %v2695_v41 = vunpack.c.l.bf16 %v1044_v31 }
 0x3ca   : > { %4909 = vmatpush1.msra.mxu1 %v2791_v34  ;;  %4839 = vmatprep.subr.mxu0 %v2528_v37  ;;  %v2960_v34 = vunpack.c.h.bf16 %v1176_v26  ;;  %v1040_v37 = vld [vmem:[%s5679_s0 + $0x1778] sm:$0xff]  ;;  %v2951_v42 = vunpack.c.l.bf16 %v1172_v32 }
 0x3cb   : > { %4910 = vmatprep.subr.mxu1 %v2784_v38  ;;  %4840 = vmatpush1.msra.mxu0 %v2527_v39  ;;  %v1168_v38 = vld [vmem:[%s5679_s0 + $0x1b78] sm:$0xff]  ;;  %v2696_v39 = vunpack.c.h.bf16 %v1044_v31  ;;  %v2687_v48 = vunpack.c.l.bf16 %v1040_v37 }
 0x3cc   : > { %4911 = vmatpush1.msra.mxu1 %v2783_v40  ;;  %4841 = vmatprep.subr.mxu0 %v2520_v43  ;;  %v2952_v40 = vunpack.c.h.bf16 %v1172_v32  ;;  %v1036_v43 = vld [vmem:[%s5679_s0 + $0x1758] sm:$0xff]  ;;  %v2944_v47 = vunpack.c.h.bf16 %v1168_v38 }
 0x3cd   : > { %4912 = vmatprep.subr.mxu1 %v2776_v44  ;;  %4842 = vmatpush1.msra.mxu0 %v2519_v45  ;;  %v1164_v44 = vld [vmem:[%s5679_s0 + $0x1b58] sm:$0xff]  ;;  %v4037_v45 = vpop.f32.mrf.mxu0  ;;  %v2679_v54 = vunpack.c.l.bf16 %v1036_v43 }
 0x3ce   : > { %4913 = vmatpush1.msra.mxu1 %v2775_v46  ;;  %4843 = vmatprep.subr.mxu0 %v2512_v49  ;;  %v2688_v46 = vunpack.c.h.bf16 %v1040_v37  ;;  %v2943_v49 = vunpack.c.l.bf16 %v1168_v38  ;;  %v2936_v53 = vunpack.c.h.bf16 %v1164_v44  ;;  %v1152_v1 = vld [vmem:[%s5679_s0 + $0x1af8] sm:$0xff] }
 0x3cf   : > { %4914 = vmatprep.subr.mxu1 %v2768_v50  ;;  %4844 = vmatpush1.msra.mxu0 %v2511_v51  ;;  %v1032_v50 = vld [vmem:[%s5679_s0 + $0x1738] sm:$0xff]  ;;  %v4039_v59 = vpop.f32.mrf.mxu0  ;;  %v2911_v14 = vunpack.c.l.bf16 %v1152_v1 }
 0x3d0   : > { %4915 = vmatpush1.msra.mxu1 %v2767_v52  ;;  %4845 = vmatprep.subr.mxu0 %v2504_v55  ;;  %v1160_v51 = vld [vmem:[%s5679_s0 + $0x1b38] sm:$0xff]  ;;  %v2680_v52 = vunpack.c.h.bf16 %v1036_v43  ;;  %v2935_v55 = vunpack.c.l.bf16 %v1164_v44  ;;  %v2672_v60 = vunpack.c.h.bf16 %v1032_v50 }
 0x3d1   : > { %4916 = vmatprep.subr.mxu1 %v2760_v56  ;;  %4846 = vmatpush1.msra.mxu0 %v2503_v57  ;;  %v1028_v56 = vld [vmem:[%s5679_s0 + $0x1718] sm:$0xff]  ;;  %v4179_v2 = vpop.f32.mrf.mxu0 }
 0x3d2   : > { %4917 = vmatpush1.msra.mxu1 %v2759_v58  ;;  %4847 = vmatprep.subr.mxu0 %v2496_v61  ;;  %v1156_v57 = vld [vmem:[%s5679_s0 + $0x1b18] sm:$0xff]  ;;  %v4108_v58 = vpop.f32.mrf.mxu1  ;;  %v2928_v61 = vunpack.c.h.bf16 %v1160_v51 }
 0x3d3   : > { %4918 = vmatprep.subr.mxu1 %v2752_v62  ;;  %4848 = vmatpush1.msra.mxu0 %v2495_v63  ;;  %v2671_v62 = vunpack.c.l.bf16 %v1032_v50  ;;  %v2927_v63 = vunpack.c.l.bf16 %v1160_v51  ;;  %v1020_v7 = vld [vmem:[%s5679_s0 + $0x16d8] sm:$0xff] }
 0x3d4   : > { %4919 = vmatpush1.msra.mxu1 %v2751_v0  ;;  %4849 = vmatprep.subr.mxu0 %v2488_v3  ;;  %v1024_v0 = vld [vmem:[%s5679_s0 + $0x16f8] sm:$0xff]  ;;  %v2664_v3 = vunpack.c.h.bf16 %v1028_v56  ;;  %v2648_v19 = vunpack.c.h.bf16 %v1020_v7 }
 0x3d5   : > { %4920 = vmatprep.subr.mxu1 %v2744_v4  ;;  %4850 = vmatpush1.msra.mxu0 %v2487_v5  ;;  %v2920_v4 = vunpack.c.h.bf16 %v1156_v57  ;;  %v2663_v5 = vunpack.c.l.bf16 %v1028_v56  ;;  %v1148_v8 = vld [vmem:[%s5679_s0 + $0x1ad8] sm:$0xff]  ;;  %v2655_v13 = vunpack.c.l.bf16 %v1024_v0 }
 0x3d6   : > { %4921 = vmatpush1.msra.mxu1 %v2743_v6  ;;  %4851 = vmatprep.subr.mxu0 %v2480_v9  ;;  %v2919_v6 = vunpack.c.l.bf16 %v1156_v57  ;;  %v4110_v9 = vpop.f32.mrf.mxu1  ;;  %v2904_v20 = vunpack.c.h.bf16 %v1148_v8  ;;  %v1012_v25 = vld [vmem:[%s5679_s0 + $0x1698] sm:$0xff] }
 0x3d7   : > { %4922 = vmatprep.subr.mxu1 %v2736_v10  ;;  %4852 = vmatpush1.msra.mxu0 %v2479_v11  ;;  %v2656_v10 = vunpack.c.h.bf16 %v1024_v0  ;;  %v2912_v11 = vunpack.c.h.bf16 %v1152_v1  ;;  %v1140_v26 = vld [vmem:[%s5679_s0 + $0x1a98] sm:$0xff] }
 0x3d8   : > { %4923 = vmatpush1.msra.mxu1 %v2735_v12  ;;  %4853 = vmatprep.subr.mxu0 %v2472_v15  ;;  %v4109_v12 = vadd.f32 %v4108_v58, %v4037_v45  ;;  %v1016_v15 = vld [vmem:[%s5679_s0 + $0x16b8] sm:$0xff]  ;;  %v2888_v37 = vunpack.c.h.bf16 %v1140_v26 }
 0x3d9   : > { %4924 = vmatprep.subr.mxu1 %v2728_v16  ;;  %4854 = vmatpush1.msra.mxu0 %v2471_v17  ;;  %v1144_v16 = vld [vmem:[%s5679_s0 + $0x1ab8] sm:$0xff]  ;;  %v4250_v17 = vpop.f32.mrf.mxu1  ;;  %v2639_v31 = vunpack.c.l.bf16 %v1016_v15 }
 0x3da   : > { %4925 = vmatpush1.msra.mxu1 %v2727_v18  ;;  %4855 = vmatprep.subr.mxu0 %v2720_v21  ;;  %v4181_v18 = vpop.f32.mrf.mxu0  ;;  %v4111_v21 = vadd.f32 %v4110_v9, %v4039_v59  ;;  %v2895_v32 = vunpack.c.l.bf16 %v1144_v16  ;;  %v1000_v51 = vld [vmem:[%s5679_s0 + $0x1638] sm:$0xff] }
 0x3db   : > { %4926 = vmatprep.subr.mxu1 %v2976_v22  ;;  %4856 = vmatpush2.msra.mxu0 %v2719_v23  ;;  %v4180_v22 = vadd.f32 %v4179_v2, %v4109_v12  ;;  %v2647_v23 = vunpack.c.l.bf16 %v1020_v7  ;;  %v996_v58 = vld [vmem:[%s5679_s0 + $0x1618] sm:$0xff]  ;;  %v2607_v0 = vunpack.c.l.bf16 %v1000_v51 }
 0x3dc   : > { %4927 = vmatpush2.msra.mxu1 %v2975_v24  ;;  %4857 = vmatprep.subr.mxu0 %v2712_v27  ;;  %v2903_v24 = vunpack.c.l.bf16 %v1148_v8  ;;  %v4321_v27 = vpop.f32.mrf.mxu0  ;;  %v1124_v59 = vld [vmem:[%s5679_s0 + $0x1a18] sm:$0xff]  ;;  %v2600_v2 = vunpack.c.h.bf16 %v996_v58  ;;  %v2599_v7 = vunpack.c.l.bf16 %v996_v58 }
 0x3dd   : > { %4928 = vmatprep.subr.mxu1 %v2968_v28  ;;  %4858 = vmatpush2.msra.mxu0 %v2711_v29  ;;  %v2640_v28 = vunpack.c.h.bf16 %v1016_v15  ;;  %v2896_v29 = vunpack.c.h.bf16 %v1144_v16  ;;  %v4251_v38 = vadd.f32 %v4250_v17, %v4180_v22  ;;  %v2855_v9 = vunpack.c.l.bf16 %v1124_v59  ;;  %v5332_v16 = vld [vmem:[%s5771_s18 + $0x68] sm:$0xff]  ;;  %v5333_v17 = vld [vmem:[%s5771_s18 + $0x50] sm:$0xff] }
 0x3de   : > { %4929 = vmatpush2.msra.mxu1 %v2967_v30  ;;  %4859 = vmatprep.subr.mxu0 %v2704_v33  ;;  %v4182_v30 = vadd.f32 %v4181_v18, %v4111_v21  ;;  %v1008_v33 = vld [vmem:[%s5679_s0 + $0x1678] sm:$0xff]  ;;  %v4323_v44 = vpop.f32.mrf.mxu0  ;;  %v5334_v18 = vld [vmem:[%s5771_s18 + $0x60] sm:$0xff] }
 0x3df   : > { %4930 = vmatprep.subr.mxu1 %v2960_v34  ;;  %4860 = vmatpush2.msra.mxu0 %v2703_v35  ;;  %v1136_v34 = vld [vmem:[%s5679_s0 + $0x1a78] sm:$0xff]  ;;  %v4252_v35 = vpop.f32.mrf.mxu1  ;;  %v2624_v45 = vunpack.c.h.bf16 %v1008_v33 }
 0x3e0   : > { %4931 = vmatpush2.msra.mxu1 %v2959_v36  ;;  %4861 = vmatprep.subr.mxu0 %v2696_v39  ;;  %v2632_v36 = vunpack.c.h.bf16 %v1012_v25  ;;  %v2631_v39 = vunpack.c.l.bf16 %v1012_v25  ;;  %v2879_v50 = vunpack.c.l.bf16 %v1136_v34 }
 0x3e1   : > { %4932 = vmatprep.subr.mxu1 %v2952_v40  ;;  %4862 = vmatpush2.msra.mxu0 %v2695_v41  ;;  %v2887_v40 = vunpack.c.l.bf16 %v1140_v26  ;;  %v1004_v41 = vld [vmem:[%s5679_s0 + $0x1658] sm:$0xff]  ;;  %v4392_v43 = vpop.f32.mrf.mxu1 }
 0x3e2   : > { %4933 = vmatpush2.msra.mxu1 %v2951_v42  ;;  %4863 = vmatprep.subr.mxu0 %v2688_v46  ;;  %v1132_v42 = vld [vmem:[%s5679_s0 + $0x1a58] sm:$0xff]  ;;  %v2880_v46 = vunpack.c.h.bf16 %v1136_v34  ;;  %v2615_v56 = vunpack.c.l.bf16 %v1004_v41 }
 0x3e3   : > { %4934 = vmatprep.subr.mxu1 %v2944_v47  ;;  %4864 = vmatpush2.msra.mxu0 %v2687_v48  ;;  %v4253_v47 = vadd.f32 %v4252_v35, %v4182_v30  ;;  %v4322_v48 = vadd.f32 %v4321_v27, %v4251_v38  ;;  %v2871_v57 = vunpack.c.l.bf16 %v1132_v42 }
 0x3e4   : > { %4935 = vmatpush2.msra.mxu1 %v2943_v49  ;;  %4865 = vmatprep.subr.mxu0 %v2680_v52  ;;  %v2623_v49 = vunpack.c.l.bf16 %v1008_v33  ;;  %v1128_v52 = vld [vmem:[%s5679_s0 + $0x1a38] sm:$0xff] }
 0x3e5   : > { %4936 = vmatprep.subr.mxu1 %v2936_v53  ;;  %4866 = vmatpush2.msra.mxu0 %v2679_v54  ;;  %v2616_v53 = vunpack.c.h.bf16 %v1004_v41  ;;  %v2872_v54 = vunpack.c.h.bf16 %v1132_v42  ;;  %v2863_v1 = vunpack.c.l.bf16 %v1128_v52 }
 0x3e6   : > { %4937 = vmatpush2.msra.mxu1 %v2935_v55  ;;  %4867 = vmatprep.subr.mxu0 %v2672_v60  ;;  %v4324_v55 = vadd.f32 %v4323_v44, %v4253_v47  ;;  %v4394_v60 = vpop.f32.mrf.mxu1  ;;  %v288_v44 = vld [vmem:[#allocation2 + $0x38] sm:$0xff] }
 0x3e7   : > { %4938 = vmatprep.subr.mxu1 %v2928_v61  ;;  %4868 = vmatpush2.msra.mxu0 %v2671_v62  ;;  %v2608_v61 = vunpack.c.h.bf16 %v1000_v51  ;;  %v2864_v62 = vunpack.c.h.bf16 %v1128_v52 }
 0x3e8   : > { %4939 = vmatpush2.msra.mxu1 %v2927_v63  ;;  %4869 = vmatprep.subr.mxu0 %v2664_v3  ;;  %v4393_v63 = vadd.f32 %v4392_v43, %v4322_v48  ;;  %v2856_v3 = vunpack.c.h.bf16 %v1124_v59 }
 0x3e9   : > { %4940 = vmatprep.subr.mxu1 %v2920_v4  ;;  %4870 = vmatpush2.msra.mxu0 %v2663_v5  ;;  %v285_v4 = vld [vmem:[#allocation2 + $0x8] sm:$0xff] }
 0x3ea   : > { %4941 = vmatpush2.msra.mxu1 %v2919_v6  ;;  %4871 = vmatprep.subr.mxu0 %v2656_v10  ;;  %v4395_v6 = vadd.f32 %v4394_v60, %v4324_v55  ;;  %v286_v10 = vld [vmem:[#allocation2 + $0x20] sm:$0xff] }
 0x3eb   : > { %4942 = vmatprep.subr.mxu1 %v2912_v11  ;;  %4872 = vmatpush2.msra.mxu0 %v2655_v13 }
 0x3ec   : > { %4943 = vmatpush2.msra.mxu1 %v2911_v14  ;;  %4873 = vmatprep.subr.mxu0 %v2648_v19  ;;  %v5331_v14 = vld [vmem:[%s5771_s18 + $0x58] sm:$0xff] }
 0x3ed   : > { %4944 = vmatprep.subr.mxu1 %v2904_v20  ;;  %4874 = vmatpush2.msra.mxu0 %v2647_v23 }
 0x3ee   : > { %4945 = vmatpush2.msra.mxu1 %v2903_v24  ;;  %4875 = vmatprep.subr.mxu0 %v2640_v28 }
 0x3ef   : > { %4946 = vmatprep.subr.mxu1 %v2896_v29  ;;  %4876 = vmatpush2.msra.mxu0 %v2639_v31 }
 0x3f0   : > { %4947 = vmatpush2.msra.mxu1 %v2895_v32  ;;  %4877 = vmatprep.subr.mxu0 %v2632_v36 }
 0x3f1   : > { %4948 = vmatprep.subr.mxu1 %v2888_v37  ;;  %4878 = vmatpush2.msra.mxu0 %v2631_v39 }
 0x3f2   : > { %4949 = vmatpush2.msra.mxu1 %v2887_v40  ;;  %4879 = vmatprep.subr.mxu0 %v2624_v45  ;;  %v287_v40 = vld [vmem:[#allocation2 + $0x28] sm:$0xff] }
 0x3f3   : > { %4950 = vmatprep.subr.mxu1 %v2880_v46  ;;  %4880 = vmatpush2.msra.mxu0 %v2623_v49 }
 0x3f4   : > { %4951 = vmatpush2.msra.mxu1 %v2879_v50  ;;  %4881 = vmatprep.subr.mxu0 %v2616_v53 }
 0x3f5   : > { %4952 = vmatprep.subr.mxu1 %v2872_v54  ;;  %v4463_v5 = vpop.f32.mrf.mxu0  ;;  %4882 = vmatpush2.msra.mxu0 %v2615_v56 }
 0x3f6   : > { %4953 = vmatpush2.msra.mxu1 %v2871_v57  ;;  %v4464_v8 = vadd.f32 %v4463_v5, %v4393_v63  ;;  %4883 = vmatprep.subr.mxu0 %v2608_v61 }
 0x3f7   : > { %4954 = vmatprep.subr.mxu1 %v2864_v62  ;;  %v4465_v11 = vpop.f32.mrf.mxu0  ;;  %4884 = vmatpush2.msra.mxu0 %v2607_v0  ;;  %v4534_v19 = vpop.f32.mrf.mxu1 }
 0x3f8   : > { %4955 = vmatpush2.msra.mxu1 %v2863_v1  ;;  %v4969_v12 = vadd.f32 %v4464_v8, %v285_v4  ;;  %v4466_v13 = vadd.f32 %v4465_v11, %v4395_v6  ;;  %4885 = vmatprep.subr.mxu0 %v2600_v2 }
 0x3f9   : > { %4956 = vmatprep.subr.mxu1 %v2856_v3  ;;  %4886 = vmatpush2.msra.mxu0 %v2599_v7  ;;  %v4536_v21 = vpop.f32.mrf.mxu1 }
 0x3fa   : > { %4887 = vmatprep.mubr.f32.mxu0 %v5331_v14  ;;  %4977 = vst [vmem:[#allocation2 + $0x8] sm:$0xff] %v4969_v12  ;;  %v4970_v15 = vadd.f32 %v4466_v13, %v286_v10  ;;  %4957 = vmatpush2.msra.mxu1 %v2855_v9 }
 0x3fb   : > { %4958 = vmatprep.mubr.f32.mxu1 %v5332_v16  ;;  %4888 = vmatmul.mubr.f32.vlgmr.msra.gmra.mxu0 %v5333_v17 }
 0x3fc   : > { %4959 = vmatmul.mubr.f32.vlgmr.msra.gmra.mxu1 %v5334_v18  ;;  %4978 = vst [vmem:[#allocation2 + $0x20] sm:$0xff] %v4970_v15 }
 0x437   : > { %v4605_v20 = vpop.f32.mrf.mxu0 }
 0x438   : > { %v4606_v24 = vadd.f32 %v4605_v20, %v4534_v19 }
 0x439   : > { %v4676_v22 = vpop.f32.mrf.mxu1  ;;  %v4607_v23 = vpop.f32.mrf.mxu0 }
 0x43a   : > { %v4608_v26 = vadd.f32 %v4607_v23, %v4536_v21  ;;  %v4677_v28 = vadd.f32 %v4676_v22, %v4606_v24 }
 0x43b   : > { %v4678_v27 = vpop.f32.mrf.mxu1 }
 0x43c   : > { %v4679_v31 = vadd.f32 %v4678_v27, %v4608_v26 }
 0x479   : > { %v4747_v25 = vpop.f32.mrf.mxu0 }
 0x47a   : > { %v4748_v32 = vadd.f32 %v4747_v25, %v4677_v28 }
 0x47b   : > { %v4818_v29 = vpop.f32.mrf.mxu1  ;;  %v4749_v30 = vpop.f32.mrf.mxu0 }
 0x47c   : > { %v4750_v33 = vadd.f32 %v4749_v30, %v4679_v31  ;;  %v4819_v35 = vadd.f32 %v4818_v29, %v4748_v32 }
 0x47d   : > { %v4820_v34 = vpop.f32.mrf.mxu1 }
 0x47e   : > { %v4821_v38 = vadd.f32 %v4820_v34, %v4750_v33 }
 0x4bb   : > { %v4889_v36 = vpop.f32.mrf.mxu0 }
 0x4bc   : > { %v4960_v37 = vpop.f32.mrf.mxu1  ;;  %v4890_v39 = vadd.f32 %v4889_v36, %v4819_v35 }
 0x4bd   : > { %v4891_v41 = vpop.f32.mrf.mxu0 }
 0x4be   : > { %v4961_v42 = vadd.f32 %v4960_v37, %v4890_v39  ;;  %v4892_v43 = vadd.f32 %v4891_v41, %v4821_v38  ;;  %v4962_v45 = vpop.f32.mrf.mxu1 }
 0x4c0   : > { %v4971_v46 = vadd.f32 %v4961_v42, %v287_v40  ;;  %v4963_v47 = vadd.f32 %v4962_v45, %v4892_v43  ;;  %4984 = sbr.rel (%p5182_p6) target bundleno = 1237 (0x4d5), region = 48 }
 0x4c2   : > { %4979 = vst [vmem:[#allocation2 + $0x28] sm:$0xff] %v4971_v46  ;;  %v4972_v48 = vadd.f32 %v4963_v47, %v288_v44 }
 0x4c4   : > { %4980 = vst [vmem:[#allocation2 + $0x38] sm:$0xff] %v4972_v48 }
 0x4c5   : > { %v4995_v49 = vlaneseq  ;;  %v4985_v51 = vld [vmem:[#allocation2 + $0x30] sm:$0xff]  ;;  %v4993_v52 = vld [vmem:[%s213_s27] sm:$0xff]  ;;  %v4987_v56 = vld [vmem:[#allocation2 + $0x18] sm:$0xff] }
 0x4c6   : > { %v4986_v54 = vld [vmem:[#allocation2] sm:$0xff]  ;;  %v4988_v59 = vld [vmem:[#allocation2 + $0x10] sm:$0xff]  ;;  %v4989_v60 = vld [vmem:[#allocation2 + $0x8] sm:$0xff] }
 0x4c7   : > { %v4996_v50 = vshrl.u32 %v4995_v49, 7  ;;  %v4990_v5 = vld [vmem:[#allocation2 + $0x20] sm:$0xff] }
 0x4c9   : > { %v4997_v53 = vsub.s32 0, %v4996_v50  ;;  %v5001_v55 = vsub.s32 1, %v4996_v50  ;;  %v5005_v57 = vsub.s32 2, %v4996_v50  ;;  %v5009_v58 = vsub.s32 3, %v4996_v50  ;;  %v4991_v6 = vld [vmem:[#allocation2 + $0x28] sm:$0xff] }
 0x4ca   : > { %v5013_v61 = vsub.s32 4, %v4996_v50  ;;  %v5017_v62 = vsub.s32 5, %v4996_v50  ;;  %v5021_v63 = vsub.s32 6, %v4996_v50  ;;  %v5025_v0 = vsub.s32 7, %v4996_v50 }
 0x4cb   : > { %v4998_v1 = vrot.slane %v4993_v52, %v4997_v53  ;;  %v5002_v2 = vrot.slane %v4993_v52, %v5001_v55  ;;  %v5006_v3 = vrot.slane %v4993_v52, %v5005_v57  ;;  %v5010_v4 = vrot.slane %v4993_v52, %v5009_v58  ;;  %v4992_v7 = vld [vmem:[#allocation2 + $0x38] sm:$0xff] }
 0x4cc   : > { %v5014_v8 = vrot.slane %v4993_v52, %v5013_v61  ;;  %v5018_v9 = vrot.slane %v4993_v52, %v5017_v62  ;;  %v5022_v10 = vrot.slane %v4993_v52, %v5021_v63  ;;  %v5026_v11 = vrot.slane %v4993_v52, %v5025_v0 }
 0x4cd   : > { %v5035_v12 = vadd.f32 %v4998_v1, %v4985_v51  ;;  %v5036_v13 = vadd.f32 %v5002_v2, %v4986_v54  ;;  %v5037_v14 = vadd.f32 %v5006_v3, %v4987_v56  ;;  %v5038_v15 = vadd.f32 %v5010_v4, %v4988_v59 }
 0x4ce   : > { %v5039_v16 = vadd.f32 %v5014_v8, %v4989_v60  ;;  %v5040_v17 = vadd.f32 %v5018_v9, %v4990_v5  ;;  %v5041_v18 = vadd.f32 %v5022_v10, %v4991_v6  ;;  %v5042_v19 = vadd.f32 %v5026_v11, %v4992_v7 }
 0x4cf   : > { %v5043_v20 = vmax.f32 %v5035_v12, 0.0  ;;  %v5044_v21 = vmax.f32 %v5036_v13, 0.0  ;;  %v5045_v22 = vmax.f32 %v5037_v14, 0.0  ;;  %v5046_v23 = vmax.f32 %v5038_v15, 0.0 }
 0x4d0   : > { %v5047_v24 = vmax.f32 %v5039_v16, 0.0  ;;  %v5048_v25 = vmax.f32 %v5040_v17, 0.0  ;;  %v5049_v26 = vmax.f32 %v5041_v18, 0.0  ;;  %v5050_v27 = vmax.f32 %v5042_v19, 0.0 }
 0x4d1   : > { %5051 = vst [vmem:[%s5697_s25] sm:$0xff] %v5043_v20  ;;  %5052 = vst [vmem:[%s5697_s25 + $0x8] sm:$0xff] %v5044_v21 }
 0x4d2   : > { %5053 = vst [vmem:[%s5697_s25 + $0x10] sm:$0xff] %v5045_v22  ;;  %5054 = vst [vmem:[%s5697_s25 + $0x18] sm:$0xff] %v5046_v23 }
 0x4d3   : > { %5055 = vst [vmem:[%s5697_s25 + $0x20] sm:$0xff] %v5047_v24  ;;  %5056 = vst [vmem:[%s5697_s25 + $0x28] sm:$0xff] %v5048_v25 }
 0x4d4   : > { %5057 = vst [vmem:[%s5697_s25 + $0x30] sm:$0xff] %v5049_v26  ;;  %5058 = vst [vmem:[%s5697_s25 + $0x38] sm:$0xff] %v5050_v27 }
 0x4d5 PF: > { %s19_s22 = sadd.s32 1, %s5485_s22   ;;  %s6727_s12 = smov %s5449_s13 }
 0x4d6   : > { %p16_p0 = scmp.ge.s32.totalorder %s19_s22, 36   ;;  %s6728_s13 = smov %s5453_s14 }
 0x4d7   : > { %s6729_s14 = smov %s5653_s10  ;;  %s6730_s15 = smov %s5461_s16 }
 0x4d8   : > { %s6731_s16 = smov %s5465_s17  ;;  %s6732_s17 = smov %s5658_s29 }
 0x4d9   : > { %s6733_s18 = smov %s5477_s20  ;;  %s6734_s19 = smov %s5481_s21 }
 0x4da   : > { %s6735_s20 = smov %s6738_s23  ;;  %s6736_s21 = smov %s6742_s30 }
 0x4db   :  { %18 = sbr.rel (!%p16_p0) target bundleno = 12 (0xc), region = 94 }
 0x4e0   :  { %5081 = vsyncpa [#allocation4], 1 }
 0x4e1   :  { %5083 = vsyncpa [#allocation4 + $0x1], 1 }
 0x4e2   :  { %5084 = vsyncpa [#allocation6], 1 }
 0x4e3   :  { %5086 = vsyncpa [#allocation6 + $0x1], 1 }

</bundles_post_ra>
